<compile_context>
chip_gen: v7x
topology: tpu7x:2x2x1
jax: 0.10.0
libtpu: 0.0.40
codegen_flags: <defaults>
</compile_context>

<pallas_src>
import functools

import numpy as np

import jax
import jax.numpy as jnp
from jax import lax
from jax.experimental import pallas as pl
from jax.experimental.pallas import tpu as pltpu

START_TAG = "<START>"
STOP_TAG = "<STOP>"


# ---------------------------------------------------------------------------
# Fused kernel: input proj -> fused fwd+bwd LSTM -> hidden2tag -> Viterbi
# ---------------------------------------------------------------------------
def _bilstm_crf_fused_kernel(xcat_ref,      # (S*B, 2E) row t*B+b = [emb(b,t)|emb(b,S-1-t)]
                             wx_ref,        # (2E, 8H)  packed input weights
                             bx_ref,        # (1, 8H)   packed biases
                             wh_ref,        # (2H, 8H)  packed recurrent weights
                             h0_ref,        # (B, 2H)   [h0_f | h0_b]
                             c0_ref,        # (B, 2H)
                             woutf_ref,     # (H, T)    hidden2tag fwd half (pre-T)
                             woutb_ref,     # (H, T)    hidden2tag bwd half (pre-T)
                             bout_ref,      # (1, T)
                             trans_ref,     # (T, T)    transitions[next, prev]
                             # outputs
                             score_ref,     # (B, 1) f32
                             path_ref,      # (S*B, 1) i32
                             start_ref,     # (B, 1) i32
                             # scratch
                             xg_ref,        # (S*B, 8H) f32
                             hs_ref,        # (S*B, 2H) f32
                             feats_ref,     # (S*B, T)  f32
                             bptr_ref,      # (S*B, T)  i32
                             *, seq_len, batch, start_idx, stop_idx):
    S, B = seq_len, batch
    H = woutf_ref.shape[0]
    T = trans_ref.shape[0]
    H2 = 2 * H

    # ---- batched input-gate projection for BOTH directions (one MXU matmul) --
    xg_ref[...] = (jnp.dot(xcat_ref[...], wx_ref[...],
                           preferred_element_type=jnp.float32) + bx_ref[...])

    wh = wh_ref[...]                                        # (2H, 8H), loop-invariant

    # ---- fused fwd+bwd LSTM recurrence, fully unrolled (static offsets) ------
    # lanes of h/c: [0:H) fwd direction at fused step t, [H:2H) bwd direction
    # (which at fused step t is processing time position S-1-t).
    # Packed gate column order: [i_f i_b | f_f f_b | o_f o_b | g_f g_b].
    h = h0_ref[...]                                         # (B, 2H)
    c = c0_ref[...]
    for t in range(S):
        g = xg_ref[t * B:(t + 1) * B, :] + jnp.dot(
            h, wh, preferred_element_type=jnp.float32)      # (B, 8H)
        sig = jax.nn.sigmoid(g[:, 0:3 * H2])                # i|f|o : 1 EUP push
        gg = jnp.tanh(g[:, 3 * H2:4 * H2])                  # g     : 1 EUP push
        i_g = sig[:, 0:H2]
        f_g = sig[:, H2:2 * H2]
        o_g = sig[:, 2 * H2:3 * H2]
        c = f_g * c + i_g * gg
        h = o_g * jnp.tanh(c)
        hs_ref[t * B:(t + 1) * B, :] = h                    # single contiguous store

    # ---- hidden2tag; bwd-direction rows re-ordered to time order ONCE --------
    hs = hs_ref[...]                                        # (S*B, 2H)
    ff = (jnp.dot(hs[:, 0:H], woutf_ref[...],
                  preferred_element_type=jnp.float32) + bout_ref[...])   # (S*B, T)
    fb = jnp.dot(hs[:, H:H2], woutb_ref[...],
                 preferred_element_type=jnp.float32)                      # (S*B, T)
    for t in range(S):
        feats_ref[t * B:(t + 1) * B, :] = (ff[t * B:(t + 1) * B, :]
                                           + fb[(S - 1 - t) * B:(S - t) * B, :])

    # ---- Viterbi forward DP, batched over sentences on the sublane axis ------
    trans = trans_ref[...]                                  # (T, T) [next, prev]
    col3 = lax.broadcasted_iota(jnp.int32, (B, T, T), 2)    # prev index
    lane2 = lax.broadcasted_iota(jnp.int32, (B, T), 1)

    fv = jnp.where(lane2 == start_idx,
                   jnp.float32(0.0),
                   jnp.full((B, T), -10000.0, jnp.float32))  # (B, T) over prev
    for t in range(S):
        # M[b, next, prev] = fv[b, prev] + transitions[next, prev]
        M = fv[:, None, :] + trans[None, :, :]              # (B, T, T)
        best = jnp.max(M, axis=2, keepdims=True)            # (B, T, 1)
        # first-index argmax (torch.max tie-break convention)
        bp = jnp.min(jnp.where(M == best, col3, T),
                     axis=2).astype(jnp.int32)              # (B, T)
        bptr_ref[t * B:(t + 1) * B, :] = bp
        fv = best[:, :, 0] + feats_ref[t * B:(t + 1) * B, :]

    terminal = fv + trans[stop_idx:stop_idx + 1, :]         # (B, T)
    tmax = jnp.max(terminal, axis=1, keepdims=True)         # (B, 1)
    btag = jnp.min(jnp.where(terminal == tmax, lane2, T),
                   axis=1, keepdims=True).astype(jnp.int32)  # (B, 1)
    score_ref[...] = tmax

    # ---- in-kernel backpointer traceback (vectorized lane select) ------------
    bt = btag
    for i in range(S):
        t = S - 1 - i
        path_ref[t * B:(t + 1) * B, :] = bt                 # tag at time t, per sentence
        row = bptr_ref[t * B:(t + 1) * B, :]                # (B, T) i32
        bt = jnp.min(jnp.where(lane2 == bt, row, T),
                     axis=1, keepdims=True).astype(jnp.int32)
    start_ref[...] = bt                                     # should be START tag


# ---------------------------------------------------------------------------
# Wrapper: BiLSTM_CRF.forward(sentence) -> (path_score, best_path, start_tag)
# ---------------------------------------------------------------------------
class BiLSTMCRFPallas:
    def __init__(self, vocab_size, tag_to_ix, embedding_dim, hidden_dim, key):
        assert hidden_dim % 2 == 0
        self.tag_to_ix = tag_to_ix
        self.tagset_size = len(tag_to_ix)
        self.embedding_dim = embedding_dim
        self.hidden_dim = hidden_dim
        self.H = hidden_dim // 2
        T, E, H = self.tagset_size, embedding_dim, self.H
        f32 = jnp.float32

        ks = jax.random.split(key, 12)
        self.word_embeds = jax.random.normal(ks[0], (vocab_size, E), f32) * 0.1
        # LSTM params, PyTorch layout: weight_ih (4H, E), weight_hh (4H, H),
        # gate row order i, f, g, o.
        self.wih_f = jax.random.normal(ks[1], (4 * H, E), f32) * 0.1
        self.whh_f = jax.random.normal(ks[2], (4 * H, H), f32) * 0.1
        self.b_f = jax.random.normal(ks[3], (4 * H,), f32) * 0.1     # = b_ih + b_hh
        self.wih_b = jax.random.normal(ks[4], (4 * H, E), f32) * 0.1
        self.whh_b = jax.random.normal(ks[5], (4 * H, H), f32) * 0.1
        self.b_b = jax.random.normal(ks[6], (4 * H,), f32) * 0.1
        # hidden2tag: (T, 2H) weight, (T,) bias
        self.w_out = jax.random.normal(ks[7], (T, 2 * H), f32) * 0.1
        self.b_out = jax.random.normal(ks[8], (T,), f32) * 0.1
        # CRF transitions with START/STOP constraints
        trans = jax.random.normal(ks[9], (T, T), f32)
        trans = trans.at[tag_to_ix[START_TAG], :].set(-10000.0)
        trans = trans.at[:, tag_to_ix[STOP_TAG]].set(-10000.0)
        self.transitions = trans
        # initial hidden state (fixed at init for determinism)
        self.h0 = jax.random.normal(ks[10], (2, H), f32)
        self.c0 = jax.random.normal(ks[11], (2, H), f32)

        # --- host-side packing / pre-transposition (done once) -----------------
        # Packed gate column layout (8 blocks of width H):
        #   [i_f i_b | f_f f_b | o_f o_b | g_f g_b]
        # so sigmoid covers the first 6H lanes and tanh the last 2H lanes.
        wihT_f, wihT_b = self.wih_f.T, self.wih_b.T           # (E, 4H)
        whhT_f, whhT_b = self.whh_f.T, self.whh_b.T           # (H, 4H)
        wx = jnp.zeros((2 * E, 8 * H), f32)
        wh = jnp.zeros((2 * H, 8 * H), f32)
        bx = jnp.zeros((8 * H,), f32)
        # (packed position p, pytorch gate k): i->i, f->f, o(3)->pos2, g(2)->pos3
        for p, k in ((0, 0), (1, 1), (2, 3), (3, 2)):
            fcol = slice(2 * p * H, (2 * p + 1) * H)
            bcol = slice((2 * p + 1) * H, (2 * p + 2) * H)
            gsl = slice(k * H, (k + 1) * H)
            wx = wx.at[0:E, fcol].set(wihT_f[:, gsl])         # fwd input rows
            wx = wx.at[E:2 * E, bcol].set(wihT_b[:, gsl])     # bwd input rows
            wh = wh.at[0:H, fcol].set(whhT_f[:, gsl])         # fwd hidden rows
            wh = wh.at[H:2 * H, bcol].set(whhT_b[:, gsl])     # bwd hidden rows
            bx = bx.at[fcol].set(self.b_f[gsl])
            bx = bx.at[bcol].set(self.b_b[gsl])
        self.wx = wx
        self.wh = wh
        self.bx = bx.reshape(1, 8 * H)
        self.woutT_f = self.w_out[:, :H].T                    # (H, T)
        self.woutT_b = self.w_out[:, H:].T                    # (H, T)
        self.bout = self.b_out.reshape(1, T)
        self.h0cat = self.h0.reshape(1, 2 * H)
        self.c0cat = self.c0.reshape(1, 2 * H)

        self._forward_batch_jit = jax.jit(self._forward_batch_impl)

    def _forward_batch_impl(self, sentences):
        B, S = sentences.shape
        T, H, E = self.tagset_size, self.H, self.embedding_dim
        f32, i32 = jnp.float32, jnp.int32

        emb = self.word_embeds[sentences]                     # (B, S, E) gather fused in jit
        emb_t = jnp.transpose(emb, (1, 0, 2))                 # (S, B, E)
        # row (t, b) = [emb(b, t) | emb(b, S-1-t)]  (fwd input | bwd input)
        xcat = jnp.concatenate([emb_t, emb_t[::-1]], axis=-1).reshape(S * B, 2 * E)
        h0b = jnp.broadcast_to(self.h0cat, (B, 2 * H))
        c0b = jnp.broadcast_to(self.c0cat, (B, 2 * H))

        vmem = pl.BlockSpec(memory_space=pltpu.MemorySpace.VMEM)
        kernel = functools.partial(_bilstm_crf_fused_kernel,
                                   seq_len=S, batch=B,
                                   start_idx=self.tag_to_ix[START_TAG],
                                   stop_idx=self.tag_to_ix[STOP_TAG])
        score, path, start = pl.pallas_call(
            kernel,
            out_shape=(jax.ShapeDtypeStruct((B, 1), f32),
                       jax.ShapeDtypeStruct((S * B, 1), i32),
                       jax.ShapeDtypeStruct((B, 1), i32)),
            in_specs=[vmem] * 10,
            out_specs=(vmem, vmem, vmem),
            scratch_shapes=[pltpu.VMEM((S * B, 8 * H), f32),   # gate projections
                            pltpu.VMEM((S * B, 2 * H), f32),   # hidden states
                            pltpu.VMEM((S * B, T), f32),       # feats
                            pltpu.VMEM((S * B, T), i32)],      # backpointers
            compiler_params=pltpu.CompilerParams(
                vmem_limit_bytes=32 * 1024 * 1024),
        )(xcat, self.wx, self.bx, self.wh, h0b, c0b,
          self.woutT_f, self.woutT_b, self.bout, self.transitions)

        scores = score[:, 0]                                  # (B,)
        paths = jnp.transpose(path[:, 0].reshape(S, B))       # (B, S)
        starts = start[:, 0]                                  # (B,)
        return scores, paths, starts

    def forward_batch(self, sentences):
        return self._forward_batch_jit(sentences)

    def forward(self, sentence):
        # Module-equivalent single-sentence API (same kernel at B=1).
        s, p, st = self._forward_batch_jit(sentence[None, :])
        return s[0], p[0], st[0]


# ---------------------------------------------------------------------------
# Pure-numpy reference (PyTorch semantics) for a correctness check
# ---------------------------------------------------------------------------
def _reference_forward(model, sentence_np):
    H, T = model.H, model.tagset_size
    emb = np.asarray(model.word_embeds)[sentence_np]          # (S, E)

    def sigmoid(x):
        return 1.0 / (1.0 + np.exp(-x))

    def run_dir(xs, wih, whh, b, h, c):
        hs = []
        for x in xs:
            g = wih @ x + whh @ h + b
            i = sigmoid(g[0:H]); f = sigmoid(g[H:2 * H])
            gg = np.tanh(g[2 * H:3 * H]); o = sigmoid(g[3 * H:4 * H])
            c = f * c + i * gg
            h = o * np.tanh(c)
            hs.append(h)
        return np.stack(hs)

    h0, c0 = np.asarray(model.h0), np.asarray(model.c0)
    hs_f = run_dir(emb, np.asarray(model.wih_f), np.asarray(model.whh_f),
                   np.asarray(model.b_f), h0[0], c0[0])
    hs_b = run_dir(emb[::-1], np.asarray(model.wih_b), np.asarray(model.whh_b),
                   np.asarray(model.b_b), h0[1], c0[1])[::-1]
    lstm_out = np.concatenate([hs_f, hs_b], axis=1)           # (S, 2H)
    feats = lstm_out @ np.asarray(model.w_out).T + np.asarray(model.b_out)

    trans = np.asarray(model.transitions)
    fv = np.full(T, -10000.0, np.float64)
    fv[model.tag_to_ix[START_TAG]] = 0.0
    bptrs = []
    for t in range(feats.shape[0]):
        M = fv[None, :] + trans                               # [next, prev]
        bptrs.append(np.argmax(M, axis=1))
        fv = np.max(M, axis=1) + feats[t]
    terminal = fv + trans[model.tag_to_ix[STOP_TAG]]
    best_tag = int(np.argmax(terminal))
    score = float(terminal[best_tag])
    path = [best_tag]
    for bp in reversed(bptrs):
        best_tag = int(bp[best_tag])
        path.append(best_tag)
    start = path.pop()
    path.reverse()
    return score, np.array(path, np.int32), start


if __name__ == "__main__":
    tag_to_ix = {"B": 0, "I": 1, "O": 2, START_TAG: 3, STOP_TAG: 4}
    vocab_size = 20
    embedding_dim = 8
    hidden_dim = 32
    seq_len = 8
    batch = 8

    key = jax.random.PRNGKey(0)
    k_params, k_sent = jax.random.split(key)
    model = BiLSTMCRFPallas(vocab_size, tag_to_ix, embedding_dim, hidden_dim,
                            k_params)

    sentences = jax.random.randint(k_sent, (batch, seq_len), 0, vocab_size,
                                   dtype=jnp.int32)

    # Batched decode (B sentences per kernel call -> sublane-filled recurrence).
    scores, paths, starts = model.forward_batch(sentences)
    scores = jax.block_until_ready(scores)
    paths = jax.block_until_ready(paths)
    starts = jax.block_until_ready(starts)

    sent_np = np.asarray(sentences)
    refs = [_reference_forward(model, sent_np[b]) for b in range(batch)]
    for b in range(batch):
        ref_score, ref_path, ref_start = refs[b]
        assert ref_start == tag_to_ix[START_TAG]
        assert int(starts[b]) == tag_to_ix[START_TAG]
        assert paths.shape == (batch, seq_len)
        assert np.array_equal(np.asarray(paths[b]), ref_path), (b, paths[b], ref_path)
        assert abs(float(scores[b]) - ref_score) < 5e-2, (b, float(scores[b]), ref_score)

    # Module-equivalent single-sentence forward() (same kernel at B=1).
    s0, p0, st0 = model.forward(sentences[0])
    s0 = jax.block_until_ready(s0)
    ref_score0, ref_path0, _ = refs[0]
    assert int(st0) == tag_to_ix[START_TAG]
    assert np.array_equal(np.asarray(p0), ref_path0), (p0, ref_path0)
    assert abs(float(s0) - ref_score0) < 5e-2, (float(s0), ref_score0)

    print("KERNEL_OK")
</pallas_src>

<mosaic_0001>
module attributes {stable_mosaic.version = 11 : i64} {
  func.func @_bilstm_crf_fused_kernel(%arg0: memref<64x16xf32, #tpu.memory_space<vmem>>, %arg1: memref<16x128xf32, #tpu.memory_space<vmem>>, %arg2: memref<1x128xf32, #tpu.memory_space<vmem>>, %arg3: memref<32x128xf32, #tpu.memory_space<vmem>>, %arg4: memref<8x32xf32, #tpu.memory_space<vmem>>, %arg5: memref<8x32xf32, #tpu.memory_space<vmem>>, %arg6: memref<16x5xf32, #tpu.memory_space<vmem>>, %arg7: memref<16x5xf32, #tpu.memory_space<vmem>>, %arg8: memref<1x5xf32, #tpu.memory_space<vmem>>, %arg9: memref<5x5xf32, #tpu.memory_space<vmem>>, %arg10: memref<8x1xf32, #tpu.memory_space<vmem>>, %arg11: memref<64x1xi32, #tpu.memory_space<vmem>>, %arg12: memref<8x1xi32, #tpu.memory_space<vmem>>, %arg13: memref<64x128xf32, #tpu.memory_space<vmem>>, %arg14: memref<64x32xf32, #tpu.memory_space<vmem>>, %arg15: memref<64x5xf32, #tpu.memory_space<vmem>>, %arg16: memref<64x5xi32, #tpu.memory_space<vmem>>) attributes {dimension_semantics = [], scalar_prefetch = 0 : i64, scratch_operands = 4 : i64, tpu.core_type = #tpu.core_type<tc>} {
    %c0 = arith.constant 0 : index
    %c0_0 = arith.constant 0 : index
    %0 = vector.load %arg0[%c0, %c0_0] : memref<64x16xf32, #tpu.memory_space<vmem>>, vector<64x16xf32>
    %c0_1 = arith.constant 0 : index
    %c0_2 = arith.constant 0 : index
    %1 = vector.load %arg1[%c0_1, %c0_2] : memref<16x128xf32, #tpu.memory_space<vmem>>, vector<16x128xf32>
    %cst = arith.constant dense<0.000000e+00> : vector<64x128xf32>
    %2 = tpu.matmul %0, %1, %cst {dimension_numbers = #tpu.dot_dimension_numbers<[1], [0], [0], [1], [0, 0, 1, 1], [], []>} : vector<64x16xf32>, vector<16x128xf32>, vector<64x128xf32> -> vector<64x128xf32>
    %c0_3 = arith.constant 0 : index
    %c0_4 = arith.constant 0 : index
    %3 = vector.load %arg2[%c0_3, %c0_4] : memref<1x128xf32, #tpu.memory_space<vmem>>, vector<1x128xf32>
    %4 = vector.broadcast %3 : vector<1x128xf32> to vector<64x128xf32>
    %5 = arith.addf %2, %4 : vector<64x128xf32>
    %c0_5 = arith.constant 0 : index
    %c0_6 = arith.constant 0 : index
    %6 = vector.load %arg13[%c0_5, %c0_6] : memref<64x128xf32, #tpu.memory_space<vmem>>, vector<64x128xf32>
    tpu.vector_store %arg13[%c0_5, %c0_6], %5 {strides = array<i32>} : memref<64x128xf32, #tpu.memory_space<vmem>>, vector<64x128xf32>,
    %c0_7 = arith.constant 0 : index
    %c0_8 = arith.constant 0 : index
    %7 = vector.load %arg3[%c0_7, %c0_8] : memref<32x128xf32, #tpu.memory_space<vmem>>, vector<32x128xf32>
    %c0_9 = arith.constant 0 : index
    %c0_10 = arith.constant 0 : index
    %8 = vector.load %arg4[%c0_9, %c0_10] : memref<8x32xf32, #tpu.memory_space<vmem>>, vector<8x32xf32>
    %c0_11 = arith.constant 0 : index
    %c0_12 = arith.constant 0 : index
    %9 = vector.load %arg5[%c0_11, %c0_12] : memref<8x32xf32, #tpu.memory_space<vmem>>, vector<8x32xf32>
    %c0_13 = arith.constant 0 : index
    %c0_14 = arith.constant 0 : index
    %10 = vector.load %arg13[%c0_13, %c0_14] : memref<64x128xf32, #tpu.memory_space<vmem>>, vector<8x128xf32>
    %cst_15 = arith.constant dense<0.000000e+00> : vector<8x128xf32>
    %11 = tpu.matmul %8, %7, %cst_15 {dimension_numbers = #tpu.dot_dimension_numbers<[1], [0], [0], [1], [0, 0, 1, 1], [], []>} : vector<8x32xf32>, vector<32x128xf32>, vector<8x128xf32> -> vector<8x128xf32>
    %12 = arith.addf %10, %11 : vector<8x128xf32>
    %13 = vector.extract_strided_slice %12 {offsets = [0, 0], sizes = [8, 96], strides = [1, 1]} : vector<8x128xf32> to vector<8x96xf32>
    %14 = arith.negf %13 : vector<8x96xf32>
    %15 = math.exp %14 : vector<8x96xf32>
    %cst_16 = arith.constant 1.000000e+00 : f32
    %16 = vector.broadcast %cst_16 : f32 to vector<8x96xf32>
    %17 = arith.addf %16, %15 : vector<8x96xf32>
    %18 = arith.divf %16, %17 : vector<8x96xf32>
    %19 = vector.extract_strided_slice %12 {offsets = [0, 96], sizes = [8, 32], strides = [1, 1]} : vector<8x128xf32> to vector<8x32xf32>
    %20 = math.tanh %19 : vector<8x32xf32>
    %21 = vector.extract_strided_slice %18 {offsets = [0, 0], sizes = [8, 32], strides = [1, 1]} : vector<8x96xf32> to vector<8x32xf32>
    %22 = vector.extract_strided_slice %18 {offsets = [0, 32], sizes = [8, 32], strides = [1, 1]} : vector<8x96xf32> to vector<8x32xf32>
    %23 = vector.extract_strided_slice %18 {offsets = [0, 64], sizes = [8, 32], strides = [1, 1]} : vector<8x96xf32> to vector<8x32xf32>
    %24 = arith.mulf %22, %9 : vector<8x32xf32>
    %25 = arith.mulf %21, %20 : vector<8x32xf32>
    %26 = arith.addf %24, %25 : vector<8x32xf32>
    %27 = math.tanh %26 : vector<8x32xf32>
    %28 = arith.mulf %23, %27 : vector<8x32xf32>
    %c0_17 = arith.constant 0 : index
    %c0_18 = arith.constant 0 : index
    %29 = vector.load %arg14[%c0_17, %c0_18] : memref<64x32xf32, #tpu.memory_space<vmem>>, vector<8x32xf32>
    tpu.vector_store %arg14[%c0_17, %c0_18], %28 {strides = array<i32>} : memref<64x32xf32, #tpu.memory_space<vmem>>, vector<8x32xf32>,
    %c8 = arith.constant 8 : index
    %c0_19 = arith.constant 0 : index
    %30 = vector.load %arg13[%c8, %c0_19] : memref<64x128xf32, #tpu.memory_space<vmem>>, vector<8x128xf32>
    %cst_20 = arith.constant dense<0.000000e+00> : vector<8x128xf32>
    %31 = tpu.matmul %28, %7, %cst_20 {dimension_numbers = #tpu.dot_dimension_numbers<[1], [0], [0], [1], [0, 0, 1, 1], [], []>} : vector<8x32xf32>, vector<32x128xf32>, vector<8x128xf32> -> vector<8x128xf32>
    %32 = arith.addf %30, %31 : vector<8x128xf32>
    %33 = vector.extract_strided_slice %32 {offsets = [0, 0], sizes = [8, 96], strides = [1, 1]} : vector<8x128xf32> to vector<8x96xf32>
    %34 = arith.negf %33 : vector<8x96xf32>
    %35 = math.exp %34 : vector<8x96xf32>
    %cst_21 = arith.constant 1.000000e+00 : f32
    %36 = vector.broadcast %cst_21 : f32 to vector<8x96xf32>
    %37 = arith.addf %36, %35 : vector<8x96xf32>
    %38 = arith.divf %36, %37 : vector<8x96xf32>
    %39 = vector.extract_strided_slice %32 {offsets = [0, 96], sizes = [8, 32], strides = [1, 1]} : vector<8x128xf32> to vector<8x32xf32>
    %40 = math.tanh %39 : vector<8x32xf32>
    %41 = vector.extract_strided_slice %38 {offsets = [0, 0], sizes = [8, 32], strides = [1, 1]} : vector<8x96xf32> to vector<8x32xf32>
    %42 = vector.extract_strided_slice %38 {offsets = [0, 32], sizes = [8, 32], strides = [1, 1]} : vector<8x96xf32> to vector<8x32xf32>
    %43 = vector.extract_strided_slice %38 {offsets = [0, 64], sizes = [8, 32], strides = [1, 1]} : vector<8x96xf32> to vector<8x32xf32>
    %44 = arith.mulf %42, %26 : vector<8x32xf32>
    %45 = arith.mulf %41, %40 : vector<8x32xf32>
    %46 = arith.addf %44, %45 : vector<8x32xf32>
    %47 = math.tanh %46 : vector<8x32xf32>
    %48 = arith.mulf %43, %47 : vector<8x32xf32>
    %c8_22 = arith.constant 8 : index
    %c0_23 = arith.constant 0 : index
    %49 = vector.load %arg14[%c8_22, %c0_23] : memref<64x32xf32, #tpu.memory_space<vmem>>, vector<8x32xf32>
    tpu.vector_store %arg14[%c8_22, %c0_23], %48 {strides = array<i32>} : memref<64x32xf32, #tpu.memory_space<vmem>>, vector<8x32xf32>,
    %c16 = arith.constant 16 : index
    %c0_24 = arith.constant 0 : index
    %50 = vector.load %arg13[%c16, %c0_24] : memref<64x128xf32, #tpu.memory_space<vmem>>, vector<8x128xf32>
    %cst_25 = arith.constant dense<0.000000e+00> : vector<8x128xf32>
    %51 = tpu.matmul %48, %7, %cst_25 {dimension_numbers = #tpu.dot_dimension_numbers<[1], [0], [0], [1], [0, 0, 1, 1], [], []>} : vector<8x32xf32>, vector<32x128xf32>, vector<8x128xf32> -> vector<8x128xf32>
    %52 = arith.addf %50, %51 : vector<8x128xf32>
    %53 = vector.extract_strided_slice %52 {offsets = [0, 0], sizes = [8, 96], strides = [1, 1]} : vector<8x128xf32> to vector<8x96xf32>
    %54 = arith.negf %53 : vector<8x96xf32>
    %55 = math.exp %54 : vector<8x96xf32>
    %cst_26 = arith.constant 1.000000e+00 : f32
    %56 = vector.broadcast %cst_26 : f32 to vector<8x96xf32>
    %57 = arith.addf %56, %55 : vector<8x96xf32>
    %58 = arith.divf %56, %57 : vector<8x96xf32>
    %59 = vector.extract_strided_slice %52 {offsets = [0, 96], sizes = [8, 32], strides = [1, 1]} : vector<8x128xf32> to vector<8x32xf32>
    %60 = math.tanh %59 : vector<8x32xf32>
    %61 = vector.extract_strided_slice %58 {offsets = [0, 0], sizes = [8, 32], strides = [1, 1]} : vector<8x96xf32> to vector<8x32xf32>
    %62 = vector.extract_strided_slice %58 {offsets = [0, 32], sizes = [8, 32], strides = [1, 1]} : vector<8x96xf32> to vector<8x32xf32>
    %63 = vector.extract_strided_slice %58 {offsets = [0, 64], sizes = [8, 32], strides = [1, 1]} : vector<8x96xf32> to vector<8x32xf32>
    %64 = arith.mulf %62, %46 : vector<8x32xf32>
    %65 = arith.mulf %61, %60 : vector<8x32xf32>
    %66 = arith.addf %64, %65 : vector<8x32xf32>
    %67 = math.tanh %66 : vector<8x32xf32>
    %68 = arith.mulf %63, %67 : vector<8x32xf32>
    %c16_27 = arith.constant 16 : index
    %c0_28 = arith.constant 0 : index
    %69 = vector.load %arg14[%c16_27, %c0_28] : memref<64x32xf32, #tpu.memory_space<vmem>>, vector<8x32xf32>
    tpu.vector_store %arg14[%c16_27, %c0_28], %68 {strides = array<i32>} : memref<64x32xf32, #tpu.memory_space<vmem>>, vector<8x32xf32>,
    %c24 = arith.constant 24 : index
    %c0_29 = arith.constant 0 : index
    %70 = vector.load %arg13[%c24, %c0_29] : memref<64x128xf32, #tpu.memory_space<vmem>>, vector<8x128xf32>
    %cst_30 = arith.constant dense<0.000000e+00> : vector<8x128xf32>
    %71 = tpu.matmul %68, %7, %cst_30 {dimension_numbers = #tpu.dot_dimension_numbers<[1], [0], [0], [1], [0, 0, 1, 1], [], []>} : vector<8x32xf32>, vector<32x128xf32>, vector<8x128xf32> -> vector<8x128xf32>
    %72 = arith.addf %70, %71 : vector<8x128xf32>
    %73 = vector.extract_strided_slice %72 {offsets = [0, 0], sizes = [8, 96], strides = [1, 1]} : vector<8x128xf32> to vector<8x96xf32>
    %74 = arith.negf %73 : vector<8x96xf32>
    %75 = math.exp %74 : vector<8x96xf32>
    %cst_31 = arith.constant 1.000000e+00 : f32
    %76 = vector.broadcast %cst_31 : f32 to vector<8x96xf32>
    %77 = arith.addf %76, %75 : vector<8x96xf32>
    %78 = arith.divf %76, %77 : vector<8x96xf32>
    %79 = vector.extract_strided_slice %72 {offsets = [0, 96], sizes = [8, 32], strides = [1, 1]} : vector<8x128xf32> to vector<8x32xf32>
    %80 = math.tanh %79 : vector<8x32xf32>
    %81 = vector.extract_strided_slice %78 {offsets = [0, 0], sizes = [8, 32], strides = [1, 1]} : vector<8x96xf32> to vector<8x32xf32>
    %82 = vector.extract_strided_slice %78 {offsets = [0, 32], sizes = [8, 32], strides = [1, 1]} : vector<8x96xf32> to vector<8x32xf32>
    %83 = vector.extract_strided_slice %78 {offsets = [0, 64], sizes = [8, 32], strides = [1, 1]} : vector<8x96xf32> to vector<8x32xf32>
    %84 = arith.mulf %82, %66 : vector<8x32xf32>
    %85 = arith.mulf %81, %80 : vector<8x32xf32>
    %86 = arith.addf %84, %85 : vector<8x32xf32>
    %87 = math.tanh %86 : vector<8x32xf32>
    %88 = arith.mulf %83, %87 : vector<8x32xf32>
    %c24_32 = arith.constant 24 : index
    %c0_33 = arith.constant 0 : index
    %89 = vector.load %arg14[%c24_32, %c0_33] : memref<64x32xf32, #tpu.memory_space<vmem>>, vector<8x32xf32>
    tpu.vector_store %arg14[%c24_32, %c0_33], %88 {strides = array<i32>} : memref<64x32xf32, #tpu.memory_space<vmem>>, vector<8x32xf32>,
    %c32 = arith.constant 32 : index
    %c0_34 = arith.constant 0 : index
    %90 = vector.load %arg13[%c32, %c0_34] : memref<64x128xf32, #tpu.memory_space<vmem>>, vector<8x128xf32>
    %cst_35 = arith.constant dense<0.000000e+00> : vector<8x128xf32>
    %91 = tpu.matmul %88, %7, %cst_35 {dimension_numbers = #tpu.dot_dimension_numbers<[1], [0], [0], [1], [0, 0, 1, 1], [], []>} : vector<8x32xf32>, vector<32x128xf32>, vector<8x128xf32> -> vector<8x128xf32>
    %92 = arith.addf %90, %91 : vector<8x128xf32>
    %93 = vector.extract_strided_slice %92 {offsets = [0, 0], sizes = [8, 96], strides = [1, 1]} : vector<8x128xf32> to vector<8x96xf32>
    %94 = arith.negf %93 : vector<8x96xf32>
    %95 = math.exp %94 : vector<8x96xf32>
    %cst_36 = arith.constant 1.000000e+00 : f32
    %96 = vector.broadcast %cst_36 : f32 to vector<8x96xf32>
    %97 = arith.addf %96, %95 : vector<8x96xf32>
    %98 = arith.divf %96, %97 : vector<8x96xf32>
    %99 = vector.extract_strided_slice %92 {offsets = [0, 96], sizes = [8, 32], strides = [1, 1]} : vector<8x128xf32> to vector<8x32xf32>
    %100 = math.tanh %99 : vector<8x32xf32>
    %101 = vector.extract_strided_slice %98 {offsets = [0, 0], sizes = [8, 32], strides = [1, 1]} : vector<8x96xf32> to vector<8x32xf32>
    %102 = vector.extract_strided_slice %98 {offsets = [0, 32], sizes = [8, 32], strides = [1, 1]} : vector<8x96xf32> to vector<8x32xf32>
    %103 = vector.extract_strided_slice %98 {offsets = [0, 64], sizes = [8, 32], strides = [1, 1]} : vector<8x96xf32> to vector<8x32xf32>
    %104 = arith.mulf %102, %86 : vector<8x32xf32>
    %105 = arith.mulf %101, %100 : vector<8x32xf32>
    %106 = arith.addf %104, %105 : vector<8x32xf32>
    %107 = math.tanh %106 : vector<8x32xf32>
    %108 = arith.mulf %103, %107 : vector<8x32xf32>
    %c32_37 = arith.constant 32 : index
    %c0_38 = arith.constant 0 : index
    %109 = vector.load %arg14[%c32_37, %c0_38] : memref<64x32xf32, #tpu.memory_space<vmem>>, vector<8x32xf32>
    tpu.vector_store %arg14[%c32_37, %c0_38], %108 {strides = array<i32>} : memref<64x32xf32, #tpu.memory_space<vmem>>, vector<8x32xf32>,
    %c40 = arith.constant 40 : index
    %c0_39 = arith.constant 0 : index
    %110 = vector.load %arg13[%c40, %c0_39] : memref<64x128xf32, #tpu.memory_space<vmem>>, vector<8x128xf32>
    %cst_40 = arith.constant dense<0.000000e+00> : vector<8x128xf32>
    %111 = tpu.matmul %108, %7, %cst_40 {dimension_numbers = #tpu.dot_dimension_numbers<[1], [0], [0], [1], [0, 0, 1, 1], [], []>} : vector<8x32xf32>, vector<32x128xf32>, vector<8x128xf32> -> vector<8x128xf32>
    %112 = arith.addf %110, %111 : vector<8x128xf32>
    %113 = vector.extract_strided_slice %112 {offsets = [0, 0], sizes = [8, 96], strides = [1, 1]} : vector<8x128xf32> to vector<8x96xf32>
    %114 = arith.negf %113 : vector<8x96xf32>
    %115 = math.exp %114 : vector<8x96xf32>
    %cst_41 = arith.constant 1.000000e+00 : f32
    %116 = vector.broadcast %cst_41 : f32 to vector<8x96xf32>
    %117 = arith.addf %116, %115 : vector<8x96xf32>
    %118 = arith.divf %116, %117 : vector<8x96xf32>
    %119 = vector.extract_strided_slice %112 {offsets = [0, 96], sizes = [8, 32], strides = [1, 1]} : vector<8x128xf32> to vector<8x32xf32>
    %120 = math.tanh %119 : vector<8x32xf32>
    %121 = vector.extract_strided_slice %118 {offsets = [0, 0], sizes = [8, 32], strides = [1, 1]} : vector<8x96xf32> to vector<8x32xf32>
    %122 = vector.extract_strided_slice %118 {offsets = [0, 32], sizes = [8, 32], strides = [1, 1]} : vector<8x96xf32> to vector<8x32xf32>
    %123 = vector.extract_strided_slice %118 {offsets = [0, 64], sizes = [8, 32], strides = [1, 1]} : vector<8x96xf32> to vector<8x32xf32>
    %124 = arith.mulf %122, %106 : vector<8x32xf32>
    %125 = arith.mulf %121, %120 : vector<8x32xf32>
    %126 = arith.addf %124, %125 : vector<8x32xf32>
    %127 = math.tanh %126 : vector<8x32xf32>
    %128 = arith.mulf %123, %127 : vector<8x32xf32>
    %c40_42 = arith.constant 40 : index
    %c0_43 = arith.constant 0 : index
    %129 = vector.load %arg14[%c40_42, %c0_43] : memref<64x32xf32, #tpu.memory_space<vmem>>, vector<8x32xf32>
    tpu.vector_store %arg14[%c40_42, %c0_43], %128 {strides = array<i32>} : memref<64x32xf32, #tpu.memory_space<vmem>>, vector<8x32xf32>,
    %c48 = arith.constant 48 : index
    %c0_44 = arith.constant 0 : index
    %130 = vector.load %arg13[%c48, %c0_44] : memref<64x128xf32, #tpu.memory_space<vmem>>, vector<8x128xf32>
    %cst_45 = arith.constant dense<0.000000e+00> : vector<8x128xf32>
    %131 = tpu.matmul %128, %7, %cst_45 {dimension_numbers = #tpu.dot_dimension_numbers<[1], [0], [0], [1], [0, 0, 1, 1], [], []>} : vector<8x32xf32>, vector<32x128xf32>, vector<8x128xf32> -> vector<8x128xf32>
    %132 = arith.addf %130, %131 : vector<8x128xf32>
    %133 = vector.extract_strided_slice %132 {offsets = [0, 0], sizes = [8, 96], strides = [1, 1]} : vector<8x128xf32> to vector<8x96xf32>
    %134 = arith.negf %133 : vector<8x96xf32>
    %135 = math.exp %134 : vector<8x96xf32>
    %cst_46 = arith.constant 1.000000e+00 : f32
    %136 = vector.broadcast %cst_46 : f32 to vector<8x96xf32>
    %137 = arith.addf %136, %135 : vector<8x96xf32>
    %138 = arith.divf %136, %137 : vector<8x96xf32>
    %139 = vector.extract_strided_slice %132 {offsets = [0, 96], sizes = [8, 32], strides = [1, 1]} : vector<8x128xf32> to vector<8x32xf32>
    %140 = math.tanh %139 : vector<8x32xf32>
    %141 = vector.extract_strided_slice %138 {offsets = [0, 0], sizes = [8, 32], strides = [1, 1]} : vector<8x96xf32> to vector<8x32xf32>
    %142 = vector.extract_strided_slice %138 {offsets = [0, 32], sizes = [8, 32], strides = [1, 1]} : vector<8x96xf32> to vector<8x32xf32>
    %143 = vector.extract_strided_slice %138 {offsets = [0, 64], sizes = [8, 32], strides = [1, 1]} : vector<8x96xf32> to vector<8x32xf32>
    %144 = arith.mulf %142, %126 : vector<8x32xf32>
    %145 = arith.mulf %141, %140 : vector<8x32xf32>
    %146 = arith.addf %144, %145 : vector<8x32xf32>
    %147 = math.tanh %146 : vector<8x32xf32>
    %148 = arith.mulf %143, %147 : vector<8x32xf32>
    %c48_47 = arith.constant 48 : index
    %c0_48 = arith.constant 0 : index
    %149 = vector.load %arg14[%c48_47, %c0_48] : memref<64x32xf32, #tpu.memory_space<vmem>>, vector<8x32xf32>
    tpu.vector_store %arg14[%c48_47, %c0_48], %148 {strides = array<i32>} : memref<64x32xf32, #tpu.memory_space<vmem>>, vector<8x32xf32>,
    %c56 = arith.constant 56 : index
    %c0_49 = arith.constant 0 : index
    %150 = vector.load %arg13[%c56, %c0_49] : memref<64x128xf32, #tpu.memory_space<vmem>>, vector<8x128xf32>
    %cst_50 = arith.constant dense<0.000000e+00> : vector<8x128xf32>
    %151 = tpu.matmul %148, %7, %cst_50 {dimension_numbers = #tpu.dot_dimension_numbers<[1], [0], [0], [1], [0, 0, 1, 1], [], []>} : vector<8x32xf32>, vector<32x128xf32>, vector<8x128xf32> -> vector<8x128xf32>
    %152 = arith.addf %150, %151 : vector<8x128xf32>
    %153 = vector.extract_strided_slice %152 {offsets = [0, 0], sizes = [8, 96], strides = [1, 1]} : vector<8x128xf32> to vector<8x96xf32>
    %154 = arith.negf %153 : vector<8x96xf32>
    %155 = math.exp %154 : vector<8x96xf32>
    %cst_51 = arith.constant 1.000000e+00 : f32
    %156 = vector.broadcast %cst_51 : f32 to vector<8x96xf32>
    %157 = arith.addf %156, %155 : vector<8x96xf32>
    %158 = arith.divf %156, %157 : vector<8x96xf32>
    %159 = vector.extract_strided_slice %152 {offsets = [0, 96], sizes = [8, 32], strides = [1, 1]} : vector<8x128xf32> to vector<8x32xf32>
    %160 = math.tanh %159 : vector<8x32xf32>
    %161 = vector.extract_strided_slice %158 {offsets = [0, 0], sizes = [8, 32], strides = [1, 1]} : vector<8x96xf32> to vector<8x32xf32>
    %162 = vector.extract_strided_slice %158 {offsets = [0, 32], sizes = [8, 32], strides = [1, 1]} : vector<8x96xf32> to vector<8x32xf32>
    %163 = vector.extract_strided_slice %158 {offsets = [0, 64], sizes = [8, 32], strides = [1, 1]} : vector<8x96xf32> to vector<8x32xf32>
    %164 = arith.mulf %162, %146 : vector<8x32xf32>
    %165 = arith.mulf %161, %160 : vector<8x32xf32>
    %166 = arith.addf %164, %165 : vector<8x32xf32>
    %167 = math.tanh %166 : vector<8x32xf32>
    %168 = arith.mulf %163, %167 : vector<8x32xf32>
    %c56_52 = arith.constant 56 : index
    %c0_53 = arith.constant 0 : index
    %169 = vector.load %arg14[%c56_52, %c0_53] : memref<64x32xf32, #tpu.memory_space<vmem>>, vector<8x32xf32>
    tpu.vector_store %arg14[%c56_52, %c0_53], %168 {strides = array<i32>} : memref<64x32xf32, #tpu.memory_space<vmem>>, vector<8x32xf32>,
    %c0_54 = arith.constant 0 : index
    %c0_55 = arith.constant 0 : index
    %170 = vector.load %arg14[%c0_54, %c0_55] : memref<64x32xf32, #tpu.memory_space<vmem>>, vector<64x32xf32>
    %171 = vector.extract_strided_slice %170 {offsets = [0, 0], sizes = [64, 16], strides = [1, 1]} : vector<64x32xf32> to vector<64x16xf32>
    %c0_56 = arith.constant 0 : index
    %c0_57 = arith.constant 0 : index
    %172 = vector.load %arg6[%c0_56, %c0_57] : memref<16x5xf32, #tpu.memory_space<vmem>>, vector<16x5xf32>
    %cst_58 = arith.constant dense<0.000000e+00> : vector<64x5xf32>
    %173 = tpu.matmul %171, %172, %cst_58 {dimension_numbers = #tpu.dot_dimension_numbers<[1], [0], [0], [1], [0, 0, 1, 1], [], []>} : vector<64x16xf32>, vector<16x5xf32>, vector<64x5xf32> -> vector<64x5xf32>
    %c0_59 = arith.constant 0 : index
    %c0_60 = arith.constant 0 : index
    %174 = vector.load %arg8[%c0_59, %c0_60] : memref<1x5xf32, #tpu.memory_space<vmem>>, vector<1x5xf32>
    %175 = vector.broadcast %174 : vector<1x5xf32> to vector<64x5xf32>
    %176 = arith.addf %173, %175 : vector<64x5xf32>
    %177 = vector.extract_strided_slice %170 {offsets = [0, 16], sizes = [64, 16], strides = [1, 1]} : vector<64x32xf32> to vector<64x16xf32>
    %c0_61 = arith.constant 0 : index
    %c0_62 = arith.constant 0 : index
    %178 = vector.load %arg7[%c0_61, %c0_62] : memref<16x5xf32, #tpu.memory_space<vmem>>, vector<16x5xf32>
    %cst_63 = arith.constant dense<0.000000e+00> : vector<64x5xf32>
    %179 = tpu.matmul %177, %178, %cst_63 {dimension_numbers = #tpu.dot_dimension_numbers<[1], [0], [0], [1], [0, 0, 1, 1], [], []>} : vector<64x16xf32>, vector<16x5xf32>, vector<64x5xf32> -> vector<64x5xf32>
    %180 = vector.extract_strided_slice %176 {offsets = [0, 0], sizes = [8, 5], strides = [1, 1]} : vector<64x5xf32> to vector<8x5xf32>
    %181 = vector.extract_strided_slice %179 {offsets = [56, 0], sizes = [8, 5], strides = [1, 1]} : vector<64x5xf32> to vector<8x5xf32>
    %182 = arith.addf %180, %181 : vector<8x5xf32>
    %c0_64 = arith.constant 0 : index
    %c0_65 = arith.constant 0 : index
    %183 = vector.load %arg15[%c0_64, %c0_65] : memref<64x5xf32, #tpu.memory_space<vmem>>, vector<8x5xf32>
    tpu.vector_store %arg15[%c0_64, %c0_65], %182 {strides = array<i32>} : memref<64x5xf32, #tpu.memory_space<vmem>>, vector<8x5xf32>,
    %184 = vector.extract_strided_slice %176 {offsets = [8, 0], sizes = [8, 5], strides = [1, 1]} : vector<64x5xf32> to vector<8x5xf32>
    %185 = vector.extract_strided_slice %179 {offsets = [48, 0], sizes = [8, 5], strides = [1, 1]} : vector<64x5xf32> to vector<8x5xf32>
    %186 = arith.addf %184, %185 : vector<8x5xf32>
    %c8_66 = arith.constant 8 : index
    %c0_67 = arith.constant 0 : index
    %187 = vector.load %arg15[%c8_66, %c0_67] : memref<64x5xf32, #tpu.memory_space<vmem>>, vector<8x5xf32>
    tpu.vector_store %arg15[%c8_66, %c0_67], %186 {strides = array<i32>} : memref<64x5xf32, #tpu.memory_space<vmem>>, vector<8x5xf32>,
    %188 = vector.extract_strided_slice %176 {offsets = [16, 0], sizes = [8, 5], strides = [1, 1]} : vector<64x5xf32> to vector<8x5xf32>
    %189 = vector.extract_strided_slice %179 {offsets = [40, 0], sizes = [8, 5], strides = [1, 1]} : vector<64x5xf32> to vector<8x5xf32>
    %190 = arith.addf %188, %189 : vector<8x5xf32>
    %c16_68 = arith.constant 16 : index
    %c0_69 = arith.constant 0 : index
    %191 = vector.load %arg15[%c16_68, %c0_69] : memref<64x5xf32, #tpu.memory_space<vmem>>, vector<8x5xf32>
    tpu.vector_store %arg15[%c16_68, %c0_69], %190 {strides = array<i32>} : memref<64x5xf32, #tpu.memory_space<vmem>>, vector<8x5xf32>,
    %192 = vector.extract_strided_slice %176 {offsets = [24, 0], sizes = [8, 5], strides = [1, 1]} : vector<64x5xf32> to vector<8x5xf32>
    %193 = vector.extract_strided_slice %179 {offsets = [32, 0], sizes = [8, 5], strides = [1, 1]} : vector<64x5xf32> to vector<8x5xf32>
    %194 = arith.addf %192, %193 : vector<8x5xf32>
    %c24_70 = arith.constant 24 : index
    %c0_71 = arith.constant 0 : index
    %195 = vector.load %arg15[%c24_70, %c0_71] : memref<64x5xf32, #tpu.memory_space<vmem>>, vector<8x5xf32>
    tpu.vector_store %arg15[%c24_70, %c0_71], %194 {strides = array<i32>} : memref<64x5xf32, #tpu.memory_space<vmem>>, vector<8x5xf32>,
    %196 = vector.extract_strided_slice %176 {offsets = [32, 0], sizes = [8, 5], strides = [1, 1]} : vector<64x5xf32> to vector<8x5xf32>
    %197 = vector.extract_strided_slice %179 {offsets = [24, 0], sizes = [8, 5], strides = [1, 1]} : vector<64x5xf32> to vector<8x5xf32>
    %198 = arith.addf %196, %197 : vector<8x5xf32>
    %c32_72 = arith.constant 32 : index
    %c0_73 = arith.constant 0 : index
    %199 = vector.load %arg15[%c32_72, %c0_73] : memref<64x5xf32, #tpu.memory_space<vmem>>, vector<8x5xf32>
    tpu.vector_store %arg15[%c32_72, %c0_73], %198 {strides = array<i32>} : memref<64x5xf32, #tpu.memory_space<vmem>>, vector<8x5xf32>,
    %200 = vector.extract_strided_slice %176 {offsets = [40, 0], sizes = [8, 5], strides = [1, 1]} : vector<64x5xf32> to vector<8x5xf32>
    %201 = vector.extract_strided_slice %179 {offsets = [16, 0], sizes = [8, 5], strides = [1, 1]} : vector<64x5xf32> to vector<8x5xf32>
    %202 = arith.addf %200, %201 : vector<8x5xf32>
    %c40_74 = arith.constant 40 : index
    %c0_75 = arith.constant 0 : index
    %203 = vector.load %arg15[%c40_74, %c0_75] : memref<64x5xf32, #tpu.memory_space<vmem>>, vector<8x5xf32>
    tpu.vector_store %arg15[%c40_74, %c0_75], %202 {strides = array<i32>} : memref<64x5xf32, #tpu.memory_space<vmem>>, vector<8x5xf32>,
    %204 = vector.extract_strided_slice %176 {offsets = [48, 0], sizes = [8, 5], strides = [1, 1]} : vector<64x5xf32> to vector<8x5xf32>
    %205 = vector.extract_strided_slice %179 {offsets = [8, 0], sizes = [8, 5], strides = [1, 1]} : vector<64x5xf32> to vector<8x5xf32>
    %206 = arith.addf %204, %205 : vector<8x5xf32>
    %c48_76 = arith.constant 48 : index
    %c0_77 = arith.constant 0 : index
    %207 = vector.load %arg15[%c48_76, %c0_77] : memref<64x5xf32, #tpu.memory_space<vmem>>, vector<8x5xf32>
    tpu.vector_store %arg15[%c48_76, %c0_77], %206 {strides = array<i32>} : memref<64x5xf32, #tpu.memory_space<vmem>>, vector<8x5xf32>,
    %208 = vector.extract_strided_slice %176 {offsets = [56, 0], sizes = [8, 5], strides = [1, 1]} : vector<64x5xf32> to vector<8x5xf32>
    %209 = vector.extract_strided_slice %179 {offsets = [0, 0], sizes = [8, 5], strides = [1, 1]} : vector<64x5xf32> to vector<8x5xf32>
    %210 = arith.addf %208, %209 : vector<8x5xf32>
    %c56_78 = arith.constant 56 : index
    %c0_79 = arith.constant 0 : index
    %211 = vector.load %arg15[%c56_78, %c0_79] : memref<64x5xf32, #tpu.memory_space<vmem>>, vector<8x5xf32>
    tpu.vector_store %arg15[%c56_78, %c0_79], %210 {strides = array<i32>} : memref<64x5xf32, #tpu.memory_space<vmem>>, vector<8x5xf32>,
    %c0_80 = arith.constant 0 : index
    %c0_81 = arith.constant 0 : index
    %212 = vector.load %arg9[%c0_80, %c0_81] : memref<5x5xf32, #tpu.memory_space<vmem>>, vector<5x5xf32>
    %213 = tpu.iota {dimensions = array<i32: 2>} : vector<8x5x5xi32>
    %214 = tpu.iota {dimensions = array<i32: 1>} : vector<8x5xi32>
    %c3_i32 = arith.constant 3 : i32
    %215 = vector.broadcast %c3_i32 : i32 to vector<8x5xi32>
    %216 = arith.cmpi eq, %214, %215 : vector<8x5xi32>
    %cst_82 = arith.constant -1.000000e+04 : f32
    %217 = vector.broadcast %cst_82 : f32 to vector<8x5xf32>
    %cst_83 = arith.constant 0.000000e+00 : f32
    %218 = vector.broadcast %cst_83 : f32 to vector<8x5xf32>
    %219 = arith.select %216, %218, %217 : vector<8x5xi1>, vector<8x5xf32>
    %220 = vector.shape_cast %219 : vector<8x5xf32> to vector<8x1x5xf32>
    %221 = vector.shape_cast %212 : vector<5x5xf32> to vector<1x5x5xf32>
    %222 = vector.broadcast %220 : vector<8x1x5xf32> to vector<8x5x5xf32>
    %223 = vector.broadcast %221 : vector<1x5x5xf32> to vector<8x5x5xf32>
    %224 = arith.addf %222, %223 : vector<8x5x5xf32>
    %cst_84 = arith.constant dense<0xFF800000> : vector<8x5xf32>
    %225 = vector.multi_reduction <maximumf>, %224, %cst_84 [2] : vector<8x5x5xf32> to vector<8x5xf32>
    %226 = vector.shape_cast %225 : vector<8x5xf32> to vector<8x5x1xf32>
    %227 = vector.broadcast %226 : vector<8x5x1xf32> to vector<8x5x5xf32>
    %228 = arith.cmpf oeq, %224, %227 : vector<8x5x5xf32>
    %c5_i32 = arith.constant 5 : i32
    %229 = vector.broadcast %c5_i32 : i32 to vector<8x5x5xi32>
    %230 = arith.select %228, %213, %229 : vector<8x5x5xi1>, vector<8x5x5xi32>
    %cst_85 = arith.constant dense<2147483647> : vector<8x5xi32>
    %231 = vector.multi_reduction <minsi>, %230, %cst_85 [2] : vector<8x5x5xi32> to vector<8x5xi32>
    %c0_86 = arith.constant 0 : index
    %c0_87 = arith.constant 0 : index
    %232 = vector.load %arg16[%c0_86, %c0_87] : memref<64x5xi32, #tpu.memory_space<vmem>>, vector<8x5xi32>
    tpu.vector_store %arg16[%c0_86, %c0_87], %231 {strides = array<i32>} : memref<64x5xi32, #tpu.memory_space<vmem>>, vector<8x5xi32>,
    %233 = vector.shape_cast %226 : vector<8x5x1xf32> to vector<8x5xf32>
    %c0_88 = arith.constant 0 : index
    %c0_89 = arith.constant 0 : index
    %234 = vector.load %arg15[%c0_88, %c0_89] : memref<64x5xf32, #tpu.memory_space<vmem>>, vector<8x5xf32>
    %235 = arith.addf %233, %234 : vector<8x5xf32>
    %236 = vector.shape_cast %235 : vector<8x5xf32> to vector<8x1x5xf32>
    %237 = vector.shape_cast %212 : vector<5x5xf32> to vector<1x5x5xf32>
    %238 = vector.broadcast %236 : vector<8x1x5xf32> to vector<8x5x5xf32>
    %239 = vector.broadcast %237 : vector<1x5x5xf32> to vector<8x5x5xf32>
    %240 = arith.addf %238, %239 : vector<8x5x5xf32>
    %cst_90 = arith.constant dense<0xFF800000> : vector<8x5xf32>
    %241 = vector.multi_reduction <maximumf>, %240, %cst_90 [2] : vector<8x5x5xf32> to vector<8x5xf32>
    %242 = vector.shape_cast %241 : vector<8x5xf32> to vector<8x5x1xf32>
    %243 = vector.broadcast %242 : vector<8x5x1xf32> to vector<8x5x5xf32>
    %244 = arith.cmpf oeq, %240, %243 : vector<8x5x5xf32>
    %c5_i32_91 = arith.constant 5 : i32
    %245 = vector.broadcast %c5_i32_91 : i32 to vector<8x5x5xi32>
    %246 = arith.select %244, %213, %245 : vector<8x5x5xi1>, vector<8x5x5xi32>
    %cst_92 = arith.constant dense<2147483647> : vector<8x5xi32>
    %247 = vector.multi_reduction <minsi>, %246, %cst_92 [2] : vector<8x5x5xi32> to vector<8x5xi32>
    %c8_93 = arith.constant 8 : index
    %c0_94 = arith.constant 0 : index
    %248 = vector.load %arg16[%c8_93, %c0_94] : memref<64x5xi32, #tpu.memory_space<vmem>>, vector<8x5xi32>
    tpu.vector_store %arg16[%c8_93, %c0_94], %247 {strides = array<i32>} : memref<64x5xi32, #tpu.memory_space<vmem>>, vector<8x5xi32>,
    %249 = vector.shape_cast %242 : vector<8x5x1xf32> to vector<8x5xf32>
    %c8_95 = arith.constant 8 : index
    %c0_96 = arith.constant 0 : index
    %250 = vector.load %arg15[%c8_95, %c0_96] : memref<64x5xf32, #tpu.memory_space<vmem>>, vector<8x5xf32>
    %251 = arith.addf %249, %250 : vector<8x5xf32>
    %252 = vector.shape_cast %251 : vector<8x5xf32> to vector<8x1x5xf32>
    %253 = vector.shape_cast %212 : vector<5x5xf32> to vector<1x5x5xf32>
    %254 = vector.broadcast %252 : vector<8x1x5xf32> to vector<8x5x5xf32>
    %255 = vector.broadcast %253 : vector<1x5x5xf32> to vector<8x5x5xf32>
    %256 = arith.addf %254, %255 : vector<8x5x5xf32>
    %cst_97 = arith.constant dense<0xFF800000> : vector<8x5xf32>
    %257 = vector.multi_reduction <maximumf>, %256, %cst_97 [2] : vector<8x5x5xf32> to vector<8x5xf32>
    %258 = vector.shape_cast %257 : vector<8x5xf32> to vector<8x5x1xf32>
    %259 = vector.broadcast %258 : vector<8x5x1xf32> to vector<8x5x5xf32>
    %260 = arith.cmpf oeq, %256, %259 : vector<8x5x5xf32>
    %c5_i32_98 = arith.constant 5 : i32
    %261 = vector.broadcast %c5_i32_98 : i32 to vector<8x5x5xi32>
    %262 = arith.select %260, %213, %261 : vector<8x5x5xi1>, vector<8x5x5xi32>
    %cst_99 = arith.constant dense<2147483647> : vector<8x5xi32>
    %263 = vector.multi_reduction <minsi>, %262, %cst_99 [2] : vector<8x5x5xi32> to vector<8x5xi32>
    %c16_100 = arith.constant 16 : index
    %c0_101 = arith.constant 0 : index
    %264 = vector.load %arg16[%c16_100, %c0_101] : memref<64x5xi32, #tpu.memory_space<vmem>>, vector<8x5xi32>
    tpu.vector_store %arg16[%c16_100, %c0_101], %263 {strides = array<i32>} : memref<64x5xi32, #tpu.memory_space<vmem>>, vector<8x5xi32>,
    %265 = vector.shape_cast %258 : vector<8x5x1xf32> to vector<8x5xf32>
    %c16_102 = arith.constant 16 : index
    %c0_103 = arith.constant 0 : index
    %266 = vector.load %arg15[%c16_102, %c0_103] : memref<64x5xf32, #tpu.memory_space<vmem>>, vector<8x5xf32>
    %267 = arith.addf %265, %266 : vector<8x5xf32>
    %268 = vector.shape_cast %267 : vector<8x5xf32> to vector<8x1x5xf32>
    %269 = vector.shape_cast %212 : vector<5x5xf32> to vector<1x5x5xf32>
    %270 = vector.broadcast %268 : vector<8x1x5xf32> to vector<8x5x5xf32>
    %271 = vector.broadcast %269 : vector<1x5x5xf32> to vector<8x5x5xf32>
    %272 = arith.addf %270, %271 : vector<8x5x5xf32>
    %cst_104 = arith.constant dense<0xFF800000> : vector<8x5xf32>
    %273 = vector.multi_reduction <maximumf>, %272, %cst_104 [2] : vector<8x5x5xf32> to vector<8x5xf32>
    %274 = vector.shape_cast %273 : vector<8x5xf32> to vector<8x5x1xf32>
    %275 = vector.broadcast %274 : vector<8x5x1xf32> to vector<8x5x5xf32>
    %276 = arith.cmpf oeq, %272, %275 : vector<8x5x5xf32>
    %c5_i32_105 = arith.constant 5 : i32
    %277 = vector.broadcast %c5_i32_105 : i32 to vector<8x5x5xi32>
    %278 = arith.select %276, %213, %277 : vector<8x5x5xi1>, vector<8x5x5xi32>
    %cst_106 = arith.constant dense<2147483647> : vector<8x5xi32>
    %279 = vector.multi_reduction <minsi>, %278, %cst_106 [2] : vector<8x5x5xi32> to vector<8x5xi32>
    %c24_107 = arith.constant 24 : index
    %c0_108 = arith.constant 0 : index
    %280 = vector.load %arg16[%c24_107, %c0_108] : memref<64x5xi32, #tpu.memory_space<vmem>>, vector<8x5xi32>
    tpu.vector_store %arg16[%c24_107, %c0_108], %279 {strides = array<i32>} : memref<64x5xi32, #tpu.memory_space<vmem>>, vector<8x5xi32>,
    %281 = vector.shape_cast %274 : vector<8x5x1xf32> to vector<8x5xf32>
    %c24_109 = arith.constant 24 : index
    %c0_110 = arith.constant 0 : index
    %282 = vector.load %arg15[%c24_109, %c0_110] : memref<64x5xf32, #tpu.memory_space<vmem>>, vector<8x5xf32>
    %283 = arith.addf %281, %282 : vector<8x5xf32>
    %284 = vector.shape_cast %283 : vector<8x5xf32> to vector<8x1x5xf32>
    %285 = vector.shape_cast %212 : vector<5x5xf32> to vector<1x5x5xf32>
    %286 = vector.broadcast %284 : vector<8x1x5xf32> to vector<8x5x5xf32>
    %287 = vector.broadcast %285 : vector<1x5x5xf32> to vector<8x5x5xf32>
    %288 = arith.addf %286, %287 : vector<8x5x5xf32>
    %cst_111 = arith.constant dense<0xFF800000> : vector<8x5xf32>
    %289 = vector.multi_reduction <maximumf>, %288, %cst_111 [2] : vector<8x5x5xf32> to vector<8x5xf32>
    %290 = vector.shape_cast %289 : vector<8x5xf32> to vector<8x5x1xf32>
    %291 = vector.broadcast %290 : vector<8x5x1xf32> to vector<8x5x5xf32>
    %292 = arith.cmpf oeq, %288, %291 : vector<8x5x5xf32>
    %c5_i32_112 = arith.constant 5 : i32
    %293 = vector.broadcast %c5_i32_112 : i32 to vector<8x5x5xi32>
    %294 = arith.select %292, %213, %293 : vector<8x5x5xi1>, vector<8x5x5xi32>
    %cst_113 = arith.constant dense<2147483647> : vector<8x5xi32>
    %295 = vector.multi_reduction <minsi>, %294, %cst_113 [2] : vector<8x5x5xi32> to vector<8x5xi32>
    %c32_114 = arith.constant 32 : index
    %c0_115 = arith.constant 0 : index
    %296 = vector.load %arg16[%c32_114, %c0_115] : memref<64x5xi32, #tpu.memory_space<vmem>>, vector<8x5xi32>
    tpu.vector_store %arg16[%c32_114, %c0_115], %295 {strides = array<i32>} : memref<64x5xi32, #tpu.memory_space<vmem>>, vector<8x5xi32>,
    %297 = vector.shape_cast %290 : vector<8x5x1xf32> to vector<8x5xf32>
    %c32_116 = arith.constant 32 : index
    %c0_117 = arith.constant 0 : index
    %298 = vector.load %arg15[%c32_116, %c0_117] : memref<64x5xf32, #tpu.memory_space<vmem>>, vector<8x5xf32>
    %299 = arith.addf %297, %298 : vector<8x5xf32>
    %300 = vector.shape_cast %299 : vector<8x5xf32> to vector<8x1x5xf32>
    %301 = vector.shape_cast %212 : vector<5x5xf32> to vector<1x5x5xf32>
    %302 = vector.broadcast %300 : vector<8x1x5xf32> to vector<8x5x5xf32>
    %303 = vector.broadcast %301 : vector<1x5x5xf32> to vector<8x5x5xf32>
    %304 = arith.addf %302, %303 : vector<8x5x5xf32>
    %cst_118 = arith.constant dense<0xFF800000> : vector<8x5xf32>
    %305 = vector.multi_reduction <maximumf>, %304, %cst_118 [2] : vector<8x5x5xf32> to vector<8x5xf32>
    %306 = vector.shape_cast %305 : vector<8x5xf32> to vector<8x5x1xf32>
    %307 = vector.broadcast %306 : vector<8x5x1xf32> to vector<8x5x5xf32>
    %308 = arith.cmpf oeq, %304, %307 : vector<8x5x5xf32>
    %c5_i32_119 = arith.constant 5 : i32
    %309 = vector.broadcast %c5_i32_119 : i32 to vector<8x5x5xi32>
    %310 = arith.select %308, %213, %309 : vector<8x5x5xi1>, vector<8x5x5xi32>
    %cst_120 = arith.constant dense<2147483647> : vector<8x5xi32>
    %311 = vector.multi_reduction <minsi>, %310, %cst_120 [2] : vector<8x5x5xi32> to vector<8x5xi32>
    %c40_121 = arith.constant 40 : index
    %c0_122 = arith.constant 0 : index
    %312 = vector.load %arg16[%c40_121, %c0_122] : memref<64x5xi32, #tpu.memory_space<vmem>>, vector<8x5xi32>
    tpu.vector_store %arg16[%c40_121, %c0_122], %311 {strides = array<i32>} : memref<64x5xi32, #tpu.memory_space<vmem>>, vector<8x5xi32>,
    %313 = vector.shape_cast %306 : vector<8x5x1xf32> to vector<8x5xf32>
    %c40_123 = arith.constant 40 : index
    %c0_124 = arith.constant 0 : index
    %314 = vector.load %arg15[%c40_123, %c0_124] : memref<64x5xf32, #tpu.memory_space<vmem>>, vector<8x5xf32>
    %315 = arith.addf %313, %314 : vector<8x5xf32>
    %316 = vector.shape_cast %315 : vector<8x5xf32> to vector<8x1x5xf32>
    %317 = vector.shape_cast %212 : vector<5x5xf32> to vector<1x5x5xf32>
    %318 = vector.broadcast %316 : vector<8x1x5xf32> to vector<8x5x5xf32>
    %319 = vector.broadcast %317 : vector<1x5x5xf32> to vector<8x5x5xf32>
    %320 = arith.addf %318, %319 : vector<8x5x5xf32>
    %cst_125 = arith.constant dense<0xFF800000> : vector<8x5xf32>
    %321 = vector.multi_reduction <maximumf>, %320, %cst_125 [2] : vector<8x5x5xf32> to vector<8x5xf32>
    %322 = vector.shape_cast %321 : vector<8x5xf32> to vector<8x5x1xf32>
    %323 = vector.broadcast %322 : vector<8x5x1xf32> to vector<8x5x5xf32>
    %324 = arith.cmpf oeq, %320, %323 : vector<8x5x5xf32>
    %c5_i32_126 = arith.constant 5 : i32
    %325 = vector.broadcast %c5_i32_126 : i32 to vector<8x5x5xi32>
    %326 = arith.select %324, %213, %325 : vector<8x5x5xi1>, vector<8x5x5xi32>
    %cst_127 = arith.constant dense<2147483647> : vector<8x5xi32>
    %327 = vector.multi_reduction <minsi>, %326, %cst_127 [2] : vector<8x5x5xi32> to vector<8x5xi32>
    %c48_128 = arith.constant 48 : index
    %c0_129 = arith.constant 0 : index
    %328 = vector.load %arg16[%c48_128, %c0_129] : memref<64x5xi32, #tpu.memory_space<vmem>>, vector<8x5xi32>
    tpu.vector_store %arg16[%c48_128, %c0_129], %327 {strides = array<i32>} : memref<64x5xi32, #tpu.memory_space<vmem>>, vector<8x5xi32>,
    %329 = vector.shape_cast %322 : vector<8x5x1xf32> to vector<8x5xf32>
    %c48_130 = arith.constant 48 : index
    %c0_131 = arith.constant 0 : index
    %330 = vector.load %arg15[%c48_130, %c0_131] : memref<64x5xf32, #tpu.memory_space<vmem>>, vector<8x5xf32>
    %331 = arith.addf %329, %330 : vector<8x5xf32>
    %332 = vector.shape_cast %331 : vector<8x5xf32> to vector<8x1x5xf32>
    %333 = vector.shape_cast %212 : vector<5x5xf32> to vector<1x5x5xf32>
    %334 = vector.broadcast %332 : vector<8x1x5xf32> to vector<8x5x5xf32>
    %335 = vector.broadcast %333 : vector<1x5x5xf32> to vector<8x5x5xf32>
    %336 = arith.addf %334, %335 : vector<8x5x5xf32>
    %cst_132 = arith.constant dense<0xFF800000> : vector<8x5xf32>
    %337 = vector.multi_reduction <maximumf>, %336, %cst_132 [2] : vector<8x5x5xf32> to vector<8x5xf32>
    %338 = vector.shape_cast %337 : vector<8x5xf32> to vector<8x5x1xf32>
    %339 = vector.broadcast %338 : vector<8x5x1xf32> to vector<8x5x5xf32>
    %340 = arith.cmpf oeq, %336, %339 : vector<8x5x5xf32>
    %c5_i32_133 = arith.constant 5 : i32
    %341 = vector.broadcast %c5_i32_133 : i32 to vector<8x5x5xi32>
    %342 = arith.select %340, %213, %341 : vector<8x5x5xi1>, vector<8x5x5xi32>
    %cst_134 = arith.constant dense<2147483647> : vector<8x5xi32>
    %343 = vector.multi_reduction <minsi>, %342, %cst_134 [2] : vector<8x5x5xi32> to vector<8x5xi32>
    %c56_135 = arith.constant 56 : index
    %c0_136 = arith.constant 0 : index
    %344 = vector.load %arg16[%c56_135, %c0_136] : memref<64x5xi32, #tpu.memory_space<vmem>>, vector<8x5xi32>
    tpu.vector_store %arg16[%c56_135, %c0_136], %343 {strides = array<i32>} : memref<64x5xi32, #tpu.memory_space<vmem>>, vector<8x5xi32>,
    %345 = vector.shape_cast %338 : vector<8x5x1xf32> to vector<8x5xf32>
    %c56_137 = arith.constant 56 : index
    %c0_138 = arith.constant 0 : index
    %346 = vector.load %arg15[%c56_137, %c0_138] : memref<64x5xf32, #tpu.memory_space<vmem>>, vector<8x5xf32>
    %347 = arith.addf %345, %346 : vector<8x5xf32>
    %348 = vector.extract_strided_slice %212 {offsets = [4, 0], sizes = [1, 5], strides = [1, 1]} : vector<5x5xf32> to vector<1x5xf32>
    %349 = vector.broadcast %348 : vector<1x5xf32> to vector<8x5xf32>
    %350 = arith.addf %347, %349 : vector<8x5xf32>
    %cst_139 = arith.constant dense<0xFF800000> : vector<8xf32>
    %351 = vector.multi_reduction <maximumf>, %350, %cst_139 [1] : vector<8x5xf32> to vector<8xf32>
    %352 = vector.shape_cast %351 : vector<8xf32> to vector<8x1xf32>
    %353 = vector.broadcast %352 : vector<8x1xf32> to vector<8x5xf32>
    %354 = arith.cmpf oeq, %350, %353 : vector<8x5xf32>
    %c5_i32_140 = arith.constant 5 : i32
    %355 = vector.broadcast %c5_i32_140 : i32 to vector<8x5xi32>
    %356 = arith.select %354, %214, %355 : vector<8x5xi1>, vector<8x5xi32>
    %cst_141 = arith.constant dense<2147483647> : vector<8xi32>
    %357 = vector.multi_reduction <minsi>, %356, %cst_141 [1] : vector<8x5xi32> to vector<8xi32>
    %358 = vector.shape_cast %357 : vector<8xi32> to vector<8x1xi32>
    %c0_142 = arith.constant 0 : index
    %c0_143 = arith.constant 0 : index
    %359 = vector.load %arg10[%c0_142, %c0_143] : memref<8x1xf32, #tpu.memory_space<vmem>>, vector<8x1xf32>
    tpu.vector_store %arg10[%c0_142, %c0_143], %352 {strides = array<i32>} : memref<8x1xf32, #tpu.memory_space<vmem>>, vector<8x1xf32>,
    %c56_144 = arith.constant 56 : index
    %c0_145 = arith.constant 0 : index
    %360 = vector.load %arg11[%c56_144, %c0_145] : memref<64x1xi32, #tpu.memory_space<vmem>>, vector<8x1xi32>
    tpu.vector_store %arg11[%c56_144, %c0_145], %358 {strides = array<i32>} : memref<64x1xi32, #tpu.memory_space<vmem>>, vector<8x1xi32>,
    %c56_146 = arith.constant 56 : index
    %c0_147 = arith.constant 0 : index
    %361 = vector.load %arg16[%c56_146, %c0_147] : memref<64x5xi32, #tpu.memory_space<vmem>>, vector<8x5xi32>
    %362 = vector.broadcast %358 : vector<8x1xi32> to vector<8x5xi32>
    %363 = arith.cmpi eq, %214, %362 : vector<8x5xi32>
    %c5_i32_148 = arith.constant 5 : i32
    %364 = vector.broadcast %c5_i32_148 : i32 to vector<8x5xi32>
    %365 = arith.select %363, %361, %364 : vector<8x5xi1>, vector<8x5xi32>
    %cst_149 = arith.constant dense<2147483647> : vector<8xi32>
    %366 = vector.multi_reduction <minsi>, %365, %cst_149 [1] : vector<8x5xi32> to vector<8xi32>
    %367 = vector.shape_cast %366 : vector<8xi32> to vector<8x1xi32>
    %c48_150 = arith.constant 48 : index
    %c0_151 = arith.constant 0 : index
    %368 = vector.load %arg11[%c48_150, %c0_151] : memref<64x1xi32, #tpu.memory_space<vmem>>, vector<8x1xi32>
    tpu.vector_store %arg11[%c48_150, %c0_151], %367 {strides = array<i32>} : memref<64x1xi32, #tpu.memory_space<vmem>>, vector<8x1xi32>,
    %c48_152 = arith.constant 48 : index
    %c0_153 = arith.constant 0 : index
    %369 = vector.load %arg16[%c48_152, %c0_153] : memref<64x5xi32, #tpu.memory_space<vmem>>, vector<8x5xi32>
    %370 = vector.broadcast %367 : vector<8x1xi32> to vector<8x5xi32>
    %371 = arith.cmpi eq, %214, %370 : vector<8x5xi32>
    %c5_i32_154 = arith.constant 5 : i32
    %372 = vector.broadcast %c5_i32_154 : i32 to vector<8x5xi32>
    %373 = arith.select %371, %369, %372 : vector<8x5xi1>, vector<8x5xi32>
    %cst_155 = arith.constant dense<2147483647> : vector<8xi32>
    %374 = vector.multi_reduction <minsi>, %373, %cst_155 [1] : vector<8x5xi32> to vector<8xi32>
    %375 = vector.shape_cast %374 : vector<8xi32> to vector<8x1xi32>
    %c40_156 = arith.constant 40 : index
    %c0_157 = arith.constant 0 : index
    %376 = vector.load %arg11[%c40_156, %c0_157] : memref<64x1xi32, #tpu.memory_space<vmem>>, vector<8x1xi32>
    tpu.vector_store %arg11[%c40_156, %c0_157], %375 {strides = array<i32>} : memref<64x1xi32, #tpu.memory_space<vmem>>, vector<8x1xi32>,
    %c40_158 = arith.constant 40 : index
    %c0_159 = arith.constant 0 : index
    %377 = vector.load %arg16[%c40_158, %c0_159] : memref<64x5xi32, #tpu.memory_space<vmem>>, vector<8x5xi32>
    %378 = vector.broadcast %375 : vector<8x1xi32> to vector<8x5xi32>
    %379 = arith.cmpi eq, %214, %378 : vector<8x5xi32>
    %c5_i32_160 = arith.constant 5 : i32
    %380 = vector.broadcast %c5_i32_160 : i32 to vector<8x5xi32>
    %381 = arith.select %379, %377, %380 : vector<8x5xi1>, vector<8x5xi32>
    %cst_161 = arith.constant dense<2147483647> : vector<8xi32>
    %382 = vector.multi_reduction <minsi>, %381, %cst_161 [1] : vector<8x5xi32> to vector<8xi32>
    %383 = vector.shape_cast %382 : vector<8xi32> to vector<8x1xi32>
    %c32_162 = arith.constant 32 : index
    %c0_163 = arith.constant 0 : index
    %384 = vector.load %arg11[%c32_162, %c0_163] : memref<64x1xi32, #tpu.memory_space<vmem>>, vector<8x1xi32>
    tpu.vector_store %arg11[%c32_162, %c0_163], %383 {strides = array<i32>} : memref<64x1xi32, #tpu.memory_space<vmem>>, vector<8x1xi32>,
    %c32_164 = arith.constant 32 : index
    %c0_165 = arith.constant 0 : index
    %385 = vector.load %arg16[%c32_164, %c0_165] : memref<64x5xi32, #tpu.memory_space<vmem>>, vector<8x5xi32>
    %386 = vector.broadcast %383 : vector<8x1xi32> to vector<8x5xi32>
    %387 = arith.cmpi eq, %214, %386 : vector<8x5xi32>
    %c5_i32_166 = arith.constant 5 : i32
    %388 = vector.broadcast %c5_i32_166 : i32 to vector<8x5xi32>
    %389 = arith.select %387, %385, %388 : vector<8x5xi1>, vector<8x5xi32>
    %cst_167 = arith.constant dense<2147483647> : vector<8xi32>
    %390 = vector.multi_reduction <minsi>, %389, %cst_167 [1] : vector<8x5xi32> to vector<8xi32>
    %391 = vector.shape_cast %390 : vector<8xi32> to vector<8x1xi32>
    %c24_168 = arith.constant 24 : index
    %c0_169 = arith.constant 0 : index
    %392 = vector.load %arg11[%c24_168, %c0_169] : memref<64x1xi32, #tpu.memory_space<vmem>>, vector<8x1xi32>
    tpu.vector_store %arg11[%c24_168, %c0_169], %391 {strides = array<i32>} : memref<64x1xi32, #tpu.memory_space<vmem>>, vector<8x1xi32>,
    %c24_170 = arith.constant 24 : index
    %c0_171 = arith.constant 0 : index
    %393 = vector.load %arg16[%c24_170, %c0_171] : memref<64x5xi32, #tpu.memory_space<vmem>>, vector<8x5xi32>
    %394 = vector.broadcast %391 : vector<8x1xi32> to vector<8x5xi32>
    %395 = arith.cmpi eq, %214, %394 : vector<8x5xi32>
    %c5_i32_172 = arith.constant 5 : i32
    %396 = vector.broadcast %c5_i32_172 : i32 to vector<8x5xi32>
    %397 = arith.select %395, %393, %396 : vector<8x5xi1>, vector<8x5xi32>
    %cst_173 = arith.constant dense<2147483647> : vector<8xi32>
    %398 = vector.multi_reduction <minsi>, %397, %cst_173 [1] : vector<8x5xi32> to vector<8xi32>
    %399 = vector.shape_cast %398 : vector<8xi32> to vector<8x1xi32>
    %c16_174 = arith.constant 16 : index
    %c0_175 = arith.constant 0 : index
    %400 = vector.load %arg11[%c16_174, %c0_175] : memref<64x1xi32, #tpu.memory_space<vmem>>, vector<8x1xi32>
    tpu.vector_store %arg11[%c16_174, %c0_175], %399 {strides = array<i32>} : memref<64x1xi32, #tpu.memory_space<vmem>>, vector<8x1xi32>,
    %c16_176 = arith.constant 16 : index
    %c0_177 = arith.constant 0 : index
    %401 = vector.load %arg16[%c16_176, %c0_177] : memref<64x5xi32, #tpu.memory_space<vmem>>, vector<8x5xi32>
    %402 = vector.broadcast %399 : vector<8x1xi32> to vector<8x5xi32>
    %403 = arith.cmpi eq, %214, %402 : vector<8x5xi32>
    %c5_i32_178 = arith.constant 5 : i32
    %404 = vector.broadcast %c5_i32_178 : i32 to vector<8x5xi32>
    %405 = arith.select %403, %401, %404 : vector<8x5xi1>, vector<8x5xi32>
    %cst_179 = arith.constant dense<2147483647> : vector<8xi32>
    %406 = vector.multi_reduction <minsi>, %405, %cst_179 [1] : vector<8x5xi32> to vector<8xi32>
    %407 = vector.shape_cast %406 : vector<8xi32> to vector<8x1xi32>
    %c8_180 = arith.constant 8 : index
    %c0_181 = arith.constant 0 : index
    %408 = vector.load %arg11[%c8_180, %c0_181] : memref<64x1xi32, #tpu.memory_space<vmem>>, vector<8x1xi32>
    tpu.vector_store %arg11[%c8_180, %c0_181], %407 {strides = array<i32>} : memref<64x1xi32, #tpu.memory_space<vmem>>, vector<8x1xi32>,
    %c8_182 = arith.constant 8 : index
    %c0_183 = arith.constant 0 : index
    %409 = vector.load %arg16[%c8_182, %c0_183] : memref<64x5xi32, #tpu.memory_space<vmem>>, vector<8x5xi32>
    %410 = vector.broadcast %407 : vector<8x1xi32> to vector<8x5xi32>
    %411 = arith.cmpi eq, %214, %410 : vector<8x5xi32>
    %c5_i32_184 = arith.constant 5 : i32
    %412 = vector.broadcast %c5_i32_184 : i32 to vector<8x5xi32>
    %413 = arith.select %411, %409, %412 : vector<8x5xi1>, vector<8x5xi32>
    %cst_185 = arith.constant dense<2147483647> : vector<8xi32>
    %414 = vector.multi_reduction <minsi>, %413, %cst_185 [1] : vector<8x5xi32> to vector<8xi32>
    %415 = vector.shape_cast %414 : vector<8xi32> to vector<8x1xi32>
    %c0_186 = arith.constant 0 : index
    %c0_187 = arith.constant 0 : index
    %416 = vector.load %arg11[%c0_186, %c0_187] : memref<64x1xi32, #tpu.memory_space<vmem>>, vector<8x1xi32>
    tpu.vector_store %arg11[%c0_186, %c0_187], %415 {strides = array<i32>} : memref<64x1xi32, #tpu.memory_space<vmem>>, vector<8x1xi32>,
    %c0_188 = arith.constant 0 : index
    %c0_189 = arith.constant 0 : index
    %417 = vector.load %arg16[%c0_188, %c0_189] : memref<64x5xi32, #tpu.memory_space<vmem>>, vector<8x5xi32>
    %418 = vector.broadcast %415 : vector<8x1xi32> to vector<8x5xi32>
    %419 = arith.cmpi eq, %214, %418 : vector<8x5xi32>
    %c5_i32_190 = arith.constant 5 : i32
    %420 = vector.broadcast %c5_i32_190 : i32 to vector<8x5xi32>
    %421 = arith.select %419, %417, %420 : vector<8x5xi1>, vector<8x5xi32>
    %cst_191 = arith.constant dense<2147483647> : vector<8xi32>
    %422 = vector.multi_reduction <minsi>, %421, %cst_191 [1] : vector<8x5xi32> to vector<8xi32>
    %423 = vector.shape_cast %422 : vector<8xi32> to vector<8x1xi32>
    %c0_192 = arith.constant 0 : index
    %c0_193 = arith.constant 0 : index
    %424 = vector.load %arg12[%c0_192, %c0_193] : memref<8x1xi32, #tpu.memory_space<vmem>>, vector<8x1xi32>
    tpu.vector_store %arg12[%c0_192, %c0_193], %423 {strides = array<i32>} : memref<8x1xi32, #tpu.memory_space<vmem>>, vector<8x1xi32>,
    return
  }
}

</mosaic_0001>

<bundles_post_ra>
// kernel: squeeze.4
= control target key start
LH: loop header
LB: loop body
LE: loop exit
PB: predicated region body
PF: predicated region fallthrough
CT: control target
= control target key end

     0   :  { %s66_s8 = smov 104   ;;  %vm7_vm0 = vcmask 64512   ;;  %s67_s11 = smov 112   ;;  %s117_s0 = inlined_call_operand.vmem [shape: s32[64], index: 0, kind: input, shape index: {}]   ;;  %s118_s1 = inlined_call_operand.vmem [shape: s32[8,8], index: 1, kind: output, shape index: {}]  }
   0x1   :  { %v4_v0 = vld [vmem:[%s117_s0] sm:$0x1]  ;;  %s65_s0 = smov 120   ;;  %s68_s12 = smov 96  }
   0x2   :  { %5 = vst [vmem:[#allocation0] sm:$0x1] %v4_v0  ;;  %s69_s13 = smov 88   ;;  %s70_s14 = smov 80  }
   0x3   :  { %s71_s15 = smov 72  }
   0x9   :  { %v9_v1 = vld [vmem:[#allocation0] sm:$0x1]  }
   0xa   :  { %v21_v2 = vld [vmem:[#allocation0] sm:$0x1]   ;;  %10 = vrot.lane.b32.xlu0 %v9_v1, %s65_s0 }
   0xb   :  { %22 = vrot.lane.b32.xlu1 %v21_v2, %s66_s8  ;;  %v15_v3 = vld [vmem:[#allocation0] sm:$0x1]  }
   0xc   :  { %v27_v4 = vld [vmem:[#allocation0] sm:$0x1]  }
   0xd   :  { %v6_v5 = vld [vmem:[#allocation0] sm:$0x1]  }
   0xe   :  { %8 = vst.msk [vmem:[%s118_s1] sm:$0x1] %vm7_vm0, %v6_v5   ;;  %16 = vrot.lane.b32.xlu0 %v15_v3, %s67_s11  ;;  %v33_v6 = vld [vmem:[#allocation0] sm:$0x1]  }
   0xf   :  { %28 = vrot.lane.b32.xlu1 %v27_v4, %s68_s12  ;;  %v39_v7 = vld [vmem:[#allocation0] sm:$0x1]  }
  0x10   :  { %v45_v8 = vld [vmem:[#allocation0] sm:$0x1]  }
  0x12   :  { %34 = vrot.lane.b32.xlu0 %v33_v6, %s69_s13 }
  0x13   :  { %40 = vrot.lane.b32.xlu1 %v39_v7, %s70_s14 }
  0x16   :  { %46 = vrot.lane.b32.xlu0 %v45_v8, %s71_s15 }
  0x7c   :  { %v11_v9 = vpop.permute.xlu0 %10  }
  0x7d   :  { %v23_v10 = vpop.permute.xlu1 %22   ;;  %51 = vst.msk [vmem:[%s118_s1 + $0x1] sm:$0x1] %vm7_vm0, %v11_v9  }
  0x7e   :  { %53 = vst.msk [vmem:[%s118_s1 + $0x3] sm:$0x1] %vm7_vm0, %v23_v10  }
  0x80   :  { %v17_v11 = vpop.permute.xlu0 %16  }
  0x81   :  { %v29_v12 = vpop.permute.xlu1 %28   ;;  %52 = vst.msk [vmem:[%s118_s1 + $0x2] sm:$0x1] %vm7_vm0, %v17_v11  }
  0x82   :  { %54 = vst.msk [vmem:[%s118_s1 + $0x4] sm:$0x1] %vm7_vm0, %v29_v12  }
  0x84   :  { %v35_v13 = vpop.permute.xlu0 %34  }
  0x85   :  { %v41_v14 = vpop.permute.xlu1 %40   ;;  %55 = vst.msk [vmem:[%s118_s1 + $0x5] sm:$0x1] %vm7_vm0, %v35_v13  }
  0x86   :  { %56 = vst.msk [vmem:[%s118_s1 + $0x6] sm:$0x1] %vm7_vm0, %v41_v14  }
  0x88   :  { %v47_v15 = vpop.permute.xlu0 %46  }
  0x89   :  { %57 = vst.msk [vmem:[%s118_s1 + $0x7] sm:$0x1] %vm7_vm0, %v47_v15  }

// kernel: _forward_batch_impl.1
= control target key start
LH: loop header
LB: loop body
LE: loop exit
PB: predicated region body
PF: predicated region fallthrough
CT: control target
= control target key end

     0   :  { %vm55_vm0 = vcmask 130048   ;;  %v11344_v0 = vmov 0.0|0.0   ;;  %vm11345_vm1 = vmmov 0   ;;  %v11346_v4 = vmov 0.0   ;;  %s11347_s20 = smov 32   ;;  %s16997_s1 = inlined_call_operand.vmem [shape: f32[16,128], index: 1, kind: input, shape index: {}]   ;;  %s16998_s3 = inlined_call_operand.vmem [shape: f32[32,128], index: 3, kind: input, shape index: {}]   ;;  %s16999_s0 = inlined_call_operand.vmem [shape: f32[64,16], index: 0, kind: input, shape index: {}]   ;;  %s17000_s4 = inlined_call_operand.vmem [shape: f32[8,32], index: 4, kind: input, shape index: {}]   ;;  %s17001_s2 = inlined_call_operand.vmem [shape: f32[1,128], index: 2, kind: input, shape index: {}]   ;;  %s17002_s5 = inlined_call_operand.vmem [shape: f32[8,32], index: 5, kind: input, shape index: {}]   ;;  %s17003_s6 = inlined_call_operand.vmem [shape: f32[16,5], index: 6, kind: input, shape index: {}]   ;;  %s17004_s9 = inlined_call_operand.vmem [shape: f32[5,5], index: 9, kind: input, shape index: {}]   ;;  %s17005_s7 = inlined_call_operand.vmem [shape: f32[16,5], index: 7, kind: input, shape index: {}]   ;;  %s17006_s8 = inlined_call_operand.vmem [shape: f32[1,5], index: 8, kind: input, shape index: {}]   ;;  %s17007_s10 = inlined_call_operand.vmem [shape: f32[8,1], index: 10, kind: output, shape index: {0}]   ;;  %s17008_s11 = inlined_call_operand.vmem [shape: s32[64,1], index: 11, kind: output, shape index: {1}]   ;;  %s17009_s12 = inlined_call_operand.vmem [shape: s32[8,1], index: 12, kind: output, shape index: {2}]  }
   0x1   :  { %11212 = vmatprep.subr.bf16.mxu1 %v11344_v0  ;;  %v46_v1 = vld [vmem:[%s16997_s1] sm:$0xff]  ;;  %v47_v2 = vld [vmem:[%s16997_s1 + $0x8] sm:$0xff]  ;;  %11096 = vmatprep.mubr.msk.f32.mxu1 %vm11345_vm1, %v11346_v4  ;;  %v195_v9 = vld [vmem:[%s16998_s3 + $0x10] sm:$0xff]  ;;  %vm200_vm2 = vcmask 261120   ;;  %vm1434_vm4 = vcmask 36864   ;;  %vm1315_vm14 = vcmask 39936  }
   0x2   :  { %v193_v3 = vld [vmem:[%s16998_s3] sm:$0xff]  ;;  %v11208_v5 = vpack.c.bf16 %v47_v2, %v46_v1  ;;  %v194_v6 = vld [vmem:[%s16998_s3 + $0x8] sm:$0xff]  ;;  %v196_v10 = vld [vmem:[%s16998_s3 + $0x18] sm:$0xff] }
   0x3   :  { %v38_v7 = vld [vmem:[%s16999_s0] sm:$0xff]  ;;  %v11436_v8 = vpack.c.bf16 %v194_v6, %v193_v3  ;;  %v39_v11 = vld [vmem:[%s16999_s0 + $0x8] sm:$0xff]  ;;  %v11449_v12 = vpack.c.bf16 %v196_v10, %v195_v9  ;;  %v40_v51 = vld [vmem:[%s16999_s0 + $0x10] sm:$0xff] }
   0x4   :  { %11076 = vmatprep.mubr.msk.f32.mxu0 %vm55_vm0, %v38_v7  ;;  %11209 = vmatprep.subr.bf16.mxu0 %v11208_v5  ;;  %v197_v13 = vld [vmem:[%s17000_s4] sm:$0xff]  ;;  %v41_v52 = vld [vmem:[%s16999_s0 + $0x18] sm:$0xff]  ;;  %v43_v54 = vld [vmem:[%s16999_s0 + $0x28] sm:$0xff] }
   0x5   :  { %11214 = vmatpush3.bf16.msra.mxu1 %v11436_v8  ;;  %11211 = vmatpush3.bf16.msra.mxu0 %v11208_v5  ;;  %v11473_v14 = vld [vmem:[%s17001_s2] ss:$0 sm:$0xff]  ;;  %s11348_s2 = smov 64   ;;  %v44_v55 = vld [vmem:[%s16999_s0 + $0x30] sm:$0xff]  ;;  %v45_v56 = vld [vmem:[%s16999_s0 + $0x38] sm:$0xff] }
   0x6   :  { %11215 = vmatprep.subr.bf16.mxu1 %v11344_v0  ;;  %11224 = vmatprep.subr.bf16.mxu0 %v11344_v0  ;;  %v198_v22 = vld [vmem:[%s17002_s5] sm:$0xff] }
   0x7   :  { %v42_v53 = vld [vmem:[%s16999_s0 + $0x20] sm:$0xff] }
   0x8   :  { %11077 = vmatmul.mubr.msk.f32.vlgmr.msra.gmra.mrb[0].mxu0 %vm55_vm0, %v39_v11 }
   0x9   :  { %11217 = vmatpush3.bf16.msra.mxu1 %v11449_v12  ;;  %11226 = vmatpush3.bf16.msra.mxu0 %v11436_v8 }
   0xa   :  { %11218 = vmatprep.subr.bf16.mxu1 %v11344_v0  ;;  %11227 = vmatprep.subr.bf16.mxu0 %v11344_v0 }
   0xb   :  { %11079 = vmatprep.mubr.msk.f32.mxu0 %vm55_vm0, %v40_v51 }
   0xc   :  { %11097 = vmatmul.mubr.msk.f32.vlgmr.msra.gmra.mrb[0].mxu1 %vm200_vm2, %v197_v13  ;;  %11080 = vmatmul.mubr.msk.f32.gmra.mrb[2].mxu0 %vm55_vm0, %v41_v52 }
   0xd   :  { %11220 = vmatpush3.bf16.msra.mxu1 %v11436_v8  ;;  %11107 = vmatprep.mubr.msk.f32.mxu1 %vm11345_vm1, %v11346_v4 }
   0xe   :  { %11221 = vmatprep.subr.bf16.mxu1 %v11344_v0  ;;  %11229 = vmatpush3.bf16.msra.mxu0 %v11449_v12 }
   0xf   :  { %11236 = vmatprep.subr.bf16.mxu0 %v11344_v0  ;;  %11082 = vmatprep.mubr.msk.f32.mxu0 %vm55_vm0, %v42_v53 }
  0x10   :  { %11083 = vmatmul.mubr.msk.f32.gmra.mrb[4].mxu0 %vm55_vm0, %v43_v54 }
  0x11   :  { %11223 = vmatpush3.bf16.msra.mxu1 %v11449_v12  ;;  %11085 = vmatprep.mubr.msk.f32.mxu0 %vm55_vm0, %v44_v55 }
  0x12   :  { %11230 = vmatprep.subr.bf16.mxu1 %v11344_v0 }
  0x14   :  { %11086 = vmatmul.mubr.msk.f32.gmra.mrb[6].mxu0 %vm55_vm0, %v45_v56 }
  0x15   :  { %11118 = vmatprep.mubr.msk.f32.mxu0 %vm11345_vm1, %v11346_v4 }
  0xdb   :  { %v11078_v15 = vpop.f32.mrb[0].mxu0 }
  0xdc   :  { %v146_v16 = vpop.f32.mrb[1].mxu0  ;;  %v152_v37 = vadd.f32 %v11078_v15, %v11473_v14 }
  0xdd   :  { %v147_v17 = vadd.f32 %v11473_v14, %v146_v16 }
  0xdf   :  { %v270_v18 = vpop.f32.mrb[0].mxu1  ;;  %v11081_v60 = vpop.f32.mrb[2].mxu0 }
  0xe0   :  { %v274_v19 = vadd.f32 %v270_v18, %v147_v17  ;;  %v11098_v20 = vpop.f32.mrb[1].mxu1  ;;  %v156_v61 = vpop.f32.mrb[3].mxu0 }
  0xe1   :  { %v157_v5 = vadd.f32 %v11473_v14, %v156_v61 }
  0xe2   :  { %11279 = vtanh.f32 %v274_v19  ;;  %v10970_v23 = vmul.f32 -1.442695, %v274_v19 }
  0xe3   :  { %v11523_v62 = vpop.f32.mrb[4].mxu0 }
  0xe4   :  { %11281 = vpow2.f32 %v10970_v23  ;;  %v11525_v63 = vpop.f32.mrb[5].mxu0 }
  0xe7   :  { %v11527_v1 = vpop.f32.mrb[6].mxu0 }
  0xe8   :  { %v11529_v2 = vpop.f32.mrb[7].mxu0 }
  0xec   :  { %v11280_v21 = vpop.eup %11279 }
  0xed   :  { %288 = vrot.lane.b32.xlu0 %v11280_v21, %s11347_s20 }
  0xee   :  { %v11282_v24 = vpop.eup %11281 }
  0xef   :  { %v278_v25 = vadd.f32 1.0, %v11282_v24 }
  0xf1   :  { %283 = vrot.lane.b32.xlu0 %v198_v22, %s11347_s20  ;;  %11283 = vrcp.f32 %v278_v25 }
  0xfb   :  { %v11284_v26 = vpop.eup %11283 }
 0x15f   :  { %v289_v27 = vpop.permute.xlu0 %288 }
 0x160   :  { %v291_v28 = vmul.f32 %v11284_v26, %v289_v27 }
 0x162   :  { %293 = vrot.lane.b32.xlu1 %v291_v28, %s11347_s20 }
 0x163   :  { %v284_v29 = vpop.permute.xlu0 %283 }
 0x164   :  { %v286_v30 = vmul.f32 %v11284_v26, %v284_v29 }
 0x1d4   :  { %v294_v31 = vpop.permute.xlu1 %293 }
 0x1d5   :  { %v296_v32 = vadd.f32 %v294_v31, %v286_v30 }
 0x1d7   :  { %11285 = vtanh.f32 %v296_v32 }
 0x1e1   :  { %v11286_v33 = vpop.eup %11285 }
 0x1e2   :  { %299 = vrot.lane.b32.xlu1 %v11286_v33, %s11347_s20 }
 0x254   :  { %v300_v34 = vpop.permute.xlu1 %299 }
 0x255   :  { %v302_v35 = vmul.f32 %v11284_v26, %v300_v34  ;;  %v162_v26 = vadd.f32 %v11081_v60, %v11473_v14 }
 0x257   :  { %304 = vrot.lane.b32.xlu0 %v302_v35, %s11348_s2 }
 0x2c9   :  { %v305_v36 = vpop.permute.xlu0 %304 }
 0x2ca   :  { %307 = vst.msk [vmem:[#allocation3] sm:$0xff] %vm200_vm2, %v305_v36  ;;  %11108 = vmatmul.mubr.msk.f32.vlgmr.msra.gmra.mrb[2].mxu1 %vm200_vm2, %v305_v36 }
 0x2cb   :  { %11232 = vmatpush3.bf16.msra.mxu1 %v11436_v8  ;;  %11129 = vmatprep.mubr.msk.f32.mxu1 %vm11345_vm1, %v11346_v4 }
 0x2cc   :  { %11233 = vmatprep.subr.bf16.mxu1 %v11344_v0 }
 0x2cf   :  { %11235 = vmatpush3.bf16.msra.mxu1 %v11449_v12 }
 0x2d0   :  { %11242 = vmatprep.subr.bf16.mxu1 %v11344_v0 }
 0x39d   :  { %v377_v38 = vpop.f32.mrb[2].mxu1 }
 0x39e   :  { %v381_v39 = vadd.f32 %v377_v38, %v152_v37  ;;  %v11109_v40 = vpop.f32.mrb[3].mxu1 }
 0x3a0   :  { %11287 = vtanh.f32 %v381_v39  ;;  %v10972_v42 = vmul.f32 -1.442695, %v381_v39 }
 0x3a2   :  { %11289 = vpow2.f32 %v10972_v42 }
 0x3aa   :  { %v11288_v41 = vpop.eup %11287 }
 0x3ab   :  { %391 = vrot.lane.b32.xlu1 %v11288_v41, %s11347_s20 }
 0x3ac   :  { %v11290_v43 = vpop.eup %11289 }
 0x3ad   :  { %v385_v44 = vadd.f32 1.0, %v11290_v43 }
 0x3af   :  { %11291 = vrcp.f32 %v385_v44  ;;  %v167_v44 = vadd.f32 %v11473_v14, %v11525_v63  ;;  %v172_v63 = vadd.f32 %v11523_v62, %v11473_v14 }
 0x3b9   :  { %v11292_v45 = vpop.eup %11291 }
 0x3ba   :  { %v389_v48 = vmul.f32 %v11292_v45, %v296_v32 }
 0x41d   :  { %v392_v46 = vpop.permute.xlu1 %391 }
 0x41e   :  { %v394_v47 = vmul.f32 %v11292_v45, %v392_v46 }
 0x420   :  { %396 = vrot.lane.b32.xlu0 %v394_v47, %s11347_s20 }
 0x492   :  { %v397_v49 = vpop.permute.xlu0 %396 }
 0x493   :  { %v399_v50 = vadd.f32 %v397_v49, %v389_v48 }
 0x495   :  { %11293 = vtanh.f32 %v399_v50 }
 0x49f   :  { %v11294_v57 = vpop.eup %11293 }
 0x4a0   :  { %402 = vrot.lane.b32.xlu1 %v11294_v57, %s11347_s20 }
 0x512   :  { %v403_v58 = vpop.permute.xlu1 %402 }
 0x513   :  { %v405_v59 = vmul.f32 %v11292_v45, %v403_v58 }
 0x515   :  { %407 = vrot.lane.b32.xlu0 %v405_v59, %s11348_s2 }
 0x587   :  { %v408_v3 = vpop.permute.xlu0 %407 }
 0x588   :  { %410 = vst.msk [vmem:[#allocation3 + $0x8] sm:$0xff] %vm200_vm2, %v408_v3  ;;  %11119 = vmatmul.mubr.msk.f32.vlgmr.msra.gmra.mrb[8].mxu0 %vm200_vm2, %v408_v3 }
 0x589   :  { %11238 = vmatpush3.bf16.msra.mxu0 %v11436_v8  ;;  %11140 = vmatprep.mubr.msk.f32.mxu0 %vm11345_vm1, %v11346_v4 }
 0x58a   :  { %11239 = vmatprep.subr.bf16.mxu0 %v11344_v0 }
 0x58d   :  { %11241 = vmatpush3.bf16.msra.mxu0 %v11449_v12 }
 0x58e   :  { %11248 = vmatprep.subr.bf16.mxu0 %v11344_v0 }
 0x65b   :  { %v480_v6 = vpop.f32.mrb[8].mxu0 }
 0x65c   :  { %v484_v7 = vadd.f32 %v480_v6, %v157_v5  ;;  %v11120_v9 = vpop.f32.mrb[9].mxu0 }
 0x65e   :  { %11295 = vtanh.f32 %v484_v7  ;;  %v10974_v11 = vmul.f32 -1.442695, %v484_v7 }
 0x660   :  { %11297 = vpow2.f32 %v10974_v11 }
 0x668   :  { %v11296_v10 = vpop.eup %11295 }
 0x669   :  { %494 = vrot.lane.b32.xlu1 %v11296_v10, %s11347_s20 }
 0x66a   :  { %v11298_v13 = vpop.eup %11297 }
 0x66b   :  { %v488_v15 = vadd.f32 1.0, %v11298_v13 }
 0x66d   :  { %11299 = vrcp.f32 %v488_v15 }
 0x677   :  { %v11300_v16 = vpop.eup %11299 }
 0x678   :  { %v492_v19 = vmul.f32 %v11300_v16, %v399_v50 }
 0x6db   :  { %v495_v17 = vpop.permute.xlu1 %494 }
 0x6dc   :  { %v497_v18 = vmul.f32 %v11300_v16, %v495_v17  ;;  %v1038_v17 = vld [vmem:[%s17003_s6 + $0x8] sm:$0xff] }
 0x6de   :  { %499 = vrot.lane.b32.xlu0 %v497_v18, %s11347_s20 }
 0x750   :  { %v500_v20 = vpop.permute.xlu0 %499 }
 0x751   :  { %v502_v21 = vadd.f32 %v500_v20, %v492_v19 }
 0x753   :  { %11301 = vtanh.f32 %v502_v21 }
 0x75d   :  { %v11302_v22 = vpop.eup %11301 }
 0x75e   :  { %505 = vrot.lane.b32.xlu1 %v11302_v22, %s11347_s20  ;;  %v1029_v22 = vld [vmem:[#allocation3] sm:$0xff] }
 0x7d0   :  { %v506_v23 = vpop.permute.xlu1 %505 }
 0x7d1   :  { %v508_v24 = vmul.f32 %v11300_v16, %v506_v23  ;;  %v1037_v16 = vld [vmem:[%s17003_s6] sm:$0xff]  ;;  %s11349_s6 = smov 112  }
 0x7d2   :  { %v11260_v18 = vpack.c.bf16 %v1038_v17, %v1037_v16  ;;  %v11592_v23 = vld [vmem:[#allocation3 + $0x8] sm:$0xff] }
 0x7d3   :  { %510 = vrot.lane.b32.xlu0 %v508_v24, %s11348_s2 }
 0x845   :  { %v511_v25 = vpop.permute.xlu0 %510 }
 0x846   :  { %513 = vst.msk [vmem:[#allocation3 + $0x10] sm:$0xff] %vm200_vm2, %v511_v25  ;;  %11130 = vmatmul.mubr.msk.f32.vlgmr.msra.gmra.mrb[4].mxu1 %vm200_vm2, %v511_v25 }
 0x847   :  { %11244 = vmatpush3.bf16.msra.mxu1 %v11436_v8  ;;  %11151 = vmatprep.mubr.msk.f32.mxu1 %vm11345_vm1, %v11346_v4 }
 0x848   :  { %11245 = vmatprep.subr.bf16.mxu1 %v11344_v0 }
 0x84b   :  { %11247 = vmatpush3.bf16.msra.mxu1 %v11449_v12 }
 0x84c   :  { %11254 = vmatprep.subr.bf16.mxu1 %v11344_v0 }
 0x84d   :  { %v1031_v24 = vld [vmem:[#allocation3 + $0x10] sm:$0xff] }
 0x919   :  { %v583_v27 = vpop.f32.mrb[4].mxu1 }
 0x91a   :  { %v587_v28 = vadd.f32 %v583_v27, %v162_v26  ;;  %v11131_v29 = vpop.f32.mrb[5].mxu1 }
 0x91c   :  { %11303 = vtanh.f32 %v587_v28  ;;  %v10976_v31 = vmul.f32 -1.442695, %v587_v28  ;;  %v177_v28 = vadd.f32 %v11473_v14, %v11529_v2 }
 0x91e   :  { %11305 = vpow2.f32 %v10976_v31 }
 0x926   :  { %v11304_v30 = vpop.eup %11303 }
 0x927   :  { %597 = vrot.lane.b32.xlu1 %v11304_v30, %s11347_s20 }
 0x928   :  { %v11306_v32 = vpop.eup %11305 }
 0x929   :  { %v591_v33 = vadd.f32 1.0, %v11306_v32 }
 0x92b   :  { %11307 = vrcp.f32 %v591_v33 }
 0x935   :  { %v11308_v34 = vpop.eup %11307 }
 0x936   :  { %v595_v37 = vmul.f32 %v11308_v34, %v502_v21 }
 0x999   :  { %v598_v35 = vpop.permute.xlu1 %597 }
 0x99a   :  { %v600_v36 = vmul.f32 %v11308_v34, %v598_v35 }
 0x99c   :  { %602 = vrot.lane.b32.xlu0 %v600_v36, %s11347_s20 }
 0xa0e   :  { %v603_v38 = vpop.permute.xlu0 %602 }
 0xa0f   :  { %v605_v39 = vadd.f32 %v603_v38, %v595_v37 }
 0xa11   :  { %11309 = vtanh.f32 %v605_v39 }
 0xa1b   :  { %v11310_v40 = vpop.eup %11309 }
 0xa1c   :  { %608 = vrot.lane.b32.xlu1 %v11310_v40, %s11347_s20 }
 0xa8e   :  { %v609_v41 = vpop.permute.xlu1 %608 }
 0xa8f   :  { %v611_v42 = vmul.f32 %v11308_v34, %v609_v41 }
 0xa91   :  { %613 = vrot.lane.b32.xlu0 %v611_v42, %s11348_s2 }
 0xb03   :  { %v614_v43 = vpop.permute.xlu0 %613 }
 0xb04   :  { %616 = vst.msk [vmem:[#allocation3 + $0x18] sm:$0xff] %vm200_vm2, %v614_v43  ;;  %11141 = vmatmul.mubr.msk.f32.vlgmr.msra.gmra.mrb[10].mxu0 %vm200_vm2, %v614_v43 }
 0xb05   :  { %11250 = vmatpush3.bf16.msra.mxu0 %v11436_v8  ;;  %11162 = vmatprep.mubr.msk.f32.mxu0 %vm11345_vm1, %v11346_v4 }
 0xb06   :  { %11251 = vmatprep.subr.bf16.mxu0 %v11344_v0 }
 0xb09   :  { %11253 = vmatpush3.bf16.msra.mxu0 %v11449_v12 }
 0xb0a   :  { %11261 = vmatprep.subr.bf16.mxu0 %v11260_v18 }
 0xb0b   :  { %v11597_v25 = vld [vmem:[#allocation3 + $0x18] sm:$0xff] }
 0xbd7   :  { %v686_v45 = vpop.f32.mrb[10].mxu0 }
 0xbd8   :  { %v690_v46 = vadd.f32 %v686_v45, %v167_v44  ;;  %v11142_v47 = vpop.f32.mrb[11].mxu0 }
 0xbda   :  { %11311 = vtanh.f32 %v690_v46  ;;  %v10978_v49 = vmul.f32 -1.442695, %v690_v46 }
 0xbdc   :  { %11313 = vpow2.f32 %v10978_v49 }
 0xbe4   :  { %v11312_v48 = vpop.eup %11311 }
 0xbe5   :  { %700 = vrot.lane.b32.xlu1 %v11312_v48, %s11347_s20 }
 0xbe6   :  { %v11314_v50 = vpop.eup %11313 }
 0xbe7   :  { %v694_v51 = vadd.f32 1.0, %v11314_v50 }
 0xbe9   :  { %11315 = vrcp.f32 %v694_v51 }
 0xbf3   :  { %v11316_v52 = vpop.eup %11315 }
 0xbf4   :  { %v698_v55 = vmul.f32 %v11316_v52, %v605_v39 }
 0xc57   :  { %v701_v53 = vpop.permute.xlu1 %700 }
 0xc58   :  { %v703_v54 = vmul.f32 %v11316_v52, %v701_v53 }
 0xc5a   :  { %705 = vrot.lane.b32.xlu0 %v703_v54, %s11347_s20 }
 0xccc   :  { %v706_v56 = vpop.permute.xlu0 %705 }
 0xccd   :  { %v708_v57 = vadd.f32 %v706_v56, %v698_v55 }
 0xccf   :  { %11317 = vtanh.f32 %v708_v57 }
 0xcd9   :  { %v11318_v58 = vpop.eup %11317 }
 0xcda   :  { %711 = vrot.lane.b32.xlu1 %v11318_v58, %s11347_s20  ;;  %v11350_v58 = vmov 1966171168  }
 0xd4c   :  { %v712_v59 = vpop.permute.xlu1 %711 }
 0xd4d   :  { %v714_v60 = vmul.f32 %v11316_v52, %v712_v59  ;;  %v182_v52 = vadd.f32 %v11527_v1, %v11473_v14  ;;  %v1339_v59 = vunpack.c.l.s4 %v11350_v58 }
 0xd4f   :  { %716 = vrot.lane.b32.xlu0 %v714_v60, %s11348_s2  ;;  %v1340_v1 = vunpack.c.0.s8 %v1339_v59 }
 0xdc1   :  { %v717_v61 = vpop.permute.xlu0 %716 }
 0xdc2   :  { %719 = vst.msk [vmem:[#allocation3 + $0x20] sm:$0xff] %vm200_vm2, %v717_v61  ;;  %11152 = vmatmul.mubr.msk.f32.vlgmr.msra.gmra.mrb[6].mxu1 %vm200_vm2, %v717_v61 }
 0xdc3   :  { %11256 = vmatpush3.bf16.msra.mxu1 %v11436_v8  ;;  %11173 = vmatprep.mubr.msk.f32.mxu1 %vm11345_vm1, %v11346_v4 }
 0xdc4   :  { %11257 = vmatprep.subr.bf16.mxu1 %v11344_v0 }
 0xdc7   :  { %11259 = vmatpush3.bf16.msra.mxu1 %v11449_v12 }
 0xdc9   :  { %v1033_v26 = vld [vmem:[#allocation3 + $0x20] sm:$0xff] }
 0xe95   :  { %v789_v3 = vpop.f32.mrb[6].mxu1 }
 0xe96   :  { %v793_v5 = vadd.f32 %v789_v3, %v172_v63  ;;  %v11153_v6 = vpop.f32.mrb[7].mxu1  ;;  %v11351_v63 = vmov -10000.0  }
 0xe98   :  { %11319 = vtanh.f32 %v793_v5  ;;  %v10980_v9 = vmul.f32 -1.442695, %v793_v5 }
 0xe9a   :  { %11321 = vpow2.f32 %v10980_v9 }
 0xea2   :  { %v11320_v7 = vpop.eup %11319 }
 0xea3   :  { %803 = vrot.lane.b32.xlu1 %v11320_v7, %s11347_s20 }
 0xea4   :  { %v11322_v8 = vpop.eup %11321 }
 0xea5   :  { %v797_v10 = vadd.f32 1.0, %v11322_v8 }
 0xea7   :  { %11323 = vrcp.f32 %v797_v10 }
 0xeb1   :  { %v11324_v4 = vpop.eup %11323 }
 0xeb2   :  { %v801_v12 = vmul.f32 %v11324_v4, %v708_v57  ;;  %v1332_v57 = vlaneseq }
 0xeb4   :  { %v11637_v14 = vand.u32 127, %v1332_v57  ;;  %v11639_v60 = vshrl.u32 %v1332_v57, 7 }
 0xeb6   :  { %17313 = vst [vmem:[#allocation6_spill] sm:$0xff] %v11637_v14  ;;  %vm1334_vm3 = vcmp.eq.s32.totalorder %v11637_v14, 3  ;;  %v1343_v61 = vsub.s32 %v1340_v1, %v11639_v60  ;;  %v11644_v8 = vsub.s32 0, %v11639_v60 }
 0xeb7   :  { %v1335_v3 = vsel %vm1334_vm3, 0.0, %v11351_v63 }
 0xeb8   :  { %v1344_v5 = vrot.slane %v1335_v3, %v1343_v61  ;;  %v1337_v7 = vcombine.high %v1335_v3, %v1335_v3 }
 0xeba   :  { %v1352_v6 = vcombine.high %v1344_v5, %v1344_v5  ;;  %v1360_v9 = vrot.slane %v1344_v5, %v1343_v61 }
 0xebc   :  { %v1374_v10 = vrot.slane %v1352_v6, %v1343_v61 }
 0xf15   :  { %v804_v11 = vpop.permute.xlu1 %803 }
 0xf16   :  { %v806_v0 = vmul.f32 %v11324_v4, %v804_v11  ;;  %v1389_v11 = vrot.slane %v1360_v9, %v11644_v8 }
 0xf18   :  { %808 = vrot.lane.b32.xlu0 %v806_v0, %s11347_s20  ;;  %v1384_v0 = vcombine.high %v1374_v10, %v1374_v10 }
 0xf8a   :  { %v809_v13 = vpop.permute.xlu0 %808 }
 0xf8b   :  { %v811_v62 = vadd.f32 %v809_v13, %v801_v12  ;;  %v11650_v13 = vld [vmem:[%s17004_s9] sm:$0x1f] }
 0xf8d   :  { %11325 = vtanh.f32 %v811_v62 }
 0xf97   :  { %v11326_v15 = vpop.eup %11325 }
 0xf98   :  { %814 = vrot.lane.b32.xlu1 %v11326_v15, %s11347_s20  ;;  %v1401_v15 = vrot.slane %v1384_v0, %v11644_v8 }
0x100a   :  { %v815_v19 = vpop.permute.xlu1 %814 }
0x100b   :  { %v817_v20 = vmul.f32 %v11324_v4, %v815_v19  ;;  %v1351_v4 = vrot.slane %v1337_v7, %v1343_v61 }
0x100d   :  { %819 = vrot.lane.b32.xlu0 %v817_v20, %s11348_s2  ;;  %v1353_v12 = vcombine.high %v1351_v4, %v1351_v4 }
0x100f   :  { %v1381_v16 = vrot.slane %v1353_v12, %v1343_v61 }
0x1011   :  { %v1409_v19 = vrot.slane %v1381_v16, %v11644_v8 }
0x107f   :  { %v820_v21 = vpop.permute.xlu0 %819 }
0x1080   :  { %822 = vst.msk [vmem:[#allocation3 + $0x28] sm:$0xff] %vm200_vm2, %v820_v21  ;;  %11163 = vmatmul.mubr.msk.f32.vlgmr.msra.gmra.mrb[12].mxu0 %vm200_vm2, %v820_v21  ;;  %v11665_v21 = vadd.f32 %v1409_v19, %v11650_v13 }
0x1081   :  { %11263 = vmatpush3.bf16.msra.mxu0 %v11260_v18  ;;  %11180 = vmatprep.mubr.msk.f32.mxu0 %vm55_vm0, %v1029_v22  ;;  %v11659_v18 = vadd.f32 %v1401_v15, %v11650_v13 }
0x1083   :  { %v1444_v20 = vsel %vm1434_vm4, %v11659_v18, -inf }
0x1084   :  { %11181 = vmatmul.mubr.msk.f32.vlgmr.msra.gmra.mrb[14].mxu0 %vm55_vm0, %v11592_v23 }
0x1085   :  { %11183 = vmatprep.mubr.msk.f32.mxu0 %vm55_vm0, %v1031_v24 }
0x1087   :  { %v11602_v27 = vld [vmem:[#allocation3 + $0x28] sm:$0xff] }
0x1088   :  { %11184 = vmatmul.mubr.msk.f32.gmra.mrb[16].mxu0 %vm55_vm0, %v11597_v25 }
0x1089   :  { %11186 = vmatprep.mubr.msk.f32.mxu0 %vm55_vm0, %v1033_v26 }
0x108c   :  { %11187 = vmatmul.mubr.msk.f32.gmra.mrb[18].mxu0 %vm55_vm0, %v11602_v27 }
0x1153   :  { %v892_v29 = vpop.f32.mrb[12].mxu0 }
0x1154   :  { %v896_v30 = vadd.f32 %v892_v29, %v177_v28  ;;  %v11164_v31 = vpop.f32.mrb[13].mxu0 }
0x1156   :  { %11327 = vtanh.f32 %v896_v30  ;;  %v10982_v2 = vmul.f32 -1.442695, %v896_v30 }
0x1157   :  { %v11608_v32 = vpop.f32.mrb[14].mxu0 }
0x1158   :  { %v11610_v33 = vpop.f32.mrb[15].mxu0  ;;  %11329 = vpow2.f32 %v10982_v2  ;;  %v1175_v2 = vld [vmem:[%s17005_s7] sm:$0xff] }
0x115b   :  { %v11612_v34 = vpop.f32.mrb[16].mxu0 }
0x115c   :  { %v11614_v35 = vpop.f32.mrb[17].mxu0 }
0x115f   :  { %v11616_v36 = vpop.f32.mrb[18].mxu0 }
0x1160   :  { %v11328_v37 = vpop.eup %11327  ;;  %v11618_v38 = vpop.f32.mrb[19].mxu0 }
0x1161   :  { %906 = vrot.lane.b32.xlu1 %v11328_v37, %s11347_s20 }
0x1162   :  { %v11330_v39 = vpop.eup %11329 }
0x1163   :  { %v900_v40 = vadd.f32 1.0, %v11330_v39  ;;  %v1176_v39 = vld [vmem:[%s17005_s7 + $0x8] sm:$0xff] }
0x1165   :  { %11331 = vrcp.f32 %v900_v40  ;;  %v11264_v40 = vpack.c.bf16 %v1176_v39, %v1175_v2 }
0x1167   :  { %11265 = vmatprep.subr.bf16.mxu1 %v11264_v40 }
0x116f   :  { %v11332_v41 = vpop.eup %11331 }
0x1170   :  { %v904_v44 = vmul.f32 %v11332_v41, %v811_v62  ;;  %v11653_v62 = vadd.f32 %v1389_v11, %v11650_v13 }
0x1172   :  { %v1435_v17 = vsel %vm1434_vm4, %v11653_v62, -inf }
0x11d3   :  { %v907_v42 = vpop.permute.xlu1 %906 }
0x11d4   :  { %v909_v43 = vmul.f32 %v11332_v41, %v907_v42 }
0x11d6   :  { %911 = vrot.lane.b32.xlu0 %v909_v43, %s11347_s20 }
0x1248   :  { %v912_v45 = vpop.permute.xlu0 %911 }
0x1249   :  { %v11622_v46 = vadd.f32 %v912_v45, %v904_v44  ;;  %v1393_v45 = vrot.slane %v1374_v10, %v11644_v8 }
0x124b   :  { %11333 = vtanh.f32 %v11622_v46 }
0x1255   :  { %v11334_v47 = vpop.eup %11333 }
0x1256   :  { %917 = vrot.lane.b32.xlu1 %v11334_v47, %s11347_s20  ;;  %v1382_v47 = vcombine.high %v1360_v9, %v1360_v9 }
0x12c8   :  { %v918_v48 = vpop.permute.xlu1 %917 }
0x12c9   :  { %v920_v49 = vmul.f32 %v11332_v41, %v918_v48  ;;  %v1427_v48 = vadd.f32 %v1393_v45, %v11650_v13 }
0x12cb   :  { %922 = vrot.lane.b32.xlu0 %v920_v49, %s11348_s2  ;;  %v1397_v49 = vrot.slane %v1382_v47, %v11644_v8 }
0x133d   :  { %v923_v50 = vpop.permute.xlu0 %922 }
0x133e   :  { %925 = vst.msk [vmem:[#allocation3 + $0x30] sm:$0xff] %vm200_vm2, %v923_v50  ;;  %11174 = vmatmul.mubr.msk.f32.vlgmr.msra.gmra.mrb[8].mxu1 %vm200_vm2, %v923_v50  ;;  %v1367_v50 = vrot.slane %v1351_v4, %v1343_v61 }
0x133f   :  { %11267 = vmatpush3.bf16.msra.mxu1 %v11264_v40 }
0x1345   :  { %v1035_v51 = vld [vmem:[#allocation3 + $0x30] sm:$0xff] }
0x1346   :  { %11189 = vmatprep.mubr.msk.f32.mxu0 %vm55_vm0, %v1035_v51 }
0x1411   :  { %v995_v53 = vpop.f32.mrb[8].mxu1 }
0x1412   :  { %v999_v54 = vadd.f32 %v995_v53, %v182_v52  ;;  %v11175_v55 = vpop.f32.mrb[9].mxu1  ;;  %v1428_v52 = vadd.f32 %v1397_v49, %v11650_v13  ;;  %v1383_v53 = vcombine.high %v1367_v50, %v1367_v50 }
0x1414   :  { %11335 = vtanh.f32 %v999_v54  ;;  %v10984_v30 = vmul.f32 -1.442695, %v999_v54  ;;  %v1413_v54 = vrot.slane %v1383_v53, %v11644_v8 }
0x1416   :  { %11337 = vpow2.f32 %v10984_v30 }
0x141e   :  { %v11336_v56 = vpop.eup %11335 }
0x141f   :  { %1009 = vrot.lane.b32.xlu1 %v11336_v56, %s11347_s20  ;;  %v11703_v56 = vadd.f32 %v1413_v54, %v11650_v13 }
0x1420   :  { %v11338_v31 = vpop.eup %11337 }
0x1421   :  { %v1003_v37 = vadd.f32 1.0, %v11338_v31  ;;  %v1453_v57 = vsel %vm1434_vm4, %v11703_v56, -inf }
0x1423   :  { %1177 = vrot.lane.b32.xlu1 %v1029_v22, %s11349_s6  ;;  %v1450_v22 = vsel %vm1434_vm4, %v11665_v21, -inf  ;;  %11339 = vrcp.f32 %v1003_v37 }
0x1427   :  { %1181 = vrot.lane.b32.xlu1 %v1031_v24, %s11349_s6  ;;  %v1385_v24 = vcombine.high %v1381_v16, %v1381_v16 }
0x142b   :  { %1185 = vrot.lane.b32.xlu1 %v1033_v26, %s11349_s6  ;;  %v1417_v26 = vrot.slane %v1385_v24, %v11644_v8 }
0x142d   :  { %v11671_v28 = vadd.f32 %v1417_v26, %v11650_v13  ;;  %v11681_v41 = vpop.eup %11339 }
0x142e   :  { %v1007_v7 = vmul.f32 %v11681_v41, %v11622_v46 }
0x142f   :  { %1189 = vrot.lane.b32.xlu1 %v1035_v51, %s11349_s6  ;;  %v1456_v29 = vsel %vm1434_vm4, %v11671_v28, -inf  ;;  %v1438_v51 = vsel %vm1434_vm4, %v1427_v48, -inf }
0x1453   :  { %1436 = vmax.xlane.f32.xlu1 %v1435_v17 }
0x1457   :  { %1445 = vmax.xlane.f32.xlu1 %v1444_v20 }
0x145b   :  { %1451 = vmax.xlane.f32.xlu1 %v1450_v22 }
0x145f   :  { %1457 = vmax.xlane.f32.xlu1 %v1456_v29 }
0x1491   :  { %v1010_v42 = vpop.permute.xlu1 %1009 }
0x1492   :  { %v1012_v43 = vmul.f32 %v11681_v41, %v1010_v42 }
0x1494   :  { %1014 = vrot.lane.b32.xlu0 %v1012_v43, %s11347_s20 }
0x1495   :  { %v1178_v44 = vpop.permute.xlu1 %1177 }
0x1496   :  { %11196 = vmatprep.mubr.msk.f32.mxu1 %vm55_vm0, %v1178_v44 }
0x1498   :  { %1179 = vrot.lane.b32.xlu0 %v11592_v23, %s11349_s6  ;;  %v1405_v23 = vrot.slane %v1367_v50, %v11644_v8 }
0x1499   :  { %v1182_v58 = vpop.permute.xlu1 %1181 }
0x149c   :  { %1183 = vrot.lane.b32.xlu0 %v11597_v25, %s11349_s6  ;;  %v1441_v25 = vsel %vm1434_vm4, %v1428_v52, -inf }
0x149d   :  { %v1186_v59 = vpop.permute.xlu1 %1185 }
0x14a0   :  { %1187 = vrot.lane.b32.xlu0 %v11602_v27, %s11349_s6  ;;  %v1430_v27 = vadd.f32 %v1405_v23, %v11650_v13 }
0x14a1   :  { %v1190_v1 = vpop.permute.xlu1 %1189 }
0x14a2   :  { %v1447_v55 = vsel %vm1434_vm4, %v1430_v27, -inf }
0x14bf   :  { %1439 = vmax.xlane.f32.xlu0 %v1438_v51 }
0x14c3   :  { %1442 = vmax.xlane.f32.xlu0 %v1441_v25 }
0x14c7   :  { %1448 = vmax.xlane.f32.xlu0 %v1447_v55 }
0x14cb   :  { %1454 = vmax.xlane.f32.xlu0 %v1453_v57 }
0x14e0   :  { %v11707_v61 = vpop.xlane.xlu1 %1436 }
0x14e1   :  { %vm1459_vm5 = vcmp.eq.f32.partialorder %v11653_v62, %v11707_v61 }
0x14e2   :  { %v1467_v63 = vsel %vm1459_vm5, %v11637_v14, 5 }
0x14e3   :  { %v1475_v3 = vsel %vm1434_vm4, %v1467_v63, 2147483647 }
0x14e4   :  { %v1477_v5 = vshra.s32 %v1475_v3, 16  ;;  %v11722_v46 = vpop.xlane.xlu1 %1445  ;;  %v1476_v50 = vand.u32 65535, %v1475_v3  ;;  %v11814_v3 = vsub.s32 3, %v11639_v60 }
0x14e5   :  { %vm1462_vm6 = vcmp.eq.f32.partialorder %v11659_v18, %v11722_v46 }
0x14e6   :  { %v1479_v6 = vcvt.s32.f32 %v1477_v5  ;;  %v1470_v16 = vsel %vm1462_vm6, %v11637_v14, 5  ;;  %17314 = vst [vmem:[#allocation7_spill] sm:$0xff] %v11814_v3  ;;  %v1741_v5 = vrot.slane %v11650_v13, %v11814_v3 }
0x14e7   :  { %v11741_v18 = vsel %vm1434_vm4, %v1470_v16, 2147483647 }
0x14e8   :  { %1480 = vmin.xlane.f32.xlu0 %v1479_v6  ;;  %v11737_v22 = vpop.xlane.xlu1 %1451  ;;  %v1522_v37 = vshra.s32 %v11741_v18, 16 }
0x14e9   :  { %vm1464_vm9 = vcmp.eq.f32.partialorder %v11665_v21, %v11737_v22 }
0x14ea   :  { %v1472_v40 = vsel %vm1464_vm9, %v11637_v14, 5  ;;  %v11765_v21 = vcvt.s32.f32 %v1522_v37  ;;  %vm1631_vm9 = vcmask 1043459  }
0x14eb   :  { %v11769_v44 = vsel %vm1434_vm4, %v1472_v40, 2147483647 }
0x14ec   :  { %v1552_v47 = vshra.s32 %v11769_v44, 16  ;;  %v11784_v53 = vpop.xlane.xlu1 %1457 }
0x14ed   :  { %vm1466_vm13 = vcmp.eq.f32.partialorder %v11671_v28, %v11784_v53  ;;  %v11809_v28 = vsub.s32 1, %v11639_v60 }
0x14ef   :  { %v1727_v63 = vrot.slane %v11650_v13, %v11809_v28 }
0x1506   :  { %v1015_v9 = vpop.permute.xlu0 %1014 }
0x1507   :  { %v1017_v10 = vadd.f32 %v1015_v9, %v1007_v7 }
0x1509   :  { %11341 = vtanh.f32 %v1017_v10  ;;  %v11826_v10 = vld [vmem:[%s17006_s8] ss:$0 sm:$0xff] }
0x150a   :  { %v1180_v4 = vpop.permute.xlu0 %1179 }
0x150b   :  { %11197 = vmatmul.mubr.msk.f32.vlgmr.msra.gmra.mrb[10].mxu1 %vm55_vm0, %v1180_v4  ;;  %v1157_v4 = vadd.f32 %v11826_v10, %v11618_v38  ;;  %v1147_v38 = vadd.f32 %v11826_v10, %v11614_v35 }
0x150c   :  { %11199 = vmatprep.mubr.msk.f32.mxu1 %vm55_vm0, %v1182_v58  ;;  %v1474_v58 = vsel %vm1466_vm13, %v11637_v14, 5  ;;  %vm1639_vm13 = vcmask 1047559  }
0x150e   :  { %v1184_v11 = vpop.permute.xlu0 %1183 }
0x150f   :  { %11200 = vmatmul.mubr.msk.f32.gmra.mrb[12].mxu1 %vm55_vm0, %v1184_v11 }
0x1510   :  { %11202 = vmatprep.mubr.msk.f32.mxu1 %vm55_vm0, %v1186_v59  ;;  %v11799_v59 = vsel %vm1434_vm4, %v1474_v58, 2147483647 }
0x1512   :  { %v1188_v0 = vpop.permute.xlu0 %1187 }
0x1513   :  { %v11342_v12 = vpop.eup %11341  ;;  %11203 = vmatmul.mubr.msk.f32.gmra.mrb[14].mxu1 %vm55_vm0, %v1188_v0 }
0x1514   :  { %1020 = vrot.lane.b32.xlu1 %v11342_v12, %s11347_s20  ;;  %11205 = vmatprep.mubr.msk.f32.mxu1 %vm55_vm0, %v1190_v1  ;;  %v1582_v1 = vshra.s32 %v11799_v59, 16 }
0x154c   :  { %v11726_v62 = vpop.xlane.xlu0 %1439 }
0x154d   :  { %vm1460_vm7 = vcmp.eq.f32.partialorder %v1427_v48, %v11726_v62  ;;  %v11776_v48 = vcvt.s32.f32 %v1552_v47 }
0x154e   :  { %v1468_v15 = vsel %vm1460_vm7, %v11637_v14, 5 }
0x154f   :  { %v11732_v17 = vsel %vm1434_vm4, %v1468_v15, 2147483647  ;;  %v1162_v15 = vadd.f32 %v11616_v36, %v11826_v10  ;;  %v1521_v36 = vand.u32 65535, %v11741_v18 }
0x1550   :  { %v11734_v19 = vpop.xlane.xlu0 %1442  ;;  %v1492_v20 = vshra.s32 %v11732_v17, 16 }
0x1551   :  { %vm1461_vm8 = vcmp.eq.f32.partialorder %v1428_v52, %v11734_v19  ;;  %v1478_v52 = vcvt.s32.f32 %v1476_v50 }
0x1552   :  { %v11743_v24 = vcvt.s32.f32 %v1492_v20  ;;  %v1469_v26 = vsel %vm1461_vm8, %v11637_v14, 5  ;;  %vm1629_vm8 = vcmask 1042434  }
0x1553   :  { %v11747_v29 = vsel %vm1434_vm4, %v1469_v26, 2147483647 }
0x1554   :  { %1495 = vmin.xlane.f32.xlu0 %v11743_v24  ;;  %v11752_v30 = vpop.xlane.xlu0 %1448  ;;  %v1507_v31 = vshra.s32 %v11747_v29, 16  ;;  %v1506_v12 = vand.u32 65535, %v11747_v29 }
0x1555   :  { %vm1463_vm10 = vcmp.eq.f32.partialorder %v1430_v27, %v11752_v30 }
0x1556   :  { %v11757_v2 = vcvt.s32.f32 %v1507_v31  ;;  %v1471_v39 = vsel %vm1463_vm10, %v11637_v14, 5  ;;  %v1508_v29 = vcvt.s32.f32 %v1506_v12  ;;  %vm1633_vm10 = vcmask 1044484  }
0x1557   :  { %v11762_v42 = vsel %vm1434_vm4, %v1471_v39, 2147483647  ;;  %v1152_v39 = vadd.f32 %v11612_v34, %v11826_v10 }
0x1558   :  { %1510 = vmin.xlane.f32.xlu0 %v11757_v2  ;;  %v1537_v43 = vshra.s32 %v11762_v42, 16  ;;  %v11779_v49 = vpop.xlane.xlu0 %1454  ;;  %v1536_v18 = vand.u32 65535, %v11762_v42 }
0x1559   :  { %vm1465_vm12 = vcmp.eq.f32.partialorder %v11703_v56, %v11779_v49  ;;  %v11805_v56 = vcvt.s32.f32 %v1582_v1  ;;  %v11875_v1 = vsub.s32 5, %v11639_v60 }
0x155a   :  { %v11772_v45 = vcvt.s32.f32 %v1537_v43  ;;  %v1473_v54 = vsel %vm1465_vm12, %v11637_v14, 5  ;;  %vm1637_vm12 = vcmask 1046534  }
0x155b   :  { %v11794_v55 = vsel %vm1434_vm4, %v1473_v54, 2147483647  ;;  %17315 = vst [vmem:[#allocation8_spill] sm:$0xff] %v11875_v1 }
0x155c   :  { %1525 = vmin.xlane.f32.xlu0 %v11765_v21  ;;  %v1567_v57 = vshra.s32 %v11794_v55, 16 }
0x1560   :  { %1540 = vmin.xlane.f32.xlu0 %v11772_v45 }
0x1564   :  { %1555 = vmin.xlane.f32.xlu0 %v11776_v48 }
0x1575   :  { %v11781_v51 = vpop.xlane.xlu0 %1480 }
0x1576   :  { %vm1482_vm11 = vcmp.eq.f32.partialorder %v1479_v6, %v11781_v51  ;;  %v1491_v6 = vand.u32 65535, %v11732_v17 }
0x1577   :  { %v1483_v23 = vsel %vm1482_vm11, %v1478_v52, inf  ;;  %v1523_v52 = vcvt.s32.f32 %v1521_v36  ;;  %vm1635_vm11 = vcmask 1045509  }
0x1578   :  { %1484 = vmin.xlane.f32.xlu1 %v1483_v23  ;;  %v1493_v0 = vcvt.s32.f32 %v1491_v6  ;;  %v1538_v23 = vcvt.s32.f32 %v1536_v18  ;;  %v1720_v18 = vrot.slane %v11650_v13, %v11644_v8 }
0x1586   :  { %v1021_v25 = vpop.permute.xlu1 %1020 }
0x1587   :  { %v1023_v27 = vmul.f32 %v11681_v41, %v1021_v25  ;;  %v11801_v41 = vcvt.s32.f32 %v1567_v57  ;;  %v1551_v25 = vand.u32 65535, %v11769_v44 }
0x1589   :  { %1025 = vrot.lane.b32.xlu0 %v1023_v27, %s11348_s2  ;;  %v1553_v42 = vcvt.s32.f32 %v1551_v25 }
0x15a8   :  { %1570 = vmin.xlane.f32.xlu0 %v11801_v41 }
0x15ac   :  { %1585 = vmin.xlane.f32.xlu0 %v11805_v56 }
0x15c2   :  { %1729 = vbcast.lane.b32.xlu0 %v1727_v63, 256 }
0x15c6   :  { %1743 = vbcast.lane.b32.xlu0 %v1741_v5, 256  ;;  %v11880_v5 = vsub.s32 7, %v11639_v60 }
0x15c8   :  { %17316 = vst [vmem:[#allocation9_spill] sm:$0xff] %v11880_v5 }
0x15de   :  { %v11819_v7 = vpop.f32.mrb[10].mxu1 }
0x15df   :  { %v11821_v9 = vpop.f32.mrb[11].mxu1 }
0x15e1   :  { %v11830_v11 = vpop.xlane.xlu0 %1495 }
0x15e2   :  { %v11201_v16 = vpop.f32.mrb[12].mxu1  ;;  %vm1497_vm15 = vcmp.eq.f32.partialorder %v11743_v24, %v11830_v11 }
0x15e3   :  { %v1323_v17 = vadd.f32 %v11201_v16, %v1157_v4  ;;  %v1285_v20 = vpop.f32.mrb[13].mxu1  ;;  %v1498_v26 = vsel %vm1497_vm15, %v1493_v0, inf }
0x15e4   :  { %v1325_v31 = vadd.f32 %v1285_v20, %v1162_v15  ;;  %1499 = vmin.xlane.f32.xlu1 %v1498_v26 }
0x15e5   :  { %1324 = vst.msk [vmem:[#allocation4 + $0x20] sm:$0xff] %vm1315_vm14, %v1323_v17  ;;  %v11840_v37 = vpop.xlane.xlu0 %1510 }
0x15e6   :  { %1326 = vst.msk [vmem:[#allocation4 + $0x28] sm:$0xff] %vm1315_vm14, %v1325_v31  ;;  %v11204_v24 = vpop.f32.mrb[14].mxu1  ;;  %vm1512_vm1 = vcmp.eq.f32.partialorder %v11757_v2, %v11840_v37  ;;  %v1566_v31 = vand.u32 65535, %v11794_v55 }
0x15e7   :  { %v1319_v40 = vadd.f32 %v11204_v24, %v1147_v38  ;;  %v1295_v43 = vpop.f32.mrb[15].mxu1  ;;  %v1513_v47 = vsel %vm1512_vm1, %v1508_v29, inf }
0x15e8   :  { %v1321_v35 = vadd.f32 %v1295_v43, %v1152_v39  ;;  %1514 = vmin.xlane.f32.xlu1 %v1513_v47  ;;  %v1568_v36 = vcvt.s32.f32 %v1566_v31  ;;  %v1581_v39 = vand.u32 65535, %v11799_v59 }
0x15e9   :  { %1320 = vst.msk [vmem:[#allocation4 + $0x10] sm:$0xff] %vm1315_vm14, %v1319_v40  ;;  %v11849_v50 = vpop.xlane.xlu0 %1525 }
0x15ea   :  { %1322 = vst.msk [vmem:[#allocation4 + $0x18] sm:$0xff] %vm1315_vm14, %v1321_v35  ;;  %vm1527_vm3 = vcmp.eq.f32.partialorder %v11765_v21, %v11849_v50  ;;  %v1583_v47 = vcvt.s32.f32 %v1581_v39 }
0x15eb   :  { %v1528_v34 = vsel %vm1527_vm3, %v1523_v52, inf }
0x15ec   :  { %1529 = vmin.xlane.f32.xlu1 %v1528_v34  ;;  %v11894_v17 = vld [vmem:[#allocation4 + $0x20] sm:$0xff]  ;;  %v11920_v34 = vsub.s32 2, %v11639_v60 }
0x15ed   :  { %v11855_v2 = vpop.xlane.xlu0 %1540  ;;  %v6723_v20 = vrot.slane %v11894_v17, %v11644_v8  ;;  %v6744_v26 = vrot.slane %v11894_v17, %v11814_v3  ;;  %v6758_v38 = vrot.slane %v11894_v17, %v11875_v1  ;;  %v6772_v24 = vrot.slane %v11894_v17, %v11880_v5  ;;  %v7976_v43 = vld [vmem:[#allocation4 + $0x28] sm:$0xff] }
0x15ee   :  { %vm1542_vm5 = vcmp.eq.f32.partialorder %v11772_v45, %v11855_v2  ;;  %v7981_v35 = vrot.slane %v7976_v43, %v11644_v8  ;;  %v8002_v59 = vrot.slane %v7976_v43, %v11814_v3 }
0x15ef   :  { %v1543_v27 = vsel %vm1542_vm5, %v1538_v23, inf  ;;  %v11925_v23 = vsub.s32 4, %v11639_v60 }
0x15f0   :  { %1544 = vmin.xlane.f32.xlu1 %v1543_v27  ;;  %v11867_v44 = vld [vmem:[#allocation4 + $0x10] sm:$0xff] }
0x15f1   :  { %v11860_v54 = vpop.xlane.xlu0 %1555  ;;  %v4214_v45 = vrot.slane %v11867_v44, %v11809_v28  ;;  %v4242_v63 = vrot.slane %v11867_v44, %v11875_v1  ;;  %v4256_v6 = vrot.slane %v11867_v44, %v11880_v5  ;;  %v11884_v4 = vld [vmem:[#allocation4 + $0x18] sm:$0xff]  ;;  %v11929_v25 = vrot.slane %v11650_v13, %v11925_v23 }
0x15f2   :  { %vm1557_vm6 = vcmp.eq.f32.partialorder %v11776_v48, %v11860_v54  ;;  %v4228_v48 = vrot.slane %v11867_v44, %v11814_v3  ;;  %v5465_v0 = vrot.slane %v11884_v4, %v11644_v8  ;;  %v5486_v12 = vrot.slane %v11884_v4, %v11814_v3 }
0x15f3   :  { %v1558_v57 = vsel %vm1557_vm6, %v1553_v42, inf  ;;  %v5500_v15 = vrot.slane %v11884_v4, %v11875_v1  ;;  %v5514_v16 = vrot.slane %v11884_v4, %v11880_v5  ;;  %17317 = vst [vmem:[#allocation10_spill] sm:$0xff] %v11929_v25  ;;  %v4207_v27 = vrot.slane %v11867_v44, %v11644_v8 }
0x15f4   :  { %1559 = vmin.xlane.f32.xlu1 %v1558_v57  ;;  %v4221_v42 = vrot.slane %v11867_v44, %v11920_v34  ;;  %v4235_v57 = vrot.slane %v11867_v44, %v11925_v23  ;;  %v8009_v31 = vrot.slane %v7976_v43, %v11925_v23 }
0x15fb   :  { %v1026_v21 = vpop.permute.xlu0 %1025 }
0x15fc   :  { %1028 = vst.msk [vmem:[#allocation3 + $0x38] sm:$0xff] %vm200_vm2, %v1026_v21  ;;  %v11939_v21 = vsub.s32 6, %v11639_v60 }
0x15fe   :  { %17318 = vst [vmem:[#allocation11_spill] sm:$0xff] %v11939_v21 }
0x1603   :  { %v1036_v58 = vld [vmem:[#allocation3 + $0x38] sm:$0xff] }
0x1604   :  { %1191 = vrot.lane.b32.xlu0 %v1036_v58, %s11349_s6  ;;  %11190 = vmatmul.mubr.msk.f32.gmra.mrb[20].mxu0 %vm55_vm0, %v1036_v58  ;;  %v5472_v58 = vrot.slane %v11884_v4, %v11809_v28 }
0x1608   :  { %2430 = vbcast.lane.b32.xlu0 %v11637_v14, 256 }
0x160c   :  { %4216 = vbcast.lane.b32.xlu0 %v4214_v45, 256 }
0x1610   :  { %4230 = vbcast.lane.b32.xlu0 %v4228_v48, 256  ;;  %v5479_v48 = vrot.slane %v11884_v4, %v11920_v34 }
0x1614   :  { %4244 = vbcast.lane.b32.xlu0 %v4242_v63, 256  ;;  %v5493_v63 = vrot.slane %v11884_v4, %v11925_v23 }
0x1618   :  { %4258 = vbcast.lane.b32.xlu0 %v4256_v6, 256 }
0x161c   :  { %5467 = vbcast.lane.b32.xlu0 %v5465_v0, 256 }
0x1620   :  { %5488 = vbcast.lane.b32.xlu0 %v5486_v12, 256  ;;  %v6730_v12 = vrot.slane %v11894_v17, %v11809_v28 }
0x1624   :  { %5502 = vbcast.lane.b32.xlu0 %v5500_v15, 256  ;;  %v6737_v15 = vrot.slane %v11894_v17, %v11920_v34 }
0x1628   :  { %5516 = vbcast.lane.b32.xlu0 %v5514_v16, 256  ;;  %v6751_v16 = vrot.slane %v11894_v17, %v11925_v23 }
0x162c   :  { %6725 = vbcast.lane.b32.xlu0 %v6723_v20, 256  ;;  %v6765_v20 = vrot.slane %v11894_v17, %v11939_v21  ;;  %v1502_v17 = vcvt.f32.s32 %v11830_v11 }
0x1630   :  { %6746 = vbcast.lane.b32.xlu0 %v6744_v26, 256  ;;  %v7995_v26 = vrot.slane %v7976_v43, %v11920_v34 }
0x1634   :  { %6760 = vbcast.lane.b32.xlu0 %v6758_v38, 256  ;;  %v8023_v38 = vrot.slane %v7976_v43, %v11939_v21 }
0x1635   :  { %v11903_v29 = vpop.xlane.xlu0 %1570 }
0x1636   :  { %vm1572_vm2 = vcmp.eq.f32.partialorder %v11801_v41, %v11903_v29  ;;  %v8016_v41 = vrot.slane %v7976_v43, %v11875_v1 }
0x1637   :  { %v1573_v40 = vsel %vm1572_vm2, %v1568_v36, inf  ;;  %v1485_v36 = vpop.xlane.xlu1 %1484 }
0x1638   :  { %1574 = vmin.xlane.f32.xlu1 %v1573_v40  ;;  %6774 = vbcast.lane.b32.xlu0 %v6772_v24, 256 }
0x1639   :  { %v11910_v55 = vpop.xlane.xlu0 %1585 }
0x163a   :  { %vm1587_vm7 = vcmp.eq.f32.partialorder %v11805_v56, %v11910_v55  ;;  %v1734_v56 = vrot.slane %v11650_v13, %v11920_v34  ;;  %v4249_v13 = vrot.slane %v11867_v44, %v11939_v21  ;;  %v5507_v44 = vrot.slane %v11884_v4, %v11939_v21 }
0x163b   :  { %v1588_v52 = vsel %vm1587_vm7, %v1583_v47, inf  ;;  %v7988_v4 = vrot.slane %v7976_v43, %v11809_v28  ;;  %v1503_v43 = vshll.u32 %v1502_v17, 16 }
0x163c   :  { %1589 = vmin.xlane.f32.xlu1 %v1588_v52  ;;  %7983 = vbcast.lane.b32.xlu0 %v7981_v35, 256  ;;  %v1517_v35 = vcvt.f32.s32 %v11840_v37  ;;  %v1487_v52 = vcvt.f32.s32 %v11781_v51 }
0x163d   :  { %v11945_v45 = vpop.permute.xlu0 %1729 }
0x163e   :  { %17319 = vst [vmem:[#allocation12_spill] sm:$0xff] %v11945_v45 }
0x1640   :  { %8004 = vbcast.lane.b32.xlu0 %v8002_v59, 256  ;;  %v1532_v59 = vcvt.f32.s32 %v11849_v50 }
0x1641   :  { %v11951_v6 = vpop.permute.xlu0 %1743 }
0x1642   :  { %17320 = vst [vmem:[#allocation13_spill] sm:$0xff] %v11951_v6  ;;  %v1533_v37 = vshll.u32 %v1532_v59, 16 }
0x1644   :  { %8018 = vbcast.lane.b32.xlu0 %v8016_v41, 256 }
0x164d   :  { %1722 = vbcast.lane.b32.xlu1 %v1720_v18, 256  ;;  %v1547_v18 = vcvt.f32.s32 %v11855_v2  ;;  %v11977_v2 = vsub.s32 %v11637_v14, %v11639_v60 }
0x1651   :  { %1736 = vbcast.lane.b32.xlu1 %v1734_v56, 256 }
0x1655   :  { %1750 = vbcast.lane.b32.xlu1 %v11929_v25, 256 }
0x1659   :  { %4209 = vbcast.lane.b32.xlu1 %v4207_v27, 256 }
0x165d   :  { %4223 = vbcast.lane.b32.xlu1 %v4221_v42, 256  ;;  %v1562_v42 = vcvt.f32.s32 %v11860_v54 }
0x1661   :  { %4237 = vbcast.lane.b32.xlu1 %v4235_v57, 256  ;;  %v1486_v57 = vcvt.f32.s32 %v1485_v36 }
0x1665   :  { %4251 = vbcast.lane.b32.xlu1 %v4249_v13, 256 }
0x1669   :  { %5474 = vbcast.lane.b32.xlu1 %v5472_v58, 256  ;;  %v1518_v58 = vshll.u32 %v1517_v35, 16 }
0x166d   :  { %5481 = vbcast.lane.b32.xlu1 %v5479_v48, 256  ;;  %v1577_v48 = vcvt.f32.s32 %v11903_v29 }
0x166f   :  { %v1578_v54 = vshll.u32 %v1577_v48, 16 }
0x1671   :  { %5495 = vbcast.lane.b32.xlu1 %v5493_v63, 256  ;;  %v1500_v39 = vpop.xlane.xlu1 %1499  ;;  %v1488_v63 = vshll.u32 %v1487_v52, 16 }
0x1672   :  { %v1501_v41 = vcvt.f32.s32 %v1500_v39 }
0x1675   :  { %5509 = vbcast.lane.b32.xlu1 %v5507_v44, 256  ;;  %v1515_v24 = vpop.xlane.xlu1 %1514  ;;  %v1504_v44 = vadd.s32 %v1503_v43, %v1501_v41 }
0x1676   :  { %v1192_v0 = vpop.permute.xlu0 %1191  ;;  %v1516_v56 = vcvt.f32.s32 %v1515_v24 }
0x1677   :  { %11206 = vmatmul.mubr.msk.f32.gmra.mrb[16].mxu1 %vm55_vm0, %v1192_v0  ;;  %v1548_v0 = vshll.u32 %v1547_v18, 16  ;;  %v1602_v29 = vrot.slane %v1504_v44, %v11977_v2  ;;  %vm1627_vm0 = vcmask 1041409  }
0x1678   :  { %v1519_v50 = vadd.s32 %v1518_v58, %v1516_v56 }
0x1679   :  { %6732 = vbcast.lane.b32.xlu1 %v6730_v12, 256  ;;  %v1530_v40 = vpop.xlane.xlu1 %1529  ;;  %v1563_v12 = vshll.u32 %v1562_v42, 16 }
0x167a   :  { %v1531_v13 = vcvt.f32.s32 %v1530_v40  ;;  %v1606_v36 = vrot.slane %v1519_v50, %v11977_v2 }
0x167d   :  { %6739 = vbcast.lane.b32.xlu1 %v6737_v15, 256  ;;  %v1545_v47 = vpop.xlane.xlu1 %1544  ;;  %v1489_v15 = vadd.s32 %v1488_v63, %v1486_v57 }
0x167e   :  { %v1546_v11 = vcvt.f32.s32 %v1545_v47 }
0x167f   :  { %v1598_v39 = vrot.slane %v1489_v15, %v11977_v2 }
0x1681   :  { %6753 = vbcast.lane.b32.xlu1 %v6751_v16, 256  ;;  %v1560_v27 = vpop.xlane.xlu1 %1559  ;;  %v1534_v16 = vadd.s32 %v1533_v37, %v1531_v13 }
0x1682   :  { %v1561_v51 = vcvt.f32.s32 %v1560_v27 }
0x1683   :  { %v1610_v60 = vrot.slane %v1534_v16, %v11977_v2  ;;  %v11352_v16 = vmov 0  }
0x1684   :  { %11278 = vset.pattern.permute.xlu1 %v11352_v16  ;;  %11277 = vset.pattern.permute.xlu0 %v11352_v16 }
0x1685   :  { %6767 = vbcast.lane.b32.xlu1 %v6765_v20, 256  ;;  %v1549_v20 = vadd.s32 %v1548_v0, %v1546_v11  ;;  %v1142_v0 = vadd.f32 %v11608_v32, %v11826_v10 }
0x1687   :  { %v1614_v40 = vrot.slane %v1549_v20, %v11977_v2 }
0x1689   :  { %7990 = vbcast.lane.b32.xlu1 %v7988_v4, 256 }
0x168d   :  { %7997 = vbcast.lane.b32.xlu1 %v7995_v26, 256  ;;  %v1592_v26 = vcvt.f32.s32 %v11910_v55  ;;  %v1628_v55 = vsel %vm1627_vm0, %v1602_v29, %v1598_v39 }
0x168e   :  { %v1630_v59 = vsel %vm1629_vm8, %v1606_v36, %v1628_v55 }
0x168f   :  { %v1593_v17 = vshll.u32 %v1592_v26, 16  ;;  %v1632_v18 = vsel %vm1631_vm9, %v1610_v60, %v1630_v59 }
0x1690   :  { %v1634_v27 = vsel %vm1633_vm10, %v1614_v40, %v1632_v18 }
0x1691   :  { %8011 = vbcast.lane.b32.xlu1 %v8009_v31, 256  ;;  %v1564_v31 = vadd.s32 %v1563_v12, %v1561_v51  ;;  %v1137_v51 = vadd.f32 %v11826_v10, %v11610_v33 }
0x1693   :  { %v1618_v35 = vrot.slane %v1564_v31, %v11977_v2 }
0x1695   :  { %8025 = vbcast.lane.b32.xlu1 %v8023_v38, 256  ;;  %v1636_v43 = vsel %vm1635_vm11, %v1618_v35, %v1634_v27 }
0x16c5   :  { %v1575_v4 = vpop.xlane.xlu1 %1574 }
0x16c6   :  { %v1576_v38 = vcvt.f32.s32 %v1575_v4 }
0x16c8   :  { %v1579_v24 = vadd.s32 %v1578_v54, %v1576_v38 }
0x16c9   :  { %v1590_v47 = vpop.xlane.xlu1 %1589 }
0x16ca   :  { %v1591_v52 = vcvt.f32.s32 %v1590_v47  ;;  %v1622_v41 = vrot.slane %v1579_v24, %v11977_v2 }
0x16cc   :  { %v1594_v56 = vadd.s32 %v1593_v17, %v1591_v52  ;;  %v1638_v57 = vsel %vm1637_vm12, %v1622_v41, %v1636_v43  ;;  %v12026_v17 = vpop.permute.xlu0 %2430 }
0x16ce   :  { %v1626_v42 = vrot.slane %v1594_v56, %v11977_v2 }
0x16d0   :  { %v1640_v13 = vsel %vm1639_vm13, %v1626_v42, %v1638_v57  ;;  %v12032_v59 = vpop.permute.xlu0 %4216 }
0x16d1   :  { %1641 = vst.msk [vmem:[#allocation5] sm:$0xff] %vm1315_vm14, %v1640_v13  ;;  %17325 = vst [vmem:[#allocation18_spill] sm:$0xff] %v12032_v59 }
0x16d4   :  { %v12038_v27 = vpop.permute.xlu0 %4230 }
0x16d5   :  { %17327 = vst [vmem:[#allocation20_spill] sm:$0xff] %v12038_v27 }
0x16d7   :  { %v11191_v58 = vpop.f32.mrb[20].mxu0 }
0x16d8   :  { %v1172_v48 = vadd.f32 %v11191_v58, %v11826_v10  ;;  %v1166_v11 = vpop.f32.mrb[21].mxu0  ;;  %v12042_v42 = vpop.permute.xlu0 %4244 }
0x16d9   :  { %v1167_v63 = vadd.f32 %v11826_v10, %v1166_v11  ;;  %v12012_v10 = vpop.permute.xlu1 %1722  ;;  %17329 = vst [vmem:[#allocation22_spill] sm:$0xff] %v12042_v42 }
0x16da   :  { %v1329_v37 = vadd.f32 %v11821_v9, %v1172_v48  ;;  %17321 = vst [vmem:[#allocation14_spill] sm:$0xff] %v12012_v10 }
0x16db   :  { %v1327_v44 = vadd.f32 %v11819_v7, %v1167_v63 }
0x16dc   :  { %1330 = vst.msk [vmem:[#allocation4 + $0x38] sm:$0xff] %vm1315_vm14, %v1329_v37  ;;  %v12046_v13 = vpop.permute.xlu0 %4258 }
0x16dd   :  { %1328 = vst.msk [vmem:[#allocation4 + $0x30] sm:$0xff] %vm1315_vm14, %v1327_v44  ;;  %v12018_v36 = vpop.permute.xlu1 %1736  ;;  %17331 = vst [vmem:[#allocation24_spill] sm:$0xff] %v12046_v13 }
0x16de   :  { %17322 = vst [vmem:[#allocation15_spill] sm:$0xff] %v12018_v36 }
0x16e0   :  { %v12050_v48 = vpop.permute.xlu0 %5467 }
0x16e1   :  { %v12022_v24 = vpop.permute.xlu1 %1750  ;;  %17333 = vst [vmem:[#allocation26_spill] sm:$0xff] %v12050_v48 }
0x16e2   :  { %17323 = vst [vmem:[#allocation16_spill] sm:$0xff] %v12022_v24 }
0x16e4   :  { %v12054_v63 = vpop.permute.xlu0 %5488 }
0x16e5   :  { %v12030_v52 = vpop.permute.xlu1 %4209  ;;  %17335 = vst [vmem:[#allocation28_spill] sm:$0xff] %v12054_v63 }
0x16e6   :  { %17324 = vst [vmem:[#allocation17_spill] sm:$0xff] %v12030_v52 }
0x16e8   :  { %v12058_v44 = vpop.permute.xlu0 %5502 }
0x16e9   :  { %v12035_v18 = vpop.permute.xlu1 %4223  ;;  %17337 = vst [vmem:[#allocation30_spill] sm:$0xff] %v12058_v44 }
0x16ea   :  { %17326 = vst [vmem:[#allocation19_spill] sm:$0xff] %v12035_v18 }
0x16ed   :  { %v12040_v43 = vpop.permute.xlu1 %4237 }
0x16ee   :  { %17328 = vst [vmem:[#allocation21_spill] sm:$0xff] %v12040_v43 }
0x16f1   :  { %v12044_v57 = vpop.permute.xlu1 %4251 }
0x16f2   :  { %17330 = vst [vmem:[#allocation23_spill] sm:$0xff] %v12044_v57 }
0x16f5   :  { %v12048_v58 = vpop.permute.xlu1 %5474 }
0x16f6   :  { %17332 = vst [vmem:[#allocation25_spill] sm:$0xff] %v12048_v58 }
0x16f9   :  { %v12052_v11 = vpop.permute.xlu1 %5481 }
0x16fa   :  { %17334 = vst [vmem:[#allocation27_spill] sm:$0xff] %v12052_v11 }
0x16fd   :  { %v12056_v37 = vpop.permute.xlu1 %5495 }
0x16fe   :  { %17336 = vst [vmem:[#allocation29_spill] sm:$0xff] %v12056_v37 }
0x174a   :  { %v11207_v50 = vpop.f32.mrb[16].mxu1 }
0x174b   :  { %v1314_v12 = vadd.f32 %v11207_v50, %v1137_v51  ;;  %v1305_v15 = vpop.f32.mrb[17].mxu1  ;;  %v12060_v51 = vpop.permute.xlu1 %5509 }
0x174c   :  { %v1317_v54 = vadd.f32 %v1305_v15, %v1142_v0  ;;  %17338 = vst [vmem:[#allocation31_spill] sm:$0xff] %v12060_v51  ;;  %v12062_v0 = vpop.permute.xlu0 %5516 }
0x174d   :  { %1316 = vst.msk [vmem:[#allocation4] sm:$0xff] %vm1315_vm14, %v1314_v12  ;;  %17339 = vst [vmem:[#allocation32_spill] sm:$0xff] %v12062_v0 }
0x174e   :  { %1318 = vst.msk [vmem:[#allocation4 + $0x8] sm:$0xff] %vm1315_vm14, %v1317_v54 }
0x174f   :  { %v12064_v50 = vpop.permute.xlu1 %6732 }
0x1750   :  { %17340 = vst [vmem:[#allocation33_spill] sm:$0xff] %v12064_v50  ;;  %v12066_v12 = vpop.permute.xlu0 %6725 }
0x1751   :  { %17341 = vst [vmem:[#allocation34_spill] sm:$0xff] %v12066_v12 }
0x1753   :  { %v12068_v15 = vpop.permute.xlu1 %6739 }
0x1754   :  { %v1642_v7 = vld [vmem:[#allocation4] sm:$0xff]  ;;  %17342 = vst [vmem:[#allocation35_spill] sm:$0xff] %v12068_v15  ;;  %v12070_v16 = vpop.permute.xlu0 %6746 }
0x1755   :  { %v1654_v9 = vrot.slane %v1642_v7, %v11809_v28  ;;  %v1647_v20 = vrot.slane %v1642_v7, %v11644_v8  ;;  %v1661_v32 = vrot.slane %v1642_v7, %v11920_v34  ;;  %v1668_v33 = vrot.slane %v1642_v7, %v11814_v3  ;;  %v2944_v38 = vld [vmem:[#allocation4 + $0x8] sm:$0xff]  ;;  %17343 = vst [vmem:[#allocation36_spill] sm:$0xff] %v12070_v16 }
0x1756   :  { %v1675_v4 = vrot.slane %v1642_v7, %v11925_v23  ;;  %v1682_v26 = vrot.slane %v1642_v7, %v11875_v1  ;;  %v1689_v29 = vrot.slane %v1642_v7, %v11939_v21  ;;  %v1696_v31 = vrot.slane %v1642_v7, %v11880_v5 }
0x1757   :  { %1656 = vbcast.lane.b32.xlu1 %v1654_v9, 256  ;;  %1649 = vbcast.lane.b32.xlu0 %v1647_v20, 256  ;;  %v2949_v39 = vrot.slane %v2944_v38, %v11644_v8  ;;  %v2956_v60 = vrot.slane %v2944_v38, %v11809_v28  ;;  %v2963_v40 = vrot.slane %v2944_v38, %v11920_v34  ;;  %v12072_v54 = vpop.permute.xlu1 %6753 }
0x1758   :  { %v2977_v47 = vrot.slane %v2944_v38, %v11925_v23  ;;  %v2970_v55 = vrot.slane %v2944_v38, %v11814_v3  ;;  %v2991_v35 = vrot.slane %v2944_v38, %v11939_v21  ;;  %v2984_v41 = vrot.slane %v2944_v38, %v11875_v1  ;;  %17344 = vst [vmem:[#allocation37_spill] sm:$0xff] %v12072_v54  ;;  %v12074_v7 = vpop.permute.xlu0 %6760 }
0x1759   :  { %v2998_v56 = vrot.slane %v2944_v38, %v11880_v5  ;;  %17345 = vst [vmem:[#allocation38_spill] sm:$0xff] %v12074_v7 }
0x175b   :  { %1663 = vbcast.lane.b32.xlu1 %v1661_v32, 256  ;;  %1670 = vbcast.lane.b32.xlu0 %v1668_v33, 256  ;;  %v12076_v9 = vpop.permute.xlu1 %6767 }
0x175c   :  { %17346 = vst [vmem:[#allocation39_spill] sm:$0xff] %v12076_v9  ;;  %v12078_v20 = vpop.permute.xlu0 %6774 }
0x175d   :  { %17347 = vst [vmem:[#allocation40_spill] sm:$0xff] %v12078_v20 }
0x175f   :  { %1677 = vbcast.lane.b32.xlu1 %v1675_v4, 256  ;;  %1684 = vbcast.lane.b32.xlu0 %v1682_v26, 256  ;;  %v12080_v32 = vpop.permute.xlu1 %7990 }
0x1760   :  { %17348 = vst [vmem:[#allocation41_spill] sm:$0xff] %v12080_v32  ;;  %v12082_v33 = vpop.permute.xlu0 %7983 }
0x1761   :  { %17349 = vst [vmem:[#allocation42_spill] sm:$0xff] %v12082_v33 }
0x1763   :  { %1691 = vbcast.lane.b32.xlu1 %v1689_v29, 256  ;;  %1698 = vbcast.lane.b32.xlu0 %v1696_v31, 256  ;;  %v12084_v4 = vpop.permute.xlu1 %7997 }
0x1764   :  { %17350 = vst [vmem:[#allocation43_spill] sm:$0xff] %v12084_v4  ;;  %v12086_v26 = vpop.permute.xlu0 %8004 }
0x1765   :  { %17351 = vst [vmem:[#allocation44_spill] sm:$0xff] %v12086_v26 }
0x1767   :  { %2951 = vbcast.lane.b32.xlu1 %v2949_v39, 256  ;;  %2958 = vbcast.lane.b32.xlu0 %v2956_v60, 256  ;;  %v12088_v29 = vpop.permute.xlu1 %8011 }
0x1768   :  { %17352 = vst [vmem:[#allocation45_spill] sm:$0xff] %v12088_v29  ;;  %v12090_v31 = vpop.permute.xlu0 %8018 }
0x1769   :  { %17353 = vst [vmem:[#allocation46_spill] sm:$0xff] %v12090_v31 }
0x176b   :  { %2965 = vbcast.lane.b32.xlu1 %v2963_v40, 256  ;;  %2979 = vbcast.lane.b32.xlu0 %v2977_v47, 256  ;;  %v12092_v38 = vpop.permute.xlu1 %8025 }
0x176c   :  { %17354 = vst [vmem:[#allocation47_spill] sm:$0xff] %v12092_v38 }
0x176f   :  { %2972 = vbcast.lane.b32.xlu1 %v2970_v55, 256  ;;  %2993 = vbcast.lane.b32.xlu0 %v2991_v35, 256 }
0x1773   :  { %2986 = vbcast.lane.b32.xlu1 %v2984_v41, 256 }
0x1777   :  { %3000 = vbcast.lane.b32.xlu1 %v2998_v56, 256 }
0x17c9   :  { %v1650_v39 = vpop.permute.xlu0 %1649  ;;  %v1657_v55 = vpop.permute.xlu1 %1656 }
0x17ca   :  { %v1708_v60 = vadd.f32 %v1650_v39, %v11707_v61  ;;  %v1709_v35 = vadd.f32 %v1657_v55, %v11726_v62 }
0x17cc   :  { %v12096_v40 = vadd.f32 %v11945_v45, %v1708_v60  ;;  %v12099_v47 = vadd.f32 %v12012_v10, %v1708_v60  ;;  %v12105_v41 = vadd.f32 %v12018_v36, %v1708_v60  ;;  %v12108_v56 = vadd.f32 %v11951_v6, %v1708_v60 }
0x17cd   :  { %v12113_v61 = vadd.f32 %v12022_v24, %v1708_v60  ;;  %v12116_v39 = vadd.f32 %v12012_v10, %v1709_v35  ;;  %v12121_v62 = vadd.f32 %v11945_v45, %v1709_v35  ;;  %v12124_v55 = vadd.f32 %v12018_v36, %v1709_v35  ;;  %v1664_v14 = vpop.permute.xlu1 %1663  ;;  %v1671_v31 = vpop.permute.xlu0 %1670 }
0x17ce   :  { %1841 = vperm.xlu1 %11278, %v12096_v40   ;;  %1838 = vperm.xlu0 %11277, %v12099_v47   ;;  %v1710_v60 = vadd.f32 %v1664_v14, %v11734_v19  ;;  %v12130_v25 = vadd.f32 %v11951_v6, %v1709_v35  ;;  %v12133_v1 = vadd.f32 %v12022_v24, %v1709_v35 }
0x17cf   :  { %v1711_v14 = vadd.f32 %v1671_v31, %v11722_v46 }
0x17d0   :  { %v12138_v21 = vadd.f32 %v12012_v10, %v1710_v60  ;;  %v12141_v38 = vadd.f32 %v11945_v45, %v1710_v60  ;;  %v12147_v19 = vadd.f32 %v12018_v36, %v1710_v60  ;;  %v12150_v35 = vadd.f32 %v11951_v6, %v1710_v60 }
0x17d1   :  { %v12155_v29 = vadd.f32 %v12022_v24, %v1710_v60  ;;  %v12158_v26 = vadd.f32 %v12012_v10, %v1711_v14  ;;  %v12163_v46 = vadd.f32 %v11945_v45, %v1711_v14  ;;  %v12166_v31 = vadd.f32 %v12018_v36, %v1711_v14  ;;  %v1678_v4 = vpop.permute.xlu1 %1677  ;;  %v1685_v7 = vpop.permute.xlu0 %1684 }
0x17d2   :  { %1844 = vperm.xlu1 %11278, %v12105_v41   ;;  %1847 = vperm.xlu0 %11277, %v12108_v56   ;;  %v1712_v60 = vadd.f32 %v1678_v4, %v11752_v30  ;;  %v12172_v32 = vadd.f32 %v11951_v6, %v1711_v14  ;;  %v12175_v33 = vadd.f32 %v12022_v24, %v1711_v14 }
0x17d3   :  { %v1713_v30 = vadd.f32 %v1685_v7, %v11737_v22 }
0x17d4   :  { %v12180_v20 = vadd.f32 %v12012_v10, %v1712_v60  ;;  %v12183_v9 = vadd.f32 %v11945_v45, %v1712_v60  ;;  %v12189_v4 = vadd.f32 %v12018_v36, %v1712_v60  ;;  %v12192_v14 = vadd.f32 %v11951_v6, %v1712_v60 }
0x17d5   :  { %v12197_v54 = vadd.f32 %v12022_v24, %v1712_v60  ;;  %v12200_v16 = vadd.f32 %v12012_v10, %v1713_v30  ;;  %v12205_v22 = vadd.f32 %v11945_v45, %v1713_v30  ;;  %v12208_v7 = vadd.f32 %v12018_v36, %v1713_v30  ;;  %v1692_v15 = vpop.permute.xlu1 %1691  ;;  %v1699_v51 = vpop.permute.xlu0 %1698 }
0x17d6   :  { %1850 = vperm.xlu1 %11278, %v12113_v61   ;;  %1853 = vperm.xlu0 %11277, %v12116_v39   ;;  %v1714_v60 = vadd.f32 %v1692_v15, %v11779_v49  ;;  %v12214_v50 = vadd.f32 %v11951_v6, %v1713_v30  ;;  %v12217_v12 = vadd.f32 %v12022_v24, %v1713_v30 }
0x17d7   :  { %v1715_v49 = vadd.f32 %v1699_v51, %v11784_v53 }
0x17d8   :  { %v12222_v5 = vadd.f32 %v12012_v10, %v1714_v60  ;;  %v12225_v0 = vadd.f32 %v11945_v45, %v1714_v60  ;;  %v12231_v15 = vadd.f32 %v12018_v36, %v1714_v60  ;;  %v12234_v30 = vadd.f32 %v11951_v6, %v1714_v60 }
0x17d9   :  { %v12239_v44 = vadd.f32 %v12022_v24, %v1714_v60  ;;  %v12242_v37 = vadd.f32 %v12012_v10, %v1715_v49  ;;  %v12247_v53 = vadd.f32 %v11945_v45, %v1715_v49  ;;  %v12250_v51 = vadd.f32 %v12018_v36, %v1715_v49  ;;  %v12262_v11 = vpop.permute.xlu1 %2951  ;;  %v12266_v48 = vpop.permute.xlu0 %2958 }
0x17da   :  { %1856 = vperm.xlu1 %11278, %v12121_v62   ;;  %1859 = vperm.xlu0 %11277, %v12124_v55   ;;  %v12255_v60 = vadd.f32 %v11951_v6, %v1715_v49  ;;  %v12258_v63 = vadd.f32 %v12022_v24, %v1715_v49  ;;  %17356 = vst [vmem:[#allocation49_spill] sm:$0xff] %v12266_v48 }
0x17dd   :  { %v12264_v58 = vpop.permute.xlu1 %2965  ;;  %v12270_v57 = vpop.permute.xlu0 %2979 }
0x17de   :  { %1862 = vperm.xlu1 %11278, %v12130_v25   ;;  %1865 = vperm.xlu0 %11277, %v12133_v1   ;;  %17355 = vst [vmem:[#allocation48_spill] sm:$0xff] %v12264_v58  ;;  %17358 = vst [vmem:[#allocation51_spill] sm:$0xff] %v12270_v57 }
0x17e1   :  { %v12268_v13 = vpop.permute.xlu1 %2972  ;;  %v12274_v43 = vpop.permute.xlu0 %2993 }
0x17e2   :  { %1868 = vperm.xlu1 %11278, %v12138_v21   ;;  %1871 = vperm.xlu0 %11277, %v12141_v38   ;;  %17357 = vst [vmem:[#allocation50_spill] sm:$0xff] %v12268_v13  ;;  %17360 = vst [vmem:[#allocation53_spill] sm:$0xff] %v12274_v43 }
0x17e5   :  { %v12272_v42 = vpop.permute.xlu1 %2986 }
0x17e6   :  { %1874 = vperm.xlu1 %11278, %v12147_v19   ;;  %1877 = vperm.xlu0 %11277, %v12150_v35   ;;  %17359 = vst [vmem:[#allocation52_spill] sm:$0xff] %v12272_v42 }
0x17e9   :  { %v12276_v49 = vpop.permute.xlu1 %3000 }
0x17ea   :  { %1880 = vperm.xlu1 %11278, %v12155_v29   ;;  %1883 = vperm.xlu0 %11277, %v12158_v26   ;;  %17361 = vst [vmem:[#allocation54_spill] sm:$0xff] %v12276_v49 }
0x17ee   :  { %1886 = vperm.xlu1 %11278, %v12163_v46   ;;  %1889 = vperm.xlu0 %11277, %v12166_v31  }
0x17f2   :  { %1892 = vperm.xlu1 %11278, %v12172_v32   ;;  %1895 = vperm.xlu0 %11277, %v12175_v33  }
0x17f6   :  { %1898 = vperm.xlu1 %11278, %v12180_v20   ;;  %1901 = vperm.xlu0 %11277, %v12183_v9  }
0x17fa   :  { %1904 = vperm.xlu1 %11278, %v12189_v4   ;;  %1907 = vperm.xlu0 %11277, %v12192_v14  }
0x17fe   :  { %1910 = vperm.xlu1 %11278, %v12197_v54   ;;  %1913 = vperm.xlu0 %11277, %v12200_v16  }
0x1802   :  { %1916 = vperm.xlu1 %11278, %v12205_v22   ;;  %1919 = vperm.xlu0 %11277, %v12208_v7  }
0x1806   :  { %1922 = vperm.xlu1 %11278, %v12214_v50   ;;  %1925 = vperm.xlu0 %11277, %v12217_v12  }
0x180a   :  { %1928 = vperm.xlu1 %11278, %v12222_v5   ;;  %1931 = vperm.xlu0 %11277, %v12225_v0  }
0x180e   :  { %1934 = vperm.xlu1 %11278, %v12231_v15   ;;  %1937 = vperm.xlu0 %11277, %v12234_v30  }
0x1812   :  { %1940 = vperm.xlu1 %11278, %v12239_v44   ;;  %1943 = vperm.xlu0 %11277, %v12242_v37  }
0x1816   :  { %1946 = vperm.xlu1 %11278, %v12247_v53   ;;  %1949 = vperm.xlu0 %11277, %v12250_v51  }
0x181a   :  { %1952 = vperm.xlu1 %11278, %v12255_v60   ;;  %1955 = vperm.xlu0 %11277, %v12258_v63  }
0x184d   :  { %v1842_v27 = vpop.permute.xlu1 %1841  ;;  %v1839_v18 = vpop.permute.xlu0 %1838 }
0x184e   :  { %v1964_v59 = vrot.slane %v1842_v27, %v11977_v2  ;;  %v1960_v52 = vrot.slane %v1839_v18, %v11977_v2 }
0x1850   :  { %v2117_v13 = vsel %vm1627_vm0, %v1964_v59, %v1960_v52 }
0x1851   :  { %v1845_v24 = vpop.permute.xlu1 %1844  ;;  %v1848_v58 = vpop.permute.xlu0 %1847 }
0x1852   :  { %v1968_v6 = vrot.slane %v1845_v24, %v11977_v2  ;;  %v1972_v57 = vrot.slane %v1848_v58, %v11977_v2 }
0x1854   :  { %v2118_v42 = vsel %vm1629_vm8, %v1968_v6, %v2117_v13 }
0x1855   :  { %v1851_v48 = vpop.permute.xlu1 %1850  ;;  %v1854_v43 = vpop.permute.xlu0 %1853  ;;  %v2119_v36 = vsel %vm1631_vm9, %v1972_v57, %v2118_v42 }
0x1856   :  { %v1976_v49 = vrot.slane %v1851_v48, %v11977_v2  ;;  %v1980_v24 = vrot.slane %v1854_v43, %v11977_v2 }
0x1858   :  { %v2120_v27 = vsel %vm1633_vm10, %v1976_v49, %v2119_v36 }
0x1859   :  { %v1857_v45 = vpop.permute.xlu1 %1856  ;;  %v1860_v18 = vpop.permute.xlu0 %1859  ;;  %v2157_v10 = vsel %vm1434_vm4, %v2120_v27, -inf }
0x185a   :  { %v1984_v52 = vrot.slane %v1857_v45, %v11977_v2  ;;  %2158 = vmax.xlane.f32.xlu1 %v2157_v10  ;;  %v1988_v59 = vrot.slane %v1860_v18, %v11977_v2 }
0x185c   :  { %v2121_v6 = vsel %vm1627_vm0, %v1984_v52, %v1980_v24 }
0x185d   :  { %v1863_v13 = vpop.permute.xlu1 %1862  ;;  %v1866_v58 = vpop.permute.xlu0 %1865  ;;  %v2122_v36 = vsel %vm1629_vm8, %v1988_v59, %v2121_v6 }
0x185e   :  { %v1992_v48 = vrot.slane %v1863_v13, %v11977_v2  ;;  %v1996_v42 = vrot.slane %v1866_v58, %v11977_v2 }
0x1860   :  { %v2123_v57 = vsel %vm1631_vm9, %v1992_v48, %v2122_v36 }
0x1861   :  { %v1869_v49 = vpop.permute.xlu1 %1868  ;;  %v1872_v27 = vpop.permute.xlu0 %1871  ;;  %v2124_v43 = vsel %vm1633_vm10, %v1996_v42, %v2123_v57 }
0x1862   :  { %v2160_v45 = vsel %vm1434_vm4, %v2124_v43, -inf  ;;  %v2000_v10 = vrot.slane %v1869_v49, %v11977_v2  ;;  %v2004_v18 = vrot.slane %v1872_v27, %v11977_v2 }
0x1863   :  { %2161 = vmax.xlane.f32.xlu0 %v2160_v45 }
0x1864   :  { %v2125_v58 = vsel %vm1627_vm0, %v2004_v18, %v2000_v10 }
0x1865   :  { %v1875_v24 = vpop.permute.xlu1 %1874  ;;  %v1878_v52 = vpop.permute.xlu0 %1877 }
0x1866   :  { %v2008_v13 = vrot.slane %v1875_v24, %v11977_v2  ;;  %v2012_v59 = vrot.slane %v1878_v52, %v11977_v2 }
0x1868   :  { %v2126_v6 = vsel %vm1629_vm8, %v2008_v13, %v2125_v58 }
0x1869   :  { %v1881_v48 = vpop.permute.xlu1 %1880  ;;  %v1884_v36 = vpop.permute.xlu0 %1883  ;;  %v2127_v57 = vsel %vm1631_vm9, %v2012_v59, %v2126_v6 }
0x186a   :  { %v2016_v42 = vrot.slane %v1881_v48, %v11977_v2  ;;  %v2020_v24 = vrot.slane %v1884_v36, %v11977_v2 }
0x186c   :  { %v2128_v49 = vsel %vm1633_vm10, %v2016_v42, %v2127_v57 }
0x186d   :  { %v1887_v27 = vpop.permute.xlu1 %1886  ;;  %v1890_v43 = vpop.permute.xlu0 %1889  ;;  %v2163_v45 = vsel %vm1434_vm4, %v2128_v49, -inf }
0x186e   :  { %v2024_v10 = vrot.slane %v1887_v27, %v11977_v2  ;;  %2164 = vmax.xlane.f32.xlu0 %v2163_v45  ;;  %v2028_v18 = vrot.slane %v1890_v43, %v11977_v2 }
0x1870   :  { %v2129_v52 = vsel %vm1627_vm0, %v2024_v10, %v2020_v24 }
0x1871   :  { %v1893_v13 = vpop.permute.xlu1 %1892  ;;  %v1896_v58 = vpop.permute.xlu0 %1895  ;;  %v2130_v6 = vsel %vm1629_vm8, %v2028_v18, %v2129_v52 }
0x1872   :  { %v2032_v48 = vrot.slane %v1893_v13, %v11977_v2  ;;  %v2036_v59 = vrot.slane %v1896_v58, %v11977_v2 }
0x1874   :  { %v2131_v42 = vsel %vm1631_vm9, %v2032_v48, %v2130_v6 }
0x1875   :  { %v1899_v57 = vpop.permute.xlu1 %1898  ;;  %v1902_v49 = vpop.permute.xlu0 %1901  ;;  %v2132_v36 = vsel %vm1633_vm10, %v2036_v59, %v2131_v42 }
0x1876   :  { %v2166_v27 = vsel %vm1434_vm4, %v2132_v36, -inf  ;;  %v2040_v43 = vrot.slane %v1899_v57, %v11977_v2  ;;  %v2044_v45 = vrot.slane %v1902_v49, %v11977_v2 }
0x1877   :  { %2167 = vmax.xlane.f32.xlu1 %v2166_v27 }
0x1878   :  { %v2133_v58 = vsel %vm1627_vm0, %v2044_v45, %v2040_v43 }
0x1879   :  { %v1905_v24 = vpop.permute.xlu1 %1904  ;;  %v1908_v10 = vpop.permute.xlu0 %1907 }
0x187a   :  { %v2048_v13 = vrot.slane %v1905_v24, %v11977_v2  ;;  %v2052_v18 = vrot.slane %v1908_v10, %v11977_v2 }
0x187c   :  { %v2134_v52 = vsel %vm1629_vm8, %v2048_v13, %v2133_v58 }
0x187d   :  { %v1911_v48 = vpop.permute.xlu1 %1910  ;;  %v1914_v6 = vpop.permute.xlu0 %1913  ;;  %v2135_v42 = vsel %vm1631_vm9, %v2052_v18, %v2134_v52 }
0x187e   :  { %v2056_v59 = vrot.slane %v1911_v48, %v11977_v2  ;;  %v2060_v24 = vrot.slane %v1914_v6, %v11977_v2 }
0x1880   :  { %v2136_v57 = vsel %vm1633_vm10, %v2056_v59, %v2135_v42 }
0x1881   :  { %v1917_v49 = vpop.permute.xlu1 %1916  ;;  %v1920_v36 = vpop.permute.xlu0 %1919  ;;  %v2169_v27 = vsel %vm1434_vm4, %v2136_v57, -inf }
0x1882   :  { %v2064_v43 = vrot.slane %v1917_v49, %v11977_v2  ;;  %2170 = vmax.xlane.f32.xlu0 %v2169_v27  ;;  %v2068_v45 = vrot.slane %v1920_v36, %v11977_v2 }
0x1884   :  { %v2137_v10 = vsel %vm1627_vm0, %v2064_v43, %v2060_v24 }
0x1885   :  { %v1923_v13 = vpop.permute.xlu1 %1922  ;;  %v1926_v58 = vpop.permute.xlu0 %1925  ;;  %v2138_v52 = vsel %vm1629_vm8, %v2068_v45, %v2137_v10 }
0x1886   :  { %v2072_v48 = vrot.slane %v1923_v13, %v11977_v2  ;;  %v2076_v18 = vrot.slane %v1926_v58, %v11977_v2 }
0x1888   :  { %v2139_v59 = vsel %vm1631_vm9, %v2072_v48, %v2138_v52 }
0x1889   :  { %v1929_v42 = vpop.permute.xlu1 %1928  ;;  %v1932_v57 = vpop.permute.xlu0 %1931  ;;  %v2140_v6 = vsel %vm1633_vm10, %v2076_v18, %v2139_v59 }
0x188a   :  { %v2172_v49 = vsel %vm1434_vm4, %v2140_v6, -inf  ;;  %v2080_v36 = vrot.slane %v1929_v42, %v11977_v2  ;;  %v2084_v27 = vrot.slane %v1932_v57, %v11977_v2 }
0x188b   :  { %2173 = vmax.xlane.f32.xlu1 %v2172_v49 }
0x188c   :  { %v2141_v58 = vsel %vm1627_vm0, %v2084_v27, %v2080_v36 }
0x188d   :  { %v1935_v24 = vpop.permute.xlu1 %1934  ;;  %v1938_v43 = vpop.permute.xlu0 %1937 }
0x188e   :  { %v2088_v13 = vrot.slane %v1935_v24, %v11977_v2  ;;  %v2092_v45 = vrot.slane %v1938_v43, %v11977_v2 }
0x1890   :  { %v2142_v10 = vsel %vm1629_vm8, %v2088_v13, %v2141_v58 }
0x1891   :  { %v1941_v48 = vpop.permute.xlu1 %1940  ;;  %v1944_v52 = vpop.permute.xlu0 %1943  ;;  %v2143_v59 = vsel %vm1631_vm9, %v2092_v45, %v2142_v10 }
0x1892   :  { %v2096_v18 = vrot.slane %v1941_v48, %v11977_v2  ;;  %v2100_v24 = vrot.slane %v1944_v52, %v11977_v2 }
0x1894   :  { %v2144_v42 = vsel %vm1633_vm10, %v2096_v18, %v2143_v59 }
0x1895   :  { %v1947_v57 = vpop.permute.xlu1 %1946  ;;  %v1950_v6 = vpop.permute.xlu0 %1949  ;;  %v2175_v49 = vsel %vm1434_vm4, %v2144_v42, -inf }
0x1896   :  { %v2104_v36 = vrot.slane %v1947_v57, %v11977_v2  ;;  %2176 = vmax.xlane.f32.xlu0 %v2175_v49  ;;  %v2108_v27 = vrot.slane %v1950_v6, %v11977_v2 }
0x1898   :  { %v2145_v43 = vsel %vm1627_vm0, %v2104_v36, %v2100_v24 }
0x1899   :  { %v1953_v13 = vpop.permute.xlu1 %1952  ;;  %v1956_v58 = vpop.permute.xlu0 %1955  ;;  %v2146_v10 = vsel %vm1629_vm8, %v2108_v27, %v2145_v43 }
0x189a   :  { %v2112_v48 = vrot.slane %v1953_v13, %v11977_v2  ;;  %v2116_v45 = vrot.slane %v1956_v58, %v11977_v2 }
0x189c   :  { %v2147_v18 = vsel %vm1631_vm9, %v2112_v48, %v2146_v10 }
0x189d   :  { %v2148_v59 = vsel %vm1633_vm10, %v2116_v45, %v2147_v18 }
0x189e   :  { %v2178_v52 = vsel %vm1434_vm4, %v2148_v59, -inf }
0x189f   :  { %2179 = vmax.xlane.f32.xlu1 %v2178_v52 }
0x18e7   :  { %v12358_v42 = vpop.xlane.xlu1 %2158 }
0x18e8   :  { %v2200_v57 = vrot.slane %v12358_v42, %v11920_v34  ;;  %v2192_v6 = vrot.slane %v12358_v42, %v11644_v8  ;;  %v2208_v49 = vrot.slane %v12358_v42, %v11925_v23  ;;  %v2196_v24 = vrot.slane %v12358_v42, %v11809_v28 }
0x18e9   :  { %v2204_v43 = vrot.slane %v12358_v42, %v11814_v3 }
0x18ea   :  { %vm2391_vm15 = vcmp.eq.f32.partialorder %v12105_v41, %v2200_v57  ;;  %vm2389_vm1 = vcmp.eq.f32.partialorder %v12099_v47, %v2192_v6  ;;  %vm2393_vm3 = vcmp.eq.f32.partialorder %v12113_v61, %v2208_v49  ;;  %vm2390_vm5 = vcmp.eq.f32.partialorder %v12096_v40, %v2196_v24 }
0x18eb   :  { %v2434_v36 = vsel %vm2391_vm15, %v12026_v17, 5  ;;  %v2432_v27 = vsel %vm2389_vm1, %v12026_v17, 5  ;;  %v2436_v13 = vsel %vm2393_vm3, %v12026_v17, 5  ;;  %v2433_v58 = vsel %vm2390_vm5, %v12026_v17, 5 }
0x18ec   :  { %2479 = vperm.xlu0 %11277, %v2434_v36   ;;  %2473 = vperm.xlu1 %11278, %v2432_v27   ;;  %vm2392_vm6 = vcmp.eq.f32.partialorder %v12108_v56, %v2204_v43 }
0x18ed   :  { %v2435_v48 = vsel %vm2392_vm6, %v12026_v17, 5 }
0x18f0   :  { %2485 = vperm.xlu0 %11277, %v2436_v13   ;;  %2476 = vperm.xlu1 %11278, %v2433_v58   ;;  %v12378_v47 = vpop.xlane.xlu0 %2161 }
0x18f1   :  { %v2216_v41 = vrot.slane %v12378_v47, %v11809_v28  ;;  %v2212_v61 = vrot.slane %v12378_v47, %v11644_v8  ;;  %v2224_v40 = vrot.slane %v12378_v47, %v11814_v3  ;;  %v2220_v56 = vrot.slane %v12378_v47, %v11920_v34 }
0x18f3   :  { %vm2395_vm2 = vcmp.eq.f32.partialorder %v12121_v62, %v2216_v41  ;;  %vm2394_vm7 = vcmp.eq.f32.partialorder %v12116_v39, %v2212_v61  ;;  %vm2397_vm15 = vcmp.eq.f32.partialorder %v12130_v25, %v2224_v40  ;;  %vm2396_vm1 = vcmp.eq.f32.partialorder %v12124_v55, %v2220_v56 }
0x18f4   :  { %2482 = vperm.xlu1 %11278, %v2435_v48   ;;  %v2438_v45 = vsel %vm2395_vm2, %v12026_v17, 5  ;;  %v2437_v10 = vsel %vm2394_vm7, %v12026_v17, 5  ;;  %v2440_v18 = vsel %vm2397_vm15, %v12026_v17, 5  ;;  %v2228_v62 = vrot.slane %v12378_v47, %v11925_v23 }
0x18f5   :  { %2491 = vperm.xlu0 %11277, %v2438_v45   ;;  %v2439_v39 = vsel %vm2396_vm1, %v12026_v17, 5 }
0x18f6   :  { %vm2398_vm3 = vcmp.eq.f32.partialorder %v12133_v1, %v2228_v62 }
0x18f7   :  { %v2441_v57 = vsel %vm2398_vm3, %v12026_v17, 5 }
0x18f8   :  { %2488 = vperm.xlu1 %11278, %v2437_v10  }
0x18f9   :  { %2497 = vperm.xlu0 %11277, %v2440_v18  }
0x18fb   :  { %v12399_v59 = vpop.xlane.xlu0 %2164 }
0x18fc   :  { %2494 = vperm.xlu1 %11278, %v2439_v39   ;;  %v2232_v25 = vrot.slane %v12399_v59, %v11644_v8  ;;  %v2236_v52 = vrot.slane %v12399_v59, %v11809_v28  ;;  %v2240_v55 = vrot.slane %v12399_v59, %v11920_v34  ;;  %v2244_v49 = vrot.slane %v12399_v59, %v11814_v3 }
0x18fd   :  { %v2248_v1 = vrot.slane %v12399_v59, %v11925_v23 }
0x18fe   :  { %vm2399_vm5 = vcmp.eq.f32.partialorder %v12138_v21, %v2232_v25  ;;  %vm2400_vm6 = vcmp.eq.f32.partialorder %v12141_v38, %v2236_v52  ;;  %vm2401_vm2 = vcmp.eq.f32.partialorder %v12147_v19, %v2240_v55  ;;  %vm2402_vm7 = vcmp.eq.f32.partialorder %v12150_v35, %v2244_v49 }
0x18ff   :  { %v2442_v6 = vsel %vm2399_vm5, %v12026_v17, 5  ;;  %v2443_v24 = vsel %vm2400_vm6, %v12026_v17, 5  ;;  %v2444_v21 = vsel %vm2401_vm2, %v12026_v17, 5  ;;  %vm2403_vm15 = vcmp.eq.f32.partialorder %v12155_v29, %v2248_v1 }
0x1900   :  { %2500 = vperm.xlu1 %11278, %v2441_v57   ;;  %2503 = vperm.xlu0 %11277, %v2442_v6   ;;  %v2445_v27 = vsel %vm2402_vm7, %v12026_v17, 5  ;;  %v2446_v43 = vsel %vm2403_vm15, %v12026_v17, 5 }
0x1904   :  { %v12420_v36 = vpop.xlane.xlu1 %2167  ;;  %2506 = vperm.xlu1 %11278, %v2443_v24   ;;  %2509 = vperm.xlu0 %11277, %v2444_v21  }
0x1905   :  { %v2252_v38 = vrot.slane %v12420_v36, %v11644_v8  ;;  %v2256_v19 = vrot.slane %v12420_v36, %v11809_v28  ;;  %v2260_v13 = vrot.slane %v12420_v36, %v11920_v34  ;;  %v2264_v29 = vrot.slane %v12420_v36, %v11814_v3 }
0x1906   :  { %v2268_v41 = vrot.slane %v12420_v36, %v11925_v23 }
0x1907   :  { %vm2404_vm1 = vcmp.eq.f32.partialorder %v12158_v26, %v2252_v38  ;;  %vm2405_vm3 = vcmp.eq.f32.partialorder %v12163_v46, %v2256_v19  ;;  %vm2406_vm5 = vcmp.eq.f32.partialorder %v12166_v31, %v2260_v13  ;;  %vm2407_vm6 = vcmp.eq.f32.partialorder %v12172_v32, %v2264_v29 }
0x1908   :  { %2512 = vperm.xlu1 %11278, %v2445_v27   ;;  %2515 = vperm.xlu0 %11277, %v2446_v43   ;;  %v2447_v35 = vsel %vm2404_vm1, %v12026_v17, 5  ;;  %v2448_v58 = vsel %vm2405_vm3, %v12026_v17, 5  ;;  %v2449_v26 = vsel %vm2406_vm5, %v12026_v17, 5  ;;  %v2450_v46 = vsel %vm2407_vm6, %v12026_v17, 5 }
0x1909   :  { %vm2408_vm2 = vcmp.eq.f32.partialorder %v12175_v33, %v2268_v41 }
0x190a   :  { %v2451_v48 = vsel %vm2408_vm2, %v12026_v17, 5 }
0x190c   :  { %2518 = vperm.xlu1 %11278, %v2447_v35   ;;  %2521 = vperm.xlu0 %11277, %v2448_v58   ;;  %v17362_v58 = vld [vmem:[#allocation14_spill] sm:$0xff] }
0x190f   :  { %v12442_v61 = vpop.xlane.xlu0 %2170 }
0x1910   :  { %2524 = vperm.xlu1 %11278, %v2449_v26   ;;  %2527 = vperm.xlu0 %11277, %v2450_v46   ;;  %v2272_v40 = vrot.slane %v12442_v61, %v11644_v8  ;;  %v2276_v31 = vrot.slane %v12442_v61, %v11809_v28  ;;  %v2280_v32 = vrot.slane %v12442_v61, %v11920_v34 }
0x1911   :  { %v2284_v56 = vrot.slane %v12442_v61, %v11814_v3  ;;  %v2288_v33 = vrot.slane %v12442_v61, %v11925_v23 }
0x1912   :  { %vm2409_vm7 = vcmp.eq.f32.partialorder %v12180_v20, %v2272_v40  ;;  %vm2410_vm15 = vcmp.eq.f32.partialorder %v12183_v9, %v2276_v31  ;;  %vm2411_vm1 = vcmp.eq.f32.partialorder %v12189_v4, %v2280_v32  ;;  %v17367_v40 = vld [vmem:[#allocation13_spill] sm:$0xff]  ;;  %v17369_v32 = vld [vmem:[#allocation16_spill] sm:$0xff] }
0x1913   :  { %v2452_v45 = vsel %vm2409_vm7, %v12026_v17, 5  ;;  %v2453_v10 = vsel %vm2410_vm15, %v12026_v17, 5  ;;  %v2454_v20 = vsel %vm2411_vm1, %v12026_v17, 5  ;;  %vm2412_vm3 = vcmp.eq.f32.partialorder %v12192_v14, %v2284_v56 }
0x1914   :  { %2530 = vperm.xlu1 %11278, %v2451_v48   ;;  %2533 = vperm.xlu0 %11277, %v2452_v45   ;;  %vm2413_vm5 = vcmp.eq.f32.partialorder %v12197_v54, %v2288_v33  ;;  %v2455_v62 = vsel %vm2412_vm3, %v12026_v17, 5 }
0x1915   :  { %v2456_v39 = vsel %vm2413_vm5, %v12026_v17, 5 }
0x1918   :  { %v12464_v18 = vpop.xlane.xlu1 %2173  ;;  %2536 = vperm.xlu1 %11278, %v2453_v10   ;;  %2539 = vperm.xlu0 %11277, %v2454_v20  }
0x1919   :  { %v2292_v9 = vrot.slane %v12464_v18, %v11644_v8  ;;  %v2296_v4 = vrot.slane %v12464_v18, %v11809_v28  ;;  %v2300_v25 = vrot.slane %v12464_v18, %v11920_v34  ;;  %v2304_v54 = vrot.slane %v12464_v18, %v11814_v3 }
0x191a   :  { %v2308_v55 = vrot.slane %v12464_v18, %v11925_v23 }
0x191b   :  { %vm2414_vm6 = vcmp.eq.f32.partialorder %v12200_v16, %v2292_v9  ;;  %vm2415_vm2 = vcmp.eq.f32.partialorder %v12205_v22, %v2296_v4  ;;  %vm2416_vm7 = vcmp.eq.f32.partialorder %v12208_v7, %v2300_v25  ;;  %vm2417_vm15 = vcmp.eq.f32.partialorder %v12214_v50, %v2304_v54 }
0x191c   :  { %2542 = vperm.xlu1 %11278, %v2455_v62   ;;  %2545 = vperm.xlu0 %11277, %v2456_v39   ;;  %v2457_v14 = vsel %vm2414_vm6, %v12026_v17, 5  ;;  %v2458_v52 = vsel %vm2415_vm2, %v12026_v17, 5  ;;  %v2459_v16 = vsel %vm2416_vm7, %v12026_v17, 5  ;;  %v2460_v22 = vsel %vm2417_vm15, %v12026_v17, 5  ;;  %v17380_v39 = vld [vmem:[#allocation50_spill] sm:$0xff] }
0x191d   :  { %vm2418_vm1 = vcmp.eq.f32.partialorder %v12217_v12, %v2308_v55  ;;  %v3013_v25 = vadd.f32 %v17380_v39, %v12420_v36  ;;  %v17385_v36 = vld [vmem:[#allocation51_spill] sm:$0xff] }
0x191e   :  { %v2461_v49 = vsel %vm2418_vm1, %v12026_v17, 5 }
0x1920   :  { %2548 = vperm.xlu1 %11278, %v2457_v14   ;;  %2551 = vperm.xlu0 %11277, %v2458_v52   ;;  %v12603_v52 = vadd.f32 %v3013_v25, %v17362_v58 }
0x1922   :  { %17383 = vst [vmem:[#allocation65_spill] sm:$0xff] %v12603_v52 }
0x1923   :  { %v12486_v57 = vpop.xlane.xlu0 %2176 }
0x1924   :  { %2554 = vperm.xlu1 %11278, %v2459_v16   ;;  %2557 = vperm.xlu0 %11277, %v2460_v22   ;;  %v2312_v6 = vrot.slane %v12486_v57, %v11644_v8  ;;  %v2316_v7 = vrot.slane %v12486_v57, %v11809_v28  ;;  %v2320_v50 = vrot.slane %v12486_v57, %v11920_v34 }
0x1925   :  { %v2324_v24 = vrot.slane %v12486_v57, %v11814_v3  ;;  %v2328_v12 = vrot.slane %v12486_v57, %v11925_v23  ;;  %v3014_v16 = vadd.f32 %v17385_v36, %v12442_v61 }
0x1926   :  { %vm2419_vm3 = vcmp.eq.f32.partialorder %v12222_v5, %v2312_v6  ;;  %vm2420_vm5 = vcmp.eq.f32.partialorder %v12225_v0, %v2316_v7  ;;  %vm2421_vm6 = vcmp.eq.f32.partialorder %v12231_v15, %v2320_v50  ;;  %v12616_v6 = vadd.f32 %v3013_v25, %v17367_v40 }
0x1927   :  { %v2462_v1 = vsel %vm2419_vm3, %v12026_v17, 5  ;;  %v2463_v21 = vsel %vm2420_vm5, %v12026_v17, 5  ;;  %v2464_v5 = vsel %vm2421_vm6, %v12026_v17, 5  ;;  %vm2422_vm2 = vcmp.eq.f32.partialorder %v12234_v30, %v2324_v24 }
0x1928   :  { %2560 = vperm.xlu1 %11278, %v2461_v49   ;;  %2563 = vperm.xlu0 %11277, %v2462_v1   ;;  %vm2423_vm7 = vcmp.eq.f32.partialorder %v12239_v44, %v2328_v12  ;;  %v2465_v19 = vsel %vm2422_vm2, %v12026_v17, 5  ;;  %17387 = vst [vmem:[#allocation67_spill] sm:$0xff] %v12616_v6  ;;  %v12621_v7 = vadd.f32 %v3013_v25, %v17369_v32  ;;  %v17392_v1 = vld [vmem:[#allocation52_spill] sm:$0xff] }
0x1929   :  { %v2466_v27 = vsel %vm2423_vm7, %v12026_v17, 5  ;;  %v12624_v50 = vadd.f32 %v3014_v16, %v17362_v58  ;;  %v3015_v24 = vadd.f32 %v17392_v1, %v12464_v18  ;;  %v12639_v12 = vadd.f32 %v3014_v16, %v17367_v40 }
0x192a   :  { %17388 = vst [vmem:[#allocation68_spill] sm:$0xff] %v12621_v7 }
0x192b   :  { %17389 = vst [vmem:[#allocation69_spill] sm:$0xff] %v12624_v50  ;;  %17393 = vst [vmem:[#allocation52_spill] sm:$0xff] %v12639_v12 }
0x192c   :  { %v12508_v38 = vpop.xlane.xlu1 %2179  ;;  %2566 = vperm.xlu1 %11278, %v2463_v21   ;;  %2569 = vperm.xlu0 %11277, %v2464_v5   ;;  %v12642_v21 = vadd.f32 %v3014_v16, %v17369_v32 }
0x192d   :  { %v2332_v0 = vrot.slane %v12508_v38, %v11644_v8  ;;  %v2336_v15 = vrot.slane %v12508_v38, %v11809_v28  ;;  %v2340_v43 = vrot.slane %v12508_v38, %v11920_v34  ;;  %v2344_v44 = vrot.slane %v12508_v38, %v11814_v3 }
0x192e   :  { %v2348_v29 = vrot.slane %v12508_v38, %v11925_v23  ;;  %17394 = vst [vmem:[#allocation72_spill] sm:$0xff] %v12642_v21 }
0x192f   :  { %vm2424_vm15 = vcmp.eq.f32.partialorder %v12242_v37, %v2332_v0  ;;  %vm2425_vm1 = vcmp.eq.f32.partialorder %v12247_v53, %v2336_v15  ;;  %vm2426_vm3 = vcmp.eq.f32.partialorder %v12250_v51, %v2340_v43  ;;  %vm2427_vm5 = vcmp.eq.f32.partialorder %v12255_v60, %v2344_v44  ;;  %v17363_v60 = vld [vmem:[#allocation12_spill] sm:$0xff]  ;;  %v17397_v43 = vld [vmem:[#allocation53_spill] sm:$0xff] }
0x1930   :  { %2572 = vperm.xlu1 %11278, %v2465_v19   ;;  %2575 = vperm.xlu0 %11277, %v2466_v27   ;;  %v2467_v30 = vsel %vm2424_vm15, %v12026_v17, 5  ;;  %v2468_v13 = vsel %vm2425_vm1, %v12026_v17, 5  ;;  %v3010_v37 = vadd.f32 %v12262_v11, %v12358_v42  ;;  %v2469_v53 = vsel %vm2426_vm3, %v12026_v17, 5  ;;  %v17364_v11 = vld [vmem:[#allocation15_spill] sm:$0xff] }
0x1931   :  { %v2470_v35 = vsel %vm2427_vm5, %v12026_v17, 5  ;;  %vm2428_vm6 = vcmp.eq.f32.partialorder %v12258_v63, %v2348_v29  ;;  %v17366_v63 = vld [vmem:[#allocation49_spill] sm:$0xff]  ;;  %v12606_v55 = vadd.f32 %v3013_v25, %v17363_v60  ;;  %v12613_v22 = vadd.f32 %v3013_v25, %v17364_v11 }
0x1932   :  { %v12536_v41 = vadd.f32 %v3010_v37, %v17362_v58  ;;  %v2471_v51 = vsel %vm2428_vm6, %v12026_v17, 5  ;;  %v12541_v26 = vadd.f32 %v3010_v37, %v17363_v60  ;;  %v12544_v42 = vadd.f32 %v3010_v37, %v17364_v11 }
0x1933   :  { %v3011_v46 = vadd.f32 %v17366_v63, %v12378_v47  ;;  %v12551_v31 = vadd.f32 %v3010_v37, %v17367_v40  ;;  %v12554_v48 = vadd.f32 %v3010_v37, %v17369_v32  ;;  %v17373_v47 = vld [vmem:[#allocation48_spill] sm:$0xff]  ;;  %17384 = vst [vmem:[#allocation66_spill] sm:$0xff] %v12606_v55  ;;  %17386 = vst [vmem:[#allocation51_spill] sm:$0xff] %v12613_v22 }
0x1934   :  { %2578 = vperm.xlu1 %11278, %v2467_v30   ;;  %2581 = vperm.xlu0 %11277, %v2468_v13   ;;  %17365 = vst [vmem:[#allocation55_spill] sm:$0xff] %v12544_v42  ;;  %v3012_v33 = vadd.f32 %v17373_v47, %v12399_v59  ;;  %v12629_v61 = vadd.f32 %v3014_v16, %v17363_v60 }
0x1935   :  { %17368 = vst [vmem:[#allocation49_spill] sm:$0xff] %v12551_v31  ;;  %17370 = vst [vmem:[#allocation56_spill] sm:$0xff] %v12554_v48  ;;  %v12559_v45 = vadd.f32 %v3011_v46, %v17362_v58  ;;  %v12562_v56 = vadd.f32 %v3011_v46, %v17363_v60  ;;  %v12569_v10 = vadd.f32 %v3011_v46, %v17364_v11 }
0x1936   :  { %v12572_v20 = vadd.f32 %v3011_v46, %v17367_v40  ;;  %v12577_v9 = vadd.f32 %v3011_v46, %v17369_v32  ;;  %v12580_v4 = vadd.f32 %v3012_v33, %v17362_v58  ;;  %v12585_v59 = vadd.f32 %v3012_v33, %v17363_v60  ;;  %17390 = vst [vmem:[#allocation70_spill] sm:$0xff] %v12629_v61 }
0x1937   :  { %17371 = vst [vmem:[#allocation57_spill] sm:$0xff] %v12559_v45  ;;  %17372 = vst [vmem:[#allocation58_spill] sm:$0xff] %v12562_v56  ;;  %v12588_v62 = vadd.f32 %v3012_v33, %v17364_v11  ;;  %v12595_v54 = vadd.f32 %v3012_v33, %v17367_v40  ;;  %v12598_v14 = vadd.f32 %v3012_v33, %v17369_v32  ;;  %v17404_v33 = vld [vmem:[#allocation54_spill] sm:$0xff] }
0x1938   :  { %2584 = vperm.xlu1 %11278, %v2469_v53   ;;  %2587 = vperm.xlu0 %11277, %v2470_v35   ;;  %17374 = vst [vmem:[#allocation48_spill] sm:$0xff] %v12569_v10  ;;  %17375 = vst [vmem:[#allocation59_spill] sm:$0xff] %v12572_v20  ;;  %v12632_v49 = vadd.f32 %v3014_v16, %v17364_v11  ;;  %v12651_v15 = vadd.f32 %v3015_v24, %v17362_v58 }
0x1939   :  { %17376 = vst [vmem:[#allocation60_spill] sm:$0xff] %v12577_v9  ;;  %17377 = vst [vmem:[#allocation61_spill] sm:$0xff] %v12580_v4  ;;  %v12654_v19 = vadd.f32 %v3015_v24, %v17363_v60  ;;  %v3016_v44 = vadd.f32 %v17397_v43, %v12486_v57  ;;  %v12665_v30 = vadd.f32 %v3015_v24, %v17364_v11 }
0x193a   :  { %17378 = vst [vmem:[#allocation62_spill] sm:$0xff] %v12585_v59  ;;  %17379 = vst [vmem:[#allocation63_spill] sm:$0xff] %v12588_v62  ;;  %v12668_v13 = vadd.f32 %v3015_v24, %v17367_v40  ;;  %v12677_v53 = vadd.f32 %v3015_v24, %v17369_v32  ;;  %v3017_v39 = vadd.f32 %v17404_v33, %v12508_v38 }
0x193b   :  { %17381 = vst [vmem:[#allocation50_spill] sm:$0xff] %v12595_v54  ;;  %17382 = vst [vmem:[#allocation64_spill] sm:$0xff] %v12598_v14  ;;  %v12680_v35 = vadd.f32 %v3016_v44, %v17362_v58  ;;  %v12690_v63 = vadd.f32 %v3016_v44, %v17364_v11  ;;  %v12701_v25 = vadd.f32 %v3016_v44, %v17367_v40 }
0x193c   :  { %2590 = vperm.xlu1 %11278, %v2471_v51   ;;  %3099 = vperm.xlu0 %11277, %v12536_v41   ;;  %17391 = vst [vmem:[#allocation71_spill] sm:$0xff] %v12632_v49  ;;  %17395 = vst [vmem:[#allocation73_spill] sm:$0xff] %v12651_v15  ;;  %v12687_v51 = vadd.f32 %v3016_v44, %v17363_v60  ;;  %v12704_v36 = vadd.f32 %v3016_v44, %v17369_v32 }
0x193d   :  { %17396 = vst [vmem:[#allocation74_spill] sm:$0xff] %v12654_v19  ;;  %17398 = vst [vmem:[#allocation53_spill] sm:$0xff] %v12665_v30  ;;  %v12713_v24 = vadd.f32 %v3017_v39, %v17362_v58  ;;  %v12716_v43 = vadd.f32 %v3017_v39, %v17363_v60  ;;  %v12725_v44 = vadd.f32 %v3017_v39, %v17364_v11 }
0x193e   :  { %17399 = vst [vmem:[#allocation75_spill] sm:$0xff] %v12668_v13  ;;  %17400 = vst [vmem:[#allocation76_spill] sm:$0xff] %v12677_v53  ;;  %v12737_v60 = vadd.f32 %v3017_v39, %v17369_v32 }
0x193f   :  { %17401 = vst [vmem:[#allocation77_spill] sm:$0xff] %v12680_v35  ;;  %17402 = vst [vmem:[#allocation78_spill] sm:$0xff] %v12687_v51 }
0x1940   :  { %3102 = vperm.xlu1 %11278, %v12541_v26   ;;  %3105 = vperm.xlu0 %11277, %v12544_v42   ;;  %17403 = vst [vmem:[#allocation79_spill] sm:$0xff] %v12690_v63  ;;  %17405 = vst [vmem:[#allocation54_spill] sm:$0xff] %v12701_v25 }
0x1941   :  { %17406 = vst [vmem:[#allocation80_spill] sm:$0xff] %v12704_v36  ;;  %17407 = vst [vmem:[#allocation81_spill] sm:$0xff] %v12713_v24 }
0x1942   :  { %17408 = vst [vmem:[#allocation82_spill] sm:$0xff] %v12716_v43  ;;  %17409 = vst [vmem:[#allocation83_spill] sm:$0xff] %v12725_v44 }
0x1943   :  { %17411 = vst [vmem:[#allocation85_spill] sm:$0xff] %v12737_v60 }
0x1944   :  { %3108 = vperm.xlu1 %11278, %v12551_v31   ;;  %3111 = vperm.xlu0 %11277, %v12554_v48  }
0x1948   :  { %3114 = vperm.xlu1 %11278, %v12559_v45   ;;  %3117 = vperm.xlu0 %11277, %v12562_v56  }
0x194c   :  { %3120 = vperm.xlu1 %11278, %v12569_v10   ;;  %3123 = vperm.xlu0 %11277, %v12572_v20  }
0x1950   :  { %3126 = vperm.xlu1 %11278, %v12577_v9   ;;  %3129 = vperm.xlu0 %11277, %v12580_v4  }
0x1954   :  { %3132 = vperm.xlu1 %11278, %v12585_v59   ;;  %3135 = vperm.xlu0 %11277, %v12588_v62  }
0x1958   :  { %3138 = vperm.xlu1 %11278, %v12595_v54   ;;  %3141 = vperm.xlu0 %11277, %v12598_v14  }
0x195c   :  { %3144 = vperm.xlu1 %11278, %v12603_v52   ;;  %3147 = vperm.xlu0 %11277, %v12606_v55  }
0x1960   :  { %3150 = vperm.xlu1 %11278, %v12613_v22   ;;  %3153 = vperm.xlu0 %11277, %v12616_v6  }
0x1964   :  { %3156 = vperm.xlu1 %11278, %v12621_v7   ;;  %3159 = vperm.xlu0 %11277, %v12624_v50  }
0x1968   :  { %3162 = vperm.xlu1 %11278, %v12629_v61   ;;  %3165 = vperm.xlu0 %11277, %v12632_v49  }
0x196b   :  { %v12644_v5 = vpop.permute.xlu1 %2473  ;;  %v12646_v0 = vpop.permute.xlu0 %2479 }
0x196c   :  { %3168 = vperm.xlu1 %11278, %v12639_v12   ;;  %3171 = vperm.xlu0 %11277, %v12642_v21  }
0x196f   :  { %v12656_v18 = vpop.permute.xlu1 %2476  ;;  %v12658_v27 = vpop.permute.xlu0 %2485 }
0x1970   :  { %3174 = vperm.xlu1 %11278, %v12651_v15   ;;  %3177 = vperm.xlu0 %11277, %v12654_v19  }
0x1973   :  { %v12670_v29 = vpop.permute.xlu1 %2482 }
0x1974   :  { %3180 = vperm.xlu1 %11278, %v12665_v30   ;;  %3183 = vperm.xlu0 %11277, %v12668_v13   ;;  %v12674_v37 = vpop.permute.xlu0 %2491 }
0x1977   :  { %v12682_v57 = vpop.permute.xlu1 %2488 }
0x1978   :  { %3186 = vperm.xlu1 %11278, %v12677_v53   ;;  %3189 = vperm.xlu0 %11277, %v12680_v35   ;;  %v12692_v46 = vpop.permute.xlu0 %2497 }
0x197b   :  { %v12694_v47 = vpop.permute.xlu1 %2494 }
0x197c   :  { %3192 = vperm.xlu1 %11278, %v12687_v51   ;;  %3195 = vperm.xlu0 %11277, %v12690_v63  }
0x197f   :  { %v12706_v16 = vpop.permute.xlu1 %2500  ;;  %v12708_v1 = vpop.permute.xlu0 %2503 }
0x1980   :  { %3198 = vperm.xlu1 %11278, %v12701_v25   ;;  %3201 = vperm.xlu0 %11277, %v12704_v36   ;;  %v12728_v25 = vadd.f32 %v3017_v39, %v17367_v40 }
0x1982   :  { %17410 = vst [vmem:[#allocation84_spill] sm:$0xff] %v12728_v25 }
0x1983   :  { %v12718_v38 = vpop.permute.xlu1 %2506  ;;  %v12720_v33 = vpop.permute.xlu0 %2509 }
0x1984   :  { %3204 = vperm.xlu1 %11278, %v12713_v24   ;;  %3207 = vperm.xlu0 %11277, %v12716_v43  }
0x1987   :  { %v12730_v36 = vpop.permute.xlu1 %2512  ;;  %v12732_v58 = vpop.permute.xlu0 %2515 }
0x1988   :  { %3210 = vperm.xlu1 %11278, %v12725_v44   ;;  %3213 = vperm.xlu0 %11277, %v12728_v25  }
0x198b   :  { %v12739_v24 = vpop.permute.xlu1 %2518  ;;  %v12741_v43 = vpop.permute.xlu0 %2521 }
0x198c   :  { %3216 = vperm.xlu1 %11278, %v12737_v60  }
0x198f   :  { %v12744_v11 = vpop.permute.xlu1 %2524  ;;  %v12746_v40 = vpop.permute.xlu0 %2527 }
0x1993   :  { %v12748_v51 = vpop.permute.xlu1 %2530  ;;  %v12750_v63 = vpop.permute.xlu0 %2533 }
0x1997   :  { %v12752_v44 = vpop.permute.xlu1 %2536  ;;  %v12754_v25 = vpop.permute.xlu0 %2539 }
0x199b   :  { %v12756_v39 = vpop.permute.xlu1 %2542  ;;  %v12758_v32 = vpop.permute.xlu0 %2545 }
0x199f   :  { %v12760_v35 = vpop.permute.xlu1 %2548  ;;  %v12762_v53 = vpop.permute.xlu0 %2551 }
0x19a3   :  { %v12764_v60 = vpop.permute.xlu1 %2554  ;;  %v12766_v30 = vpop.permute.xlu0 %2557 }
0x19a7   :  { %v12768_v13 = vpop.permute.xlu1 %2560  ;;  %v12770_v15 = vpop.permute.xlu0 %2563 }
0x19ab   :  { %v12772_v19 = vpop.permute.xlu1 %2566  ;;  %v12774_v12 = vpop.permute.xlu0 %2569 }
0x19af   :  { %v12776_v21 = vpop.permute.xlu1 %2572  ;;  %v12778_v61 = vpop.permute.xlu0 %2575 }
0x19b3   :  { %v12780_v49 = vpop.permute.xlu1 %2578  ;;  %v12782_v50 = vpop.permute.xlu0 %2581 }
0x19b7   :  { %v12784_v7 = vpop.permute.xlu1 %2584  ;;  %v12786_v22 = vpop.permute.xlu0 %2587 }
0x19bb   :  { %v12788_v6 = vpop.permute.xlu1 %2590  ;;  %v3100_v52 = vpop.permute.xlu0 %3099 }
0x19bc   :  { %v3221_v54 = vrot.slane %v3100_v52, %v11977_v2 }
0x19bf   :  { %v3103_v55 = vpop.permute.xlu1 %3102  ;;  %v3106_v14 = vpop.permute.xlu0 %3105 }
0x19c0   :  { %v3225_v62 = vrot.slane %v3103_v55, %v11977_v2  ;;  %v3229_v59 = vrot.slane %v3106_v14, %v11977_v2 }
0x19c2   :  { %v3378_v4 = vsel %vm1627_vm0, %v3225_v62, %v3221_v54 }
0x19c3   :  { %v3109_v9 = vpop.permute.xlu1 %3108  ;;  %v3112_v10 = vpop.permute.xlu0 %3111  ;;  %v3379_v56 = vsel %vm1629_vm8, %v3229_v59, %v3378_v4 }
0x19c4   :  { %v3233_v20 = vrot.slane %v3109_v9, %v11977_v2  ;;  %v3237_v45 = vrot.slane %v3112_v10, %v11977_v2 }
0x19c6   :  { %v3380_v31 = vsel %vm1631_vm9, %v3233_v20, %v3379_v56 }
0x19c7   :  { %v3115_v3 = vpop.permute.xlu1 %3114  ;;  %v3118_v42 = vpop.permute.xlu0 %3117  ;;  %v3381_v52 = vsel %vm1633_vm10, %v3237_v45, %v3380_v31 }
0x19c8   :  { %v3418_v55 = vsel %vm1434_vm4, %v3381_v52, -inf  ;;  %v3241_v14 = vrot.slane %v3115_v3, %v11977_v2  ;;  %v3245_v62 = vrot.slane %v3118_v42, %v11977_v2 }
0x19c9   :  { %3419 = vmax.xlane.f32.xlu0 %v3418_v55 }
0x19ca   :  { %v3382_v10 = vsel %vm1627_vm0, %v3245_v62, %v3241_v14 }
0x19cb   :  { %v3121_v54 = vpop.permute.xlu1 %3120  ;;  %v3124_v48 = vpop.permute.xlu0 %3123 }
0x19cc   :  { %v3249_v9 = vrot.slane %v3121_v54, %v11977_v2  ;;  %v3253_v4 = vrot.slane %v3124_v48, %v11977_v2 }
0x19ce   :  { %v3383_v56 = vsel %vm1629_vm8, %v3249_v9, %v3382_v10 }
0x19cf   :  { %v3127_v20 = vpop.permute.xlu1 %3126  ;;  %v3130_v59 = vpop.permute.xlu0 %3129  ;;  %v3384_v45 = vsel %vm1631_vm9, %v3253_v4, %v3383_v56 }
0x19d0   :  { %v3257_v31 = vrot.slane %v3127_v20, %v11977_v2  ;;  %v3261_v54 = vrot.slane %v3130_v59, %v11977_v2 }
0x19d2   :  { %v3385_v3 = vsel %vm1633_vm10, %v3257_v31, %v3384_v45 }
0x19d3   :  { %v3133_v42 = vpop.permute.xlu1 %3132  ;;  %v3136_v52 = vpop.permute.xlu0 %3135  ;;  %v3421_v55 = vsel %vm1434_vm4, %v3385_v3, -inf }
0x19d4   :  { %v3265_v14 = vrot.slane %v3133_v42, %v11977_v2  ;;  %3422 = vmax.xlane.f32.xlu1 %v3421_v55  ;;  %v3269_v48 = vrot.slane %v3136_v52, %v11977_v2 }
0x19d6   :  { %v3386_v62 = vsel %vm1627_vm0, %v3265_v14, %v3261_v54 }
0x19d7   :  { %v3139_v9 = vpop.permute.xlu1 %3138  ;;  %v3142_v10 = vpop.permute.xlu0 %3141  ;;  %v3387_v56 = vsel %vm1629_vm8, %v3269_v48, %v3386_v62 }
0x19d8   :  { %v3273_v20 = vrot.slane %v3139_v9, %v11977_v2  ;;  %v3277_v4 = vrot.slane %v3142_v10, %v11977_v2 }
0x19da   :  { %v3388_v31 = vsel %vm1631_vm9, %v3273_v20, %v3387_v56 }
0x19db   :  { %v3145_v45 = vpop.permute.xlu1 %3144  ;;  %v3148_v3 = vpop.permute.xlu0 %3147  ;;  %v3389_v59 = vsel %vm1633_vm10, %v3277_v4, %v3388_v31 }
0x19dc   :  { %v3424_v42 = vsel %vm1434_vm4, %v3389_v59, -inf  ;;  %v3281_v52 = vrot.slane %v3145_v45, %v11977_v2  ;;  %v3285_v55 = vrot.slane %v3148_v3, %v11977_v2 }
0x19dd   :  { %3425 = vmax.xlane.f32.xlu0 %v3424_v42 }
0x19de   :  { %v3390_v10 = vsel %vm1627_vm0, %v3285_v55, %v3281_v52 }
0x19df   :  { %v3151_v54 = vpop.permute.xlu1 %3150  ;;  %v3154_v14 = vpop.permute.xlu0 %3153 }
0x19e0   :  { %v3289_v9 = vrot.slane %v3151_v54, %v11977_v2  ;;  %v3293_v48 = vrot.slane %v3154_v14, %v11977_v2 }
0x19e2   :  { %v3391_v62 = vsel %vm1629_vm8, %v3289_v9, %v3390_v10 }
0x19e3   :  { %v3157_v20 = vpop.permute.xlu1 %3156  ;;  %v3160_v56 = vpop.permute.xlu0 %3159  ;;  %v3392_v31 = vsel %vm1631_vm9, %v3293_v48, %v3391_v62 }
0x19e4   :  { %v3297_v4 = vrot.slane %v3157_v20, %v11977_v2  ;;  %v3301_v54 = vrot.slane %v3160_v56, %v11977_v2  ;;  %v2599_v56 = vrot.slane %v12656_v18, %v11977_v2  ;;  %v2643_v18 = vrot.slane %v12720_v33, %v11977_v2 }
0x19e6   :  { %v3393_v45 = vsel %vm1633_vm10, %v3297_v4, %v3392_v31  ;;  %v2639_v31 = vrot.slane %v12718_v38, %v11977_v2 }
0x19e7   :  { %v3163_v3 = vpop.permute.xlu1 %3162  ;;  %v3166_v59 = vpop.permute.xlu0 %3165  ;;  %v3427_v42 = vsel %vm1434_vm4, %v3393_v45, -inf }
0x19e8   :  { %v3305_v52 = vrot.slane %v3163_v3, %v11977_v2  ;;  %3428 = vmax.xlane.f32.xlu0 %v3427_v42  ;;  %v3309_v55 = vrot.slane %v3166_v59, %v11977_v2 }
0x19ea   :  { %v3394_v14 = vsel %vm1627_vm0, %v3305_v52, %v3301_v54  ;;  %v2595_v54 = vrot.slane %v12644_v5, %v11977_v2  ;;  %v2635_v52 = vrot.slane %v12708_v1, %v11977_v2  ;;  %v2647_v5 = vrot.slane %v12730_v36, %v11977_v2 }
0x19eb   :  { %v3169_v9 = vpop.permute.xlu1 %3168  ;;  %v3172_v10 = vpop.permute.xlu0 %3171  ;;  %v3395_v62 = vsel %vm1629_vm8, %v3309_v55, %v3394_v14 }
0x19ec   :  { %v3313_v20 = vrot.slane %v3169_v9, %v11977_v2  ;;  %v3317_v48 = vrot.slane %v3172_v10, %v11977_v2  ;;  %v2752_v38 = vsel %vm1627_vm0, %v2599_v56, %v2595_v54  ;;  %v2607_v9 = vrot.slane %v12670_v29, %v11977_v2 }
0x19ed   :  { %v2760_v10 = vsel %vm1627_vm0, %v2639_v31, %v2635_v52  ;;  %v2651_v31 = vrot.slane %v12732_v58, %v11977_v2  ;;  %v2611_v52 = vrot.slane %v12658_v27, %v11977_v2  ;;  %v2663_v58 = vrot.slane %v12744_v11, %v11977_v2 }
0x19ee   :  { %v3396_v4 = vsel %vm1631_vm9, %v3313_v20, %v3395_v62  ;;  %v2761_v29 = vsel %vm1629_vm8, %v2643_v18, %v2760_v10  ;;  %v2679_v18 = vrot.slane %v12752_v44, %v11977_v2  ;;  %v2675_v44 = vrot.slane %v12750_v63, %v11977_v2 }
0x19ef   :  { %v3175_v45 = vpop.permute.xlu1 %3174  ;;  %v3178_v3 = vpop.permute.xlu0 %3177  ;;  %v3397_v59 = vsel %vm1633_vm10, %v3317_v48, %v3396_v4  ;;  %v2603_v48 = vrot.slane %v12646_v0, %v11977_v2  ;;  %v2655_v0 = vrot.slane %v12739_v24, %v11977_v2  ;;  %v2687_v63 = vrot.slane %v12756_v39, %v11977_v2 }
0x19f0   :  { %v3430_v42 = vsel %vm1434_vm4, %v3397_v59, -inf  ;;  %v3321_v55 = vrot.slane %v3175_v45, %v11977_v2  ;;  %v3325_v14 = vrot.slane %v3178_v3, %v11977_v2  ;;  %v2762_v3 = vsel %vm1631_vm9, %v2647_v5, %v2761_v29 }
0x19f1   :  { %3431 = vmax.xlane.f32.xlu1 %v3430_v42  ;;  %v2753_v56 = vsel %vm1629_vm8, %v2603_v48, %v2752_v38  ;;  %v2659_v59 = vrot.slane %v12741_v43, %v11977_v2  ;;  %v2615_v43 = vrot.slane %v12682_v57, %v11977_v2  ;;  %v2763_v38 = vsel %vm1633_vm10, %v2651_v31, %v2762_v3 }
0x19f2   :  { %v3398_v4 = vsel %vm1627_vm0, %v3325_v14, %v3321_v55  ;;  %v2754_v45 = vsel %vm1631_vm9, %v2607_v9, %v2753_v56  ;;  %v2619_v14 = vrot.slane %v12674_v37, %v11977_v2  ;;  %v2667_v37 = vrot.slane %v12746_v40, %v11977_v2 }
0x19f3   :  { %v3181_v20 = vpop.permute.xlu1 %3180  ;;  %v3184_v1 = vpop.permute.xlu0 %3183  ;;  %v12889_v9 = vsel %vm1633_vm10, %v2611_v52, %v2754_v45  ;;  %v2764_v11 = vsel %vm1627_vm0, %v2659_v59, %v2655_v0  ;;  %v2671_v40 = vrot.slane %v12748_v51, %v11977_v2  ;;  %v2627_v56 = vrot.slane %v12692_v46, %v11977_v2 }
0x19f4   :  { %v3329_v62 = vrot.slane %v3181_v20, %v11977_v2  ;;  %v3333_v33 = vrot.slane %v3184_v1, %v11977_v2  ;;  %v2765_v57 = vsel %vm1629_vm8, %v2663_v58, %v2764_v11  ;;  %v2683_v1 = vrot.slane %v12754_v25, %v11977_v2 }
0x19f5   :  { %v2695_v25 = vrot.slane %v12760_v35, %v11977_v2  ;;  %v2699_v29 = vrot.slane %v12762_v53, %v11977_v2  ;;  %v2623_v51 = vrot.slane %v12694_v47, %v11977_v2  ;;  %v2703_v39 = vrot.slane %v12764_v60, %v11977_v2 }
0x19f6   :  { %v3399_v36 = vsel %vm1629_vm8, %v3329_v62, %v3398_v4  ;;  %v2768_v4 = vsel %vm1627_vm0, %v2679_v18, %v2675_v44  ;;  %v12921_v46 = vsel %vm1434_vm4, %v2763_v38, 2147483647  ;;  %v2691_v53 = vrot.slane %v12758_v32, %v11977_v2 }
0x19f7   :  { %v3187_v42 = vpop.permute.xlu1 %3186  ;;  %v3190_v54 = vpop.permute.xlu0 %3189  ;;  %v3400_v24 = vsel %vm1631_vm9, %v3333_v33, %v3399_v36  ;;  %v2766_v36 = vsel %vm1631_vm9, %v2667_v37, %v2765_v57  ;;  %v2769_v35 = vsel %vm1629_vm8, %v2683_v1, %v2768_v4  ;;  %v2719_v60 = vrot.slane %v12772_v19, %v11977_v2 }
0x19f8   :  { %v3337_v55 = vrot.slane %v3187_v42, %v11977_v2  ;;  %v3341_v48 = vrot.slane %v3190_v54, %v11977_v2  ;;  %v2767_v47 = vsel %vm1633_vm10, %v2671_v40, %v2766_v36  ;;  %v2770_v42 = vsel %vm1631_vm9, %v2687_v63, %v2769_v35 }
0x19f9   :  { %v2772_v52 = vsel %vm1627_vm0, %v2699_v29, %v2695_v25  ;;  %v2707_v58 = vrot.slane %v12766_v30, %v11977_v2  ;;  %v2715_v38 = vrot.slane %v12770_v15, %v11977_v2  ;;  %v2771_v37 = vsel %vm1633_vm10, %v2691_v53, %v2770_v42 }
0x19fa   :  { %v3401_v27 = vsel %vm1633_vm10, %v3337_v55, %v3400_v24  ;;  %v2816_v55 = vshra.s32 %v12921_v46, 16  ;;  %v2773_v18 = vsel %vm1629_vm8, %v2703_v39, %v2772_v52  ;;  %v2711_v24 = vrot.slane %v12768_v13, %v11977_v2 }
0x19fb   :  { %v3193_v10 = vpop.permute.xlu1 %3192  ;;  %v3196_v5 = vpop.permute.xlu0 %3195  ;;  %v3433_v20 = vsel %vm1434_vm4, %v3401_v27, -inf  ;;  %v2723_v30 = vrot.slane %v12774_v12, %v11977_v2  ;;  %v2776_v13 = vsel %vm1627_vm0, %v2719_v60, %v2715_v38  ;;  %v2631_v1 = vrot.slane %v12706_v16, %v11977_v2 }
0x19fc   :  { %v3345_v62 = vrot.slane %v3193_v10, %v11977_v2  ;;  %3434 = vmax.xlane.f32.xlu0 %v3433_v20  ;;  %v3349_v33 = vrot.slane %v3196_v5, %v11977_v2  ;;  %v12949_v10 = vsel %vm1434_vm4, %v2767_v47, 2147483647  ;;  %v2756_v5 = vsel %vm1627_vm0, %v2619_v14, %v2615_v43 }
0x19fd   :  { %v2757_v57 = vsel %vm1629_vm8, %v2623_v51, %v2756_v5  ;;  %v2774_v12 = vsel %vm1631_vm9, %v2707_v58, %v2773_v18  ;;  %v12962_v40 = vcvt.s32.f32 %v2816_v55  ;;  %v2831_v4 = vshra.s32 %v12949_v10, 16 }
0x19fe   :  { %v3402_v31 = vsel %vm1627_vm0, %v3345_v62, %v3341_v48  ;;  %v2727_v48 = vrot.slane %v12776_v21, %v11977_v2  ;;  %v2775_v62 = vsel %vm1633_vm10, %v2711_v24, %v2774_v12  ;;  %v12966_v63 = vsel %vm1434_vm4, %v2771_v37, 2147483647 }
0x19ff   :  { %v3199_v45 = vpop.permute.xlu1 %3198  ;;  %v3202_v3 = vpop.permute.xlu0 %3201  ;;  %v3403_v54 = vsel %vm1629_vm8, %v3349_v33, %v3402_v31  ;;  %v2777_v33 = vsel %vm1629_vm8, %v2723_v30, %v2776_v13  ;;  %v2735_v16 = vrot.slane %v12780_v49, %v11977_v2  ;;  %v2739_v25 = vrot.slane %v12782_v50, %v11977_v2 }
0x1a00   :  { %v3353_v0 = vrot.slane %v3199_v45, %v11977_v2  ;;  %v3357_v59 = vrot.slane %v3202_v3, %v11977_v2  ;;  %v2731_v29 = vrot.slane %v12778_v61, %v11977_v2  ;;  %v2743_v31 = vrot.slane %v12784_v7, %v11977_v2 }
0x1a01   :  { %v2758_v39 = vsel %vm1631_vm9, %v2627_v56, %v2757_v57  ;;  %v2778_v49 = vsel %vm1631_vm9, %v2727_v48, %v2777_v33  ;;  %v12985_v35 = vcvt.s32.f32 %v2831_v4  ;;  %v2846_v61 = vshra.s32 %v12966_v63, 16  ;;  %v17414_v4 = vld [vmem:[#allocation7_spill] sm:$0xff] }
0x1a02   :  { %v3404_v32 = vsel %vm1631_vm9, %v3353_v0, %v3403_v54  ;;  %v2759_v45 = vsel %vm1633_vm10, %v2631_v1, %v2758_v39  ;;  %v12990_v7 = vsel %vm1434_vm4, %v12889_v9, 2147483647  ;;  %v2780_v53 = vsel %vm1627_vm0, %v2739_v25, %v2735_v16  ;;  %v17416_v39 = vld [vmem:[#allocation58_spill] sm:$0xff] }
0x1a03   :  { %v3205_v19 = vpop.permute.xlu1 %3204  ;;  %v3208_v27 = vpop.permute.xlu0 %3207  ;;  %v3405_v11 = vsel %vm1633_vm10, %v3357_v59, %v3404_v32  ;;  %v2747_v56 = vrot.slane %v12786_v22, %v11977_v2  ;;  %v12997_v59 = vsel %vm1434_vm4, %v2775_v62, 2147483647  ;;  %v2779_v47 = vsel %vm1633_vm10, %v2731_v29, %v2778_v49  ;;  %v17417_v49 = vld [vmem:[#allocation57_spill] sm:$0xff] }
0x1a04   :  { %v3436_v44 = vsel %vm1434_vm4, %v3405_v11, -inf  ;;  %v3361_v15 = vrot.slane %v3205_v19, %v11977_v2  ;;  %v3365_v20 = vrot.slane %v3208_v27, %v11977_v2  ;;  %v2781_v42 = vsel %vm1629_vm8, %v2743_v31, %v2780_v53 }
0x1a05   :  { %3437 = vmax.xlane.f32.xlu1 %v3436_v44  ;;  %v2751_v60 = vrot.slane %v12788_v6, %v11977_v2  ;;  %v2786_v22 = vshra.s32 %v12990_v7, 16  ;;  %v13008_v58 = vcvt.s32.f32 %v2846_v61  ;;  %v2861_v32 = vshra.s32 %v12997_v59, 16  ;;  %v17419_v61 = vld [vmem:[#allocation48_spill] sm:$0xff] }
0x1a06   :  { %v3406_v51 = vsel %vm1627_vm0, %v3365_v20, %v3361_v15  ;;  %v13012_v55 = vsel %vm1434_vm4, %v2759_v45, 2147483647  ;;  %v2782_v18 = vsel %vm1631_vm9, %v2747_v56, %v2781_v42  ;;  %v13016_v6 = vsel %vm1434_vm4, %v2779_v47, 2147483647  ;;  %v17420_v42 = vld [vmem:[#allocation60_spill] sm:$0xff] }
0x1a07   :  { %v3211_v14 = vpop.permute.xlu1 %3210  ;;  %v3214_v43 = vpop.permute.xlu0 %3213  ;;  %v2783_v24 = vsel %vm1633_vm10, %v2751_v60, %v2782_v18  ;;  %v13020_v38 = vcvt.s32.f32 %v2786_v22  ;;  %v2801_v19 = vshra.s32 %v13012_v55, 16  ;;  %v13023_v27 = vcvt.s32.f32 %v2861_v32  ;;  %v17421_v22 = vld [vmem:[#allocation61_spill] sm:$0xff] }
0x1a08   :  { %v3369_v21 = vrot.slane %v3211_v14, %v11977_v2  ;;  %v3373_v36 = vrot.slane %v3214_v43, %v11977_v2  ;;  %v2876_v11 = vshra.s32 %v13016_v6, 16  ;;  %v13028_v37 = vsel %vm1434_vm4, %v2783_v24, 2147483647  ;;  %v17412_v14 = vld [vmem:[#allocation56_spill] sm:$0xff]  ;;  %v17413_v43 = vld [vmem:[#allocation55_spill] sm:$0xff]  ;;  %v17422_v24 = vld [vmem:[#allocation62_spill] sm:$0xff] }
0x1a09   :  { %2819 = vmin.xlane.f32.xlu1 %v12962_v40  ;;  %v13031_v30 = vcvt.s32.f32 %v2801_v19  ;;  %v2891_v5 = vshra.s32 %v13028_v37, 16  ;;  %v17423_v19 = vld [vmem:[#allocation63_spill] sm:$0xff] }
0x1a0a   :  { %v3407_v50 = vsel %vm1629_vm8, %v3369_v21, %v3406_v51  ;;  %v13033_v44 = vcvt.s32.f32 %v2876_v11 }
0x1a0b   :  { %v3217_v3 = vpop.permute.xlu1 %3216  ;;  %v3408_v9 = vsel %vm1631_vm9, %v3373_v36, %v3407_v50  ;;  %v13038_v13 = vcvt.s32.f32 %v2891_v5 }
0x1a0c   :  { %v3377_v0 = vrot.slane %v3217_v3, %v11977_v2  ;;  %v17418_v3 = vld [vmem:[#allocation59_spill] sm:$0xff] }
0x1a0d   :  { %2834 = vmin.xlane.f32.xlu1 %v12985_v35 }
0x1a0e   :  { %v3409_v54 = vsel %vm1633_vm10, %v3377_v0, %v3408_v9 }
0x1a0f   :  { %v3439_v52 = vsel %vm1434_vm4, %v3409_v54, -inf }
0x1a10   :  { %3440 = vmax.xlane.f32.xlu0 %v3439_v52 }
0x1a11   :  { %2849 = vmin.xlane.f32.xlu1 %v13008_v58 }
0x1a14   :  { %2789 = vmin.xlane.f32.xlu0 %v13020_v38 }
0x1a15   :  { %2864 = vmin.xlane.f32.xlu1 %v13023_v27 }
0x1a18   :  { %2804 = vmin.xlane.f32.xlu0 %v13031_v30 }
0x1a19   :  { %2879 = vmin.xlane.f32.xlu1 %v13033_v44 }
0x1a1d   :  { %2894 = vmin.xlane.f32.xlu1 %v13038_v13 }
0x1a56   :  { %v13041_v15 = vpop.xlane.xlu0 %3419 }
0x1a57   :  { %v3457_v20 = vrot.slane %v13041_v15, %v11809_v28  ;;  %v3453_v57 = vrot.slane %v13041_v15, %v11644_v8  ;;  %v3469_v1 = vrot.slane %v13041_v15, %v11925_v23  ;;  %v3461_v12 = vrot.slane %v13041_v15, %v11920_v34 }
0x1a58   :  { %v3465_v33 = vrot.slane %v13041_v15, %v17414_v4 }
0x1a59   :  { %vm3651_vm2 = vcmp.eq.f32.partialorder %v12541_v26, %v3457_v20  ;;  %vm3650_vm7 = vcmp.eq.f32.partialorder %v12536_v41, %v3453_v57  ;;  %vm3654_vm15 = vcmp.eq.f32.partialorder %v17412_v14, %v3469_v1  ;;  %vm3652_vm1 = vcmp.eq.f32.partialorder %v17413_v43, %v3461_v12  ;;  %v17415_v41 = vld [vmem:[#allocation49_spill] sm:$0xff]  ;;  %v17424_v57 = vld [vmem:[#allocation50_spill] sm:$0xff]  ;;  %v17425_v1 = vld [vmem:[#allocation64_spill] sm:$0xff] }
0x1a5a   :  { %v3691_v48 = vsel %vm3651_vm2, %v12026_v17, 5  ;;  %v3690_v62 = vsel %vm3650_vm7, %v12026_v17, 5  ;;  %v3694_v16 = vsel %vm3654_vm15, %v12026_v17, 5  ;;  %v3692_v25 = vsel %vm3652_vm1, %v12026_v17, 5 }
0x1a5b   :  { %3734 = vperm.xlu0 %11277, %v3691_v48   ;;  %3731 = vperm.xlu1 %11278, %v3690_v62   ;;  %vm3653_vm3 = vcmp.eq.f32.partialorder %v17415_v41, %v3465_v33  ;;  %v17427_v41 = vld [vmem:[#allocation65_spill] sm:$0xff] }
0x1a5c   :  { %v3693_v21 = vsel %vm3653_vm3, %v12026_v17, 5 }
0x1a5f   :  { %3743 = vperm.xlu0 %11277, %v3694_v16   ;;  %3737 = vperm.xlu1 %11278, %v3692_v25   ;;  %v17426_v25 = vld [vmem:[#allocation66_spill] sm:$0xff] }
0x1a61   :  { %v13062_v26 = vpop.xlane.xlu1 %3422 }
0x1a62   :  { %v3477_v29 = vrot.slane %v13062_v26, %v11809_v28  ;;  %v3473_v31 = vrot.slane %v13062_v26, %v11644_v8  ;;  %v3485_v51 = vrot.slane %v13062_v26, %v17414_v4  ;;  %v3481_v36 = vrot.slane %v13062_v26, %v11920_v34 }
0x1a63   :  { %3740 = vperm.xlu1 %11278, %v3693_v21   ;;  %v3489_v53 = vrot.slane %v13062_v26, %v11925_v23 }
0x1a64   :  { %vm3656_vm5 = vcmp.eq.f32.partialorder %v17416_v39, %v3477_v29  ;;  %vm3655_vm6 = vcmp.eq.f32.partialorder %v17417_v49, %v3473_v31  ;;  %vm3658_vm2 = vcmp.eq.f32.partialorder %v17418_v3, %v3485_v51  ;;  %vm3657_vm7 = vcmp.eq.f32.partialorder %v17419_v61, %v3481_v36  ;;  %v17428_v31 = vld [vmem:[#allocation67_spill] sm:$0xff]  ;;  %v17430_v3 = vld [vmem:[#allocation68_spill] sm:$0xff] }
0x1a65   :  { %v3696_v50 = vsel %vm3656_vm5, %v12026_v17, 5  ;;  %v3695_v45 = vsel %vm3655_vm6, %v12026_v17, 5  ;;  %v3698_v56 = vsel %vm3658_vm2, %v12026_v17, 5  ;;  %v3697_v47 = vsel %vm3657_vm7, %v12026_v17, 5  ;;  %v17429_v51 = vld [vmem:[#allocation51_spill] sm:$0xff] }
0x1a66   :  { %3749 = vperm.xlu0 %11277, %v3696_v50   ;;  %vm3659_vm15 = vcmp.eq.f32.partialorder %v17420_v42, %v3489_v53 }
0x1a67   :  { %3746 = vperm.xlu1 %11278, %v3695_v45   ;;  %v3699_v52 = vsel %vm3659_vm15, %v12026_v17, 5 }
0x1a6a   :  { %3755 = vperm.xlu0 %11277, %v3698_v56   ;;  %v13082_v0 = vpop.xlane.xlu0 %3425  ;;  %v17431_v56 = vld [vmem:[#allocation69_spill] sm:$0xff] }
0x1a6b   :  { %3752 = vperm.xlu1 %11278, %v3697_v47   ;;  %v3493_v60 = vrot.slane %v13082_v0, %v11644_v8  ;;  %v3497_v9 = vrot.slane %v13082_v0, %v11809_v28  ;;  %v3501_v54 = vrot.slane %v13082_v0, %v11920_v34  ;;  %v3505_v18 = vrot.slane %v13082_v0, %v17414_v4 }
0x1a6c   :  { %v3509_v11 = vrot.slane %v13082_v0, %v11925_v23 }
0x1a6d   :  { %vm3660_vm1 = vcmp.eq.f32.partialorder %v17421_v22, %v3493_v60  ;;  %vm3661_vm3 = vcmp.eq.f32.partialorder %v17422_v24, %v3497_v9  ;;  %vm3662_vm5 = vcmp.eq.f32.partialorder %v17423_v19, %v3501_v54  ;;  %vm3663_vm6 = vcmp.eq.f32.partialorder %v17424_v57, %v3505_v18  ;;  %v17432_v9 = vld [vmem:[#allocation71_spill] sm:$0xff]  ;;  %v17433_v54 = vld [vmem:[#allocation70_spill] sm:$0xff]  ;;  %v17434_v18 = vld [vmem:[#allocation72_spill] sm:$0xff] }
0x1a6e   :  { %v3700_v32 = vsel %vm3660_vm1, %v12026_v17, 5  ;;  %v3701_v5 = vsel %vm3661_vm3, %v12026_v17, 5  ;;  %v3702_v20 = vsel %vm3662_vm5, %v12026_v17, 5  ;;  %vm3664_vm2 = vcmp.eq.f32.partialorder %v17425_v1, %v3509_v11  ;;  %v17435_v24 = vld [vmem:[#allocation52_spill] sm:$0xff] }
0x1a6f   :  { %3758 = vperm.xlu1 %11278, %v3699_v52   ;;  %3761 = vperm.xlu0 %11277, %v3700_v32   ;;  %v3703_v48 = vsel %vm3663_vm6, %v12026_v17, 5  ;;  %v3704_v62 = vsel %vm3664_vm2, %v12026_v17, 5 }
0x1a73   :  { %3764 = vperm.xlu1 %11278, %v3701_v5   ;;  %3767 = vperm.xlu0 %11277, %v3702_v20  }
0x1a75   :  { %v13105_v12 = vpop.xlane.xlu0 %3428 }
0x1a76   :  { %v3517_v14 = vrot.slane %v13105_v12, %v11809_v28  ;;  %v3513_v43 = vrot.slane %v13105_v12, %v11644_v8  ;;  %v3525_v33 = vrot.slane %v13105_v12, %v17414_v4  ;;  %v3521_v16 = vrot.slane %v13105_v12, %v11920_v34 }
0x1a77   :  { %3770 = vperm.xlu1 %11278, %v3703_v48   ;;  %3773 = vperm.xlu0 %11277, %v3704_v62   ;;  %v3529_v36 = vrot.slane %v13105_v12, %v11925_v23  ;;  %v17436_v62 = vld [vmem:[#allocation74_spill] sm:$0xff] }
0x1a78   :  { %vm3666_vm7 = vcmp.eq.f32.partialorder %v17426_v25, %v3517_v14  ;;  %vm3665_vm15 = vcmp.eq.f32.partialorder %v17427_v41, %v3513_v43  ;;  %vm3668_vm1 = vcmp.eq.f32.partialorder %v17428_v31, %v3525_v33  ;;  %vm3667_vm3 = vcmp.eq.f32.partialorder %v17429_v51, %v3521_v16  ;;  %v17437_v14 = vld [vmem:[#allocation73_spill] sm:$0xff]  ;;  %v17438_v16 = vld [vmem:[#allocation75_spill] sm:$0xff] }
0x1a79   :  { %v3706_v21 = vsel %vm3666_vm7, %v12026_v17, 5  ;;  %v3705_v29 = vsel %vm3665_vm15, %v12026_v17, 5  ;;  %v3708_v49 = vsel %vm3668_vm1, %v12026_v17, 5  ;;  %v3707_v50 = vsel %vm3667_vm3, %v12026_v17, 5  ;;  %v17439_v25 = vld [vmem:[#allocation53_spill] sm:$0xff] }
0x1a7a   :  { %vm3669_vm5 = vcmp.eq.f32.partialorder %v17430_v3, %v3529_v36  ;;  %v17440_v36 = vld [vmem:[#allocation76_spill] sm:$0xff] }
0x1a7b   :  { %3779 = vperm.xlu0 %11277, %v3706_v21   ;;  %3776 = vperm.xlu1 %11278, %v3705_v29   ;;  %v3709_v42 = vsel %vm3669_vm5, %v12026_v17, 5 }
0x1a7e   :  { %v13125_v39 = vpop.xlane.xlu1 %3431 }
0x1a7f   :  { %3785 = vperm.xlu0 %11277, %v3708_v49   ;;  %3782 = vperm.xlu1 %11278, %v3707_v50   ;;  %v3533_v45 = vrot.slane %v13125_v39, %v11644_v8  ;;  %v3541_v61 = vrot.slane %v13125_v39, %v11920_v34  ;;  %v3537_v53 = vrot.slane %v13125_v39, %v11809_v28 }
0x1a80   :  { %v3549_v60 = vrot.slane %v13125_v39, %v11925_v23  ;;  %v3545_v22 = vrot.slane %v13125_v39, %v17414_v4 }
0x1a81   :  { %vm3670_vm6 = vcmp.eq.f32.partialorder %v17431_v56, %v3533_v45  ;;  %vm3672_vm2 = vcmp.eq.f32.partialorder %v17432_v9, %v3541_v61  ;;  %vm3671_vm7 = vcmp.eq.f32.partialorder %v17433_v54, %v3537_v53  ;;  %v17441_v45 = vld [vmem:[#allocation77_spill] sm:$0xff]  ;;  %v17442_v56 = vld [vmem:[#allocation79_spill] sm:$0xff]  ;;  %v17444_v54 = vld [vmem:[#allocation80_spill] sm:$0xff] }
0x1a82   :  { %v3710_v47 = vsel %vm3670_vm6, %v12026_v17, 5  ;;  %v3712_v52 = vsel %vm3672_vm2, %v12026_v17, 5  ;;  %v3711_v32 = vsel %vm3671_vm7, %v12026_v17, 5  ;;  %vm3674_vm15 = vcmp.eq.f32.partialorder %v17434_v18, %v3549_v60 }
0x1a83   :  { %3791 = vperm.xlu0 %11277, %v3710_v47   ;;  %3788 = vperm.xlu1 %11278, %v3709_v42   ;;  %vm3673_vm1 = vcmp.eq.f32.partialorder %v17435_v24, %v3545_v22  ;;  %v3714_v11 = vsel %vm3674_vm15, %v12026_v17, 5  ;;  %v17443_v47 = vld [vmem:[#allocation78_spill] sm:$0xff] }
0x1a84   :  { %v3713_v5 = vsel %vm3673_vm1, %v12026_v17, 5  ;;  %v17445_v22 = vld [vmem:[#allocation54_spill] sm:$0xff] }
0x1a87   :  { %3797 = vperm.xlu0 %11277, %v3712_v52   ;;  %3794 = vperm.xlu1 %11278, %v3711_v32  }
0x1a89   :  { %v13149_v19 = vpop.xlane.xlu0 %3434 }
0x1a8a   :  { %v3557_v20 = vrot.slane %v13149_v19, %v11809_v28  ;;  %v3553_v57 = vrot.slane %v13149_v19, %v11644_v8  ;;  %v3565_v1 = vrot.slane %v13149_v19, %v17414_v4  ;;  %v3561_v48 = vrot.slane %v13149_v19, %v11920_v34 }
0x1a8b   :  { %3803 = vperm.xlu0 %11277, %v3714_v11   ;;  %3800 = vperm.xlu1 %11278, %v3713_v5   ;;  %v3569_v41 = vrot.slane %v13149_v19, %v11925_v23 }
0x1a8c   :  { %vm3676_vm3 = vcmp.eq.f32.partialorder %v17436_v62, %v3557_v20  ;;  %vm3675_vm5 = vcmp.eq.f32.partialorder %v17437_v14, %v3553_v57  ;;  %vm3678_vm6 = vcmp.eq.f32.partialorder %v17438_v16, %v3565_v1  ;;  %vm3677_vm2 = vcmp.eq.f32.partialorder %v17439_v25, %v3561_v48  ;;  %v17446_v57 = vld [vmem:[#allocation82_spill] sm:$0xff]  ;;  %v17447_v1 = vld [vmem:[#allocation81_spill] sm:$0xff]  ;;  %v17448_v14 = vld [vmem:[#allocation84_spill] sm:$0xff] }
0x1a8d   :  { %v3716_v43 = vsel %vm3676_vm3, %v12026_v17, 5  ;;  %v3715_v33 = vsel %vm3675_vm5, %v12026_v17, 5  ;;  %v3718_v29 = vsel %vm3678_vm6, %v12026_v17, 5  ;;  %v3717_v31 = vsel %vm3677_vm2, %v12026_v17, 5  ;;  %v17450_v16 = vld [vmem:[#allocation17_spill] sm:$0xff] }
0x1a8e   :  { %vm3679_vm7 = vcmp.eq.f32.partialorder %v17440_v36, %v3569_v41  ;;  %v4268_v25 = vadd.f32 %v17450_v16, %v13041_v15  ;;  %v17455_v15 = vld [vmem:[#allocation12_spill] sm:$0xff] }
0x1a8f   :  { %3809 = vperm.xlu0 %11277, %v3716_v43   ;;  %3806 = vperm.xlu1 %11278, %v3715_v33   ;;  %v3719_v61 = vsel %vm3679_vm7, %v12026_v17, 5  ;;  %v17449_v43 = vld [vmem:[#allocation83_spill] sm:$0xff] }
0x1a92   :  { %v13169_v21 = vpop.xlane.xlu1 %3437 }
0x1a93   :  { %3815 = vperm.xlu0 %11277, %v3718_v29   ;;  %3812 = vperm.xlu1 %11278, %v3717_v31   ;;  %v3573_v51 = vrot.slane %v13169_v21, %v11644_v8  ;;  %v3581_v49 = vrot.slane %v13169_v21, %v11920_v34  ;;  %v3577_v50 = vrot.slane %v13169_v21, %v11809_v28  ;;  %v17451_v31 = vld [vmem:[#allocation85_spill] sm:$0xff] }
0x1a94   :  { %v3589_v53 = vrot.slane %v13169_v21, %v11925_v23  ;;  %v3585_v42 = vrot.slane %v13169_v21, %v17414_v4 }
0x1a95   :  { %vm3680_vm15 = vcmp.eq.f32.partialorder %v17441_v45, %v3573_v51  ;;  %vm3682_vm1 = vcmp.eq.f32.partialorder %v17442_v56, %v3581_v49  ;;  %vm3681_vm3 = vcmp.eq.f32.partialorder %v17443_v47, %v3577_v50  ;;  %v17452_v51 = vld [vmem:[#allocation18_spill] sm:$0xff]  ;;  %v17459_v56 = vld [vmem:[#allocation15_spill] sm:$0xff] }
0x1a96   :  { %v3720_v3 = vsel %vm3680_vm15, %v12026_v17, 5  ;;  %v3722_v60 = vsel %vm3682_vm1, %v12026_v17, 5  ;;  %v3721_v9 = vsel %vm3681_vm3, %v12026_v17, 5  ;;  %vm3684_vm5 = vcmp.eq.f32.partialorder %v17444_v54, %v3589_v53  ;;  %v17453_v49 = vld [vmem:[#allocation14_spill] sm:$0xff]  ;;  %v17464_v54 = vld [vmem:[#allocation20_spill] sm:$0xff] }
0x1a97   :  { %3821 = vperm.xlu0 %11277, %v3720_v3   ;;  %3818 = vperm.xlu1 %11278, %v3719_v61   ;;  %vm3683_vm6 = vcmp.eq.f32.partialorder %v17445_v22, %v3585_v42  ;;  %v3724_v32 = vsel %vm3684_vm5, %v12026_v17, 5  ;;  %v4269_v36 = vadd.f32 %v17452_v51, %v13062_v26  ;;  %v13221_v50 = vadd.f32 %v4268_v25, %v17453_v49  ;;  %v17458_v26 = vld [vmem:[#allocation19_spill] sm:$0xff]  ;;  %v17480_v51 = vld [vmem:[#allocation22_spill] sm:$0xff] }
0x1a98   :  { %v3723_v18 = vsel %vm3683_vm6, %v12026_v17, 5  ;;  %v13229_v61 = vadd.f32 %v4268_v25, %v17455_v15  ;;  %v4270_v53 = vadd.f32 %v17458_v26, %v13082_v0  ;;  %v13251_v0 = vpop.xlane.xlu1 %2819  ;;  %v4271_v22 = vadd.f32 %v17464_v54, %v13105_v12  ;;  %v17470_v12 = vld [vmem:[#allocation16_spill] sm:$0xff] }
0x1a99   :  { %17454 = vst [vmem:[#allocation56_spill] sm:$0xff] %v13221_v50  ;;  %v13226_v3 = vadd.f32 %v4269_v36, %v17455_v15  ;;  %v13236_v47 = vadd.f32 %v4269_v36, %v17459_v56  ;;  %v13239_v42 = vadd.f32 %v4269_v36, %v17453_v49  ;;  %vm2821_vm6 = vcmp.eq.f32.partialorder %v12962_v40, %v13251_v0 }
0x1a9a   :  { %17457 = vst [vmem:[#allocation7_spill] sm:$0xff] %v13229_v61  ;;  %v2845_v40 = vand.u32 65535, %v12966_v63 }
0x1a9b   :  { %3827 = vperm.xlu0 %11277, %v3722_v60   ;;  %3824 = vperm.xlu1 %11278, %v3721_v9   ;;  %17456 = vst [vmem:[#allocation55_spill] sm:$0xff] %v13226_v3  ;;  %17460 = vst [vmem:[#allocation49_spill] sm:$0xff] %v13236_v47  ;;  %v13244_v60 = vadd.f32 %v4270_v53, %v17455_v15  ;;  %v13247_v9 = vadd.f32 %v4268_v25, %v17459_v56 }
0x1a9c   :  { %17461 = vst [vmem:[#allocation58_spill] sm:$0xff] %v13239_v42 }
0x1a9d   :  { %v13193_v52 = vpop.xlane.xlu0 %3440  ;;  %17462 = vst [vmem:[#allocation57_spill] sm:$0xff] %v13244_v60  ;;  %17463 = vst [vmem:[#allocation59_spill] sm:$0xff] %v13247_v9 }
0x1a9e   :  { %v3597_v24 = vrot.slane %v13193_v52, %v11809_v28  ;;  %v3593_v11 = vrot.slane %v13193_v52, %v11644_v8  ;;  %v3605_v5 = vrot.slane %v13193_v52, %v17414_v4  ;;  %v3601_v20 = vrot.slane %v13193_v52, %v11920_v34 }
0x1a9f   :  { %3833 = vperm.xlu0 %11277, %v3724_v32   ;;  %3830 = vperm.xlu1 %11278, %v3723_v18   ;;  %v3609_v33 = vrot.slane %v13193_v52, %v11925_v23  ;;  %v17465_v32 = vld [vmem:[#allocation13_spill] sm:$0xff] }
0x1aa0   :  { %vm3686_vm2 = vcmp.eq.f32.partialorder %v17446_v57, %v3597_v24  ;;  %vm3685_vm7 = vcmp.eq.f32.partialorder %v17447_v1, %v3593_v11  ;;  %vm3688_vm15 = vcmp.eq.f32.partialorder %v17448_v14, %v3605_v5  ;;  %vm3687_vm1 = vcmp.eq.f32.partialorder %v17449_v43, %v3601_v20  ;;  %v13269_v20 = vpop.xlane.xlu1 %2834 }
0x1aa1   :  { %v3726_v48 = vsel %vm3686_vm2, %v12026_v17, 5  ;;  %v3725_v62 = vsel %vm3685_vm7, %v12026_v17, 5  ;;  %v3728_v41 = vsel %vm3688_vm15, %v12026_v17, 5  ;;  %v3727_v29 = vsel %vm3687_vm1, %v12026_v17, 5 }
0x1aa2   :  { %vm3689_vm3 = vcmp.eq.f32.partialorder %v17451_v31, %v3609_v33  ;;  %v13256_v18 = vadd.f32 %v4269_v36, %v17465_v32  ;;  %v13259_v24 = vadd.f32 %v4270_v53, %v17453_v49  ;;  %v13264_v11 = vadd.f32 %v4271_v22, %v17453_v49 }
0x1aa3   :  { %3839 = vperm.xlu0 %11277, %v3726_v48   ;;  %3836 = vperm.xlu1 %11278, %v3725_v62   ;;  %v3729_v45 = vsel %vm3689_vm3, %v12026_v17, 5  ;;  %v13267_v5 = vadd.f32 %v4268_v25, %v17465_v32  ;;  %v13274_v57 = vadd.f32 %v4268_v25, %v17470_v12  ;;  %v13277_v1 = vadd.f32 %v4270_v53, %v17459_v56  ;;  %v17473_v62 = vld [vmem:[#allocation21_spill] sm:$0xff] }
0x1aa4   :  { %17466 = vst [vmem:[#allocation48_spill] sm:$0xff] %v13256_v18  ;;  %17467 = vst [vmem:[#allocation60_spill] sm:$0xff] %v13259_v24  ;;  %v13281_v48 = vpop.xlane.xlu1 %2849  ;;  %v4272_v14 = vadd.f32 %v17473_v62, %v13125_v39  ;;  %v13286_v43 = vadd.f32 %v4270_v53, %v17465_v32  ;;  %v13289_v33 = vadd.f32 %v4271_v22, %v17455_v15 }
0x1aa5   :  { %17468 = vst [vmem:[#allocation61_spill] sm:$0xff] %v13264_v11  ;;  %17469 = vst [vmem:[#allocation62_spill] sm:$0xff] %v13267_v5  ;;  %v13297_v25 = vadd.f32 %v4269_v36, %v17470_v12  ;;  %v13304_v39 = vadd.f32 %v4270_v53, %v17470_v12  ;;  %v4273_v36 = vadd.f32 %v17480_v51, %v13149_v19  ;;  %v17485_v51 = vld [vmem:[#allocation23_spill] sm:$0xff] }
0x1aa6   :  { %17471 = vst [vmem:[#allocation63_spill] sm:$0xff] %v13274_v57  ;;  %17472 = vst [vmem:[#allocation50_spill] sm:$0xff] %v13277_v1  ;;  %v13294_v16 = vadd.f32 %v4272_v14, %v17453_v49  ;;  %v13318_v26 = vadd.f32 %v4272_v14, %v17459_v56  ;;  %v13321_v53 = vadd.f32 %v4272_v14, %v17455_v15 }
0x1aa7   :  { %3845 = vperm.xlu0 %11277, %v3728_v41   ;;  %3842 = vperm.xlu1 %11278, %v3727_v29   ;;  %17474 = vst [vmem:[#allocation64_spill] sm:$0xff] %v13286_v43  ;;  %17475 = vst [vmem:[#allocation66_spill] sm:$0xff] %v13289_v33  ;;  %v13307_v29 = vadd.f32 %v4271_v22, %v17459_v56  ;;  %v13326_v54 = vadd.f32 %v4273_v36, %v17455_v15 }
0x1aa8   :  { %17476 = vst [vmem:[#allocation65_spill] sm:$0xff] %v13294_v16  ;;  %17477 = vst [vmem:[#allocation67_spill] sm:$0xff] %v13297_v25  ;;  %v13299_v41 = vpop.xlane.xlu1 %2864  ;;  %v13329_v62 = vadd.f32 %v4271_v22, %v17465_v32  ;;  %vm2836_vm2 = vcmp.eq.f32.partialorder %v12985_v35, %v13269_v20  ;;  %vm2851_vm15 = vcmp.eq.f32.partialorder %v13008_v58, %v13281_v48  ;;  %v2860_v35 = vand.u32 65535, %v12997_v59 }
0x1aa9   :  { %17478 = vst [vmem:[#allocation51_spill] sm:$0xff] %v13304_v39  ;;  %17479 = vst [vmem:[#allocation68_spill] sm:$0xff] %v13307_v29  ;;  %vm2866_vm1 = vcmp.eq.f32.partialorder %v13023_v27, %v13299_v41 }
0x1aaa   :  { %17481 = vst [vmem:[#allocation69_spill] sm:$0xff] %v13318_v26  ;;  %17482 = vst [vmem:[#allocation71_spill] sm:$0xff] %v13321_v53 }
0x1aab   :  { %4357 = vperm.xlu0 %11277, %v13221_v50   ;;  %3848 = vperm.xlu1 %11278, %v3729_v45   ;;  %v13315_v45 = vpop.xlane.xlu0 %2789  ;;  %17483 = vst [vmem:[#allocation70_spill] sm:$0xff] %v13326_v54  ;;  %17484 = vst [vmem:[#allocation72_spill] sm:$0xff] %v13329_v62 }
0x1aac   :  { %v13311_v31 = vpop.xlane.xlu1 %2879  ;;  %vm2791_vm7 = vcmp.eq.f32.partialorder %v13020_v38, %v13315_v45  ;;  %v2862_v38 = vcvt.s32.f32 %v2860_v35 }
0x1aad   :  { %vm2881_vm3 = vcmp.eq.f32.partialorder %v13033_v44, %v13311_v31 }
0x1aaf   :  { %4375 = vperm.xlu0 %11277, %v13226_v3   ;;  %4360 = vperm.xlu1 %11278, %v13229_v61   ;;  %v13333_v19 = vpop.xlane.xlu0 %2804 }
0x1ab0   :  { %vm2806_vm5 = vcmp.eq.f32.partialorder %v13031_v30, %v13333_v19 }
0x1ab3   :  { %4378 = vperm.xlu0 %11277, %v13236_v47   ;;  %4372 = vperm.xlu1 %11278, %v13239_v42  }
0x1ab7   :  { %4390 = vperm.xlu0 %11277, %v13244_v60   ;;  %4363 = vperm.xlu1 %11278, %v13247_v9   ;;  %v13364_v60 = vadd.f32 %v4272_v14, %v17470_v12 }
0x1ab9   :  { %17490 = vst [vmem:[#allocation53_spill] sm:$0xff] %v13364_v60 }
0x1abb   :  { %4381 = vperm.xlu0 %11277, %v13256_v18   ;;  %4387 = vperm.xlu1 %11278, %v13259_v24   ;;  %v13355_v18 = vadd.f32 %v4271_v22, %v17470_v12  ;;  %v17492_v22 = vld [vmem:[#allocation24_spill] sm:$0xff] }
0x1abc   :  { %v4275_v3 = vadd.f32 %v17492_v22, %v13193_v52  ;;  %v13393_v52 = vadd.f32 %v4273_v36, %v17465_v32 }
0x1abd   :  { %17489 = vst [vmem:[#allocation75_spill] sm:$0xff] %v13355_v18 }
0x1abe   :  { %17496 = vst [vmem:[#allocation80_spill] sm:$0xff] %v13393_v52 }
0x1abf   :  { %4402 = vperm.xlu0 %11277, %v13264_v11   ;;  %4366 = vperm.xlu1 %11278, %v13267_v5  }
0x1ac3   :  { %4369 = vperm.xlu0 %11277, %v13274_v57   ;;  %4393 = vperm.xlu1 %11278, %v13277_v1  }
0x1ac7   :  { %4396 = vperm.xlu0 %11277, %v13286_v43   ;;  %4405 = vperm.xlu1 %11278, %v13289_v33   ;;  %v13343_v43 = vadd.f32 %v4273_v36, %v17453_v49 }
0x1ac9   :  { %17487 = vst [vmem:[#allocation74_spill] sm:$0xff] %v13343_v43 }
0x1acb   :  { %4417 = vperm.xlu0 %11277, %v13294_v16   ;;  %4384 = vperm.xlu1 %11278, %v13297_v25   ;;  %v4274_v16 = vadd.f32 %v17485_v51, %v13169_v21 }
0x1acd   :  { %v13378_v42 = vadd.f32 %v4274_v16, %v17459_v56 }
0x1acf   :  { %4399 = vperm.xlu0 %11277, %v13304_v39   ;;  %4408 = vperm.xlu1 %11278, %v13307_v29   ;;  %v13331_v39 = vpop.xlane.xlu1 %2894  ;;  %17493 = vst [vmem:[#allocation77_spill] sm:$0xff] %v13378_v42  ;;  %v13424_v29 = vadd.f32 %v4275_v3, %v17470_v12 }
0x1ad1   :  { %17501 = vst [vmem:[#allocation83_spill] sm:$0xff] %v13424_v29 }
0x1ad3   :  { %4423 = vperm.xlu0 %11277, %v13318_v26   ;;  %4420 = vperm.xlu1 %11278, %v13321_v53   ;;  %v13340_v26 = vadd.f32 %v4272_v14, %v17465_v32  ;;  %v13381_v14 = vadd.f32 %v4274_v16, %v17455_v15 }
0x1ad5   :  { %17486 = vst [vmem:[#allocation52_spill] sm:$0xff] %v13340_v26  ;;  %17494 = vst [vmem:[#allocation79_spill] sm:$0xff] %v13381_v14 }
0x1ad7   :  { %4435 = vperm.xlu0 %11277, %v13326_v54   ;;  %4411 = vperm.xlu1 %11278, %v13329_v62   ;;  %v13352_v54 = vadd.f32 %v4274_v16, %v17453_v49  ;;  %v13412_v62 = vadd.f32 %v4274_v16, %v17470_v12 }
0x1ad9   :  { %17488 = vst [vmem:[#allocation73_spill] sm:$0xff] %v13352_v54  ;;  %17499 = vst [vmem:[#allocation81_spill] sm:$0xff] %v13412_v62 }
0x1ada   :  { %v13345_v57 = vpop.permute.xlu1 %3731  ;;  %v13347_v11 = vpop.permute.xlu0 %3734 }
0x1adb   :  { %4426 = vperm.xlu0 %11277, %v13340_v26   ;;  %4432 = vperm.xlu1 %11278, %v13343_v43   ;;  %v13367_v26 = vadd.f32 %v4273_v36, %v17459_v56 }
0x1add   :  { %17491 = vst [vmem:[#allocation76_spill] sm:$0xff] %v13367_v26 }
0x1ade   :  { %v13357_v21 = vpop.permute.xlu1 %3737  ;;  %v13361_v51 = vpop.permute.xlu0 %3743 }
0x1adf   :  { %4447 = vperm.xlu0 %11277, %v13352_v54   ;;  %4414 = vperm.xlu1 %11278, %v13355_v18   ;;  %v13400_v18 = vadd.f32 %v4274_v16, %v17465_v32 }
0x1ae1   :  { %17497 = vst [vmem:[#allocation54_spill] sm:$0xff] %v13400_v18 }
0x1ae2   :  { %v13369_v47 = vpop.permute.xlu1 %3740 }
0x1ae3   :  { %4429 = vperm.xlu0 %11277, %v13364_v60   ;;  %4438 = vperm.xlu1 %11278, %v13367_v26   ;;  %v13390_v26 = vadd.f32 %v4275_v3, %v17455_v15 }
0x1ae5   :  { %v13375_v54 = vpop.permute.xlu0 %3749  ;;  %17495 = vst [vmem:[#allocation78_spill] sm:$0xff] %v13390_v26 }
0x1ae6   :  { %v13383_v61 = vpop.permute.xlu1 %3746 }
0x1ae7   :  { %4453 = vperm.xlu0 %11277, %v13378_v42   ;;  %4450 = vperm.xlu1 %11278, %v13381_v14   ;;  %v13403_v42 = vadd.f32 %v4275_v3, %v17453_v49 }
0x1ae9   :  { %v13387_v60 = vpop.permute.xlu0 %3755  ;;  %17498 = vst [vmem:[#allocation82_spill] sm:$0xff] %v13403_v42 }
0x1aea   :  { %v13395_v22 = vpop.permute.xlu1 %3752 }
0x1aeb   :  { %4465 = vperm.xlu0 %11277, %v13390_v26   ;;  %4441 = vperm.xlu1 %11278, %v13393_v52   ;;  %v13415_v26 = vadd.f32 %v4273_v36, %v17470_v12  ;;  %v13436_v36 = vadd.f32 %v4275_v3, %v17465_v32 }
0x1aed   :  { %17500 = vst [vmem:[#allocation84_spill] sm:$0xff] %v13415_v26  ;;  %17503 = vst [vmem:[#allocation85_spill] sm:$0xff] %v13436_v36 }
0x1aee   :  { %v13405_v14 = vpop.permute.xlu1 %3758  ;;  %v13407_v43 = vpop.permute.xlu0 %3761 }
0x1aef   :  { %4456 = vperm.xlu0 %11277, %v13400_v18   ;;  %4462 = vperm.xlu1 %11278, %v13403_v42   ;;  %v13427_v18 = vadd.f32 %v4275_v3, %v17459_v56 }
0x1af1   :  { %17502 = vst [vmem:[#allocation17_spill] sm:$0xff] %v13427_v18 }
0x1af2   :  { %v13417_v52 = vpop.permute.xlu1 %3764  ;;  %v13419_v53 = vpop.permute.xlu0 %3767 }
0x1af3   :  { %4459 = vperm.xlu0 %11277, %v13412_v62   ;;  %4444 = vperm.xlu1 %11278, %v13415_v26  }
0x1af6   :  { %v13429_v42 = vpop.permute.xlu1 %3770  ;;  %v13431_v16 = vpop.permute.xlu0 %3773 }
0x1af7   :  { %4474 = vperm.xlu0 %11277, %v13424_v29   ;;  %4468 = vperm.xlu1 %11278, %v13427_v18  }
0x1afa   :  { %v13438_v62 = vpop.permute.xlu1 %3776  ;;  %v13440_v26 = vpop.permute.xlu0 %3779 }
0x1afb   :  { %17504 = vst [vmem:[#allocation18_spill] sm:$0xff] %v13438_v62  ;;  %17505 = vst [vmem:[#allocation14_spill] sm:$0xff] %v13440_v26  ;;  %4471 = vperm.xlu1 %11278, %v13436_v36  }
0x1afe   :  { %v13443_v25 = vpop.permute.xlu1 %3782  ;;  %v13445_v33 = vpop.permute.xlu0 %3785 }
0x1aff   :  { %17506 = vst [vmem:[#allocation12_spill] sm:$0xff] %v13443_v25  ;;  %17507 = vst [vmem:[#allocation19_spill] sm:$0xff] %v13445_v33  ;;  %v2800_v25 = vand.u32 65535, %v13012_v55 }
0x1b02   :  { %v13447_v1 = vpop.permute.xlu1 %3788  ;;  %v13449_v5 = vpop.permute.xlu0 %3791 }
0x1b03   :  { %17508 = vst [vmem:[#allocation15_spill] sm:$0xff] %v13447_v1  ;;  %17509 = vst [vmem:[#allocation20_spill] sm:$0xff] %v13449_v5  ;;  %v2802_v5 = vcvt.s32.f32 %v2800_v25 }
0x1b06   :  { %v13451_v29 = vpop.permute.xlu1 %3794  ;;  %v13453_v18 = vpop.permute.xlu0 %3797 }
0x1b07   :  { %17510 = vst [vmem:[#allocation13_spill] sm:$0xff] %v13451_v29  ;;  %17511 = vst [vmem:[#allocation16_spill] sm:$0xff] %v13453_v18  ;;  %v2815_v18 = vand.u32 65535, %v12921_v46  ;;  %v2807_v29 = vsel %vm2806_vm5, %v2802_v5, inf  ;;  %vm2896_vm5 = vcmp.eq.f32.partialorder %v13038_v13, %v13331_v39 }
0x1b09   :  { %v2817_v55 = vcvt.s32.f32 %v2815_v18 }
0x1b0a   :  { %v13455_v3 = vpop.permute.xlu1 %3800  ;;  %v13457_v24 = vpop.permute.xlu0 %3803 }
0x1b0b   :  { %17512 = vst [vmem:[#allocation21_spill] sm:$0xff] %v13455_v3  ;;  %17513 = vst [vmem:[#allocation22_spill] sm:$0xff] %v13457_v24 }
0x1b0e   :  { %v13459_v62 = vpop.permute.xlu1 %3806  ;;  %v13461_v26 = vpop.permute.xlu0 %3809 }
0x1b0f   :  { %17514 = vst [vmem:[#allocation23_spill] sm:$0xff] %v13459_v62  ;;  %17515 = vst [vmem:[#allocation24_spill] sm:$0xff] %v13461_v26  ;;  %v2822_v26 = vsel %vm2821_vm6, %v2817_v55, inf  ;;  %v2867_v55 = vsel %vm2866_vm1, %v2862_v38, inf }
0x1b12   :  { %v13464_v36 = vpop.permute.xlu1 %3812  ;;  %v13466_v33 = vpop.permute.xlu0 %3815 }
0x1b13   :  { %17516 = vst [vmem:[#allocation86_spill] sm:$0xff] %v13464_v36  ;;  %17517 = vst [vmem:[#allocation87_spill] sm:$0xff] %v13466_v33  ;;  %v2830_v36 = vand.u32 65535, %v12949_v10  ;;  %v2785_v33 = vand.u32 65535, %v12990_v7 }
0x1b15   :  { %v2832_v46 = vcvt.s32.f32 %v2830_v36  ;;  %v2787_v18 = vcvt.s32.f32 %v2785_v33  ;;  %v2875_v33 = vand.u32 65535, %v13016_v6 }
0x1b16   :  { %v13471_v3 = vpop.permute.xlu1 %3818  ;;  %2808 = vmin.xlane.f32.xlu0 %v2807_v29  ;;  %v13473_v24 = vpop.permute.xlu0 %3821  ;;  %v2847_v29 = vcvt.s32.f32 %v2845_v40  ;;  %v2890_v40 = vand.u32 65535, %v13028_v37 }
0x1b17   :  { %17518 = vst [vmem:[#allocation88_spill] sm:$0xff] %v13471_v3  ;;  %17519 = vst [vmem:[#allocation89_spill] sm:$0xff] %v13473_v24  ;;  %v2837_v5 = vsel %vm2836_vm2, %v2832_v46, inf  ;;  %v2792_v25 = vsel %vm2791_vm7, %v2787_v18, inf  ;;  %v2877_v59 = vcvt.s32.f32 %v2875_v33 }
0x1b18   :  { %v2892_v6 = vcvt.s32.f32 %v2890_v40 }
0x1b19   :  { %v2882_v18 = vsel %vm2881_vm3, %v2877_v59, inf }
0x1b1a   :  { %v13479_v62 = vpop.permute.xlu1 %3824  ;;  %2823 = vmin.xlane.f32.xlu0 %v2822_v26  ;;  %v13481_v30 = vpop.permute.xlu0 %3827  ;;  %v2852_v26 = vsel %vm2851_vm15, %v2847_v29, inf }
0x1b1b   :  { %17520 = vst [vmem:[#allocation90_spill] sm:$0xff] %v13479_v62  ;;  %17521 = vst [vmem:[#allocation91_spill] sm:$0xff] %v13481_v30 }
0x1b1e   :  { %v13488_v10 = vpop.permute.xlu1 %3830  ;;  %2838 = vmin.xlane.f32.xlu0 %v2837_v5  ;;  %v13490_v7 = vpop.permute.xlu0 %3833 }
0x1b1f   :  { %17522 = vst [vmem:[#allocation92_spill] sm:$0xff] %v13488_v10  ;;  %17523 = vst [vmem:[#allocation93_spill] sm:$0xff] %v13490_v7  ;;  %2793 = vmin.xlane.f32.xlu1 %v2792_v25  ;;  %v2897_v25 = vsel %vm2896_vm5, %v2892_v6, inf }
0x1b22   :  { %v13495_v36 = vpop.permute.xlu1 %3836  ;;  %2853 = vmin.xlane.f32.xlu0 %v2852_v26  ;;  %v13497_v63 = vpop.permute.xlu0 %3839 }
0x1b23   :  { %17524 = vst [vmem:[#allocation94_spill] sm:$0xff] %v13495_v36  ;;  %17525 = vst [vmem:[#allocation95_spill] sm:$0xff] %v13497_v63 }
0x1b26   :  { %v13502_v46 = vpop.permute.xlu1 %3842  ;;  %2868 = vmin.xlane.f32.xlu0 %v2867_v55  ;;  %v13504_v58 = vpop.permute.xlu0 %3845 }
0x1b27   :  { %17526 = vst [vmem:[#allocation96_spill] sm:$0xff] %v13502_v46  ;;  %17527 = vst [vmem:[#allocation97_spill] sm:$0xff] %v13504_v58 }
0x1b2a   :  { %v13509_v5 = vpop.permute.xlu1 %3848  ;;  %2883 = vmin.xlane.f32.xlu0 %v2882_v18  ;;  %v4358_v27 = vpop.permute.xlu0 %4357 }
0x1b2b   :  { %17528 = vst [vmem:[#allocation98_spill] sm:$0xff] %v13509_v5  ;;  %v4479_v30 = vrot.slane %v4358_v27, %v11977_v2 }
0x1b2e   :  { %v4361_v29 = vpop.permute.xlu1 %4360  ;;  %2898 = vmin.xlane.f32.xlu0 %v2897_v25  ;;  %v4376_v35 = vpop.permute.xlu0 %4375 }
0x1b2f   :  { %v4483_v37 = vrot.slane %v4361_v29, %v11977_v2 }
0x1b31   :  { %v4636_v40 = vsel %vm1627_vm0, %v4483_v37, %v4479_v30 }
0x1b32   :  { %v4373_v26 = vpop.permute.xlu1 %4372  ;;  %v4379_v38 = vpop.permute.xlu0 %4378 }
0x1b33   :  { %v4499_v5 = vrot.slane %v4373_v26, %v11977_v2  ;;  %v4507_v30 = vrot.slane %v4379_v38, %v11977_v2 }
0x1b36   :  { %v4364_v55 = vpop.permute.xlu1 %4363  ;;  %v4391_v44 = vpop.permute.xlu0 %4390 }
0x1b37   :  { %v4487_v18 = vrot.slane %v4364_v55, %v11977_v2  ;;  %v4503_v55 = vrot.slane %v4376_v35, %v11977_v2 }
0x1b39   :  { %v4637_v24 = vsel %vm1629_vm8, %v4487_v18, %v4636_v40  ;;  %v4640_v37 = vsel %vm1627_vm0, %v4503_v55, %v4499_v5 }
0x1b3a   :  { %v4388_v33 = vpop.permute.xlu1 %4387  ;;  %v4382_v7 = vpop.permute.xlu0 %4381 }
0x1b3b   :  { %v4511_v18 = vrot.slane %v4382_v7, %v11977_v2  ;;  %v4519_v40 = vrot.slane %v4388_v33, %v11977_v2 }
0x1b3e   :  { %v4367_v59 = vpop.permute.xlu1 %4366  ;;  %v4403_v10 = vpop.permute.xlu0 %4402 }
0x1b3f   :  { %v4491_v13 = vrot.slane %v4367_v59, %v11977_v2 }
0x1b41   :  { %v4638_v29 = vsel %vm1631_vm9, %v4491_v13, %v4637_v24  ;;  %v4641_v24 = vsel %vm1629_vm8, %v4507_v30, %v4640_v37  ;;  %v4523_v13 = vrot.slane %v4391_v44, %v11977_v2 }
0x1b42   :  { %v4394_v6 = vpop.permute.xlu1 %4393  ;;  %v4370_v25 = vpop.permute.xlu0 %4369  ;;  %v4642_v38 = vsel %vm1631_vm9, %v4511_v18, %v4641_v24 }
0x1b43   :  { %v4495_v62 = vrot.slane %v4370_v25, %v11977_v2  ;;  %v4644_v7 = vsel %vm1627_vm0, %v4523_v13, %v4519_v40 }
0x1b45   :  { %v4639_v58 = vsel %vm1633_vm10, %v4495_v62, %v4638_v29  ;;  %v4527_v62 = vrot.slane %v4394_v6, %v11977_v2 }
0x1b46   :  { %v4406_v46 = vpop.permute.xlu1 %4405  ;;  %v4397_v27 = vpop.permute.xlu0 %4396  ;;  %v4676_v59 = vsel %vm1434_vm4, %v4639_v58, -inf }
0x1b47   :  { %4677 = vmax.xlane.f32.xlu1 %v4676_v59  ;;  %v4531_v58 = vrot.slane %v4397_v27, %v11977_v2  ;;  %v4645_v59 = vsel %vm1629_vm8, %v4527_v62, %v4644_v7  ;;  %v4543_v24 = vrot.slane %v4406_v46, %v11977_v2 }
0x1b49   :  { %v4646_v30 = vsel %vm1631_vm9, %v4531_v58, %v4645_v59 }
0x1b4a   :  { %v4385_v26 = vpop.permute.xlu1 %4384  ;;  %v4418_v25 = vpop.permute.xlu0 %4417 }
0x1b4b   :  { %v4515_v35 = vrot.slane %v4385_v26, %v11977_v2 }
0x1b4d   :  { %v4643_v5 = vsel %vm1633_vm10, %v4515_v35, %v4642_v38  ;;  %v4539_v38 = vrot.slane %v4403_v10, %v11977_v2 }
0x1b4e   :  { %v4409_v29 = vpop.permute.xlu1 %4408  ;;  %v4400_v33 = vpop.permute.xlu0 %4399  ;;  %v4679_v55 = vsel %vm1434_vm4, %v4643_v5, -inf }
0x1b4f   :  { %v4535_v6 = vrot.slane %v4400_v33, %v11977_v2  ;;  %4680 = vmax.xlane.f32.xlu0 %v4679_v55  ;;  %v4547_v13 = vrot.slane %v4409_v29, %v11977_v2  ;;  %v4648_v7 = vsel %vm1627_vm0, %v4543_v24, %v4539_v38  ;;  %v4559_v33 = vrot.slane %v4418_v25, %v11977_v2 }
0x1b50   :  { %v3857_v38 = vrot.slane %v13347_v11, %v11977_v2  ;;  %v3877_v11 = vrot.slane %v13375_v54, %v11977_v2  ;;  %v3885_v54 = vrot.slane %v13387_v60, %v11977_v2  ;;  %v3893_v60 = vrot.slane %v13407_v43, %v11977_v2 }
0x1b51   :  { %v4647_v44 = vsel %vm1633_vm10, %v4535_v6, %v4646_v30  ;;  %v4649_v6 = vsel %vm1629_vm8, %v4547_v13, %v4648_v7  ;;  %v3865_v7 = vrot.slane %v13369_v47, %v11977_v2  ;;  %v3881_v47 = vrot.slane %v13395_v22, %v11977_v2 }
0x1b52   :  { %v4421_v27 = vpop.permute.xlu1 %4420  ;;  %v4424_v37 = vpop.permute.xlu0 %4423  ;;  %v4682_v18 = vsel %vm1434_vm4, %v4647_v44, -inf  ;;  %v3889_v22 = vrot.slane %v13405_v14, %v11977_v2 }
0x1b53   :  { %4683 = vmax.xlane.f32.xlu0 %v4682_v18  ;;  %v4563_v58 = vrot.slane %v4421_v27, %v11977_v2  ;;  %v4567_v46 = vrot.slane %v4424_v37, %v11977_v2  ;;  %v3853_v37 = vrot.slane %v13345_v57, %v11977_v2 }
0x1b55   :  { %v4652_v29 = vsel %vm1627_vm0, %v4563_v58, %v4559_v33  ;;  %v3861_v58 = vrot.slane %v13357_v21, %v11977_v2  ;;  %v4010_v57 = vsel %vm1627_vm0, %v3857_v38, %v3853_v37  ;;  %v3873_v21 = vrot.slane %v13383_v61, %v11977_v2 }
0x1b56   :  { %v4412_v26 = vpop.permute.xlu1 %4411  ;;  %v13543_v40 = vpop.permute.xlu0 %4435  ;;  %v4653_v24 = vsel %vm1629_vm8, %v4567_v46, %v4652_v29  ;;  %v3897_v61 = vrot.slane %v13417_v52, %v11977_v2  ;;  %v3901_v52 = vrot.slane %v13419_v53, %v11977_v2  ;;  %v3905_v53 = vrot.slane %v13429_v42, %v11977_v2 }
0x1b57   :  { %v4551_v5 = vrot.slane %v4412_v26, %v11977_v2  ;;  %v4011_v46 = vsel %vm1629_vm8, %v3861_v58, %v4010_v57  ;;  %v4583_v14 = vrot.slane %v13543_v40, %v11977_v2  ;;  %v3909_v42 = vrot.slane %v13431_v16, %v11977_v2 }
0x1b58   :  { %v4018_v43 = vsel %vm1627_vm0, %v3897_v61, %v3893_v60 }
0x1b59   :  { %v4650_v44 = vsel %vm1631_vm9, %v4551_v5, %v4649_v6 }
0x1b5a   :  { %v13546_v35 = vpop.permute.xlu1 %4432  ;;  %v4427_v62 = vpop.permute.xlu0 %4426 }
0x1b5b   :  { %v4571_v10 = vrot.slane %v4427_v62, %v11977_v2 }
0x1b5d   :  { %v4654_v62 = vsel %vm1631_vm9, %v4571_v10, %v4653_v24 }
0x1b5e   :  { %v4415_v55 = vpop.permute.xlu1 %4414  ;;  %v4448_v59 = vpop.permute.xlu0 %4447 }
0x1b5f   :  { %v4555_v30 = vrot.slane %v4415_v55, %v11977_v2 }
0x1b61   :  { %v4651_v27 = vsel %vm1633_vm10, %v4555_v30, %v4650_v44  ;;  %v4012_v30 = vsel %vm1631_vm9, %v3865_v7, %v4011_v46  ;;  %v3869_v44 = vrot.slane %v13361_v51, %v11977_v2  ;;  %v4579_v51 = vrot.slane %v13546_v35, %v11977_v2 }
0x1b62   :  { %v4439_v18 = vpop.permute.xlu1 %4438  ;;  %v4430_v26 = vpop.permute.xlu0 %4429  ;;  %v4685_v25 = vsel %vm1434_vm4, %v4651_v27, -inf }
0x1b63   :  { %v4575_v13 = vrot.slane %v4430_v26, %v11977_v2  ;;  %4686 = vmax.xlane.f32.xlu1 %v4685_v25  ;;  %v4014_v26 = vsel %vm1627_vm0, %v3877_v11, %v3873_v21  ;;  %v4013_v25 = vsel %vm1633_vm10, %v3869_v44, %v4012_v30  ;;  %v4019_v30 = vsel %vm1629_vm8, %v3901_v52, %v4018_v43 }
0x1b64   :  { %v4015_v24 = vsel %vm1629_vm8, %v3881_v47, %v4014_v26  ;;  %v13617_v40 = vsel %vm1434_vm4, %v4013_v25, 2147483647  ;;  %v4020_v44 = vsel %vm1631_vm9, %v3905_v53, %v4019_v30 }
0x1b65   :  { %v4655_v5 = vsel %vm1633_vm10, %v4575_v13, %v4654_v62  ;;  %v4599_v13 = vrot.slane %v4448_v59, %v11977_v2  ;;  %v4587_v62 = vrot.slane %v4439_v18, %v11977_v2  ;;  %v4016_v7 = vsel %vm1631_vm9, %v3885_v54, %v4015_v24 }
0x1b66   :  { %v4451_v33 = vpop.permute.xlu1 %4450  ;;  %v4454_v55 = vpop.permute.xlu0 %4453  ;;  %v4688_v6 = vsel %vm1434_vm4, %v4655_v5, -inf  ;;  %v4017_v18 = vsel %vm1633_vm10, %v3889_v22, %v4016_v7  ;;  %v4044_v54 = vshra.s32 %v13617_v40, 16  ;;  %v4043_v50 = vand.u32 65535, %v13617_v40 }
0x1b67   :  { %4689 = vmax.xlane.f32.xlu0 %v4688_v6  ;;  %v4603_v27 = vrot.slane %v4451_v33, %v11977_v2  ;;  %v4607_v58 = vrot.slane %v4454_v55, %v11977_v2  ;;  %v4656_v33 = vsel %vm1627_vm0, %v4583_v14, %v4579_v51  ;;  %v13635_v22 = vsel %vm1434_vm4, %v4017_v18, 2147483647 }
0x1b68   :  { %v4657_v57 = vsel %vm1629_vm8, %v4587_v62, %v4656_v33  ;;  %v4021_v51 = vsel %vm1633_vm10, %v3909_v42, %v4020_v44  ;;  %v13641_v52 = vcvt.s32.f32 %v4044_v54  ;;  %v4059_v62 = vshra.s32 %v13635_v22, 16 }
0x1b69   :  { %v4660_v5 = vsel %vm1627_vm0, %v4603_v27, %v4599_v13  ;;  %v2826_v42 = vcvt.f32.s32 %v13251_v0 }
0x1b6a   :  { %v4442_v29 = vpop.permute.xlu1 %4441  ;;  %v4466_v10 = vpop.permute.xlu0 %4465  ;;  %v4661_v46 = vsel %vm1629_vm8, %v4607_v58, %v4660_v5 }
0x1b6b   :  { %v4591_v35 = vrot.slane %v4442_v29, %v11977_v2 }
0x1b6d   :  { %v4658_v47 = vsel %vm1631_vm9, %v4591_v35, %v4657_v57  ;;  %v2796_v57 = vcvt.f32.s32 %v13315_v45  ;;  %v2871_v45 = vcvt.f32.s32 %v13299_v41 }
0x1b6e   :  { %v4463_v37 = vpop.permute.xlu1 %4462  ;;  %v4457_v38 = vpop.permute.xlu0 %4456 }
0x1b6f   :  { %v4611_v59 = vrot.slane %v4457_v38, %v11977_v2  ;;  %v4619_v16 = vrot.slane %v4463_v37, %v11977_v2  ;;  %v4623_v38 = vrot.slane %v4466_v10, %v11977_v2  ;;  %v13648_v37 = vsel %vm1434_vm4, %v4021_v51, 2147483647 }
0x1b70   :  { %17529 = vst [vmem:[#allocation99_spill] sm:$0xff] %v13648_v37  ;;  %v13652_v10 = vcvt.s32.f32 %v4059_v62  ;;  %v4074_v53 = vshra.s32 %v13648_v37, 16  ;;  %v2886_v62 = vcvt.f32.s32 %v13311_v31 }
0x1b71   :  { %v4662_v29 = vsel %vm1631_vm9, %v4611_v59, %v4661_v46  ;;  %v4664_v14 = vsel %vm1627_vm0, %v4623_v38, %v4619_v16  ;;  %v2811_v46 = vcvt.f32.s32 %v13333_v19  ;;  %v2856_v16 = vcvt.f32.s32 %v13281_v48 }
0x1b72   :  { %v4445_v55 = vpop.permute.xlu1 %4444  ;;  %v4460_v6 = vpop.permute.xlu0 %4459  ;;  %v13659_v33 = vcvt.s32.f32 %v4074_v53  ;;  %v2901_v53 = vcvt.f32.s32 %v13331_v39 }
0x1b73   :  { %v4595_v11 = vrot.slane %v4445_v55, %v11977_v2  ;;  %v4615_v21 = vrot.slane %v4460_v6, %v11977_v2  ;;  %v2812_v44 = vshll.u32 %v2811_v46, 16 }
0x1b74   :  { %17530 = vst [vmem:[#allocation100_spill] sm:$0xff] %v13659_v33 }
0x1b75   :  { %v4659_v27 = vsel %vm1633_vm10, %v4595_v11, %v4658_v47  ;;  %v4663_v26 = vsel %vm1633_vm10, %v4615_v21, %v4662_v29  ;;  %v2797_v47 = vshll.u32 %v2796_v57, 16 }
0x1b76   :  { %v4469_v61 = vpop.permute.xlu1 %4468  ;;  %v4691_v25 = vsel %vm1434_vm4, %v4659_v27, -inf  ;;  %v4694_v24 = vsel %vm1434_vm4, %v4663_v26, -inf  ;;  %v4475_v60 = vpop.permute.xlu0 %4474 }
0x1b77   :  { %4692 = vmax.xlane.f32.xlu1 %v4691_v25  ;;  %4695 = vmax.xlane.f32.xlu0 %v4694_v24  ;;  %v4627_v13 = vrot.slane %v4469_v61, %v11977_v2  ;;  %v4635_v59 = vrot.slane %v4475_v60, %v11977_v2  ;;  %v2841_v61 = vcvt.f32.s32 %v13269_v20  ;;  %v2827_v24 = vshll.u32 %v2826_v42, 16 }
0x1b78   :  { %v2872_v20 = vshll.u32 %v2871_v45, 16 }
0x1b79   :  { %v4665_v35 = vsel %vm1629_vm8, %v4627_v13, %v4664_v14  ;;  %v2842_v60 = vshll.u32 %v2841_v61, 16 }
0x1b7a   :  { %v4472_v58 = vpop.permute.xlu1 %4471 }
0x1b7b   :  { %v4631_v5 = vrot.slane %v4472_v58, %v11977_v2  ;;  %4047 = vmin.xlane.f32.xlu0 %v13641_v52 }
0x1b7d   :  { %v4666_v7 = vsel %vm1631_vm9, %v4631_v5, %v4665_v35  ;;  %v2857_v5 = vshll.u32 %v2856_v16, 16 }
0x1b7e   :  { %v4667_v43 = vsel %vm1633_vm10, %v4635_v59, %v4666_v7 }
0x1b7f   :  { %4062 = vmin.xlane.f32.xlu0 %v13652_v10  ;;  %v4697_v18 = vsel %vm1434_vm4, %v4667_v43, -inf  ;;  %v2887_v43 = vshll.u32 %v2886_v62, 16 }
0x1b80   :  { %4698 = vmax.xlane.f32.xlu1 %v4697_v18 }
0x1b84   :  { %4077 = vmin.xlane.f32.xlu1 %v13659_v33 }
0x1ba3   :  { %v2809_v55 = vpop.xlane.xlu0 %2808 }
0x1ba4   :  { %v2810_v21 = vcvt.f32.s32 %v2809_v55 }
0x1ba6   :  { %v2813_v25 = vadd.s32 %v2812_v44, %v2810_v21  ;;  %v2902_v21 = vshll.u32 %v2901_v53, 16  ;;  %v17549_v53 = vld [vmem:[#allocation28_spill] sm:$0xff] }
0x1ba7   :  { %v2824_v6 = vpop.xlane.xlu0 %2823 }
0x1ba8   :  { %v2825_v27 = vcvt.f32.s32 %v2824_v6  ;;  %v2911_v58 = vrot.slane %v2813_v25, %v11977_v2 }
0x1baa   :  { %v2828_v13 = vadd.s32 %v2827_v24, %v2825_v27  ;;  %v17532_v24 = vld [vmem:[#allocation26_spill] sm:$0xff] }
0x1bab   :  { %v2839_v11 = vpop.xlane.xlu0 %2838 }
0x1bac   :  { %v2794_v30 = vpop.xlane.xlu1 %2793  ;;  %v2840_v19 = vcvt.f32.s32 %v2839_v11  ;;  %v2915_v48 = vrot.slane %v2828_v13, %v11977_v2  ;;  %v17536_v13 = vld [vmem:[#allocation25_spill] sm:$0xff] }
0x1bad   :  { %v2795_v29 = vcvt.f32.s32 %v2794_v30 }
0x1bae   :  { %v2843_v35 = vadd.s32 %v2842_v60, %v2840_v19 }
0x1baf   :  { %v2798_v26 = vadd.s32 %v2797_v47, %v2795_v29  ;;  %v2854_v54 = vpop.xlane.xlu0 %2853 }
0x1bb0   :  { %v2855_v38 = vcvt.f32.s32 %v2854_v54  ;;  %v2919_v31 = vrot.slane %v2843_v35, %v11977_v2 }
0x1bb1   :  { %v2907_v51 = vrot.slane %v2798_v26, %v11977_v2 }
0x1bb2   :  { %v2858_v41 = vadd.s32 %v2857_v5, %v2855_v38 }
0x1bb3   :  { %v2869_v0 = vpop.xlane.xlu0 %2868  ;;  %v2936_v59 = vsel %vm1627_vm0, %v2911_v58, %v2907_v51  ;;  %v17540_v58 = vld [vmem:[#allocation27_spill] sm:$0xff] }
0x1bb4   :  { %v2870_v14 = vcvt.f32.s32 %v2869_v0  ;;  %v2937_v6 = vsel %vm1629_vm8, %v2915_v48, %v2936_v59  ;;  %v2923_v46 = vrot.slane %v2858_v41, %v11977_v2 }
0x1bb5   :  { %v2938_v30 = vsel %vm1631_vm9, %v2919_v31, %v2937_v6 }
0x1bb6   :  { %v2873_v18 = vadd.s32 %v2872_v20, %v2870_v14  ;;  %v2939_v39 = vsel %vm1633_vm10, %v2923_v46, %v2938_v30 }
0x1bb7   :  { %v2884_v7 = vpop.xlane.xlu0 %2883 }
0x1bb8   :  { %v2885_v55 = vcvt.f32.s32 %v2884_v7  ;;  %v2927_v42 = vrot.slane %v2873_v18, %v11977_v2 }
0x1bba   :  { %v2888_v57 = vadd.s32 %v2887_v43, %v2885_v55  ;;  %v2940_v27 = vsel %vm1635_vm11, %v2927_v42, %v2939_v39 }
0x1bbb   :  { %v2899_v11 = vpop.xlane.xlu0 %2898 }
0x1bbc   :  { %v2900_v47 = vcvt.f32.s32 %v2899_v11  ;;  %v2931_v29 = vrot.slane %v2888_v57, %v11977_v2  ;;  %v17555_v11 = vld [vmem:[#allocation29_spill] sm:$0xff] }
0x1bbe   :  { %v2903_v44 = vadd.s32 %v2902_v21, %v2900_v47  ;;  %v2941_v54 = vsel %vm1637_vm12, %v2931_v29, %v2940_v27 }
0x1bc0   :  { %v2935_v26 = vrot.slane %v2903_v44, %v11977_v2 }
0x1bc2   :  { %v2942_v61 = vsel %vm1639_vm13, %v2935_v26, %v2941_v54  ;;  %v17563_v26 = vld [vmem:[#allocation30_spill] sm:$0xff] }
0x1bc3   :  { %2943 = vst.msk [vmem:[#allocation5 + $0x8] sm:$0xff] %vm1315_vm14, %v2942_v61 }
0x1bd4   :  { %v13686_v25 = vpop.xlane.xlu1 %4677 }
0x1bd5   :  { %17531 = vst [vmem:[#allocation101_spill] sm:$0xff] %v13686_v25  ;;  %v5526_v16 = vadd.f32 %v17532_v24, %v13686_v25 }
0x1bd7   :  { %v13691_v45 = vadd.f32 %v5526_v16, %v17455_v15  ;;  %v13694_v19 = vadd.f32 %v5526_v16, %v17453_v49  ;;  %v13718_v20 = vadd.f32 %v5526_v16, %v17459_v56  ;;  %v13734_v41 = vadd.f32 %v5526_v16, %v17465_v32 }
0x1bd8   :  { %v13755_v31 = vadd.f32 %v5526_v16, %v17470_v12 }
0x1bd9   :  { %17533 = vst [vmem:[#allocation26_spill] sm:$0xff] %v13691_v45  ;;  %17534 = vst [vmem:[#allocation102_spill] sm:$0xff] %v13694_v19  ;;  %5618 = vperm.xlu0 %11277, %v13691_v45   ;;  %5615 = vperm.xlu1 %11278, %v13694_v19  }
0x1bda   :  { %17542 = vst [vmem:[#allocation106_spill] sm:$0xff] %v13718_v20  ;;  %17546 = vst [vmem:[#allocation110_spill] sm:$0xff] %v13734_v41 }
0x1bdb   :  { %17552 = vst [vmem:[#allocation114_spill] sm:$0xff] %v13755_v31 }
0x1bdc   :  { %v13698_v51 = vpop.xlane.xlu0 %4680 }
0x1bdd   :  { %17535 = vst [vmem:[#allocation103_spill] sm:$0xff] %v13698_v51  ;;  %v5527_v38 = vadd.f32 %v17536_v13, %v13698_v51  ;;  %v11343_v51 = vld [vmem:[#allocation4 + $0x28] sm:$0xff] }
0x1bdf   :  { %v13703_v0 = vadd.f32 %v5527_v38, %v17455_v15  ;;  %v13706_v60 = vadd.f32 %v5527_v38, %v17453_v49  ;;  %v13715_v5 = vadd.f32 %v5527_v38, %v17459_v56  ;;  %v13731_v48 = vadd.f32 %v5527_v38, %v17465_v32 }
0x1be0   :  { %v13708_v62 = vpop.xlane.xlu0 %4683  ;;  %v13758_v57 = vadd.f32 %v5527_v38, %v17470_v12 }
0x1be1   :  { %17537 = vst [vmem:[#allocation25_spill] sm:$0xff] %v13703_v0  ;;  %17538 = vst [vmem:[#allocation104_spill] sm:$0xff] %v13706_v60  ;;  %5633 = vperm.xlu0 %11277, %v13703_v0   ;;  %5630 = vperm.xlu1 %11278, %v13706_v60   ;;  %v5528_v14 = vadd.f32 %v17540_v58, %v13708_v62  ;;  %v17569_v58 = vld [vmem:[#allocation31_spill] sm:$0xff]  ;;  %v14167_v0 = vld [vmem:[#allocation4 + $0x30] sm:$0xff] }
0x1be2   :  { %17539 = vst [vmem:[#allocation105_spill] sm:$0xff] %v13708_v62  ;;  %17541 = vst [vmem:[#allocation27_spill] sm:$0xff] %v13715_v5  ;;  %v9267_v60 = vrot.slane %v14167_v0, %v11925_v23 }
0x1be3   :  { %v13723_v35 = vadd.f32 %v5528_v14, %v17455_v15  ;;  %v13726_v59 = vadd.f32 %v5528_v14, %v17453_v49  ;;  %17545 = vst [vmem:[#allocation109_spill] sm:$0xff] %v13731_v48  ;;  %v13739_v7 = vadd.f32 %v5528_v14, %v17459_v56  ;;  %17553 = vst [vmem:[#allocation115_spill] sm:$0xff] %v13758_v57 }
0x1be4   :  { %v13767_v30 = vadd.f32 %v5528_v14, %v17465_v32  ;;  %v13786_v39 = vadd.f32 %v5528_v14, %v17470_v12 }
0x1be5   :  { %5636 = vperm.xlu0 %11277, %v13715_v5   ;;  %5621 = vperm.xlu1 %11278, %v13718_v20   ;;  %17543 = vst [vmem:[#allocation107_spill] sm:$0xff] %v13723_v35  ;;  %17544 = vst [vmem:[#allocation108_spill] sm:$0xff] %v13726_v59  ;;  %v9253_v20 = vrot.slane %v14167_v0, %v11920_v34 }
0x1be6   :  { %17547 = vst [vmem:[#allocation111_spill] sm:$0xff] %v13739_v7  ;;  %17556 = vst [vmem:[#allocation29_spill] sm:$0xff] %v13767_v30 }
0x1be7   :  { %17561 = vst [vmem:[#allocation121_spill] sm:$0xff] %v13786_v39 }
0x1be9   :  { %5648 = vperm.xlu0 %11277, %v13723_v35   ;;  %5645 = vperm.xlu1 %11278, %v13726_v59  }
0x1bed   :  { %5639 = vperm.xlu0 %11277, %v13731_v48   ;;  %5624 = vperm.xlu1 %11278, %v13734_v41  }
0x1bf0   :  { %v13741_v43 = vpop.xlane.xlu1 %4686 }
0x1bf1   :  { %17548 = vst [vmem:[#allocation112_spill] sm:$0xff] %v13741_v43  ;;  %v5529_v18 = vadd.f32 %v17549_v53, %v13741_v43  ;;  %5651 = vperm.xlu1 %11278, %v13739_v7   ;;  %v17587_v43 = vld [vmem:[#allocation9_spill] sm:$0xff] }
0x1bf2   :  { %v8030_v62 = vrot.slane %v11343_v51, %v17587_v43 }
0x1bf3   :  { %v13747_v55 = vadd.f32 %v5529_v18, %v17453_v49  ;;  %v13750_v6 = vadd.f32 %v5529_v18, %v17455_v15  ;;  %v13770_v42 = vadd.f32 %v5529_v18, %v17459_v56  ;;  %v13783_v44 = vadd.f32 %v5529_v18, %v17465_v32 }
0x1bf4   :  { %v13760_v46 = vpop.xlane.xlu0 %4689  ;;  %v13803_v16 = vadd.f32 %v5529_v18, %v17470_v12 }
0x1bf5   :  { %17550 = vst [vmem:[#allocation28_spill] sm:$0xff] %v13747_v55  ;;  %17551 = vst [vmem:[#allocation113_spill] sm:$0xff] %v13750_v6  ;;  %5660 = vperm.xlu0 %11277, %v13747_v55   ;;  %5663 = vperm.xlu1 %11278, %v13750_v6   ;;  %v5530_v21 = vadd.f32 %v17555_v11, %v13760_v46  ;;  %v17638_v6 = vld [vmem:[#allocation40_spill] sm:$0xff] }
0x1bf6   :  { %17554 = vst [vmem:[#allocation116_spill] sm:$0xff] %v13760_v46  ;;  %17557 = vst [vmem:[#allocation117_spill] sm:$0xff] %v13770_v42 }
0x1bf7   :  { %v13775_v47 = vadd.f32 %v5530_v21, %v17455_v15  ;;  %v13778_v29 = vadd.f32 %v5530_v21, %v17453_v49  ;;  %17560 = vst [vmem:[#allocation120_spill] sm:$0xff] %v13783_v44  ;;  %v13798_v24 = vadd.f32 %v5530_v21, %v17459_v56  ;;  %17566 = vst [vmem:[#allocation124_spill] sm:$0xff] %v13803_v16 }
0x1bf8   :  { %v13818_v11 = vadd.f32 %v5530_v21, %v17465_v32  ;;  %v13838_v63 = vadd.f32 %v5530_v21, %v17470_v12 }
0x1bf9   :  { %5627 = vperm.xlu0 %11277, %v13755_v31   ;;  %5642 = vperm.xlu1 %11278, %v13758_v57   ;;  %17558 = vst [vmem:[#allocation118_spill] sm:$0xff] %v13775_v47  ;;  %17559 = vst [vmem:[#allocation119_spill] sm:$0xff] %v13778_v29 }
0x1bfa   :  { %17565 = vst [vmem:[#allocation123_spill] sm:$0xff] %v13798_v24  ;;  %17571 = vst [vmem:[#allocation127_spill] sm:$0xff] %v13818_v11 }
0x1bfb   :  { %17577 = vst [vmem:[#allocation131_spill] sm:$0xff] %v13838_v63 }
0x1bfd   :  { %5654 = vperm.xlu0 %11277, %v13767_v30   ;;  %5666 = vperm.xlu1 %11278, %v13770_v42  }
0x1c01   :  { %5678 = vperm.xlu1 %11278, %v13775_v47   ;;  %5675 = vperm.xlu0 %11277, %v13778_v29  }
0x1c04   :  { %v13788_v27 = vpop.xlane.xlu1 %4692  ;;  %v13808_v38 = vpop.xlane.xlu0 %4695 }
0x1c05   :  { %17562 = vst [vmem:[#allocation122_spill] sm:$0xff] %v13788_v27  ;;  %v5531_v54 = vadd.f32 %v17563_v26, %v13788_v27  ;;  %5669 = vperm.xlu1 %11278, %v13783_v44   ;;  %5657 = vperm.xlu0 %11277, %v13786_v39   ;;  %17568 = vst [vmem:[#allocation126_spill] sm:$0xff] %v13808_v38  ;;  %v5532_v14 = vadd.f32 %v17569_v58, %v13808_v38  ;;  %v17575_v58 = vld [vmem:[#allocation32_spill] sm:$0xff]  ;;  %v17624_v39 = vld [vmem:[#allocation38_spill] sm:$0xff] }
0x1c07   :  { %v13795_v61 = vadd.f32 %v5531_v54, %v17453_v49  ;;  %v13806_v13 = vadd.f32 %v5531_v54, %v17455_v15  ;;  %v13815_v53 = vadd.f32 %v5531_v54, %v17459_v56  ;;  %v13823_v18 = vadd.f32 %v5532_v14, %v17455_v15 }
0x1c08   :  { %v13826_v26 = vadd.f32 %v5532_v14, %v17453_v49  ;;  %v13835_v3 = vadd.f32 %v5531_v54, %v17465_v32  ;;  %v13846_v1 = vadd.f32 %v5532_v14, %v17459_v56  ;;  %v13862_v38 = vadd.f32 %v5532_v14, %v17465_v32  ;;  %v13879_v9 = vpop.xlane.xlu0 %4047 }
0x1c09   :  { %17564 = vst [vmem:[#allocation30_spill] sm:$0xff] %v13795_v61  ;;  %5690 = vperm.xlu1 %11278, %v13795_v61   ;;  %5681 = vperm.xlu0 %11277, %v13798_v24   ;;  %17567 = vst [vmem:[#allocation125_spill] sm:$0xff] %v13806_v13  ;;  %v13870_v27 = vadd.f32 %v5532_v14, %v17470_v12  ;;  %vm4049_vm6 = vcmp.eq.f32.partialorder %v13641_v52, %v13879_v9  ;;  %v4058_v14 = vand.u32 65535, %v13635_v22 }
0x1c0a   :  { %17570 = vst [vmem:[#allocation31_spill] sm:$0xff] %v13815_v53  ;;  %17572 = vst [vmem:[#allocation128_spill] sm:$0xff] %v13823_v18 }
0x1c0b   :  { %17573 = vst [vmem:[#allocation129_spill] sm:$0xff] %v13826_v26  ;;  %17576 = vst [vmem:[#allocation32_spill] sm:$0xff] %v13835_v3 }
0x1c0c   :  { %17579 = vst [vmem:[#allocation133_spill] sm:$0xff] %v13846_v1  ;;  %17583 = vst [vmem:[#allocation137_spill] sm:$0xff] %v13862_v38  ;;  %v13882_v25 = vpop.xlane.xlu0 %4062 }
0x1c0d   :  { %5672 = vperm.xlu1 %11278, %v13803_v16   ;;  %5693 = vperm.xlu0 %11277, %v13806_v13   ;;  %v13828_v33 = vpop.xlane.xlu1 %4698  ;;  %17585 = vst [vmem:[#allocation139_spill] sm:$0xff] %v13870_v27  ;;  %17588 = vst [vmem:[#allocation141_spill] sm:$0xff] %v13879_v9  ;;  %vm4064_vm2 = vcmp.eq.f32.partialorder %v13652_v10, %v13882_v25  ;;  %v17618_v13 = vld [vmem:[#allocation37_spill] sm:$0xff] }
0x1c0e   :  { %17574 = vst [vmem:[#allocation130_spill] sm:$0xff] %v13828_v33  ;;  %v5533_v37 = vadd.f32 %v17575_v58, %v13828_v33  ;;  %v13851_v58 = vadd.f32 %v5531_v54, %v17470_v12  ;;  %17589 = vst [vmem:[#allocation142_spill] sm:$0xff] %v13882_v25 }
0x1c10   :  { %v13843_v36 = vadd.f32 %v5533_v37, %v17453_v49  ;;  %17580 = vst [vmem:[#allocation134_spill] sm:$0xff] %v13851_v58  ;;  %v13854_v21 = vadd.f32 %v5533_v37, %v17455_v15  ;;  %v13859_v33 = vadd.f32 %v5533_v37, %v17459_v56  ;;  %v13867_v54 = vadd.f32 %v5533_v37, %v17465_v32 }
0x1c11   :  { %5696 = vperm.xlu1 %11278, %v13815_v53   ;;  %5684 = vperm.xlu0 %11277, %v13818_v11   ;;  %v13875_v46 = vadd.f32 %v5533_v37, %v17470_v12 }
0x1c12   :  { %17578 = vst [vmem:[#allocation132_spill] sm:$0xff] %v13843_v36  ;;  %17581 = vst [vmem:[#allocation135_spill] sm:$0xff] %v13854_v21 }
0x1c13   :  { %17582 = vst [vmem:[#allocation136_spill] sm:$0xff] %v13859_v33  ;;  %17584 = vst [vmem:[#allocation138_spill] sm:$0xff] %v13867_v54 }
0x1c14   :  { %17586 = vst [vmem:[#allocation140_spill] sm:$0xff] %v13875_v46 }
0x1c15   :  { %5708 = vperm.xlu1 %11278, %v13823_v18   ;;  %5705 = vperm.xlu0 %11277, %v13826_v26  }
0x1c19   :  { %5699 = vperm.xlu1 %11278, %v13835_v3   ;;  %5687 = vperm.xlu0 %11277, %v13838_v63  }
0x1c1d   :  { %5720 = vperm.xlu1 %11278, %v13843_v36   ;;  %5711 = vperm.xlu0 %11277, %v13846_v1  }
0x1c21   :  { %5702 = vperm.xlu1 %11278, %v13851_v58   ;;  %5723 = vperm.xlu0 %11277, %v13854_v21  }
0x1c25   :  { %5726 = vperm.xlu1 %11278, %v13859_v33   ;;  %5714 = vperm.xlu0 %11277, %v13862_v38  }
0x1c29   :  { %5729 = vperm.xlu1 %11278, %v13867_v54   ;;  %5717 = vperm.xlu0 %11277, %v13870_v27   ;;  %v4045_v27 = vcvt.s32.f32 %v4043_v50 }
0x1c2b   :  { %v4050_v37 = vsel %vm4049_vm6, %v4045_v27, inf }
0x1c2d   :  { %5732 = vperm.xlu0 %11277, %v13875_v46   ;;  %v4060_v46 = vcvt.s32.f32 %v4058_v14 }
0x1c2f   :  { %v4065_v51 = vsel %vm4064_vm2, %v4060_v46, inf }
0x1c31   :  { %8032 = vbcast.lane.b32.xlu0 %v8030_v62, 256  ;;  %v13889_v62 = vpop.xlane.xlu1 %4077 }
0x1c32   :  { %17590 = vst [vmem:[#allocation143_spill] sm:$0xff] %v13889_v62 }
0x1c4d   :  { %4051 = vmin.xlane.f32.xlu1 %v4050_v37 }
0x1c50   :  { %4066 = vmin.xlane.f32.xlu0 %v4065_v51 }
0x1c58   :  { %v5616_v54 = vpop.permute.xlu1 %5615  ;;  %v5619_v40 = vpop.permute.xlu0 %5618 }
0x1c59   :  { %v5737_v1 = vrot.slane %v5616_v54, %v11977_v2  ;;  %v5741_v10 = vrot.slane %v5619_v40, %v11977_v2 }
0x1c5b   :  { %v5894_v3 = vsel %vm1627_vm0, %v5741_v10, %v5737_v1 }
0x1c60   :  { %v5631_v38 = vpop.permute.xlu1 %5630  ;;  %v5634_v33 = vpop.permute.xlu0 %5633 }
0x1c61   :  { %v5757_v46 = vrot.slane %v5631_v38, %v11977_v2  ;;  %v5761_v14 = vrot.slane %v5634_v33, %v11977_v2 }
0x1c63   :  { %v5898_v54 = vsel %vm1627_vm0, %v5761_v14, %v5757_v46 }
0x1c64   :  { %v5622_v21 = vpop.permute.xlu1 %5621  ;;  %v5637_v58 = vpop.permute.xlu0 %5636 }
0x1c65   :  { %v5745_v25 = vrot.slane %v5622_v21, %v11977_v2  ;;  %v5765_v62 = vrot.slane %v5637_v58, %v11977_v2 }
0x1c67   :  { %v5895_v38 = vsel %vm1629_vm8, %v5745_v25, %v5894_v3  ;;  %v5899_v33 = vsel %vm1629_vm8, %v5765_v62, %v5898_v54 }
0x1c68   :  { %v5646_v52 = vpop.permute.xlu1 %5645  ;;  %v5649_v9 = vpop.permute.xlu0 %5648 }
0x1c69   :  { %v5777_v25 = vrot.slane %v5646_v52, %v11977_v2 }
0x1c6c   :  { %v5625_v22 = vpop.permute.xlu1 %5624  ;;  %v5640_v50 = vpop.permute.xlu0 %5639 }
0x1c6d   :  { %v5749_v36 = vrot.slane %v5625_v22, %v11977_v2  ;;  %v5769_v63 = vrot.slane %v5640_v50, %v11977_v2 }
0x1c6f   :  { %v5900_v58 = vsel %vm1631_vm9, %v5769_v63, %v5899_v33  ;;  %v5896_v22 = vsel %vm1631_vm9, %v5749_v36, %v5895_v38 }
0x1c70   :  { %v5652_v27 = vpop.permute.xlu1 %5651 }
0x1c71   :  { %v5785_v36 = vrot.slane %v5652_v27, %v11977_v2 }
0x1c74   :  { %v5664_v37 = vpop.permute.xlu1 %5663  ;;  %v5661_v51 = vpop.permute.xlu0 %5660 }
0x1c78   :  { %v5643_v26 = vpop.permute.xlu1 %5642  ;;  %v5628_v40 = vpop.permute.xlu0 %5627 }
0x1c79   :  { %v5773_v18 = vrot.slane %v5643_v26, %v11977_v2  ;;  %v5753_v21 = vrot.slane %v5628_v40, %v11977_v2  ;;  %v5781_v26 = vrot.slane %v5649_v9, %v11977_v2  ;;  %v5801_v9 = vrot.slane %v5664_v37, %v11977_v2 }
0x1c7b   :  { %v5901_v50 = vsel %vm1633_vm10, %v5773_v18, %v5900_v58  ;;  %v5897_v1 = vsel %vm1633_vm10, %v5753_v21, %v5896_v22  ;;  %v5902_v54 = vsel %vm1627_vm0, %v5781_v26, %v5777_v25  ;;  %v5797_v22 = vrot.slane %v5661_v51, %v11977_v2 }
0x1c7c   :  { %v5667_v10 = vpop.permute.xlu1 %5666  ;;  %v5655_v46 = vpop.permute.xlu0 %5654  ;;  %v5937_v14 = vsel %vm1434_vm4, %v5901_v50, -inf  ;;  %v5934_v3 = vsel %vm1434_vm4, %v5897_v1, -inf  ;;  %v5903_v33 = vsel %vm1629_vm8, %v5785_v36, %v5902_v54 }
0x1c7d   :  { %5938 = vmax.xlane.f32.xlu0 %v5937_v14  ;;  %5935 = vmax.xlane.f32.xlu1 %v5934_v3  ;;  %v5789_v18 = vrot.slane %v5655_v46, %v11977_v2  ;;  %v5805_v46 = vrot.slane %v5667_v10, %v11977_v2  ;;  %v5906_v3 = vsel %vm1627_vm0, %v5801_v9, %v5797_v22 }
0x1c7f   :  { %v5904_v58 = vsel %vm1631_vm9, %v5789_v18, %v5903_v33  ;;  %v5907_v36 = vsel %vm1629_vm8, %v5805_v46, %v5906_v3 }
0x1c80   :  { %v5679_v62 = vpop.permute.xlu1 %5678  ;;  %v5676_v63 = vpop.permute.xlu0 %5675 }
0x1c81   :  { %v5821_v10 = vrot.slane %v5679_v62, %v11977_v2 }
0x1c84   :  { %v5670_v40 = vpop.permute.xlu1 %5669  ;;  %v5658_v38 = vpop.permute.xlu0 %5657 }
0x1c85   :  { %v5793_v21 = vrot.slane %v5658_v38, %v11977_v2  ;;  %v5809_v14 = vrot.slane %v5670_v40, %v11977_v2  ;;  %v5817_v40 = vrot.slane %v5676_v63, %v11977_v2 }
0x1c87   :  { %v5905_v52 = vsel %vm1633_vm10, %v5793_v21, %v5904_v58  ;;  %v5908_v37 = vsel %vm1631_vm9, %v5809_v14, %v5907_v36  ;;  %v5910_v22 = vsel %vm1627_vm0, %v5821_v10, %v5817_v40 }
0x1c88   :  { %v5691_v50 = vpop.permute.xlu1 %5690  ;;  %v5682_v27 = vpop.permute.xlu0 %5681  ;;  %v5940_v1 = vsel %vm1434_vm4, %v5905_v52, -inf }
0x1c89   :  { %5941 = vmax.xlane.f32.xlu0 %v5940_v1  ;;  %v5825_v52 = vrot.slane %v5682_v27, %v11977_v2 }
0x1c8b   :  { %v5911_v14 = vsel %vm1629_vm8, %v5825_v52, %v5910_v22 }
0x1c8c   :  { %v5673_v25 = vpop.permute.xlu1 %5672  ;;  %v5694_v26 = vpop.permute.xlu0 %5693 }
0x1c8d   :  { %v5813_v18 = vrot.slane %v5673_v25, %v11977_v2  ;;  %v5841_v63 = vrot.slane %v5694_v26, %v11977_v2 }
0x1c8f   :  { %v5909_v51 = vsel %vm1633_vm10, %v5813_v18, %v5908_v37 }
0x1c90   :  { %v5697_v54 = vpop.permute.xlu1 %5696  ;;  %v5685_v38 = vpop.permute.xlu0 %5684  ;;  %v5943_v33 = vsel %vm1434_vm4, %v5909_v51, -inf  ;;  %v5837_v51 = vrot.slane %v5691_v50, %v11977_v2 }
0x1c91   :  { %5944 = vmax.xlane.f32.xlu1 %v5943_v33  ;;  %v5829_v9 = vrot.slane %v5685_v38, %v11977_v2  ;;  %v5845_v37 = vrot.slane %v5697_v54, %v11977_v2 }
0x1c92   :  { %v5914_v33 = vsel %vm1627_vm0, %v5841_v63, %v5837_v51 }
0x1c93   :  { %v5912_v25 = vsel %vm1631_vm9, %v5829_v9, %v5911_v14  ;;  %v5915_v52 = vsel %vm1629_vm8, %v5845_v37, %v5914_v33 }
0x1c94   :  { %v5709_v21 = vpop.permute.xlu1 %5708  ;;  %v5706_v58 = vpop.permute.xlu0 %5705 }
0x1c95   :  { %v5857_v54 = vrot.slane %v5706_v58, %v11977_v2 }
0x1c98   :  { %v5700_v1 = vpop.permute.xlu1 %5699  ;;  %v5688_v46 = vpop.permute.xlu0 %5687 }
0x1c99   :  { %v5833_v3 = vrot.slane %v5688_v46, %v11977_v2  ;;  %v5849_v38 = vrot.slane %v5700_v1, %v11977_v2  ;;  %v5861_v46 = vrot.slane %v5709_v21, %v11977_v2 }
0x1c9b   :  { %v5913_v62 = vsel %vm1633_vm10, %v5833_v3, %v5912_v25  ;;  %v5916_v26 = vsel %vm1631_vm9, %v5849_v38, %v5915_v52 }
0x1c9c   :  { %v5721_v36 = vpop.permute.xlu1 %5720  ;;  %v5712_v18 = vpop.permute.xlu0 %5711  ;;  %v5946_v27 = vsel %vm1434_vm4, %v5913_v62, -inf  ;;  %v5918_v62 = vsel %vm1627_vm0, %v5861_v46, %v5857_v54 }
0x1c9d   :  { %5947 = vmax.xlane.f32.xlu0 %v5946_v27  ;;  %v5865_v3 = vrot.slane %v5712_v18, %v11977_v2  ;;  %v5877_v38 = vrot.slane %v5721_v36, %v11977_v2 }
0x1c9f   :  { %v5919_v51 = vsel %vm1629_vm8, %v5865_v3, %v5918_v62  ;;  %v17595_v62 = vld [vmem:[#allocation34_spill] sm:$0xff] }
0x1ca0   :  { %v5703_v10 = vpop.permute.xlu1 %5702  ;;  %v5724_v40 = vpop.permute.xlu0 %5723 }
0x1ca1   :  { %v5853_v9 = vrot.slane %v5703_v10, %v11977_v2  ;;  %v5881_v63 = vrot.slane %v5724_v40, %v11977_v2 }
0x1ca3   :  { %v5917_v22 = vsel %vm1633_vm10, %v5853_v9, %v5916_v26  ;;  %v5922_v52 = vsel %vm1627_vm0, %v5881_v63, %v5877_v38 }
0x1ca4   :  { %v5727_v14 = vpop.permute.xlu1 %5726  ;;  %v5715_v50 = vpop.permute.xlu0 %5714  ;;  %v5949_v1 = vsel %vm1434_vm4, %v5917_v22, -inf }
0x1ca5   :  { %5950 = vmax.xlane.f32.xlu1 %v5949_v1  ;;  %v5869_v25 = vrot.slane %v5715_v50, %v11977_v2  ;;  %v5885_v21 = vrot.slane %v5727_v14, %v11977_v2 }
0x1ca7   :  { %v5920_v18 = vsel %vm1631_vm9, %v5869_v25, %v5919_v51  ;;  %v5923_v26 = vsel %vm1629_vm8, %v5885_v21, %v5922_v52  ;;  %v17604_v52 = vld [vmem:[#allocation35_spill] sm:$0xff] }
0x1ca8   :  { %v5730_v27 = vpop.permute.xlu1 %5729  ;;  %v5718_v37 = vpop.permute.xlu0 %5717 }
0x1ca9   :  { %v5873_v58 = vrot.slane %v5718_v37, %v11977_v2  ;;  %v5889_v33 = vrot.slane %v5730_v27, %v11977_v2  ;;  %v17596_v27 = vld [vmem:[#allocation33_spill] sm:$0xff] }
0x1cab   :  { %v5921_v10 = vsel %vm1633_vm10, %v5873_v58, %v5920_v18  ;;  %v5924_v46 = vsel %vm1631_vm9, %v5889_v33, %v5923_v26 }
0x1cac   :  { %v5733_v9 = vpop.permute.xlu0 %5732  ;;  %v5952_v40 = vsel %vm1434_vm4, %v5921_v10, -inf }
0x1cad   :  { %v5893_v22 = vrot.slane %v5733_v9, %v11977_v2  ;;  %5953 = vmax.xlane.f32.xlu0 %v5952_v40 }
0x1caf   :  { %v5925_v36 = vsel %vm1633_vm10, %v5893_v22, %v5924_v46 }
0x1cb0   :  { %v5955_v54 = vsel %vm1434_vm4, %v5925_v36, -inf  ;;  %v13971_v14 = vpop.permute.xlu0 %8032 }
0x1cb1   :  { %5956 = vmax.xlane.f32.xlu1 %v5955_v54  ;;  %v17610_v54 = vld [vmem:[#allocation36_spill] sm:$0xff] }
0x1cda   :  { %v13973_v50 = vpop.xlane.xlu1 %4051 }
0x1cdb   :  { %17591 = vst [vmem:[#allocation144_spill] sm:$0xff] %v13973_v50 }
0x1cdd   :  { %v13975_v1 = vpop.xlane.xlu0 %4066 }
0x1cde   :  { %17592 = vst [vmem:[#allocation145_spill] sm:$0xff] %v13975_v1 }
0x1d0a   :  { %v13977_v3 = vpop.xlane.xlu1 %5935  ;;  %v13979_v25 = vpop.xlane.xlu0 %5938 }
0x1d0b   :  { %17593 = vst [vmem:[#allocation146_spill] sm:$0xff] %v13977_v3  ;;  %17594 = vst [vmem:[#allocation147_spill] sm:$0xff] %v13979_v25  ;;  %v6784_v63 = vadd.f32 %v17595_v62, %v13977_v3  ;;  %v6785_v37 = vadd.f32 %v17596_v27, %v13979_v25 }
0x1d0d   :  { %v13986_v51 = vadd.f32 %v6784_v63, %v17455_v15  ;;  %v13989_v21 = vadd.f32 %v6784_v63, %v17453_v49  ;;  %v13994_v58 = vadd.f32 %v6785_v37, %v17455_v15  ;;  %v13997_v38 = vadd.f32 %v6785_v37, %v17453_v49 }
0x1d0e   :  { %v14002_v33 = vadd.f32 %v6785_v37, %v17459_v56  ;;  %v14005_v18 = vadd.f32 %v6784_v63, %v17459_v56  ;;  %v14022_v22 = vadd.f32 %v6785_v37, %v17465_v32  ;;  %v14025_v46 = vadd.f32 %v6784_v63, %v17465_v32 }
0x1d0f   :  { %17597 = vst [vmem:[#allocation34_spill] sm:$0xff] %v13986_v51  ;;  %17598 = vst [vmem:[#allocation33_spill] sm:$0xff] %v13989_v21  ;;  %6876 = vperm.xlu0 %11277, %v13986_v51   ;;  %6873 = vperm.xlu1 %11278, %v13989_v21   ;;  %v14042_v50 = vadd.f32 %v6784_v63, %v17470_v12  ;;  %v14053_v11 = vadd.f32 %v6785_v37, %v17470_v12  ;;  %v17703_v21 = vld [vmem:[#allocation11_spill] sm:$0xff] }
0x1d10   :  { %17599 = vst [vmem:[#allocation148_spill] sm:$0xff] %v13994_v58  ;;  %17600 = vst [vmem:[#allocation149_spill] sm:$0xff] %v13997_v38 }
0x1d11   :  { %17601 = vst [vmem:[#allocation150_spill] sm:$0xff] %v14002_v33  ;;  %17602 = vst [vmem:[#allocation151_spill] sm:$0xff] %v14005_v18 }
0x1d12   :  { %17607 = vst [vmem:[#allocation154_spill] sm:$0xff] %v14022_v22  ;;  %17608 = vst [vmem:[#allocation155_spill] sm:$0xff] %v14025_v46 }
0x1d13   :  { %6891 = vperm.xlu0 %11277, %v13994_v58   ;;  %6888 = vperm.xlu1 %11278, %v13997_v38   ;;  %17613 = vst [vmem:[#allocation158_spill] sm:$0xff] %v14042_v50  ;;  %17616 = vst [vmem:[#allocation161_spill] sm:$0xff] %v14053_v11 }
0x1d16   :  { %v14007_v10 = vpop.xlane.xlu0 %5941 }
0x1d17   :  { %17603 = vst [vmem:[#allocation152_spill] sm:$0xff] %v14007_v10  ;;  %v6786_v9 = vadd.f32 %v17604_v52, %v14007_v10  ;;  %6894 = vperm.xlu0 %11277, %v14002_v33   ;;  %6879 = vperm.xlu1 %11278, %v14005_v18   ;;  %v9239_v10 = vrot.slane %v14167_v0, %v11644_v8 }
0x1d19   :  { %v14014_v40 = vadd.f32 %v6786_v9, %v17455_v15  ;;  %v14017_v26 = vadd.f32 %v6786_v9, %v17453_v49  ;;  %v14037_v52 = vadd.f32 %v6786_v9, %v17459_v56  ;;  %v14073_v61 = vadd.f32 %v6786_v9, %v17470_v12 }
0x1d1b   :  { %17605 = vst [vmem:[#allocation35_spill] sm:$0xff] %v14014_v40  ;;  %17606 = vst [vmem:[#allocation153_spill] sm:$0xff] %v14017_v26  ;;  %6906 = vperm.xlu0 %11277, %v14014_v40   ;;  %6903 = vperm.xlu1 %11278, %v14017_v26  }
0x1d1c   :  { %17612 = vst [vmem:[#allocation157_spill] sm:$0xff] %v14037_v52  ;;  %17622 = vst [vmem:[#allocation165_spill] sm:$0xff] %v14073_v61 }
0x1d1e   :  { %v14027_v36 = vpop.xlane.xlu1 %5944 }
0x1d1f   :  { %17609 = vst [vmem:[#allocation156_spill] sm:$0xff] %v14027_v36  ;;  %v6787_v62 = vadd.f32 %v17610_v54, %v14027_v36  ;;  %6897 = vperm.xlu0 %11277, %v14022_v22   ;;  %6882 = vperm.xlu1 %11278, %v14025_v46   ;;  %v14050_v54 = vadd.f32 %v6786_v9, %v17465_v32 }
0x1d21   :  { %v14034_v27 = vadd.f32 %v6787_v62, %v17453_v49  ;;  %v14045_v1 = vadd.f32 %v6787_v62, %v17455_v15  ;;  %17615 = vst [vmem:[#allocation160_spill] sm:$0xff] %v14050_v54  ;;  %v14062_v63 = vadd.f32 %v6787_v62, %v17459_v56  ;;  %v14082_v29 = vadd.f32 %v6787_v62, %v17465_v32 }
0x1d22   :  { %v14102_v42 = vadd.f32 %v6787_v62, %v17470_v12 }
0x1d23   :  { %17611 = vst [vmem:[#allocation36_spill] sm:$0xff] %v14034_v27  ;;  %6918 = vperm.xlu0 %11277, %v14034_v27   ;;  %6909 = vperm.xlu1 %11278, %v14037_v52   ;;  %17614 = vst [vmem:[#allocation159_spill] sm:$0xff] %v14045_v1 }
0x1d24   :  { %17619 = vst [vmem:[#allocation37_spill] sm:$0xff] %v14062_v63  ;;  %17625 = vst [vmem:[#allocation38_spill] sm:$0xff] %v14082_v29 }
0x1d27   :  { %6885 = vperm.xlu0 %11277, %v14042_v50   ;;  %6921 = vperm.xlu1 %11278, %v14045_v1   ;;  %v17681_v50 = vld [vmem:[#allocation46_spill] sm:$0xff] }
0x1d2a   :  { %v14055_v53 = vpop.xlane.xlu0 %5947 }
0x1d2b   :  { %17617 = vst [vmem:[#allocation162_spill] sm:$0xff] %v14055_v53  ;;  %v6788_v16 = vadd.f32 %v17618_v13, %v14055_v53  ;;  %6912 = vperm.xlu0 %11277, %v14050_v54   ;;  %6900 = vperm.xlu1 %11278, %v14053_v11  }
0x1d2d   :  { %v14065_v24 = vadd.f32 %v6788_v16, %v17453_v49  ;;  %v14070_v37 = vadd.f32 %v6788_v16, %v17455_v15  ;;  %v14085_v47 = vadd.f32 %v6788_v16, %v17459_v56  ;;  %v14105_v31 = vadd.f32 %v6788_v16, %v17465_v32 }
0x1d2f   :  { %17620 = vst [vmem:[#allocation163_spill] sm:$0xff] %v14065_v24  ;;  %6924 = vperm.xlu1 %11278, %v14062_v63   ;;  %6933 = vperm.xlu0 %11277, %v14065_v24   ;;  %17621 = vst [vmem:[#allocation164_spill] sm:$0xff] %v14070_v37 }
0x1d30   :  { %17626 = vst [vmem:[#allocation167_spill] sm:$0xff] %v14085_v47  ;;  %17632 = vst [vmem:[#allocation171_spill] sm:$0xff] %v14105_v31 }
0x1d32   :  { %v14075_v13 = vpop.xlane.xlu1 %5950 }
0x1d33   :  { %17623 = vst [vmem:[#allocation166_spill] sm:$0xff] %v14075_v13  ;;  %6936 = vperm.xlu1 %11278, %v14070_v37   ;;  %6915 = vperm.xlu0 %11277, %v14073_v61   ;;  %v6789_v44 = vadd.f32 %v17624_v39, %v14075_v13  ;;  %v17630_v39 = vld [vmem:[#allocation39_spill] sm:$0xff] }
0x1d34   :  { %17631 = vst [vmem:[#allocation39_spill] sm:$0xff] %v14102_v42 }
0x1d35   :  { %v14090_v9 = vadd.f32 %v6789_v44, %v17453_v49  ;;  %v14093_v30 = vadd.f32 %v6789_v44, %v17455_v15  ;;  %v14110_v57 = vadd.f32 %v6789_v44, %v17459_v56  ;;  %v14130_v36 = vadd.f32 %v6789_v44, %v17465_v32 }
0x1d37   :  { %6927 = vperm.xlu1 %11278, %v14082_v29   ;;  %6939 = vperm.xlu0 %11277, %v14085_v47   ;;  %17627 = vst [vmem:[#allocation168_spill] sm:$0xff] %v14090_v9  ;;  %17628 = vst [vmem:[#allocation169_spill] sm:$0xff] %v14093_v30 }
0x1d38   :  { %17633 = vst [vmem:[#allocation172_spill] sm:$0xff] %v14110_v57  ;;  %17639 = vst [vmem:[#allocation40_spill] sm:$0xff] %v14130_v36 }
0x1d3a   :  { %v14095_v53 = vpop.xlane.xlu0 %5953 }
0x1d3b   :  { %17629 = vst [vmem:[#allocation170_spill] sm:$0xff] %v14095_v53  ;;  %6948 = vperm.xlu1 %11278, %v14090_v9   ;;  %6951 = vperm.xlu0 %11277, %v14093_v30   ;;  %v6790_v13 = vadd.f32 %v17630_v39, %v14095_v53  ;;  %v14121_v39 = vadd.f32 %v6788_v16, %v17470_v12 }
0x1d3d   :  { %v14113_v55 = vadd.f32 %v6790_v13, %v17453_v49  ;;  %v14118_v62 = vadd.f32 %v6790_v13, %v17455_v15  ;;  %17636 = vst [vmem:[#allocation175_spill] sm:$0xff] %v14121_v39  ;;  %v14133_v7 = vadd.f32 %v6790_v13, %v17459_v56  ;;  %v14157_v5 = vadd.f32 %v6790_v13, %v17470_v12 }
0x1d3e   :  { %v14123_v53 = vpop.xlane.xlu1 %5956 }
0x1d3f   :  { %6930 = vperm.xlu1 %11278, %v14102_v42   ;;  %6942 = vperm.xlu0 %11277, %v14105_v31   ;;  %17634 = vst [vmem:[#allocation173_spill] sm:$0xff] %v14113_v55  ;;  %17635 = vst [vmem:[#allocation174_spill] sm:$0xff] %v14118_v62  ;;  %v6791_v48 = vadd.f32 %v17638_v6, %v14123_v53  ;;  %v14146_v6 = vadd.f32 %v6789_v44, %v17470_v12 }
0x1d40   :  { %17637 = vst [vmem:[#allocation176_spill] sm:$0xff] %v14123_v53  ;;  %17640 = vst [vmem:[#allocation177_spill] sm:$0xff] %v14133_v7  ;;  %v14149_v53 = vadd.f32 %v6790_v13, %v17465_v32  ;;  %v9246_v13 = vrot.slane %v14167_v0, %v11809_v28 }
0x1d41   :  { %v14138_v16 = vadd.f32 %v6791_v48, %v17453_v49  ;;  %v14141_v35 = vadd.f32 %v6791_v48, %v17455_v15  ;;  %17643 = vst [vmem:[#allocation180_spill] sm:$0xff] %v14146_v6  ;;  %v14154_v41 = vadd.f32 %v6791_v48, %v17459_v56  ;;  %17646 = vst [vmem:[#allocation183_spill] sm:$0xff] %v14157_v5 }
0x1d42   :  { %17644 = vst [vmem:[#allocation181_spill] sm:$0xff] %v14149_v53  ;;  %v14162_v44 = vadd.f32 %v6791_v48, %v17465_v32  ;;  %v14165_v59 = vadd.f32 %v6791_v48, %v17470_v12  ;;  %v9260_v48 = vrot.slane %v14167_v0, %v17414_v4 }
0x1d43   :  { %6954 = vperm.xlu1 %11278, %v14110_v57   ;;  %6963 = vperm.xlu0 %11277, %v14113_v55   ;;  %17641 = vst [vmem:[#allocation178_spill] sm:$0xff] %v14138_v16  ;;  %17642 = vst [vmem:[#allocation179_spill] sm:$0xff] %v14141_v35 }
0x1d44   :  { %17645 = vst [vmem:[#allocation182_spill] sm:$0xff] %v14154_v41  ;;  %17647 = vst [vmem:[#allocation184_spill] sm:$0xff] %v14162_v44 }
0x1d45   :  { %17648 = vst [vmem:[#allocation185_spill] sm:$0xff] %v14165_v59 }
0x1d47   :  { %6966 = vperm.xlu1 %11278, %v14118_v62   ;;  %6945 = vperm.xlu0 %11277, %v14121_v39  }
0x1d4b   :  { %6957 = vperm.xlu1 %11278, %v14130_v36   ;;  %6969 = vperm.xlu0 %11277, %v14133_v7  }
0x1d4f   :  { %6978 = vperm.xlu1 %11278, %v14138_v16   ;;  %6981 = vperm.xlu0 %11277, %v14141_v35  }
0x1d53   :  { %6960 = vperm.xlu1 %11278, %v14146_v6   ;;  %6972 = vperm.xlu0 %11277, %v14149_v53  }
0x1d57   :  { %6984 = vperm.xlu1 %11278, %v14154_v41   ;;  %6975 = vperm.xlu0 %11277, %v14157_v5  }
0x1d5b   :  { %6987 = vperm.xlu1 %11278, %v14162_v44   ;;  %6990 = vperm.xlu0 %11277, %v14165_v59  }
0x1d5f   :  { %9248 = vbcast.lane.b32.xlu1 %v9246_v13, 256  ;;  %9241 = vbcast.lane.b32.xlu0 %v9239_v10, 256 }
0x1d63   :  { %9255 = vbcast.lane.b32.xlu1 %v9253_v20, 256  ;;  %9262 = vbcast.lane.b32.xlu0 %v9260_v48, 256 }
0x1d67   :  { %9269 = vbcast.lane.b32.xlu1 %v9267_v60, 256 }
0x1d8e   :  { %v6874_v19 = vpop.permute.xlu1 %6873  ;;  %v6877_v25 = vpop.permute.xlu0 %6876 }
0x1d8f   :  { %v6995_v41 = vrot.slane %v6874_v19, %v11977_v2  ;;  %v6999_v35 = vrot.slane %v6877_v25, %v11977_v2 }
0x1d91   :  { %v7152_v7 = vsel %vm1627_vm0, %v6999_v35, %v6995_v41 }
0x1d92   :  { %v6889_v45 = vpop.permute.xlu1 %6888  ;;  %v6892_v3 = vpop.permute.xlu0 %6891 }
0x1d93   :  { %v7015_v16 = vrot.slane %v6889_v45, %v11977_v2  ;;  %v7019_v39 = vrot.slane %v6892_v3, %v11977_v2 }
0x1d95   :  { %v7156_v35 = vsel %vm1627_vm0, %v7019_v39, %v7015_v16 }
0x1d96   :  { %v6880_v59 = vpop.permute.xlu1 %6879  ;;  %v6895_v5 = vpop.permute.xlu0 %6894 }
0x1d97   :  { %v7003_v6 = vrot.slane %v6880_v59, %v11977_v2  ;;  %v7023_v19 = vrot.slane %v6895_v5, %v11977_v2 }
0x1d99   :  { %v7153_v62 = vsel %vm1629_vm8, %v7003_v6, %v7152_v7  ;;  %v7157_v57 = vsel %vm1629_vm8, %v7023_v19, %v7156_v35 }
0x1d9a   :  { %v6904_v13 = vpop.permute.xlu1 %6903  ;;  %v6907_v10 = vpop.permute.xlu0 %6906 }
0x1d9e   :  { %v6883_v44 = vpop.permute.xlu1 %6882  ;;  %v6898_v53 = vpop.permute.xlu0 %6897 }
0x1d9f   :  { %v7007_v60 = vrot.slane %v6883_v44, %v11977_v2  ;;  %v7027_v31 = vrot.slane %v6898_v53, %v11977_v2  ;;  %v7035_v53 = vrot.slane %v6904_v13, %v11977_v2 }
0x1da1   :  { %v7154_v59 = vsel %vm1631_vm9, %v7007_v60, %v7153_v62  ;;  %v7158_v5 = vsel %vm1631_vm9, %v7027_v31, %v7157_v57  ;;  %v7039_v62 = vrot.slane %v6907_v10, %v11977_v2 }
0x1da2   :  { %v6910_v20 = vpop.permute.xlu1 %6909  ;;  %v6919_v48 = vpop.permute.xlu0 %6918 }
0x1da3   :  { %v7043_v16 = vrot.slane %v6910_v20, %v11977_v2 }
0x1da6   :  { %v6922_v36 = vpop.permute.xlu1 %6921  ;;  %v6886_v55 = vpop.permute.xlu0 %6885 }
0x1da7   :  { %v7011_v25 = vrot.slane %v6886_v55, %v11977_v2  ;;  %v7059_v20 = vrot.slane %v6922_v36, %v11977_v2 }
0x1da9   :  { %v7155_v44 = vsel %vm1633_vm10, %v7011_v25, %v7154_v59  ;;  %v7160_v25 = vsel %vm1627_vm0, %v7039_v62, %v7035_v53 }
0x1daa   :  { %v6901_v41 = vpop.permute.xlu1 %6900  ;;  %v6913_v45 = vpop.permute.xlu0 %6912  ;;  %v7192_v3 = vsel %vm1434_vm4, %v7155_v44, -inf  ;;  %v7161_v31 = vsel %vm1629_vm8, %v7043_v16, %v7160_v25 }
0x1dab   :  { %v7031_v7 = vrot.slane %v6901_v41, %v11977_v2  ;;  %7193 = vmax.xlane.f32.xlu1 %v7192_v3  ;;  %v7047_v19 = vrot.slane %v6913_v45, %v11977_v2 }
0x1dad   :  { %v7159_v55 = vsel %vm1633_vm10, %v7031_v7, %v7158_v5  ;;  %v7162_v13 = vsel %vm1631_vm9, %v7047_v19, %v7161_v31 }
0x1dae   :  { %v6925_v6 = vpop.permute.xlu1 %6924  ;;  %v6934_v60 = vpop.permute.xlu0 %6933  ;;  %v7195_v39 = vsel %vm1434_vm4, %v7159_v55, -inf  ;;  %v7055_v55 = vrot.slane %v6919_v48, %v11977_v2 }
0x1daf   :  { %7196 = vmax.xlane.f32.xlu0 %v7195_v39  ;;  %v7063_v5 = vrot.slane %v6925_v6, %v11977_v2 }
0x1db0   :  { %v7164_v62 = vsel %vm1627_vm0, %v7059_v20, %v7055_v55 }
0x1db1   :  { %v7165_v19 = vsel %vm1629_vm8, %v7063_v5, %v7164_v62 }
0x1db2   :  { %v6937_v59 = vpop.permute.xlu1 %6936  ;;  %v6916_v44 = vpop.permute.xlu0 %6915 }
0x1db3   :  { %v7051_v57 = vrot.slane %v6916_v44, %v11977_v2  ;;  %v7079_v31 = vrot.slane %v6937_v59, %v11977_v2 }
0x1db5   :  { %v7163_v10 = vsel %vm1633_vm10, %v7051_v57, %v7162_v13 }
0x1db6   :  { %v6928_v35 = vpop.permute.xlu1 %6927  ;;  %v6940_v41 = vpop.permute.xlu0 %6939  ;;  %v7198_v3 = vsel %vm1434_vm4, %v7163_v10, -inf  ;;  %v7075_v10 = vrot.slane %v6934_v60, %v11977_v2 }
0x1db7   :  { %7199 = vmax.xlane.f32.xlu0 %v7198_v3  ;;  %v7067_v53 = vrot.slane %v6928_v35, %v11977_v2  ;;  %v7083_v13 = vrot.slane %v6940_v41, %v11977_v2 }
0x1db8   :  { %v7168_v3 = vsel %vm1627_vm0, %v7079_v31, %v7075_v10 }
0x1db9   :  { %v7166_v44 = vsel %vm1631_vm9, %v7067_v53, %v7165_v19  ;;  %v7169_v55 = vsel %vm1629_vm8, %v7083_v13, %v7168_v3 }
0x1dba   :  { %v6949_v45 = vpop.permute.xlu1 %6948  ;;  %v6952_v7 = vpop.permute.xlu0 %6951 }
0x1dbb   :  { %v7095_v60 = vrot.slane %v6949_v45, %v11977_v2 }
0x1dbe   :  { %v6931_v39 = vpop.permute.xlu1 %6930  ;;  %v6943_v16 = vpop.permute.xlu0 %6942 }
0x1dbf   :  { %v7071_v25 = vrot.slane %v6931_v39, %v11977_v2  ;;  %v7087_v35 = vrot.slane %v6943_v16, %v11977_v2  ;;  %v7099_v16 = vrot.slane %v6952_v7, %v11977_v2 }
0x1dc1   :  { %v7167_v36 = vsel %vm1633_vm10, %v7071_v25, %v7166_v44  ;;  %v7170_v59 = vsel %vm1631_vm9, %v7087_v35, %v7169_v55 }
0x1dc2   :  { %v6955_v57 = vpop.permute.xlu1 %6954  ;;  %v6964_v6 = vpop.permute.xlu0 %6963  ;;  %v7201_v48 = vsel %vm1434_vm4, %v7167_v36, -inf }
0x1dc3   :  { %7202 = vmax.xlane.f32.xlu1 %v7201_v48  ;;  %v7103_v36 = vrot.slane %v6955_v57, %v11977_v2  ;;  %v7172_v48 = vsel %vm1627_vm0, %v7099_v16, %v7095_v60  ;;  %v7115_v7 = vrot.slane %v6964_v6, %v11977_v2 }
0x1dc5   :  { %v7173_v3 = vsel %vm1629_vm8, %v7103_v36, %v7172_v48 }
0x1dc6   :  { %v6967_v20 = vpop.permute.xlu1 %6966  ;;  %v6946_v5 = vpop.permute.xlu0 %6945 }
0x1dc7   :  { %v7091_v53 = vrot.slane %v6946_v5, %v11977_v2  ;;  %v7119_v13 = vrot.slane %v6967_v20, %v11977_v2 }
0x1dc9   :  { %v7171_v62 = vsel %vm1633_vm10, %v7091_v53, %v7170_v59  ;;  %v7176_v59 = vsel %vm1627_vm0, %v7119_v13, %v7115_v7 }
0x1dca   :  { %v6958_v39 = vpop.permute.xlu1 %6957  ;;  %v6970_v19 = vpop.permute.xlu0 %6969  ;;  %v7204_v41 = vsel %vm1434_vm4, %v7171_v62, -inf }
0x1dcb   :  { %7205 = vmax.xlane.f32.xlu0 %v7204_v41  ;;  %v7107_v31 = vrot.slane %v6958_v39, %v11977_v2  ;;  %v7123_v5 = vrot.slane %v6970_v19, %v11977_v2 }
0x1dcd   :  { %v7174_v57 = vsel %vm1631_vm9, %v7107_v31, %v7173_v3  ;;  %v7177_v41 = vsel %vm1629_vm8, %v7123_v5, %v7176_v59 }
0x1dce   :  { %v6979_v25 = vpop.permute.xlu1 %6978  ;;  %v6982_v44 = vpop.permute.xlu0 %6981 }
0x1dcf   :  { %v7135_v19 = vrot.slane %v6979_v25, %v11977_v2  ;;  %v7139_v60 = vrot.slane %v6982_v44, %v11977_v2 }
0x1dd2   :  { %v6961_v10 = vpop.permute.xlu1 %6960  ;;  %v6973_v35 = vpop.permute.xlu0 %6972 }
0x1dd3   :  { %v7111_v45 = vrot.slane %v6961_v10, %v11977_v2  ;;  %v7127_v55 = vrot.slane %v6973_v35, %v11977_v2  ;;  %v7180_v35 = vsel %vm1627_vm0, %v7139_v60, %v7135_v19 }
0x1dd5   :  { %v7175_v53 = vsel %vm1633_vm10, %v7111_v45, %v7174_v57  ;;  %v7178_v36 = vsel %vm1631_vm9, %v7127_v55, %v7177_v41 }
0x1dd6   :  { %v6985_v62 = vpop.permute.xlu1 %6984  ;;  %v6976_v20 = vpop.permute.xlu0 %6975  ;;  %v7207_v39 = vsel %vm1434_vm4, %v7175_v53, -inf }
0x1dd7   :  { %v7131_v6 = vrot.slane %v6976_v20, %v11977_v2  ;;  %7208 = vmax.xlane.f32.xlu1 %v7207_v39  ;;  %v7143_v16 = vrot.slane %v6985_v62, %v11977_v2  ;;  %v17650_v39 = vld [vmem:[#allocation42_spill] sm:$0xff] }
0x1dd9   :  { %v7179_v31 = vsel %vm1633_vm10, %v7131_v6, %v7178_v36  ;;  %v7181_v44 = vsel %vm1629_vm8, %v7143_v16, %v7180_v35  ;;  %v17654_v16 = vld [vmem:[#allocation41_spill] sm:$0xff] }
0x1dda   :  { %v6988_v48 = vpop.permute.xlu1 %6987  ;;  %v6991_v13 = vpop.permute.xlu0 %6990  ;;  %v7210_v10 = vsel %vm1434_vm4, %v7179_v31, -inf }
0x1ddb   :  { %v7147_v3 = vrot.slane %v6988_v48, %v11977_v2  ;;  %v7151_v25 = vrot.slane %v6991_v13, %v11977_v2  ;;  %7211 = vmax.xlane.f32.xlu0 %v7210_v10 }
0x1ddd   :  { %v7182_v5 = vsel %vm1631_vm9, %v7147_v3, %v7181_v44  ;;  %v17660_v3 = vld [vmem:[#allocation43_spill] sm:$0xff] }
0x1dde   :  { %v7183_v45 = vsel %vm1633_vm10, %v7151_v25, %v7182_v5  ;;  %v14261_v55 = vpop.permute.xlu1 %9248  ;;  %v14265_v53 = vpop.permute.xlu0 %9241 }
0x1ddf   :  { %v7213_v7 = vsel %vm1434_vm4, %v7183_v45, -inf }
0x1de0   :  { %7214 = vmax.xlane.f32.xlu1 %v7213_v7 }
0x1de2   :  { %v14263_v57 = vpop.permute.xlu1 %9255  ;;  %v14269_v62 = vpop.permute.xlu0 %9262 }
0x1de6   :  { %v14267_v59 = vpop.permute.xlu1 %9269 }
0x1e38   :  { %v14271_v20 = vpop.xlane.xlu1 %7193 }
0x1e39   :  { %17649 = vst [vmem:[#allocation186_spill] sm:$0xff] %v14271_v20  ;;  %v8042_v41 = vadd.f32 %v17650_v39, %v14271_v20  ;;  %v17705_v20 = vld [vmem:[#allocation8_spill] sm:$0xff] }
0x1e3b   :  { %v14276_v19 = vadd.f32 %v8042_v41, %v17455_v15  ;;  %v14279_v60 = vadd.f32 %v8042_v41, %v17453_v49  ;;  %v14299_v10 = vadd.f32 %v8042_v41, %v17459_v56  ;;  %v14319_v7 = vadd.f32 %v8042_v41, %v17465_v32 }
0x1e3c   :  { %v14281_v6 = vpop.xlane.xlu0 %7196  ;;  %v14340_v9 = vadd.f32 %v8042_v41, %v17470_v12 }
0x1e3d   :  { %17651 = vst [vmem:[#allocation42_spill] sm:$0xff] %v14276_v19  ;;  %17652 = vst [vmem:[#allocation187_spill] sm:$0xff] %v14279_v60  ;;  %v8043_v36 = vadd.f32 %v17654_v16, %v14281_v6  ;;  %8134 = vperm.xlu0 %11277, %v14276_v19   ;;  %8131 = vperm.xlu1 %11278, %v14279_v60  }
0x1e3e   :  { %17653 = vst [vmem:[#allocation188_spill] sm:$0xff] %v14281_v6  ;;  %17658 = vst [vmem:[#allocation191_spill] sm:$0xff] %v14299_v10  ;;  %v9281_v6 = vrot.slane %v14167_v0, %v17703_v21 }
0x1e3f   :  { %v14288_v31 = vadd.f32 %v8043_v36, %v17455_v15  ;;  %v14291_v48 = vadd.f32 %v8043_v36, %v17453_v49  ;;  %v14296_v13 = vadd.f32 %v8043_v36, %v17459_v56  ;;  %v14316_v45 = vadd.f32 %v8043_v36, %v17465_v32  ;;  %17664 = vst [vmem:[#allocation195_spill] sm:$0xff] %v14319_v7 }
0x1e40   :  { %17670 = vst [vmem:[#allocation199_spill] sm:$0xff] %v14340_v9  ;;  %v14343_v61 = vadd.f32 %v8043_v36, %v17470_v12 }
0x1e41   :  { %17655 = vst [vmem:[#allocation41_spill] sm:$0xff] %v14288_v31  ;;  %17656 = vst [vmem:[#allocation189_spill] sm:$0xff] %v14291_v48  ;;  %8149 = vperm.xlu0 %11277, %v14288_v31   ;;  %8146 = vperm.xlu1 %11278, %v14291_v48  }
0x1e42   :  { %17657 = vst [vmem:[#allocation190_spill] sm:$0xff] %v14296_v13  ;;  %17663 = vst [vmem:[#allocation194_spill] sm:$0xff] %v14316_v45 }
0x1e43   :  { %17671 = vst [vmem:[#allocation200_spill] sm:$0xff] %v14343_v61 }
0x1e44   :  { %v14301_v35 = vpop.xlane.xlu0 %7199 }
0x1e45   :  { %17659 = vst [vmem:[#allocation192_spill] sm:$0xff] %v14301_v35  ;;  %v8044_v25 = vadd.f32 %v17660_v3, %v14301_v35  ;;  %8152 = vperm.xlu0 %11277, %v14296_v13   ;;  %8137 = vperm.xlu1 %11278, %v14299_v10   ;;  %v17667_v3 = vld [vmem:[#allocation44_spill] sm:$0xff] }
0x1e47   :  { %v14308_v44 = vadd.f32 %v8044_v25, %v17455_v15  ;;  %v14311_v5 = vadd.f32 %v8044_v25, %v17453_v49  ;;  %v14324_v39 = vadd.f32 %v8044_v25, %v17459_v56  ;;  %v14352_v37 = vadd.f32 %v8044_v25, %v17465_v32 }
0x1e49   :  { %17661 = vst [vmem:[#allocation43_spill] sm:$0xff] %v14308_v44  ;;  %17662 = vst [vmem:[#allocation193_spill] sm:$0xff] %v14311_v5  ;;  %8164 = vperm.xlu0 %11277, %v14308_v44   ;;  %8161 = vperm.xlu1 %11278, %v14311_v5   ;;  %v10492_v44 = vld [vmem:[#allocation4 + $0x38] sm:$0xff] }
0x1e4a   :  { %17665 = vst [vmem:[#allocation196_spill] sm:$0xff] %v14324_v39  ;;  %v10511_v60 = vrot.slane %v10492_v44, %v11920_v34  ;;  %v10539_v13 = vrot.slane %v10492_v44, %v17703_v21 }
0x1e4d   :  { %8155 = vperm.xlu0 %11277, %v14316_v45   ;;  %8140 = vperm.xlu1 %11278, %v14319_v7  }
0x1e50   :  { %v14326_v16 = vpop.xlane.xlu1 %7202 }
0x1e51   :  { %17666 = vst [vmem:[#allocation197_spill] sm:$0xff] %v14326_v16  ;;  %v8045_v30 = vadd.f32 %v17667_v3, %v14326_v16  ;;  %8167 = vperm.xlu1 %11278, %v14324_v39   ;;  %v17673_v3 = vld [vmem:[#allocation45_spill] sm:$0xff] }
0x1e52   :  { %17674 = vst [vmem:[#allocation45_spill] sm:$0xff] %v14352_v37 }
0x1e53   :  { %v14332_v42 = vadd.f32 %v8045_v30, %v17453_v49  ;;  %v14335_v47 = vadd.f32 %v8045_v30, %v17455_v15  ;;  %v14355_v54 = vadd.f32 %v8045_v30, %v17459_v56 }
0x1e55   :  { %17668 = vst [vmem:[#allocation44_spill] sm:$0xff] %v14332_v42  ;;  %17669 = vst [vmem:[#allocation198_spill] sm:$0xff] %v14335_v47  ;;  %8176 = vperm.xlu0 %11277, %v14332_v42   ;;  %8179 = vperm.xlu1 %11278, %v14335_v47  }
0x1e56   :  { %17675 = vst [vmem:[#allocation202_spill] sm:$0xff] %v14355_v54 }
0x1e58   :  { %v14345_v29 = vpop.xlane.xlu0 %7205 }
0x1e59   :  { %17672 = vst [vmem:[#allocation201_spill] sm:$0xff] %v14345_v29  ;;  %8143 = vperm.xlu0 %11277, %v14340_v9   ;;  %8158 = vperm.xlu1 %11278, %v14343_v61   ;;  %v8046_v24 = vadd.f32 %v17673_v3, %v14345_v29  ;;  %v14368_v3 = vadd.f32 %v8045_v30, %v17465_v32 }
0x1e5a   :  { %v14371_v29 = vadd.f32 %v8044_v25, %v17470_v12  ;;  %v14388_v25 = vadd.f32 %v8045_v30, %v17470_v12 }
0x1e5b   :  { %v14360_v41 = vadd.f32 %v8046_v24, %v17455_v15  ;;  %v14363_v36 = vadd.f32 %v8046_v24, %v17453_v49  ;;  %17678 = vst [vmem:[#allocation205_spill] sm:$0xff] %v14368_v3  ;;  %v14383_v1 = vadd.f32 %v8046_v24, %v17459_v56  ;;  %v14403_v40 = vadd.f32 %v8046_v24, %v17465_v32 }
0x1e5c   :  { %17679 = vst [vmem:[#allocation206_spill] sm:$0xff] %v14371_v29  ;;  %17684 = vst [vmem:[#allocation209_spill] sm:$0xff] %v14388_v25  ;;  %v14423_v26 = vadd.f32 %v8046_v24, %v17470_v12 }
0x1e5d   :  { %8170 = vperm.xlu0 %11277, %v14352_v37   ;;  %8182 = vperm.xlu1 %11278, %v14355_v54   ;;  %17676 = vst [vmem:[#allocation203_spill] sm:$0xff] %v14360_v41  ;;  %17677 = vst [vmem:[#allocation204_spill] sm:$0xff] %v14363_v36 }
0x1e5e   :  { %17683 = vst [vmem:[#allocation208_spill] sm:$0xff] %v14383_v1  ;;  %17689 = vst [vmem:[#allocation212_spill] sm:$0xff] %v14403_v40 }
0x1e5f   :  { %17694 = vst [vmem:[#allocation217_spill] sm:$0xff] %v14423_v26 }
0x1e61   :  { %8194 = vperm.xlu1 %11278, %v14360_v41   ;;  %8191 = vperm.xlu0 %11277, %v14363_v36  }
0x1e64   :  { %v14373_v63 = vpop.xlane.xlu1 %7208 }
0x1e65   :  { %17680 = vst [vmem:[#allocation207_spill] sm:$0xff] %v14373_v63  ;;  %v8047_v11 = vadd.f32 %v17681_v50, %v14373_v63  ;;  %8185 = vperm.xlu1 %11278, %v14368_v3   ;;  %8173 = vperm.xlu0 %11277, %v14371_v29   ;;  %v17687_v63 = vld [vmem:[#allocation47_spill] sm:$0xff] }
0x1e67   :  { %v14380_v27 = vadd.f32 %v8047_v11, %v17453_v49  ;;  %v14391_v22 = vadd.f32 %v8047_v11, %v17455_v15  ;;  %v14400_v52 = vadd.f32 %v8047_v11, %v17459_v56 }
0x1e68   :  { %v14393_v50 = vpop.xlane.xlu0 %7211 }
0x1e69   :  { %17682 = vst [vmem:[#allocation46_spill] sm:$0xff] %v14380_v27  ;;  %8206 = vperm.xlu1 %11278, %v14380_v27   ;;  %8197 = vperm.xlu0 %11277, %v14383_v1   ;;  %17685 = vst [vmem:[#allocation210_spill] sm:$0xff] %v14391_v22  ;;  %v8048_v16 = vadd.f32 %v17687_v63, %v14393_v50 }
0x1e6a   :  { %17686 = vst [vmem:[#allocation211_spill] sm:$0xff] %v14393_v50  ;;  %17688 = vst [vmem:[#allocation47_spill] sm:$0xff] %v14400_v52  ;;  %v14420_v50 = vadd.f32 %v8047_v11, %v17465_v32 }
0x1e6b   :  { %v14408_v30 = vadd.f32 %v8048_v16, %v17455_v15  ;;  %v14411_v46 = vadd.f32 %v8048_v16, %v17453_v49  ;;  %v14431_v35 = vadd.f32 %v8048_v16, %v17459_v56  ;;  %v14447_v18 = vadd.f32 %v8048_v16, %v17465_v32 }
0x1e6c   :  { %17693 = vst [vmem:[#allocation216_spill] sm:$0xff] %v14420_v50  ;;  %v14455_v38 = vadd.f32 %v8048_v16, %v17470_v12  ;;  %v9288_v16 = vrot.slane %v14167_v0, %v17587_v43 }
0x1e6d   :  { %8188 = vperm.xlu1 %11278, %v14388_v25   ;;  %8209 = vperm.xlu0 %11277, %v14391_v22   ;;  %17690 = vst [vmem:[#allocation213_spill] sm:$0xff] %v14408_v30  ;;  %17691 = vst [vmem:[#allocation214_spill] sm:$0xff] %v14411_v46  ;;  %v14413_v33 = vpop.xlane.xlu1 %7214 }
0x1e6e   :  { %17692 = vst [vmem:[#allocation215_spill] sm:$0xff] %v14413_v33  ;;  %v8049_v63 = vadd.f32 %v13971_v14, %v14413_v33  ;;  %17696 = vst [vmem:[#allocation219_spill] sm:$0xff] %v14431_v35  ;;  %v14436_v14 = vadd.f32 %v8047_v11, %v17470_v12 }
0x1e6f   :  { %17700 = vst [vmem:[#allocation223_spill] sm:$0xff] %v14447_v18  ;;  %17702 = vst [vmem:[#allocation225_spill] sm:$0xff] %v14455_v38 }
0x1e70   :  { %v14428_v58 = vadd.f32 %v8049_v63, %v17453_v49  ;;  %17697 = vst [vmem:[#allocation220_spill] sm:$0xff] %v14436_v14  ;;  %v14439_v24 = vadd.f32 %v8049_v63, %v17455_v15  ;;  %v14444_v33 = vadd.f32 %v8049_v63, %v17459_v56  ;;  %v14452_v11 = vadd.f32 %v8049_v63, %v17465_v32 }
0x1e71   :  { %8212 = vperm.xlu1 %11278, %v14400_v52   ;;  %8200 = vperm.xlu0 %11277, %v14403_v40   ;;  %v14462_v51 = vadd.f32 %v8049_v63, %v17470_v12 }
0x1e72   :  { %17695 = vst [vmem:[#allocation218_spill] sm:$0xff] %v14428_v58  ;;  %17698 = vst [vmem:[#allocation221_spill] sm:$0xff] %v14439_v24 }
0x1e73   :  { %17699 = vst [vmem:[#allocation222_spill] sm:$0xff] %v14444_v33  ;;  %17701 = vst [vmem:[#allocation224_spill] sm:$0xff] %v14452_v11 }
0x1e74   :  { %17704 = vst [vmem:[#allocation226_spill] sm:$0xff] %v14462_v51 }
0x1e75   :  { %8224 = vperm.xlu1 %11278, %v14408_v30   ;;  %8221 = vperm.xlu0 %11277, %v14411_v46  }
0x1e79   :  { %8215 = vperm.xlu1 %11278, %v14420_v50   ;;  %8203 = vperm.xlu0 %11277, %v14423_v26  }
0x1e7d   :  { %8236 = vperm.xlu1 %11278, %v14428_v58   ;;  %8227 = vperm.xlu0 %11277, %v14431_v35  }
0x1e81   :  { %8218 = vperm.xlu1 %11278, %v14436_v14   ;;  %8239 = vperm.xlu0 %11277, %v14439_v24  }
0x1e85   :  { %8242 = vperm.xlu1 %11278, %v14444_v33   ;;  %8230 = vperm.xlu0 %11277, %v14447_v18   ;;  %v9274_v33 = vrot.slane %v14167_v0, %v17705_v20 }
0x1e89   :  { %8245 = vperm.xlu1 %11278, %v14452_v11   ;;  %8233 = vperm.xlu0 %11277, %v14455_v38  }
0x1e8d   :  { %9283 = vbcast.lane.b32.xlu1 %v9281_v6, 256  ;;  %8248 = vperm.xlu0 %11277, %v14462_v51  }
0x1e91   :  { %9276 = vbcast.lane.b32.xlu0 %v9274_v33, 256 }
0x1e95   :  { %9290 = vbcast.lane.b32.xlu0 %v9288_v16, 256 }
0x1ebc   :  { %v8132_v11 = vpop.permute.xlu1 %8131  ;;  %v8135_v14 = vpop.permute.xlu0 %8134 }
0x1ebd   :  { %v8253_v51 = vrot.slane %v8132_v11, %v11977_v2  ;;  %v8257_v52 = vrot.slane %v8135_v14, %v11977_v2 }
0x1ebf   :  { %v8410_v3 = vsel %vm1627_vm0, %v8257_v52, %v8253_v51 }
0x1ec0   :  { %v8147_v38 = vpop.permute.xlu1 %8146  ;;  %v8150_v58 = vpop.permute.xlu0 %8149 }
0x1ec1   :  { %v8273_v33 = vrot.slane %v8147_v38, %v11977_v2  ;;  %v8277_v0 = vrot.slane %v8150_v58, %v11977_v2 }
0x1ec3   :  { %v8414_v11 = vsel %vm1627_vm0, %v8277_v0, %v8273_v33 }
0x1ec4   :  { %v8138_v18 = vpop.permute.xlu1 %8137  ;;  %v8153_v50 = vpop.permute.xlu0 %8152 }
0x1ec5   :  { %v8261_v25 = vrot.slane %v8138_v18, %v11977_v2  ;;  %v8281_v46 = vrot.slane %v8153_v50, %v11977_v2 }
0x1ec7   :  { %v8411_v38 = vsel %vm1629_vm8, %v8261_v25, %v8410_v3  ;;  %v8415_v58 = vsel %vm1629_vm8, %v8281_v46, %v8414_v11 }
0x1ec8   :  { %v8162_v24 = vpop.permute.xlu1 %8161  ;;  %v8165_v63 = vpop.permute.xlu0 %8164 }
0x1ec9   :  { %v8297_v46 = vrot.slane %v8165_v63, %v11977_v2 }
0x1ecc   :  { %v8141_v30 = vpop.permute.xlu1 %8140  ;;  %v8156_v6 = vpop.permute.xlu0 %8155 }
0x1ecd   :  { %v8265_v27 = vrot.slane %v8141_v30, %v11977_v2  ;;  %v8285_v40 = vrot.slane %v8156_v6, %v11977_v2 }
0x1ecf   :  { %v8416_v50 = vsel %vm1631_vm9, %v8285_v40, %v8415_v58  ;;  %v8412_v30 = vsel %vm1631_vm9, %v8265_v27, %v8411_v38 }
0x1ed0   :  { %v8168_v35 = vpop.permute.xlu1 %8167 }
0x1ed1   :  { %v8301_v27 = vrot.slane %v8168_v35, %v11977_v2 }
0x1ed4   :  { %v8180_v16 = vpop.permute.xlu1 %8179  ;;  %v8177_v26 = vpop.permute.xlu0 %8176 }
0x1ed5   :  { %v8317_v63 = vrot.slane %v8180_v16, %v11977_v2 }
0x1ed8   :  { %v8159_v22 = vpop.permute.xlu1 %8158  ;;  %v8144_v14 = vpop.permute.xlu0 %8143 }
0x1ed9   :  { %v8289_v41 = vrot.slane %v8159_v22, %v11977_v2  ;;  %v8269_v18 = vrot.slane %v8144_v14, %v11977_v2  ;;  %v8293_v22 = vrot.slane %v8162_v24, %v11977_v2 }
0x1edb   :  { %v8417_v6 = vsel %vm1633_vm10, %v8289_v41, %v8416_v50  ;;  %v8413_v51 = vsel %vm1633_vm10, %v8269_v18, %v8412_v30  ;;  %v8418_v11 = vsel %vm1627_vm0, %v8297_v46, %v8293_v22  ;;  %v8313_v30 = vrot.slane %v8177_v26, %v11977_v2 }
0x1edc   :  { %v8183_v52 = vpop.permute.xlu1 %8182  ;;  %v8171_v33 = vpop.permute.xlu0 %8170  ;;  %v8453_v0 = vsel %vm1434_vm4, %v8417_v6, -inf  ;;  %v8450_v3 = vsel %vm1434_vm4, %v8413_v51, -inf  ;;  %v8419_v58 = vsel %vm1629_vm8, %v8301_v27, %v8418_v11 }
0x1edd   :  { %8454 = vmax.xlane.f32.xlu0 %v8453_v0  ;;  %8451 = vmax.xlane.f32.xlu1 %v8450_v3  ;;  %v8305_v41 = vrot.slane %v8171_v33, %v11977_v2  ;;  %v8321_v33 = vrot.slane %v8183_v52, %v11977_v2  ;;  %v8422_v3 = vsel %vm1627_vm0, %v8317_v63, %v8313_v30 }
0x1edf   :  { %v8420_v50 = vsel %vm1631_vm9, %v8305_v41, %v8419_v58  ;;  %v8423_v27 = vsel %vm1629_vm8, %v8321_v33, %v8422_v3 }
0x1ee0   :  { %v8195_v25 = vpop.permute.xlu1 %8194  ;;  %v8192_v40 = vpop.permute.xlu0 %8191 }
0x1ee1   :  { %v8337_v52 = vrot.slane %v8195_v25, %v11977_v2 }
0x1ee4   :  { %v8186_v14 = vpop.permute.xlu1 %8185  ;;  %v8174_v38 = vpop.permute.xlu0 %8173 }
0x1ee5   :  { %v8309_v18 = vrot.slane %v8174_v38, %v11977_v2  ;;  %v8325_v0 = vrot.slane %v8186_v14, %v11977_v2  ;;  %v8333_v14 = vrot.slane %v8192_v40, %v11977_v2 }
0x1ee7   :  { %v8421_v24 = vsel %vm1633_vm10, %v8309_v18, %v8420_v50  ;;  %v8424_v16 = vsel %vm1631_vm9, %v8325_v0, %v8423_v27  ;;  %v8426_v30 = vsel %vm1627_vm0, %v8337_v52, %v8333_v14 }
0x1ee8   :  { %v8207_v6 = vpop.permute.xlu1 %8206  ;;  %v8198_v35 = vpop.permute.xlu0 %8197  ;;  %v8456_v51 = vsel %vm1434_vm4, %v8421_v24, -inf }
0x1ee9   :  { %8457 = vmax.xlane.f32.xlu0 %v8456_v51  ;;  %v8341_v24 = vrot.slane %v8198_v35, %v11977_v2 }
0x1eeb   :  { %v8427_v0 = vsel %vm1629_vm8, %v8341_v24, %v8426_v30 }
0x1eec   :  { %v8189_v22 = vpop.permute.xlu1 %8188  ;;  %v8210_v46 = vpop.permute.xlu0 %8209 }
0x1eed   :  { %v8329_v41 = vrot.slane %v8189_v22, %v11977_v2  ;;  %v8357_v40 = vrot.slane %v8210_v46, %v11977_v2 }
0x1eef   :  { %v8425_v26 = vsel %vm1633_vm10, %v8329_v41, %v8424_v16 }
0x1ef0   :  { %v8213_v11 = vpop.permute.xlu1 %8212  ;;  %v8201_v38 = vpop.permute.xlu0 %8200  ;;  %v8459_v58 = vsel %vm1434_vm4, %v8425_v26, -inf  ;;  %v8353_v26 = vrot.slane %v8207_v6, %v11977_v2 }
0x1ef1   :  { %8460 = vmax.xlane.f32.xlu1 %v8459_v58  ;;  %v8345_v63 = vrot.slane %v8201_v38, %v11977_v2  ;;  %v8361_v16 = vrot.slane %v8213_v11, %v11977_v2 }
0x1ef2   :  { %v8430_v58 = vsel %vm1627_vm0, %v8357_v40, %v8353_v26 }
0x1ef3   :  { %v8428_v22 = vsel %vm1631_vm9, %v8345_v63, %v8427_v0  ;;  %v8431_v24 = vsel %vm1629_vm8, %v8361_v16, %v8430_v58 }
0x1ef4   :  { %v8225_v18 = vpop.permute.xlu1 %8224  ;;  %v8222_v50 = vpop.permute.xlu0 %8221 }
0x1ef5   :  { %v8373_v11 = vrot.slane %v8222_v50, %v11977_v2 }
0x1ef8   :  { %v8216_v51 = vpop.permute.xlu1 %8215  ;;  %v8204_v33 = vpop.permute.xlu0 %8203 }
0x1ef9   :  { %v8349_v3 = vrot.slane %v8204_v33, %v11977_v2  ;;  %v8365_v38 = vrot.slane %v8216_v51, %v11977_v2  ;;  %v8377_v33 = vrot.slane %v8225_v18, %v11977_v2 }
0x1efb   :  { %v8429_v25 = vsel %vm1633_vm10, %v8349_v3, %v8428_v22  ;;  %v8432_v46 = vsel %vm1631_vm9, %v8365_v38, %v8431_v24 }
0x1efc   :  { %v8237_v27 = vpop.permute.xlu1 %8236  ;;  %v8228_v41 = vpop.permute.xlu0 %8227  ;;  %v8462_v35 = vsel %vm1434_vm4, %v8429_v25, -inf  ;;  %v8434_v25 = vsel %vm1627_vm0, %v8377_v33, %v8373_v11 }
0x1efd   :  { %8463 = vmax.xlane.f32.xlu0 %v8462_v35  ;;  %v8381_v3 = vrot.slane %v8228_v41, %v11977_v2  ;;  %v8393_v38 = vrot.slane %v8237_v27, %v11977_v2 }
0x1eff   :  { %v8435_v26 = vsel %vm1629_vm8, %v8381_v3, %v8434_v25 }
0x1f00   :  { %v8219_v52 = vpop.permute.xlu1 %8218  ;;  %v8240_v14 = vpop.permute.xlu0 %8239 }
0x1f01   :  { %v8369_v63 = vrot.slane %v8219_v52, %v11977_v2  ;;  %v8397_v40 = vrot.slane %v8240_v14, %v11977_v2 }
0x1f03   :  { %v8433_v30 = vsel %vm1633_vm10, %v8369_v63, %v8432_v46  ;;  %v8438_v24 = vsel %vm1627_vm0, %v8397_v40, %v8393_v38 }
0x1f04   :  { %v8243_v0 = vpop.permute.xlu1 %8242  ;;  %v8231_v6 = vpop.permute.xlu0 %8230  ;;  %v8465_v51 = vsel %vm1434_vm4, %v8433_v30, -inf }
0x1f05   :  { %8466 = vmax.xlane.f32.xlu1 %v8465_v51  ;;  %v8385_v22 = vrot.slane %v8231_v6, %v11977_v2  ;;  %v8401_v18 = vrot.slane %v8243_v0, %v11977_v2 }
0x1f07   :  { %v8436_v41 = vsel %vm1631_vm9, %v8385_v22, %v8435_v26  ;;  %v8439_v46 = vsel %vm1629_vm8, %v8401_v18, %v8438_v24 }
0x1f08   :  { %v8246_v35 = vpop.permute.xlu1 %8245  ;;  %v8234_v16 = vpop.permute.xlu0 %8233 }
0x1f09   :  { %v8389_v50 = vrot.slane %v8234_v16, %v11977_v2  ;;  %v8405_v58 = vrot.slane %v8246_v35, %v11977_v2 }
0x1f0b   :  { %v8437_v52 = vsel %vm1633_vm10, %v8389_v50, %v8436_v41  ;;  %v8440_v33 = vsel %vm1631_vm9, %v8405_v58, %v8439_v46 }
0x1f0c   :  { %v8249_v63 = vpop.permute.xlu0 %8248  ;;  %v8468_v14 = vsel %vm1434_vm4, %v8437_v52, -inf  ;;  %v14549_v6 = vpop.permute.xlu1 %9283 }
0x1f0d   :  { %v8409_v30 = vrot.slane %v8249_v63, %v11977_v2  ;;  %8469 = vmax.xlane.f32.xlu0 %v8468_v14 }
0x1f0f   :  { %v8441_v27 = vsel %vm1633_vm10, %v8409_v30, %v8440_v33 }
0x1f10   :  { %v8471_v11 = vsel %vm1434_vm4, %v8441_v27, -inf  ;;  %v9277_v0 = vpop.permute.xlu0 %9276 }
0x1f11   :  { %8472 = vmax.xlane.f32.xlu1 %v8471_v11 }
0x1f14   :  { %v14551_v51 = vpop.permute.xlu0 %9290 }
0x1f6a   :  { %v14553_v3 = vpop.xlane.xlu1 %8451  ;;  %v14555_v22 = vpop.xlane.xlu0 %8454 }
0x1f6b   :  { %17706 = vst [vmem:[#allocation227_spill] sm:$0xff] %v14553_v3  ;;  %17707 = vst [vmem:[#allocation228_spill] sm:$0xff] %v14555_v22  ;;  %v9300_v25 = vadd.f32 %v14265_v53, %v14553_v3  ;;  %v9301_v40 = vadd.f32 %v14261_v55, %v14555_v22 }
0x1f6d   :  { %v14562_v35 = vadd.f32 %v9300_v25, %v17455_v15  ;;  %v14565_v16 = vadd.f32 %v9300_v25, %v17453_v49  ;;  %v14570_v26 = vadd.f32 %v9301_v40, %v17455_v15  ;;  %v14573_v18 = vadd.f32 %v9301_v40, %v17453_v49 }
0x1f6e   :  { %v14578_v55 = vadd.f32 %v9301_v40, %v17459_v56  ;;  %v14581_v53 = vadd.f32 %v9300_v25, %v17459_v56  ;;  %v14598_v52 = vadd.f32 %v9301_v40, %v17465_v32  ;;  %v14601_v24 = vadd.f32 %v9300_v25, %v17465_v32 }
0x1f6f   :  { %9392 = vperm.xlu0 %11277, %v14562_v35   ;;  %9389 = vperm.xlu1 %11278, %v14565_v16   ;;  %v14618_v30 = vadd.f32 %v9300_v25, %v17470_v12  ;;  %v14629_v27 = vadd.f32 %v9301_v40, %v17470_v12 }
0x1f73   :  { %9407 = vperm.xlu0 %11277, %v14570_v26   ;;  %9404 = vperm.xlu1 %11278, %v14573_v18  }
0x1f76   :  { %v14583_v50 = vpop.xlane.xlu0 %8457 }
0x1f77   :  { %17708 = vst [vmem:[#allocation229_spill] sm:$0xff] %v14583_v50  ;;  %v9302_v38 = vadd.f32 %v14263_v57, %v14583_v50  ;;  %9410 = vperm.xlu0 %11277, %v14578_v55   ;;  %9395 = vperm.xlu1 %11278, %v14581_v53   ;;  %v10518_v50 = vrot.slane %v10492_v44, %v17414_v4 }
0x1f79   :  { %v14590_v58 = vadd.f32 %v9302_v38, %v17455_v15  ;;  %v14593_v41 = vadd.f32 %v9302_v38, %v17453_v49  ;;  %v14613_v46 = vadd.f32 %v9302_v38, %v17459_v56  ;;  %v14649_v29 = vadd.f32 %v9302_v38, %v17470_v12 }
0x1f7b   :  { %9422 = vperm.xlu0 %11277, %v14590_v58   ;;  %9419 = vperm.xlu1 %11278, %v14593_v41  }
0x1f7e   :  { %v14603_v57 = vpop.xlane.xlu1 %8460 }
0x1f7f   :  { %17709 = vst [vmem:[#allocation230_spill] sm:$0xff] %v14603_v57  ;;  %v9303_v63 = vadd.f32 %v14269_v62, %v14603_v57  ;;  %9413 = vperm.xlu0 %11277, %v14598_v52   ;;  %9398 = vperm.xlu1 %11278, %v14601_v24   ;;  %v14626_v62 = vadd.f32 %v9302_v38, %v17465_v32 }
0x1f81   :  { %v14610_v14 = vadd.f32 %v9303_v63, %v17453_v49  ;;  %v14621_v33 = vadd.f32 %v9303_v63, %v17455_v15  ;;  %v14638_v25 = vadd.f32 %v9303_v63, %v17459_v56  ;;  %v14657_v36 = vadd.f32 %v9303_v63, %v17465_v32 }
0x1f83   :  { %9434 = vperm.xlu0 %11277, %v14610_v14   ;;  %9425 = vperm.xlu1 %11278, %v14613_v46  }
0x1f87   :  { %9401 = vperm.xlu0 %11277, %v14618_v30   ;;  %9437 = vperm.xlu1 %11278, %v14621_v33  }
0x1f8a   :  { %v14631_v11 = vpop.xlane.xlu0 %8463 }
0x1f8b   :  { %17710 = vst [vmem:[#allocation231_spill] sm:$0xff] %v14631_v11  ;;  %v9304_v1 = vadd.f32 %v14267_v59, %v14631_v11  ;;  %9428 = vperm.xlu0 %11277, %v14626_v62   ;;  %9416 = vperm.xlu1 %11278, %v14629_v27  }
0x1f8d   :  { %v14641_v54 = vadd.f32 %v9304_v1, %v17453_v49  ;;  %v14646_v40 = vadd.f32 %v9304_v1, %v17455_v15  ;;  %v14660_v47 = vadd.f32 %v9304_v1, %v17459_v56  ;;  %v14680_v39 = vadd.f32 %v9304_v1, %v17465_v32 }
0x1f8f   :  { %9440 = vperm.xlu1 %11278, %v14638_v25   ;;  %9449 = vperm.xlu0 %11277, %v14641_v54  }
0x1f92   :  { %v14651_v59 = vpop.xlane.xlu1 %8466 }
0x1f93   :  { %17711 = vst [vmem:[#allocation232_spill] sm:$0xff] %v14651_v59  ;;  %9452 = vperm.xlu1 %11278, %v14646_v40   ;;  %9431 = vperm.xlu0 %11277, %v14649_v29   ;;  %v9305_v61 = vadd.f32 %v9277_v0, %v14651_v59  ;;  %v14677_v59 = vadd.f32 %v9303_v63, %v17470_v12 }
0x1f94   :  { %v14696_v63 = vadd.f32 %v9304_v1, %v17470_v12 }
0x1f95   :  { %v14665_v38 = vadd.f32 %v9305_v61, %v17453_v49  ;;  %v14668_v11 = vadd.f32 %v9305_v61, %v17455_v15  ;;  %v14685_v9 = vadd.f32 %v9305_v61, %v17459_v56  ;;  %v14705_v5 = vadd.f32 %v9305_v61, %v17465_v32 }
0x1f97   :  { %9443 = vperm.xlu1 %11278, %v14657_v36   ;;  %9455 = vperm.xlu0 %11277, %v14660_v47   ;;  %17713 = vst [vmem:[#allocation234_spill] sm:$0xff] %v14685_v9  ;;  %17716 = vst [vmem:[#allocation237_spill] sm:$0xff] %v14705_v5 }
0x1f9a   :  { %v14670_v37 = vpop.xlane.xlu0 %8469 }
0x1f9b   :  { %17712 = vst [vmem:[#allocation233_spill] sm:$0xff] %v14670_v37  ;;  %9464 = vperm.xlu1 %11278, %v14665_v38   ;;  %9467 = vperm.xlu0 %11277, %v14668_v11   ;;  %v9306_v0 = vadd.f32 %v14549_v6, %v14670_v37 }
0x1f9d   :  { %v14688_v7 = vadd.f32 %v9306_v0, %v17453_v49  ;;  %v14693_v6 = vadd.f32 %v9306_v0, %v17455_v15  ;;  %v14708_v57 = vadd.f32 %v9306_v0, %v17459_v56 }
0x1f9e   :  { %v14698_v37 = vpop.xlane.xlu1 %8472 }
0x1f9f   :  { %9446 = vperm.xlu1 %11278, %v14677_v59   ;;  %9458 = vperm.xlu0 %11277, %v14680_v39   ;;  %17714 = vst [vmem:[#allocation235_spill] sm:$0xff] %v14693_v6  ;;  %17715 = vst [vmem:[#allocation236_spill] sm:$0xff] %v14698_v37  ;;  %v9307_v42 = vadd.f32 %v14551_v51, %v14698_v37  ;;  %v14721_v51 = vadd.f32 %v9305_v61, %v17470_v12 }
0x1fa0   :  { %v14724_v37 = vadd.f32 %v9306_v0, %v17465_v32 }
0x1fa1   :  { %v14713_v1 = vadd.f32 %v9307_v42, %v17453_v49  ;;  %v14716_v45 = vadd.f32 %v9307_v42, %v17455_v15  ;;  %17718 = vst [vmem:[#allocation239_spill] sm:$0xff] %v14721_v51  ;;  %v14729_v49 = vadd.f32 %v9307_v42, %v17459_v56  ;;  %v14732_v15 = vadd.f32 %v9306_v0, %v17470_v12 }
0x1fa2   :  { %v14737_v61 = vadd.f32 %v9307_v42, %v17465_v32  ;;  %v14740_v10 = vadd.f32 %v9307_v42, %v17470_v12  ;;  %v10504_v56 = vrot.slane %v10492_v44, %v11809_v28  ;;  %v10497_v0 = vrot.slane %v10492_v44, %v11644_v8  ;;  %v17721_v12 = vld [vmem:[#allocation10_spill] sm:$0xff] }
0x1fa3   :  { %9470 = vperm.xlu1 %11278, %v14685_v9   ;;  %9479 = vperm.xlu0 %11277, %v14688_v7   ;;  %17717 = vst [vmem:[#allocation238_spill] sm:$0xff] %v14713_v1  ;;  %17719 = vst [vmem:[#allocation240_spill] sm:$0xff] %v14729_v49  ;;  %v10525_v32 = vrot.slane %v10492_v44, %v11925_v23  ;;  %v10532_v42 = vrot.slane %v10492_v44, %v17705_v20 }
0x1fa4   :  { %17720 = vst [vmem:[#allocation241_spill] sm:$0xff] %v14737_v61 }
0x1fa7   :  { %9482 = vperm.xlu1 %11278, %v14693_v6   ;;  %9461 = vperm.xlu0 %11277, %v14696_v63  }
0x1fab   :  { %9473 = vperm.xlu1 %11278, %v14705_v5   ;;  %9485 = vperm.xlu0 %11277, %v14708_v57  }
0x1faf   :  { %9494 = vperm.xlu1 %11278, %v14713_v1   ;;  %9497 = vperm.xlu0 %11277, %v14716_v45  }
0x1fb3   :  { %9476 = vperm.xlu1 %11278, %v14721_v51   ;;  %9488 = vperm.xlu0 %11277, %v14724_v37  }
0x1fb7   :  { %9500 = vperm.xlu1 %11278, %v14729_v49   ;;  %9491 = vperm.xlu0 %11277, %v14732_v15  }
0x1fbb   :  { %9503 = vperm.xlu1 %11278, %v14737_v61   ;;  %9506 = vperm.xlu0 %11277, %v14740_v10  }
0x1fbf   :  { %10506 = vbcast.lane.b32.xlu1 %v10504_v56, 256  ;;  %10499 = vbcast.lane.b32.xlu0 %v10497_v0, 256  ;;  %v10546_v56 = vrot.slane %v10492_v44, %v17587_v43 }
0x1fc3   :  { %10513 = vbcast.lane.b32.xlu1 %v10511_v60, 256  ;;  %10520 = vbcast.lane.b32.xlu0 %v10518_v50, 256 }
0x1fc7   :  { %10572 = vbcast.lane.b32.xlu1 %v17721_v12, 256  ;;  %10527 = vbcast.lane.b32.xlu0 %v10525_v32, 256 }
0x1fcb   :  { %10534 = vbcast.lane.b32.xlu1 %v10532_v42, 256  ;;  %10541 = vbcast.lane.b32.xlu0 %v10539_v13, 256 }
0x1fcf   :  { %10548 = vbcast.lane.b32.xlu1 %v10546_v56, 256 }
0x1fee   :  { %v9390_v0 = vpop.permute.xlu1 %9389  ;;  %v9393_v31 = vpop.permute.xlu0 %9392 }
0x1fef   :  { %v9511_v32 = vrot.slane %v9390_v0, %v11977_v2  ;;  %v9515_v20 = vrot.slane %v9393_v31, %v11977_v2 }
0x1ff1   :  { %v9668_v56 = vsel %vm1627_vm0, %v9515_v20, %v9511_v32 }
0x1ff2   :  { %v9405_v48 = vpop.permute.xlu1 %9404  ;;  %v9408_v22 = vpop.permute.xlu0 %9407 }
0x1ff3   :  { %v9531_v43 = vrot.slane %v9405_v48, %v11977_v2  ;;  %v9535_v49 = vrot.slane %v9408_v22, %v11977_v2 }
0x1ff5   :  { %v9672_v20 = vsel %vm1627_vm0, %v9535_v49, %v9531_v43 }
0x1ff6   :  { %v9396_v60 = vpop.permute.xlu1 %9395  ;;  %v9411_v50 = vpop.permute.xlu0 %9410 }
0x1ff7   :  { %v9519_v13 = vrot.slane %v9396_v60, %v11977_v2  ;;  %v9539_v0 = vrot.slane %v9411_v50, %v11977_v2 }
0x1ff9   :  { %v9669_v5 = vsel %vm1629_vm8, %v9519_v13, %v9668_v56  ;;  %v9673_v9 = vsel %vm1629_vm8, %v9539_v0, %v9672_v20 }
0x1ffa   :  { %v9420_v19 = vpop.permute.xlu1 %9419  ;;  %v9423_v3 = vpop.permute.xlu0 %9422 }
0x1ffe   :  { %v9399_v61 = vpop.permute.xlu1 %9398  ;;  %v9414_v12 = vpop.permute.xlu0 %9413 }
0x1fff   :  { %v9523_v44 = vrot.slane %v9399_v61, %v11977_v2  ;;  %v9543_v6 = vrot.slane %v9414_v12, %v11977_v2  ;;  %v9551_v12 = vrot.slane %v9420_v19, %v11977_v2 }
0x2001   :  { %v9670_v60 = vsel %vm1631_vm9, %v9523_v44, %v9669_v5  ;;  %v9674_v50 = vsel %vm1631_vm9, %v9543_v6, %v9673_v9  ;;  %v9555_v5 = vrot.slane %v9423_v3, %v11977_v2 }
0x2002   :  { %v9426_v21 = vpop.permute.xlu1 %9425  ;;  %v9435_v42 = vpop.permute.xlu0 %9434 }
0x2003   :  { %v9559_v49 = vrot.slane %v9426_v21, %v11977_v2 }
0x2006   :  { %v9438_v51 = vpop.permute.xlu1 %9437  ;;  %v9402_v1 = vpop.permute.xlu0 %9401 }
0x2007   :  { %v9527_v31 = vrot.slane %v9402_v1, %v11977_v2  ;;  %v9575_v21 = vrot.slane %v9438_v51, %v11977_v2 }
0x2009   :  { %v9671_v61 = vsel %vm1633_vm10, %v9527_v31, %v9670_v60  ;;  %v9676_v31 = vsel %vm1627_vm0, %v9555_v5, %v9551_v12 }
0x200a   :  { %v9417_v32 = vpop.permute.xlu1 %9416  ;;  %v9429_v48 = vpop.permute.xlu0 %9428  ;;  %v9708_v22 = vsel %vm1434_vm4, %v9671_v61, -inf  ;;  %v9677_v9 = vsel %vm1629_vm8, %v9559_v49, %v9676_v31 }
0x200b   :  { %v9547_v13 = vrot.slane %v9417_v32, %v11977_v2  ;;  %9709 = vmax.xlane.f32.xlu1 %v9708_v22  ;;  %v9563_v0 = vrot.slane %v9429_v48, %v11977_v2 }
0x200d   :  { %v9675_v1 = vsel %vm1633_vm10, %v9547_v13, %v9674_v50  ;;  %v9678_v19 = vsel %vm1631_vm9, %v9563_v0, %v9677_v9 }
0x200e   :  { %v9441_v44 = vpop.permute.xlu1 %9440  ;;  %v9450_v56 = vpop.permute.xlu0 %9449  ;;  %v9711_v43 = vsel %vm1434_vm4, %v9675_v1, -inf  ;;  %v9571_v1 = vrot.slane %v9435_v42, %v11977_v2 }
0x200f   :  { %9712 = vmax.xlane.f32.xlu0 %v9711_v43  ;;  %v9579_v50 = vrot.slane %v9441_v44, %v11977_v2 }
0x2010   :  { %v9680_v5 = vsel %vm1627_vm0, %v9575_v21, %v9571_v1 }
0x2011   :  { %v9681_v0 = vsel %vm1629_vm8, %v9579_v50, %v9680_v5 }
0x2012   :  { %v9453_v60 = vpop.permute.xlu1 %9452  ;;  %v9432_v61 = vpop.permute.xlu0 %9431 }
0x2013   :  { %v9567_v6 = vrot.slane %v9432_v61, %v11977_v2  ;;  %v9595_v9 = vrot.slane %v9453_v60, %v11977_v2 }
0x2015   :  { %v9679_v3 = vsel %vm1633_vm10, %v9567_v6, %v9678_v19 }
0x2016   :  { %v9444_v20 = vpop.permute.xlu1 %9443  ;;  %v9456_v32 = vpop.permute.xlu0 %9455  ;;  %v9714_v22 = vsel %vm1434_vm4, %v9679_v3, -inf  ;;  %v9591_v3 = vrot.slane %v9450_v56, %v11977_v2 }
0x2017   :  { %9715 = vmax.xlane.f32.xlu0 %v9714_v22  ;;  %v9583_v12 = vrot.slane %v9444_v20, %v11977_v2  ;;  %v9599_v19 = vrot.slane %v9456_v32, %v11977_v2 }
0x2018   :  { %v9684_v22 = vsel %vm1627_vm0, %v9595_v9, %v9591_v3 }
0x2019   :  { %v9682_v61 = vsel %vm1631_vm9, %v9583_v12, %v9681_v0  ;;  %v9685_v1 = vsel %vm1629_vm8, %v9599_v19, %v9684_v22 }
0x201a   :  { %v9465_v48 = vpop.permute.xlu1 %9464  ;;  %v9468_v13 = vpop.permute.xlu0 %9467 }
0x201b   :  { %v9611_v56 = vrot.slane %v9465_v48, %v11977_v2 }
0x201e   :  { %v9447_v43 = vpop.permute.xlu1 %9446  ;;  %v9459_v49 = vpop.permute.xlu0 %9458 }
0x201f   :  { %v9587_v31 = vrot.slane %v9447_v43, %v11977_v2  ;;  %v9603_v20 = vrot.slane %v9459_v49, %v11977_v2  ;;  %v9615_v49 = vrot.slane %v9468_v13, %v11977_v2 }
0x2021   :  { %v9683_v51 = vsel %vm1633_vm10, %v9587_v31, %v9682_v61  ;;  %v9686_v60 = vsel %vm1631_vm9, %v9603_v20, %v9685_v1 }
0x2022   :  { %v9471_v6 = vpop.permute.xlu1 %9470  ;;  %v9480_v44 = vpop.permute.xlu0 %9479  ;;  %v9717_v42 = vsel %vm1434_vm4, %v9683_v51, -inf }
0x2023   :  { %9718 = vmax.xlane.f32.xlu1 %v9717_v42  ;;  %v9619_v51 = vrot.slane %v9471_v6, %v11977_v2  ;;  %v9688_v42 = vsel %vm1627_vm0, %v9615_v49, %v9611_v56  ;;  %v9631_v13 = vrot.slane %v9480_v44, %v11977_v2 }
0x2025   :  { %v9689_v22 = vsel %vm1629_vm8, %v9619_v51, %v9688_v42 }
0x2026   :  { %v9483_v21 = vpop.permute.xlu1 %9482  ;;  %v9462_v50 = vpop.permute.xlu0 %9461 }
0x2027   :  { %v9607_v12 = vrot.slane %v9462_v50, %v11977_v2  ;;  %v9635_v19 = vrot.slane %v9483_v21, %v11977_v2 }
0x2029   :  { %v9687_v5 = vsel %vm1633_vm10, %v9607_v12, %v9686_v60  ;;  %v9692_v60 = vsel %vm1627_vm0, %v9635_v19, %v9631_v13 }
0x202a   :  { %v9474_v43 = vpop.permute.xlu1 %9473  ;;  %v9486_v0 = vpop.permute.xlu0 %9485  ;;  %v9720_v32 = vsel %vm1434_vm4, %v9687_v5, -inf }
0x202b   :  { %9721 = vmax.xlane.f32.xlu0 %v9720_v32  ;;  %v9623_v9 = vrot.slane %v9474_v43, %v11977_v2  ;;  %v9639_v50 = vrot.slane %v9486_v0, %v11977_v2 }
0x202d   :  { %v9690_v6 = vsel %vm1631_vm9, %v9623_v9, %v9689_v22  ;;  %v9693_v32 = vsel %vm1629_vm8, %v9639_v50, %v9692_v60 }
0x202e   :  { %v9495_v31 = vpop.permute.xlu1 %9494  ;;  %v9498_v61 = vpop.permute.xlu0 %9497 }
0x202f   :  { %v9651_v0 = vrot.slane %v9495_v31, %v11977_v2  ;;  %v9655_v56 = vrot.slane %v9498_v61, %v11977_v2 }
0x2032   :  { %v9477_v3 = vpop.permute.xlu1 %9476  ;;  %v9489_v20 = vpop.permute.xlu0 %9488 }
0x2033   :  { %v9627_v48 = vrot.slane %v9477_v3, %v11977_v2  ;;  %v9643_v1 = vrot.slane %v9489_v20, %v11977_v2  ;;  %v9696_v20 = vsel %vm1627_vm0, %v9655_v56, %v9651_v0 }
0x2035   :  { %v9691_v12 = vsel %vm1633_vm10, %v9627_v48, %v9690_v6  ;;  %v9694_v51 = vsel %vm1631_vm9, %v9643_v1, %v9693_v32 }
0x2036   :  { %v9501_v5 = vpop.permute.xlu1 %9500  ;;  %v9492_v21 = vpop.permute.xlu0 %9491  ;;  %v9723_v43 = vsel %vm1434_vm4, %v9691_v12, -inf }
0x2037   :  { %v9647_v44 = vrot.slane %v9492_v21, %v11977_v2  ;;  %9724 = vmax.xlane.f32.xlu1 %v9723_v43  ;;  %v9659_v49 = vrot.slane %v9501_v5, %v11977_v2 }
0x2039   :  { %v9695_v9 = vsel %vm1633_vm10, %v9647_v44, %v9694_v51  ;;  %v9697_v61 = vsel %vm1629_vm8, %v9659_v49, %v9696_v20 }
0x203a   :  { %v9504_v42 = vpop.permute.xlu1 %9503  ;;  %v9507_v19 = vpop.permute.xlu0 %9506  ;;  %v9726_v3 = vsel %vm1434_vm4, %v9695_v9, -inf }
0x203b   :  { %v9663_v22 = vrot.slane %v9504_v42, %v11977_v2  ;;  %v9667_v31 = vrot.slane %v9507_v19, %v11977_v2  ;;  %9727 = vmax.xlane.f32.xlu0 %v9726_v3 }
0x203d   :  { %v9698_v50 = vsel %vm1631_vm9, %v9663_v22, %v9697_v61 }
0x203e   :  { %v9699_v48 = vsel %vm1633_vm10, %v9667_v31, %v9698_v50  ;;  %v10507_v1 = vpop.permute.xlu1 %10506  ;;  %v10500_v12 = vpop.permute.xlu0 %10499 }
0x203f   :  { %v9729_v13 = vsel %vm1434_vm4, %v9699_v48, -inf }
0x2040   :  { %9730 = vmax.xlane.f32.xlu1 %v9729_v13 }
0x2042   :  { %v10514_v6 = vpop.permute.xlu1 %10513  ;;  %v10521_v5 = vpop.permute.xlu0 %10520 }
0x2046   :  { %v10573_v60 = vpop.permute.xlu1 %10572  ;;  %v10528_v43 = vpop.permute.xlu0 %10527 }
0x204a   :  { %v10535_v21 = vpop.permute.xlu1 %10534  ;;  %v10542_v0 = vpop.permute.xlu0 %10541 }
0x204e   :  { %v10549_v32 = vpop.permute.xlu1 %10548 }
0x2098   :  { %v14833_v56 = vpop.xlane.xlu1 %9709 }
0x2099   :  { %v10558_v44 = vadd.f32 %v10500_v12, %v14833_v56 }
0x209b   :  { %v14836_v49 = vadd.f32 %v10573_v60, %v10558_v44 }
0x209c   :  { %v14838_v51 = vpop.xlane.xlu0 %9712 }
0x209d   :  { %10592 = vperm.xlu0 %11277, %v14836_v49   ;;  %v10559_v9 = vadd.f32 %v10507_v1, %v14838_v51 }
0x209f   :  { %v14842_v42 = vadd.f32 %v10573_v60, %v10559_v9  ;;  %v9755_v9 = vrot.slane %v14833_v56, %v17414_v4 }
0x20a1   :  { %10595 = vperm.xlu1 %11278, %v14842_v42   ;;  %vm9943_vm7 = vcmp.eq.f32.partialorder %v14601_v24, %v9755_v9  ;;  %v9747_v24 = vrot.slane %v14833_v56, %v11809_v28 }
0x20a3   :  { %vm9941_vm5 = vcmp.eq.f32.partialorder %v14562_v35, %v9747_v24 }
0x20a4   :  { %v14845_v19 = vpop.xlane.xlu0 %9715 }
0x20a5   :  { %v10560_v3 = vadd.f32 %v10514_v6, %v14845_v19 }
0x20a7   :  { %v14848_v20 = vadd.f32 %v10573_v60, %v10560_v3 }
0x20a9   :  { %10598 = vperm.xlu0 %11277, %v14848_v20  }
0x20b0   :  { %v14851_v22 = vpop.xlane.xlu1 %9718 }
0x20b1   :  { %v10561_v31 = vadd.f32 %v10521_v5, %v14851_v22 }
0x20b3   :  { %v14854_v61 = vadd.f32 %v10573_v60, %v10561_v31 }
0x20b5   :  { %10601 = vperm.xlu1 %11278, %v14854_v61  }
0x20b8   :  { %v14857_v50 = vpop.xlane.xlu0 %9721 }
0x20b9   :  { %v10562_v48 = vadd.f32 %v10528_v43, %v14857_v50  ;;  %v9835_v24 = vrot.slane %v14857_v50, %v17414_v4 }
0x20bb   :  { %v14860_v13 = vadd.f32 %v10573_v60, %v10562_v48  ;;  %v9743_v48 = vrot.slane %v14833_v56, %v11644_v8 }
0x20bd   :  { %10604 = vperm.xlu0 %11277, %v14860_v13   ;;  %vm9940_vm1 = vcmp.eq.f32.partialorder %v14565_v16, %v9743_v48 }
0x20be   :  { %v9980_v9 = vsel %vm9940_vm1, %v12026_v17, 5 }
0x20c4   :  { %v14863_v1 = vpop.xlane.xlu1 %9724 }
0x20c5   :  { %v10563_v6 = vadd.f32 %v10535_v21, %v14863_v1  ;;  %v9795_v21 = vrot.slane %v14845_v19, %v17414_v4 }
0x20c7   :  { %v14866_v12 = vadd.f32 %v10573_v60, %v10563_v6  ;;  %vm9953_vm15 = vcmp.eq.f32.partialorder %v14626_v62, %v9795_v21  ;;  %v9799_v62 = vrot.slane %v14845_v19, %v11925_v23  ;;  %v9981_v21 = vsel %vm9941_vm5, %v12026_v17, 5 }
0x20c8   :  { %v14868_v44 = vpop.xlane.xlu0 %9727  ;;  %vm9963_vm5 = vcmp.eq.f32.partialorder %v14680_v39, %v9835_v24  ;;  %v9787_v39 = vrot.slane %v14845_v19, %v11809_v28 }
0x20c9   :  { %10607 = vperm.xlu1 %11278, %v14866_v12   ;;  %v10564_v5 = vadd.f32 %v10542_v0, %v14868_v44  ;;  %v9983_v0 = vsel %vm9943_vm7, %v12026_v17, 5  ;;  %vm9954_vm6 = vcmp.eq.f32.partialorder %v14649_v29, %v9799_v62  ;;  %v9751_v29 = vrot.slane %v14833_v56, %v11920_v34 }
0x20ca   :  { %v9994_v35 = vsel %vm9954_vm6, %v12026_v17, 5 }
0x20cb   :  { %v14874_v43 = vadd.f32 %v10573_v60, %v10564_v5  ;;  %v9823_v5 = vrot.slane %v14857_v50, %v11644_v8 }
0x20cd   :  { %v14876_v3 = vpop.xlane.xlu1 %9730  ;;  %10610 = vperm.xlu0 %11277, %v14874_v43   ;;  %vm9960_vm3 = vcmp.eq.f32.partialorder %v14641_v54, %v9823_v5  ;;  %v9767_v54 = vrot.slane %v14838_v51, %v11809_v28 }
0x20ce   :  { %v10565_v31 = vadd.f32 %v10549_v32, %v14876_v3  ;;  %v9993_v32 = vsel %vm9953_vm15, %v12026_v17, 5  ;;  %v10000_v16 = vsel %vm9960_vm3, %v12026_v17, 5  ;;  %vm9942_vm3 = vcmp.eq.f32.partialorder %v14581_v53, %v9751_v29 }
0x20cf   :  { %vm9946_vm15 = vcmp.eq.f32.partialorder %v14570_v26, %v9767_v54  ;;  %v10003_v53 = vsel %vm9963_vm5, %v12026_v17, 5  ;;  %v9887_v54 = vrot.slane %v14876_v3, %v11809_v28 }
0x20d0   :  { %v14886_v6 = vadd.f32 %v10573_v60, %v10565_v31  ;;  %v9763_v60 = vrot.slane %v14838_v51, %v11644_v8  ;;  %v9831_v31 = vrot.slane %v14857_v50, %v11920_v34  ;;  %v9986_v5 = vsel %vm9946_vm15, %v12026_v17, 5 }
0x20d1   :  { %10030 = vperm.xlu0 %11277, %v9983_v0   ;;  %v9847_v0 = vrot.slane %v14863_v1, %v11809_v28 }
0x20d2   :  { %10613 = vperm.xlu1 %11278, %v14886_v6   ;;  %vm9945_vm2 = vcmp.eq.f32.partialorder %v14573_v18, %v9763_v60  ;;  %vm9962_vm7 = vcmp.eq.f32.partialorder %v14660_v47, %v9831_v31  ;;  %v9771_v47 = vrot.slane %v14838_v51, %v11920_v34  ;;  %v9839_v60 = vrot.slane %v14857_v50, %v11925_v23 }
0x20d3   :  { %v9985_v48 = vsel %vm9945_vm2, %v12026_v17, 5  ;;  %v10002_v18 = vsel %vm9962_vm7, %v12026_v17, 5  ;;  %vm9966_vm1 = vcmp.eq.f32.partialorder %v14668_v11, %v9847_v0  ;;  %v9783_v11 = vrot.slane %v14845_v19, %v11644_v8 }
0x20d4   :  { %v10006_v26 = vsel %vm9966_vm1, %v12026_v17, 5  ;;  %vm9947_vm6 = vcmp.eq.f32.partialorder %v14578_v55, %v9771_v47  ;;  %vm9964_vm15 = vcmp.eq.f32.partialorder %v14696_v63, %v9839_v60  ;;  %vm9951_vm1 = vcmp.eq.f32.partialorder %v14590_v58, %v9787_v39 }
0x20d5   :  { %10060 = vperm.xlu0 %11277, %v9993_v32   ;;  %v9982_v32 = vsel %vm9942_vm3, %v12026_v17, 5  ;;  %v9987_v62 = vsel %vm9947_vm6, %v12026_v17, 5  ;;  %vm9950_vm7 = vcmp.eq.f32.partialorder %v14593_v41, %v9783_v11  ;;  %v10004_v41 = vsel %vm9964_vm15, %v12026_v17, 5 }
0x20d6   :  { %10021 = vperm.xlu1 %11278, %v9980_v9   ;;  %v9863_v9 = vrot.slane %v14868_v44, %v11644_v8  ;;  %v9991_v31 = vsel %vm9951_vm1, %v12026_v17, 5  ;;  %v9791_v63 = vrot.slane %v14845_v19, %v11920_v34  ;;  %vm9976_vm6 = vcmp.eq.f32.partialorder %v14716_v45, %v9887_v54 }
0x20d7   :  { %v9879_v0 = vrot.slane %v14868_v44, %v11925_v23  ;;  %v9807_v45 = vrot.slane %v14851_v22, %v11809_v28  ;;  %v9867_v11 = vrot.slane %v14868_v44, %v11809_v28  ;;  %v9883_v60 = vrot.slane %v14876_v3, %v11644_v8 }
0x20d8   :  { %vm9970_vm2 = vcmp.eq.f32.partialorder %v14688_v7, %v9863_v9  ;;  %v9775_v7 = vrot.slane %v14838_v51, %v17414_v4  ;;  %v17722_v9 = vld [vmem:[#allocation234_spill] sm:$0xff]  ;;  %v9895_v54 = vrot.slane %v14876_v3, %v17414_v4 }
0x20d9   :  { %10081 = vperm.xlu0 %11277, %v10000_v16   ;;  %v10010_v55 = vsel %vm9970_vm2, %v12026_v17, 5  ;;  %v9990_v16 = vsel %vm9950_vm7, %v12026_v17, 5  ;;  %vm9952_vm2 = vcmp.eq.f32.partialorder %v14613_v46, %v9791_v63  ;;  %vm9974_vm1 = vcmp.eq.f32.partialorder %v14732_v15, %v9879_v0 }
0x20da   :  { %10024 = vperm.xlu1 %11278, %v9981_v21   ;;  %v9871_v21 = vrot.slane %v14868_v44, %v11920_v34  ;;  %vm9948_vm5 = vcmp.eq.f32.partialorder %v14598_v52, %v9775_v7  ;;  %v10016_v52 = vsel %vm9976_vm6, %v12026_v17, 5  ;;  %v9992_v19 = vsel %vm9952_vm2, %v12026_v17, 5 }
0x20db   :  { %v9779_v15 = vrot.slane %v14838_v51, %v11925_v23  ;;  %v9815_v51 = vrot.slane %v14851_v22, %v17414_v4  ;;  %v9891_v7 = vrot.slane %v14876_v3, %v11920_v34 }
0x20dc   :  { %vm9972_vm3 = vcmp.eq.f32.partialorder %v14708_v57, %v9871_v21  ;;  %v9803_v57 = vrot.slane %v14851_v22, %v11644_v8  ;;  %v17726_v21 = vld [vmem:[#allocation239_spill] sm:$0xff] }
0x20dd   :  { %10063 = vperm.xlu0 %11277, %v9994_v35   ;;  %v10012_v58 = vsel %vm9972_vm3, %v12026_v17, 5  ;;  %v9988_v35 = vsel %vm9948_vm5, %v12026_v17, 5  ;;  %vm9956_vm3 = vcmp.eq.f32.partialorder %v14621_v33, %v9807_v45  ;;  %vm9949_vm2 = vcmp.eq.f32.partialorder %v14629_v27, %v9779_v15 }
0x20de   :  { %10036 = vperm.xlu1 %11278, %v9985_v48   ;;  %v9875_v48 = vrot.slane %v14868_v44, %v17414_v4  ;;  %vm9955_vm15 = vcmp.eq.f32.partialorder %v14610_v14, %v9803_v57  ;;  %v10014_v14 = vsel %vm9974_vm1, %v12026_v17, 5  ;;  %v9989_v47 = vsel %vm9949_vm2, %v12026_v17, 5  ;;  %v17725_v44 = vld [vmem:[#allocation238_spill] sm:$0xff] }
0x20df   :  { %v9995_v29 = vsel %vm9955_vm15, %v12026_v17, 5  ;;  %vm9958_vm1 = vcmp.eq.f32.partialorder %v14657_v36, %v9815_v51 }
0x20e0   :  { %vm9973_vm7 = vcmp.eq.f32.partialorder %v14724_v37, %v9875_v48  ;;  %v9759_v37 = vrot.slane %v14833_v56, %v11925_v23  ;;  %v9811_v56 = vrot.slane %v14851_v22, %v11920_v34 }
0x20e1   :  { %10087 = vperm.xlu0 %11277, %v10002_v18   ;;  %v10013_v46 = vsel %vm9973_vm7, %v12026_v17, 5  ;;  %v9899_v18 = vrot.slane %v14876_v3, %v11925_v23 }
0x20e2   :  { %10039 = vperm.xlu1 %11278, %v9986_v5   ;;  %v9996_v5 = vsel %vm9956_vm3, %v12026_v17, 5  ;;  %vm9944_vm6 = vcmp.eq.f32.partialorder %v14618_v30, %v9759_v37  ;;  %vm9957_vm7 = vcmp.eq.f32.partialorder %v14638_v25, %v9811_v56  ;;  %v9998_v25 = vsel %vm9958_vm1, %v12026_v17, 5 }
0x20e3   :  { %vm9979_vm5 = vcmp.eq.f32.partialorder %v14740_v10, %v9899_v18  ;;  %v9984_v33 = vsel %vm9944_vm6, %v12026_v17, 5  ;;  %v9827_v10 = vrot.slane %v14857_v50, %v11809_v28  ;;  %v9997_v30 = vsel %vm9957_vm7, %v12026_v17, 5 }
0x20e4   :  { %v10019_v24 = vsel %vm9979_vm5, %v12026_v17, 5  ;;  %v9819_v50 = vrot.slane %v14851_v22, %v11925_v23  ;;  %v17723_v22 = vld [vmem:[#allocation235_spill] sm:$0xff] }
0x20e5   :  { %10099 = vperm.xlu0 %11277, %v10006_v26   ;;  %vm9961_vm15 = vcmp.eq.f32.partialorder %v14646_v40, %v9827_v10  ;;  %v9843_v26 = vrot.slane %v14863_v1, %v11644_v8  ;;  %vm9971_vm2 = vcmp.eq.f32.partialorder %v17723_v22, %v9867_v11 }
0x20e6   :  { %10027 = vperm.xlu1 %11278, %v9982_v32   ;;  %v10001_v27 = vsel %vm9961_vm15, %v12026_v17, 5  ;;  %vm9959_vm5 = vcmp.eq.f32.partialorder %v14677_v59, %v9819_v50  ;;  %v9851_v32 = vrot.slane %v14863_v1, %v11920_v34  ;;  %v10011_v59 = vsel %vm9971_vm2, %v12026_v17, 5 }
0x20e7   :  { %vm9965_vm3 = vcmp.eq.f32.partialorder %v14665_v38, %v9843_v26  ;;  %v9999_v36 = vsel %vm9959_vm5, %v12026_v17, 5  ;;  %vm9975_vm15 = vcmp.eq.f32.partialorder %v17725_v44, %v9883_v60 }
0x20e8   :  { %v10005_v40 = vsel %vm9965_vm3, %v12026_v17, 5  ;;  %vm9967_vm6 = vcmp.eq.f32.partialorder %v17722_v9, %v9851_v32 }
0x20e9   :  { %10090 = vperm.xlu0 %11277, %v10003_v53   ;;  %v10007_v38 = vsel %vm9967_vm6, %v12026_v17, 5  ;;  %v9855_v53 = vrot.slane %v14863_v1, %v17414_v4  ;;  %vm10793_vm6 = vcmask 7168  }
0x20ea   :  { %10042 = vperm.xlu1 %11278, %v9987_v62   ;;  %v17724_v62 = vld [vmem:[#allocation237_spill] sm:$0xff] }
0x20eb   :  { %vm9968_vm7 = vcmp.eq.f32.partialorder %v17724_v62, %v9855_v53 }
0x20ec   :  { %v10008_v39 = vsel %vm9968_vm7, %v12026_v17, 5 }
0x20ed   :  { %10111 = vperm.xlu0 %11277, %v10010_v55   ;;  %v9859_v55 = vrot.slane %v14863_v1, %v11925_v23  ;;  %v17728_v1 = vld [vmem:[#allocation241_spill] sm:$0xff] }
0x20ee   :  { %10051 = vperm.xlu1 %11278, %v9990_v16   ;;  %v10015_v16 = vsel %vm9975_vm15, %v12026_v17, 5  ;;  %vm9978_vm5 = vcmp.eq.f32.partialorder %v17728_v1, %v9895_v54 }
0x20ef   :  { %vm9969_vm1 = vcmp.eq.f32.partialorder %v17726_v21, %v9859_v55 }
0x20f1   :  { %10093 = vperm.xlu0 %11277, %v10004_v41   ;;  %v10009_v41 = vsel %vm9969_vm1, %v12026_v17, 5 }
0x20f2   :  { %10054 = vperm.xlu1 %11278, %v9991_v31   ;;  %v17727_v31 = vld [vmem:[#allocation240_spill] sm:$0xff] }
0x20f3   :  { %vm9977_vm3 = vcmp.eq.f32.partialorder %v17727_v31, %v9891_v7 }
0x20f4   :  { %v10017_v63 = vsel %vm9977_vm3, %v12026_v17, 5 }
0x20f5   :  { %10117 = vperm.xlu0 %11277, %v10012_v58   ;;  %v10018_v58 = vsel %vm9978_vm5, %v12026_v17, 5 }
0x20f6   :  { %10045 = vperm.xlu1 %11278, %v9988_v35  }
0x20f9   :  { %10129 = vperm.xlu0 %11277, %v10016_v52  }
0x20fa   :  { %10057 = vperm.xlu1 %11278, %v9992_v19  }
0x20fd   :  { %10120 = vperm.xlu0 %11277, %v10013_v46  }
0x20fe   :  { %10066 = vperm.xlu1 %11278, %v9995_v29  }
0x2101   :  { %10123 = vperm.xlu0 %11277, %v10014_v14  }
0x2102   :  { %10069 = vperm.xlu1 %11278, %v9996_v5  }
0x2105   :  { %10138 = vperm.xlu0 %11277, %v10019_v24  }
0x2106   :  { %10033 = vperm.xlu1 %11278, %v9984_v33  }
0x210a   :  { %10048 = vperm.xlu1 %11278, %v9989_v47  }
0x210e   :  { %10072 = vperm.xlu1 %11278, %v9997_v30  }
0x2112   :  { %10084 = vperm.xlu1 %11278, %v10001_v27  }
0x2116   :  { %10075 = vperm.xlu1 %11278, %v9998_v25  }
0x211a   :  { %10096 = vperm.xlu1 %11278, %v10005_v40  }
0x211c   :  { %v10593_v35 = vpop.permute.xlu0 %10592 }
0x211d   :  { %v10618_v3 = vrot.slane %v10593_v35, %v11977_v2 }
0x211e   :  { %10078 = vperm.xlu1 %11278, %v9999_v36  }
0x2120   :  { %v10596_v48 = vpop.permute.xlu1 %10595 }
0x2121   :  { %v10622_v0 = vrot.slane %v10596_v48, %v11977_v2 }
0x2122   :  { %10102 = vperm.xlu1 %11278, %v10007_v38  }
0x2123   :  { %v10647_v14 = vsel %vm1627_vm0, %v10622_v0, %v10618_v3 }
0x2126   :  { %10114 = vperm.xlu1 %11278, %v10011_v59  }
0x2128   :  { %v10599_v57 = vpop.permute.xlu0 %10598 }
0x2129   :  { %v10626_v45 = vrot.slane %v10599_v57, %v11977_v2 }
0x212a   :  { %10105 = vperm.xlu1 %11278, %v10008_v39  }
0x212b   :  { %v10648_v15 = vsel %vm1629_vm8, %v10626_v45, %v10647_v14 }
0x212e   :  { %10126 = vperm.xlu1 %11278, %v10015_v16  }
0x2132   :  { %10108 = vperm.xlu1 %11278, %v10009_v41  }
0x2134   :  { %v10602_v52 = vpop.permute.xlu1 %10601 }
0x2135   :  { %v10630_v29 = vrot.slane %v10602_v52, %v11977_v2 }
0x2136   :  { %10132 = vperm.xlu1 %11278, %v10017_v63  }
0x2137   :  { %v10649_v33 = vsel %vm1631_vm9, %v10630_v29, %v10648_v15 }
0x213a   :  { %10135 = vperm.xlu1 %11278, %v10018_v58  }
0x213c   :  { %v10605_v19 = vpop.permute.xlu0 %10604 }
0x213d   :  { %v10634_v37 = vrot.slane %v10605_v19, %v11977_v2 }
0x213f   :  { %v10650_v56 = vsel %vm1633_vm10, %v10634_v37, %v10649_v33 }
0x2148   :  { %v10608_v46 = vpop.permute.xlu1 %10607 }
0x2149   :  { %v10638_v5 = vrot.slane %v10608_v46, %v11977_v2 }
0x214b   :  { %v10651_v10 = vsel %vm1635_vm11, %v10638_v5, %v10650_v56 }
0x214c   :  { %v10611_v18 = vpop.permute.xlu0 %10610 }
0x214d   :  { %v10642_v24 = vrot.slane %v10611_v18, %v11977_v2 }
0x214f   :  { %v10652_v51 = vsel %vm1637_vm12, %v10642_v24, %v10651_v10 }
0x2150   :  { %v10031_v32 = vpop.permute.xlu0 %10030 }
0x2151   :  { %v10614_v47 = vpop.permute.xlu1 %10613  ;;  %v10155_v19 = vrot.slane %v10031_v32, %v11977_v2 }
0x2152   :  { %v10646_v30 = vrot.slane %v10614_v47, %v11977_v2 }
0x2154   :  { %v10653_v27 = vsel %vm1639_vm13, %v10646_v30, %v10652_v51  ;;  %v10061_v9 = vpop.permute.xlu0 %10060 }
0x2155   :  { %v10022_v26 = vpop.permute.xlu1 %10021  ;;  %v10655_v25 = vsel %vm1315_vm14, %v10653_v27, -inf  ;;  %v10195_v0 = vrot.slane %v10061_v9, %v11977_v2 }
0x2156   :  { %10656 = vmax.xlane.f32.xlu0 %v10655_v25  ;;  %v10143_v54 = vrot.slane %v10022_v26, %v11977_v2 }
0x2158   :  { %v10082_v22 = vpop.permute.xlu0 %10081 }
0x2159   :  { %v10025_v50 = vpop.permute.xlu1 %10024 }
0x215a   :  { %v10147_v21 = vrot.slane %v10025_v50, %v11977_v2 }
0x215c   :  { %v10064_v59 = vpop.permute.xlu0 %10063  ;;  %v10300_v35 = vsel %vm1627_vm0, %v10147_v21, %v10143_v54 }
0x215d   :  { %v10037_v40 = vpop.permute.xlu1 %10036  ;;  %v10199_v15 = vrot.slane %v10064_v59, %v11977_v2 }
0x215e   :  { %v10163_v18 = vrot.slane %v10037_v40, %v11977_v2 }
0x2160   :  { %v10088_v39 = vpop.permute.xlu0 %10087 }
0x2161   :  { %v10040_v36 = vpop.permute.xlu1 %10039  ;;  %v10231_v21 = vrot.slane %v10088_v39, %v11977_v2 }
0x2162   :  { %v10167_v45 = vrot.slane %v10040_v36, %v11977_v2 }
0x2164   :  { %v15057_v55 = vpop.permute.xlu0 %10099  ;;  %v10304_v56 = vsel %vm1627_vm0, %v10167_v45, %v10163_v18 }
0x2165   :  { %v10028_v11 = vpop.permute.xlu1 %10027 }
0x2166   :  { %v10151_v41 = vrot.slane %v10028_v11, %v11977_v2 }
0x2168   :  { %v10091_v58 = vpop.permute.xlu0 %10090  ;;  %v10301_v57 = vsel %vm1629_vm8, %v10151_v41, %v10300_v35 }
0x2169   :  { %v10043_v38 = vpop.permute.xlu1 %10042  ;;  %v10302_v5 = vsel %vm1631_vm9, %v10155_v19, %v10301_v57 }
0x216a   :  { %v10171_v3 = vrot.slane %v10043_v38, %v11977_v2 }
0x216c   :  { %v15083_v24 = vpop.permute.xlu0 %10111  ;;  %v10305_v30 = vsel %vm1629_vm8, %v10171_v3, %v10304_v56 }
0x216d   :  { %v10052_v53 = vpop.permute.xlu1 %10051 }
0x216e   :  { %v10183_v63 = vrot.slane %v10052_v53, %v11977_v2 }
0x2170   :  { %v10094_v11 = vpop.permute.xlu0 %10093 }
0x2171   :  { %v10055_v62 = vpop.permute.xlu1 %10054 }
0x2172   :  { %v10187_v7 = vrot.slane %v10055_v62, %v11977_v2 }
0x2174   :  { %v10308_v48 = vsel %vm1627_vm0, %v10187_v7, %v10183_v63  ;;  %v10235_v7 = vrot.slane %v10091_v58, %v11977_v2  ;;  %v10118_v41 = vpop.permute.xlu0 %10117  ;;  %v10239_v63 = vrot.slane %v10094_v11, %v11977_v2 }
0x2175   :  { %v10046_v60 = vpop.permute.xlu1 %10045 }
0x2176   :  { %v10175_v37 = vrot.slane %v10046_v60, %v11977_v2  ;;  %v10223_v60 = vrot.slane %v10082_v22, %v11977_v2 }
0x2178   :  { %v10306_v25 = vsel %vm1631_vm9, %v10175_v37, %v10305_v30 }
0x2179   :  { %v10058_v44 = vpop.permute.xlu1 %10057 }
0x217a   :  { %v10191_v31 = vrot.slane %v10058_v44, %v11977_v2 }
0x217c   :  { %v10309_v52 = vsel %vm1629_vm8, %v10191_v31, %v10308_v48 }
0x217d   :  { %v15059_v16 = vpop.permute.xlu1 %10066  ;;  %v10310_v14 = vsel %vm1631_vm9, %v10195_v0, %v10309_v52  ;;  %v10130_v0 = vpop.permute.xlu0 %10129 }
0x217e   :  { %v10311_v26 = vsel %vm1633_vm10, %v10199_v15, %v10310_v14 }
0x217f   :  { %v15102_v9 = vsel %vm1434_vm4, %v10311_v26, 2147483647 }
0x2180   :  { %v10364_v59 = vshra.s32 %v15102_v9, 16 }
0x2181   :  { %v15067_v1 = vpop.permute.xlu1 %10069  ;;  %v10121_v15 = vpop.permute.xlu0 %10120 }
0x2182   :  { %v15115_v54 = vcvt.s32.f32 %v10364_v59  ;;  %v10207_v58 = vrot.slane %v15067_v1, %v11977_v2 }
0x2185   :  { %v10034_v46 = vpop.permute.xlu1 %10033  ;;  %v10124_v26 = vpop.permute.xlu0 %10123 }
0x2186   :  { %v10159_v29 = vrot.slane %v10034_v46, %v11977_v2  ;;  %v10203_v46 = vrot.slane %v15059_v16, %v11977_v2 }
0x2188   :  { %v10303_v33 = vsel %vm1633_vm10, %v10159_v29, %v10302_v5  ;;  %v10312_v18 = vsel %vm1627_vm0, %v10207_v58, %v10203_v46 }
0x2189   :  { %v10049_v47 = vpop.permute.xlu1 %10048  ;;  %v15088_v10 = vsel %vm1434_vm4, %v10303_v33, 2147483647 }
0x218a   :  { %v10179_v51 = vrot.slane %v10049_v47, %v11977_v2  ;;  %v10334_v27 = vshra.s32 %v15088_v10, 16 }
0x218c   :  { %v10307_v50 = vsel %vm1633_vm10, %v10179_v51, %v10306_v25  ;;  %v15096_v40 = vcvt.s32.f32 %v10334_v27  ;;  %v10263_v27 = vrot.slane %v15083_v24, %v11977_v2 }
0x218d   :  { %v10073_v32 = vpop.permute.xlu1 %10072  ;;  %v15099_v36 = vsel %vm1434_vm4, %v10307_v50, 2147483647  ;;  %v10271_v50 = vrot.slane %v10118_v41, %v11977_v2 }
0x218e   :  { %10337 = vmin.xlane.f32.xlu1 %v15096_v40  ;;  %v10349_v38 = vshra.s32 %v15099_v36, 16  ;;  %v10211_v45 = vrot.slane %v10073_v32, %v11977_v2  ;;  %v10275_v32 = vrot.slane %v10121_v15, %v11977_v2 }
0x2190   :  { %v15106_v53 = vcvt.s32.f32 %v10349_v38  ;;  %v10313_v1 = vsel %vm1629_vm8, %v10211_v45, %v10312_v18  ;;  %v10279_v38 = vrot.slane %v10124_v26, %v11977_v2 }
0x2191   :  { %v10085_v62 = vpop.permute.xlu1 %10084 }
0x2192   :  { %v10227_v44 = vrot.slane %v10085_v62, %v11977_v2  ;;  %10352 = vmin.xlane.f32.xlu0 %v15106_v53 }
0x2194   :  { %v10316_v31 = vsel %vm1627_vm0, %v10227_v44, %v10223_v60 }
0x2195   :  { %v10317_v35 = vsel %vm1629_vm8, %v10231_v21, %v10316_v31  ;;  %v10076_v48 = vpop.permute.xlu1 %10075 }
0x2196   :  { %10367 = vmin.xlane.f32.xlu0 %v15115_v54  ;;  %v10318_v22 = vsel %vm1631_vm9, %v10235_v7, %v10317_v35  ;;  %v10215_v3 = vrot.slane %v10076_v48, %v11977_v2 }
0x2197   :  { %v10319_v57 = vsel %vm1633_vm10, %v10239_v63, %v10318_v22  ;;  %v10247_v63 = vrot.slane %v15057_v55, %v11977_v2 }
0x2198   :  { %v15123_v39 = vsel %vm1434_vm4, %v10319_v57, 2147483647  ;;  %v10314_v5 = vsel %vm1631_vm9, %v10215_v3, %v10313_v1  ;;  %v10287_v1 = vrot.slane %v10130_v0, %v11977_v2 }
0x2199   :  { %v10097_v52 = vpop.permute.xlu1 %10096  ;;  %v10394_v19 = vshra.s32 %v15123_v39, 16 }
0x219a   :  { %v10243_v21 = vrot.slane %v10097_v52, %v11977_v2 }
0x219b   :  { %v15132_v29 = vcvt.s32.f32 %v10394_v19 }
0x219c   :  { %v10320_v22 = vsel %vm1627_vm0, %v10247_v63, %v10243_v21 }
0x219d   :  { %v10079_v37 = vpop.permute.xlu1 %10078  ;;  %10397 = vmin.xlane.f32.xlu1 %v15132_v29 }
0x219e   :  { %v10219_v14 = vrot.slane %v10079_v37, %v11977_v2 }
0x21a0   :  { %v10315_v33 = vsel %vm1633_vm10, %v10219_v14, %v10314_v5  ;;  %v10139_v14 = vpop.permute.xlu0 %10138 }
0x21a1   :  { %v10103_v56 = vpop.permute.xlu1 %10102  ;;  %v15141_v16 = vsel %vm1434_vm4, %v10315_v33, 2147483647 }
0x21a2   :  { %v10379_v47 = vshra.s32 %v15141_v16, 16  ;;  %v10251_v31 = vrot.slane %v10103_v56, %v11977_v2 }
0x21a4   :  { %v15144_v30 = vcvt.s32.f32 %v10379_v47  ;;  %v10321_v58 = vsel %vm1629_vm8, %v10251_v31, %v10320_v22  ;;  %v10299_v47 = vrot.slane %v10139_v14, %v11977_v2 }
0x21a5   :  { %v10115_v51 = vpop.permute.xlu1 %10114 }
0x21a6   :  { %v10267_v25 = vrot.slane %v10115_v51, %v11977_v2  ;;  %10382 = vmin.xlane.f32.xlu0 %v15144_v30 }
0x21a8   :  { %v10324_v11 = vsel %vm1627_vm0, %v10267_v25, %v10263_v27 }
0x21a9   :  { %v10325_v59 = vsel %vm1629_vm8, %v10271_v50, %v10324_v11  ;;  %v10106_v62 = vpop.permute.xlu1 %10105  ;;  %v10333_v11 = vand.u32 65535, %v15088_v10 }
0x21aa   :  { %v10326_v60 = vsel %vm1631_vm9, %v10275_v32, %v10325_v59  ;;  %v10255_v35 = vrot.slane %v10106_v62, %v11977_v2  ;;  %v10348_v62 = vand.u32 65535, %v15099_v36 }
0x21ab   :  { %v10327_v24 = vsel %vm1633_vm10, %v10279_v38, %v10326_v60  ;;  %v10335_v59 = vcvt.s32.f32 %v10333_v11 }
0x21ac   :  { %v15158_v44 = vsel %vm1434_vm4, %v10327_v24, 2147483647  ;;  %v10322_v19 = vsel %vm1631_vm9, %v10255_v35, %v10321_v58  ;;  %v10350_v21 = vcvt.s32.f32 %v10348_v62 }
0x21ad   :  { %v10127_v7 = vpop.permute.xlu1 %10126  ;;  %v10424_v41 = vshra.s32 %v15158_v44, 16 }
0x21ae   :  { %v10283_v3 = vrot.slane %v10127_v7, %v11977_v2  ;;  %v10363_v7 = vand.u32 65535, %v15102_v9 }
0x21af   :  { %v15166_v48 = vcvt.s32.f32 %v10424_v41 }
0x21b0   :  { %v10328_v33 = vsel %vm1627_vm0, %v10287_v1, %v10283_v3  ;;  %v10365_v31 = vcvt.s32.f32 %v10363_v7 }
0x21b1   :  { %v10109_v57 = vpop.permute.xlu1 %10108  ;;  %10427 = vmin.xlane.f32.xlu1 %v15166_v48 }
0x21b2   :  { %v10259_v52 = vrot.slane %v10109_v57, %v11977_v2 }
0x21b4   :  { %v10323_v45 = vsel %vm1633_vm10, %v10259_v52, %v10322_v19  ;;  %v17729_v52 = vld [vmem:[#allocation8_spill] sm:$0xff] }
0x21b5   :  { %v10133_v46 = vpop.permute.xlu1 %10132  ;;  %v15175_v55 = vsel %vm1434_vm4, %v10323_v45, 2147483647 }
0x21b6   :  { %v10409_v18 = vshra.s32 %v15175_v55, 16  ;;  %v10291_v37 = vrot.slane %v10133_v46, %v11977_v2 }
0x21b8   :  { %v15181_v5 = vcvt.s32.f32 %v10409_v18  ;;  %v10329_v51 = vsel %vm1629_vm8, %v10291_v37, %v10328_v33 }
0x21b9   :  { %v10136_v15 = vpop.permute.xlu1 %10135 }
0x21ba   :  { %v10295_v56 = vrot.slane %v10136_v15, %v11977_v2  ;;  %10412 = vmin.xlane.f32.xlu0 %v15181_v5 }
0x21bc   :  { %v10330_v27 = vsel %vm1631_vm9, %v10295_v56, %v10329_v51  ;;  %v10423_v51 = vand.u32 65535, %v15158_v44 }
0x21bd   :  { %v10331_v26 = vsel %vm1633_vm10, %v10299_v47, %v10330_v27 }
0x21be   :  { %v10437_v0 = vsel %vm1434_vm4, %v10331_v26, 2147483647  ;;  %v10425_v26 = vcvt.s32.f32 %v10423_v51  ;;  %v17748_v51 = vld [vmem:[#allocation196_spill] sm:$0xff] }
0x21bf   :  { %v10439_v25 = vshra.s32 %v10437_v0, 16  ;;  %v10438_v18 = vand.u32 65535, %v10437_v0  ;;  %v17732_v0 = vld [vmem:[#allocation227_spill] sm:$0xff] }
0x21c1   :  { %v15191_v50 = vcvt.s32.f32 %v10439_v25  ;;  %v8489_v25 = vrot.slane %v17732_v0, %v11809_v28 }
0x21c3   :  { %10442 = vmin.xlane.f32.xlu0 %v15191_v50 }
0x21e3   :  { %v15194_v32 = vpop.xlane.xlu0 %10656 }
0x21e4   :  { %10794 = vst.msk [vmem:[%s17007_s10] sm:$0xff] %vm10793_vm6, %v15194_v32  ;;  %v10678_v33 = vrot.slane %v15194_v32, %v11925_v23 }
0x221b   :  { %v15202_v38 = vpop.xlane.xlu1 %10337 }
0x221c   :  { %vm10339_vm2 = vcmp.eq.f32.partialorder %v15096_v40, %v15202_v38  ;;  %v10393_v40 = vand.u32 65535, %v15123_v39  ;;  %v10666_v39 = vrot.slane %v15194_v32, %v11809_v28 }
0x221d   :  { %v10340_v60 = vsel %vm10339_vm2, %v10335_v59, inf  ;;  %v17735_v59 = vld [vmem:[#allocation189_spill] sm:$0xff] }
0x221e   :  { %10341 = vmin.xlane.f32.xlu0 %v10340_v60  ;;  %v10395_v35 = vcvt.s32.f32 %v10393_v40  ;;  %vm10700_vm5 = vcmp.eq.f32.partialorder %v14842_v42, %v10666_v39  ;;  %v17730_v42 = vld [vmem:[#allocation9_spill] sm:$0xff] }
0x221f   :  { %v15207_v24 = vpop.xlane.xlu0 %10352  ;;  %v10708_v58 = vsel %vm10700_vm5, %v12026_v17, 5  ;;  %v10690_v3 = vrot.slane %v15194_v32, %v17730_v42  ;;  %v17736_v60 = vld [vmem:[#allocation41_spill] sm:$0xff] }
0x2220   :  { %vm10354_vm7 = vcmp.eq.f32.partialorder %v15106_v53, %v15207_v24  ;;  %v10378_v53 = vand.u32 65535, %v15141_v16  ;;  %v10408_v16 = vand.u32 65535, %v15175_v55 }
0x2221   :  { %v10355_v41 = vsel %vm10354_vm7, %v10350_v21, inf }
0x2222   :  { %10356 = vmin.xlane.f32.xlu1 %v10355_v41  ;;  %v10380_v57 = vcvt.s32.f32 %v10378_v53  ;;  %v10410_v46 = vcvt.s32.f32 %v10408_v16  ;;  %v17737_v41 = vld [vmem:[#allocation190_spill] sm:$0xff]  ;;  %v17739_v53 = vld [vmem:[#allocation187_spill] sm:$0xff] }
0x2223   :  { %v15212_v10 = vpop.xlane.xlu0 %10367  ;;  %v17742_v16 = vld [vmem:[#allocation194_spill] sm:$0xff] }
0x2224   :  { %vm10369_vm15 = vcmp.eq.f32.partialorder %v15115_v54, %v15212_v10 }
0x2225   :  { %v10370_v36 = vsel %vm10369_vm15, %v10365_v31, inf  ;;  %v8485_v31 = vrot.slane %v17732_v0, %v11644_v8 }
0x2226   :  { %10371 = vmin.xlane.f32.xlu0 %v10370_v36  ;;  %v17738_v36 = vld [vmem:[#allocation229_spill] sm:$0xff] }
0x2227   :  { %v8529_v40 = vrot.slane %v17738_v36, %v11809_v28 }
0x222a   :  { %v15217_v63 = vpop.xlane.xlu1 %10397 }
0x222b   :  { %vm10399_vm1 = vcmp.eq.f32.partialorder %v15132_v29, %v15217_v63  ;;  %v10674_v29 = vrot.slane %v15194_v32, %v17414_v4 }
0x222c   :  { %v10400_v9 = vsel %vm10399_vm1, %v10395_v35, inf  ;;  %vm10706_vm1 = vcmp.eq.f32.partialorder %v14886_v6, %v10690_v3  ;;  %v10670_v6 = vrot.slane %v15194_v32, %v11920_v34  ;;  %v8497_v3 = vrot.slane %v17732_v0, %v17414_v4 }
0x222d   :  { %10401 = vmin.xlane.f32.xlu0 %v10400_v9  ;;  %vm10702_vm2 = vcmp.eq.f32.partialorder %v14854_v61, %v10674_v29  ;;  %v10714_v37 = vsel %vm10706_vm1, %v12026_v17, 5  ;;  %v8493_v9 = vrot.slane %v17732_v0, %v11920_v34 }
0x222e   :  { %v10710_v19 = vsel %vm10702_vm2, %v12026_v17, 5  ;;  %vm10701_vm2 = vcmp.eq.f32.partialorder %v14848_v20, %v10670_v6  ;;  %v17747_v6 = vld [vmem:[#allocation199_spill] sm:$0xff] }
0x222f   :  { %v10709_v47 = vsel %vm10701_vm2, %v12026_v17, 5 }
0x2233   :  { %v15222_v22 = vpop.xlane.xlu0 %10382 }
0x2234   :  { %vm10384_vm3 = vcmp.eq.f32.partialorder %v15144_v30, %v15222_v22  ;;  %v10682_v30 = vrot.slane %v15194_v32, %v17729_v52  ;;  %v8525_v52 = vrot.slane %v17738_v36, %v11644_v8 }
0x2235   :  { %v10385_v54 = vsel %vm10384_vm3, %v10380_v57, inf  ;;  %v17740_v57 = vld [vmem:[#allocation43_spill] sm:$0xff] }
0x2236   :  { %10386 = vmin.xlane.f32.xlu1 %v10385_v54  ;;  %vm10704_vm7 = vcmp.eq.f32.partialorder %v14866_v12, %v10682_v30  ;;  %v10440_v12 = vcvt.s32.f32 %v10438_v18  ;;  %v17743_v30 = vld [vmem:[#allocation230_spill] sm:$0xff]  ;;  %v8501_v18 = vrot.slane %v17732_v0, %v11925_v23 }
0x2237   :  { %v10712_v55 = vsel %vm10704_vm7, %v12026_v17, 5  ;;  %vm10703_vm7 = vcmp.eq.f32.partialorder %v14860_v13, %v10678_v33  ;;  %v17733_v13 = vld [vmem:[#allocation42_spill] sm:$0xff] }
0x2238   :  { %v10711_v20 = vsel %vm10703_vm7, %v12026_v17, 5 }
0x223e   :  { %v15260_v56 = vpop.xlane.xlu1 %10427 }
0x2243   :  { %10719 = vperm.xlu0 %11277, %v10708_v58   ;;  %v17741_v58 = vld [vmem:[#allocation191_spill] sm:$0xff] }
0x2247   :  { %10725 = vperm.xlu0 %11277, %v10710_v19   ;;  %v15237_v45 = vpop.xlane.xlu0 %10412  ;;  %v8545_v19 = vrot.slane %v17743_v30, %v11644_v8 }
0x2248   :  { %vm10414_vm15 = vcmp.eq.f32.partialorder %v15181_v5, %v15237_v45  ;;  %v10662_v5 = vrot.slane %v15194_v32, %v11644_v8 }
0x2249   :  { %v10415_v61 = vsel %vm10414_vm15, %v10410_v46, inf  ;;  %vm10429_vm15 = vcmp.eq.f32.partialorder %v15166_v48, %v15260_v56 }
0x224a   :  { %10416 = vmin.xlane.f32.xlu1 %v10415_v61  ;;  %vm10699_vm5 = vcmp.eq.f32.partialorder %v14836_v49, %v10662_v5  ;;  %v17731_v49 = vld [vmem:[#allocation11_spill] sm:$0xff]  ;;  %v17744_v61 = vld [vmem:[#allocation193_spill] sm:$0xff] }
0x224b   :  { %10731 = vperm.xlu0 %11277, %v10712_v55   ;;  %v10707_v15 = vsel %vm10699_vm5, %v12026_v17, 5  ;;  %v10686_v27 = vrot.slane %v15194_v32, %v17731_v49  ;;  %v17734_v32 = vld [vmem:[#allocation228_spill] sm:$0xff]  ;;  %v17746_v5 = vld [vmem:[#allocation195_spill] sm:$0xff]  ;;  %v17749_v49 = vld [vmem:[#allocation45_spill] sm:$0xff] }
0x224c   :  { %v8505_v11 = vrot.slane %v17734_v32, %v11644_v8  ;;  %v8513_v21 = vrot.slane %v17734_v32, %v11920_v34  ;;  %v8517_v54 = vrot.slane %v17734_v32, %v17414_v4  ;;  %v17745_v55 = vld [vmem:[#allocation44_spill] sm:$0xff] }
0x224d   :  { %vm10705_vm1 = vcmp.eq.f32.partialorder %v14874_v43, %v10686_v27  ;;  %v8509_v43 = vrot.slane %v17734_v32, %v11809_v28  ;;  %v8549_v27 = vrot.slane %v17743_v30, %v11809_v28 }
0x224e   :  { %v10713_v44 = vsel %vm10705_vm1, %v12026_v17, 5  ;;  %vm8687_vm5 = vcmp.eq.f32.partialorder %v17735_v59, %v8505_v11  ;;  %vm8689_vm7 = vcmp.eq.f32.partialorder %v17737_v41, %v8513_v21  ;;  %vm8693_vm1 = vcmp.eq.f32.partialorder %v17740_v57, %v8529_v40  ;;  %v17755_v41 = vld [vmem:[#allocation202_spill] sm:$0xff]  ;;  %v17757_v40 = vld [vmem:[#allocation232_spill] sm:$0xff] }
0x224f   :  { %10737 = vperm.xlu0 %11277, %v10714_v37   ;;  %v8727_v62 = vsel %vm8687_vm5, %v12026_v17, 5  ;;  %vm8688_vm2 = vcmp.eq.f32.partialorder %v17736_v60, %v8509_v43  ;;  %v8729_v35 = vsel %vm8689_vm7, %v12026_v17, 5  ;;  %v8733_v29 = vsel %vm8693_vm1, %v12026_v17, 5 }
0x2250   :  { %v15247_v1 = vpop.xlane.xlu0 %10442  ;;  %v8728_v7 = vsel %vm8688_vm2, %v12026_v17, 5  ;;  %vm8690_vm5 = vcmp.eq.f32.partialorder %v17742_v16, %v8517_v54  ;;  %vm8692_vm2 = vcmp.eq.f32.partialorder %v17744_v61, %v8525_v52  ;;  %vm8697_vm7 = vcmp.eq.f32.partialorder %v17745_v55, %v8545_v19  ;;  %v17758_v54 = vld [vmem:[#allocation203_spill] sm:$0xff]  ;;  %v17760_v52 = vld [vmem:[#allocation205_spill] sm:$0xff]  ;;  %v17761_v19 = vld [vmem:[#allocation212_spill] sm:$0xff] }
0x2251   :  { %vm10444_vm3 = vcmp.eq.f32.partialorder %v15191_v50, %v15247_v1  ;;  %v10430_v50 = vsel %vm10429_vm15, %v10425_v26, inf  ;;  %vm8682_vm15 = vcmp.eq.f32.partialorder %v17739_v53, %v8485_v31  ;;  %v8730_v42 = vsel %vm8690_vm5, %v12026_v17, 5  ;;  %v17756_v31 = vld [vmem:[#allocation208_spill] sm:$0xff] }
0x2252   :  { %v10445_v14 = vsel %vm10444_vm3, %v10440_v12, inf  ;;  %vm8683_vm3 = vcmp.eq.f32.partialorder %v17733_v13, %v8489_v25  ;;  %v8722_v39 = vsel %vm8682_vm15, %v12026_v17, 5  ;;  %v8732_v37 = vsel %vm8692_vm2, %v12026_v17, 5  ;;  %v17752_v13 = vld [vmem:[#allocation204_spill] sm:$0xff] }
0x2253   :  { %10446 = vmin.xlane.f32.xlu1 %v10445_v14  ;;  %v8723_v48 = vsel %vm8683_vm3, %v12026_v17, 5  ;;  %vm8684_vm3 = vcmp.eq.f32.partialorder %v17741_v58, %v8493_v9  ;;  %v8737_v12 = vsel %vm8697_vm7, %v12026_v17, 5  ;;  %v8533_v14 = vrot.slane %v17738_v36, %v11920_v34 }
0x2254   :  { %v8724_v46 = vsel %vm8684_vm3, %v12026_v17, 5  ;;  %vm8685_vm15 = vcmp.eq.f32.partialorder %v17746_v5, %v8497_v3  ;;  %vm8686_vm1 = vcmp.eq.f32.partialorder %v17747_v6, %v8501_v18  ;;  %v8541_v11 = vrot.slane %v17738_v36, %v11925_v23 }
0x2255   :  { %v8725_v33 = vsel %vm8685_vm15, %v12026_v17, 5  ;;  %vm8694_vm3 = vcmp.eq.f32.partialorder %v17748_v51, %v8533_v14  ;;  %v8553_v43 = vrot.slane %v17743_v30, %v11920_v34  ;;  %v8557_v57 = vrot.slane %v17743_v30, %v17414_v4 }
0x2256   :  { %v8734_v0 = vsel %vm8694_vm3, %v12026_v17, 5  ;;  %v8561_v18 = vrot.slane %v17743_v30, %v11925_v23  ;;  %v17766_v30 = vld [vmem:[#allocation217_spill] sm:$0xff] }
0x2257   :  { %vm8699_vm3 = vcmp.eq.f32.partialorder %v17755_v41, %v8553_v43 }
0x2258   :  { %v8739_v9 = vsel %vm8699_vm3, %v12026_v17, 5 }
0x2264   :  { %10716 = vperm.xlu1 %11278, %v10707_v15   ;;  %v8537_v15 = vrot.slane %v17738_v36, %v17414_v4 }
0x2266   :  { %vm8695_vm5 = vcmp.eq.f32.partialorder %v17749_v49, %v8537_v15  ;;  %v8593_v15 = vrot.slane %v17757_v40, %v11920_v34 }
0x2267   :  { %v8735_v25 = vsel %vm8695_vm5, %v12026_v17, 5 }
0x2268   :  { %10722 = vperm.xlu1 %11278, %v10709_v47   ;;  %v8726_v47 = vsel %vm8686_vm1, %v12026_v17, 5 }
0x226c   :  { %10728 = vperm.xlu1 %11278, %v10711_v20   ;;  %v17750_v20 = vld [vmem:[#allocation231_spill] sm:$0xff] }
0x226d   :  { %v8565_v26 = vrot.slane %v17750_v20, %v11644_v8  ;;  %v8573_v60 = vrot.slane %v17750_v20, %v11920_v34  ;;  %v8569_v36 = vrot.slane %v17750_v20, %v11809_v28  ;;  %v8581_v14 = vrot.slane %v17750_v20, %v11925_v23 }
0x226e   :  { %10431 = vmin.xlane.f32.xlu0 %v10430_v50  ;;  %v8521_v50 = vrot.slane %v17734_v32, %v11925_v23  ;;  %v17754_v32 = vld [vmem:[#allocation206_spill] sm:$0xff] }
0x226f   :  { %vm8702_vm7 = vcmp.eq.f32.partialorder %v17752_v13, %v8565_v26  ;;  %vm8696_vm1 = vcmp.eq.f32.partialorder %v17754_v32, %v8541_v11  ;;  %vm8704_vm5 = vcmp.eq.f32.partialorder %v17756_v31, %v8573_v60  ;;  %v8597_v13 = vrot.slane %v17757_v40, %v17414_v4  ;;  %v17770_v11 = vld [vmem:[#allocation213_spill] sm:$0xff]  ;;  %v17772_v32 = vld [vmem:[#allocation216_spill] sm:$0xff]  ;;  %v17773_v60 = vld [vmem:[#allocation223_spill] sm:$0xff] }
0x2270   :  { %10734 = vperm.xlu1 %11278, %v10713_v44   ;;  %v17751_v44 = vld [vmem:[#allocation198_spill] sm:$0xff]  ;;  %v8742_v59 = vsel %vm8702_vm7, %v12026_v17, 5  ;;  %v8744_v53 = vsel %vm8704_vm5, %v12026_v17, 5 }
0x2271   :  { %vm8698_vm2 = vcmp.eq.f32.partialorder %v17751_v44, %v8549_v27  ;;  %v17767_v27 = vld [vmem:[#allocation47_spill] sm:$0xff] }
0x2274   :  { %8766 = vperm.xlu1 %11278, %v8723_v48   ;;  %v8738_v48 = vsel %vm8698_vm2, %v12026_v17, 5  ;;  %vm8703_vm2 = vcmp.eq.f32.partialorder %v17758_v54, %v8569_v36  ;;  %v8601_v36 = vrot.slane %v17757_v40, %v11925_v23 }
0x2275   :  { %v8743_v58 = vsel %vm8703_vm2, %v12026_v17, 5 }
0x2278   :  { %8778 = vperm.xlu1 %11278, %v8727_v62   ;;  %v17753_v62 = vld [vmem:[#allocation200_spill] sm:$0xff] }
0x2279   :  { %vm8691_vm15 = vcmp.eq.f32.partialorder %v17753_v62, %v8521_v50 }
0x227a   :  { %v8731_v21 = vsel %vm8691_vm15, %v12026_v17, 5  ;;  %vm8700_vm15 = vcmp.eq.f32.partialorder %v17760_v52, %v8557_v57  ;;  %v17778_v52 = vld [vmem:[#allocation222_spill] sm:$0xff] }
0x227b   :  { %v8740_v61 = vsel %vm8700_vm15, %v12026_v17, 5  ;;  %vm8709_vm15 = vcmp.eq.f32.partialorder %v17767_v27, %v8593_v15  ;;  %v10344_v27 = vcvt.f32.s32 %v15202_v38 }
0x227c   :  { %8781 = vperm.xlu1 %11278, %v8728_v7   ;;  %v8736_v7 = vsel %vm8696_vm1, %v12026_v17, 5  ;;  %v8749_v50 = vsel %vm8709_vm15, %v12026_v17, 5 }
0x2280   :  { %8784 = vperm.xlu1 %11278, %v8729_v35   ;;  %v8589_v35 = vrot.slane %v17757_v40, %v11809_v28 }
0x2284   :  { %8763 = vperm.xlu0 %11277, %v8722_v39   ;;  %8796 = vperm.xlu1 %11278, %v8733_v29   ;;  %v17759_v39 = vld [vmem:[#allocation210_spill] sm:$0xff]  ;;  %v8577_v29 = vrot.slane %v17750_v20, %v17414_v4  ;;  %v17768_v20 = vld [vmem:[#allocation219_spill] sm:$0xff] }
0x2285   :  { %vm8708_vm7 = vcmp.eq.f32.partialorder %v17759_v39, %v8589_v35  ;;  %v17774_v35 = vld [vmem:[#allocation218_spill] sm:$0xff]  ;;  %v17776_v39 = vld [vmem:[#allocation220_spill] sm:$0xff] }
0x2286   :  { %v8748_v16 = vsel %vm8708_vm7, %v12026_v17, 5  ;;  %vm8705_vm1 = vcmp.eq.f32.partialorder %v17761_v19, %v8577_v29  ;;  %vm8706_vm7 = vcmp.eq.f32.partialorder %v17766_v30, %v8581_v14  ;;  %v17777_v29 = vld [vmem:[#allocation226_spill] sm:$0xff] }
0x2287   :  { %v8745_v55 = vsel %vm8705_vm1, %v12026_v17, 5  ;;  %v8746_v49 = vsel %vm8706_vm7, %v12026_v17, 5 }
0x2288   :  { %8769 = vperm.xlu0 %11277, %v8724_v46   ;;  %8787 = vperm.xlu1 %11278, %v8730_v42   ;;  %v8585_v46 = vrot.slane %v17757_v40, %v11644_v8  ;;  %v17762_v42 = vld [vmem:[#allocation233_spill] sm:$0xff] }
0x2289   :  { %v8605_v3 = vrot.slane %v17762_v42, %v11644_v8  ;;  %v8609_v26 = vrot.slane %v17762_v42, %v11809_v28 }
0x228c   :  { %8793 = vperm.xlu0 %11277, %v8732_v37   ;;  %8808 = vperm.xlu1 %11278, %v8737_v12   ;;  %v17763_v37 = vld [vmem:[#allocation46_spill] sm:$0xff] }
0x228d   :  { %vm8707_vm3 = vcmp.eq.f32.partialorder %v17763_v37, %v8585_v46  ;;  %v17764_v12 = vld [vmem:[#allocation214_spill] sm:$0xff] }
0x228e   :  { %vm8712_vm5 = vcmp.eq.f32.partialorder %v17764_v12, %v8605_v3  ;;  %v8747_v5 = vsel %vm8707_vm3, %v12026_v17, 5  ;;  %vm8713_vm3 = vcmp.eq.f32.partialorder %v17770_v11, %v8609_v26 }
0x228f   :  { %v8752_v6 = vsel %vm8712_vm5, %v12026_v17, 5  ;;  %v8753_v43 = vsel %vm8713_vm3, %v12026_v17, 5  ;;  %vm8711_vm3 = vcmp.eq.f32.partialorder %v17776_v39, %v8601_v36 }
0x2290   :  { %8772 = vperm.xlu0 %11277, %v8725_v33   ;;  %8775 = vperm.xlu1 %11278, %v8726_v47   ;;  %v17765_v33 = vld [vmem:[#allocation209_spill] sm:$0xff]  ;;  %v8613_v47 = vrot.slane %v17762_v42, %v11920_v34 }
0x2291   :  { %vm8701_vm2 = vcmp.eq.f32.partialorder %v17765_v33, %v8561_v18 }
0x2292   :  { %v8741_v51 = vsel %vm8701_vm2, %v12026_v17, 5  ;;  %vm8714_vm1 = vcmp.eq.f32.partialorder %v17768_v20, %v8613_v47  ;;  %vm8710_vm2 = vcmp.eq.f32.partialorder %v17772_v32, %v8597_v13  ;;  %v10389_v20 = vcvt.f32.s32 %v15222_v22 }
0x2293   :  { %v8754_v44 = vsel %vm8714_vm1, %v12026_v17, 5  ;;  %v8750_v41 = vsel %vm8710_vm2, %v12026_v17, 5 }
0x2294   :  { %8799 = vperm.xlu0 %11277, %v8734_v0   ;;  %8802 = vperm.xlu1 %11278, %v8735_v25   ;;  %v17769_v0 = vld [vmem:[#allocation236_spill] sm:$0xff] }
0x2295   :  { %v8629_v25 = vrot.slane %v17769_v0, %v11809_v28  ;;  %v8633_v40 = vrot.slane %v17769_v0, %v11920_v34  ;;  %v8637_v19 = vrot.slane %v17769_v0, %v17414_v4 }
0x2297   :  { %vm8719_vm2 = vcmp.eq.f32.partialorder %v17778_v52, %v8633_v40 }
0x2298   :  { %8811 = vperm.xlu0 %11277, %v8738_v48   ;;  %8823 = vperm.xlu1 %11278, %v8742_v59   ;;  %v17771_v48 = vld [vmem:[#allocation221_spill] sm:$0xff]  ;;  %v8617_v59 = vrot.slane %v17762_v42, %v17414_v4  ;;  %v8759_v46 = vsel %vm8719_vm2, %v12026_v17, 5 }
0x2299   :  { %vm8718_vm5 = vcmp.eq.f32.partialorder %v17771_v48, %v8629_v25 }
0x229a   :  { %v8758_v62 = vsel %vm8718_vm5, %v12026_v17, 5  ;;  %vm8715_vm7 = vcmp.eq.f32.partialorder %v17773_v60, %v8617_v59  ;;  %v10345_v59 = vshll.u32 %v10344_v27, 16 }
0x229b   :  { %v8755_v31 = vsel %vm8715_vm7, %v12026_v17, 5 }
0x229c   :  { %8790 = vperm.xlu0 %11277, %v8731_v21   ;;  %8805 = vperm.xlu1 %11278, %v8736_v7   ;;  %v8625_v21 = vrot.slane %v17769_v0, %v11644_v8  ;;  %v8621_v7 = vrot.slane %v17762_v42, %v11925_v23  ;;  %v17779_v42 = vld [vmem:[#allocation224_spill] sm:$0xff] }
0x229d   :  { %vm8720_vm7 = vcmp.eq.f32.partialorder %v17779_v42, %v8637_v19 }
0x229e   :  { %vm8717_vm15 = vcmp.eq.f32.partialorder %v17774_v35, %v8625_v21  ;;  %v8760_v3 = vsel %vm8720_vm7, %v12026_v17, 5 }
0x229f   :  { %v8757_v57 = vsel %vm8717_vm15, %v12026_v17, 5 }
0x22a0   :  { %8814 = vperm.xlu0 %11277, %v8739_v9   ;;  %8829 = vperm.xlu1 %11278, %v8744_v53   ;;  %v17775_v9 = vld [vmem:[#allocation225_spill] sm:$0xff]  ;;  %v8641_v53 = vrot.slane %v17769_v0, %v11925_v23 }
0x22a1   :  { %vm8716_vm1 = vcmp.eq.f32.partialorder %v17775_v9, %v8621_v7 }
0x22a2   :  { %v8756_v54 = vsel %vm8716_vm1, %v12026_v17, 5  ;;  %vm8721_vm5 = vcmp.eq.f32.partialorder %v17777_v29, %v8641_v53  ;;  %v10434_v53 = vcvt.f32.s32 %v15260_v56 }
0x22a4   :  { %8826 = vperm.xlu0 %11277, %v8743_v58   ;;  %8841 = vperm.xlu1 %11278, %v8748_v16   ;;  %v8751_v58 = vsel %vm8711_vm3, %v12026_v17, 5  ;;  %v8761_v16 = vsel %vm8721_vm5, %v12026_v17, 5  ;;  %v10435_v52 = vshll.u32 %v10434_v53, 16 }
0x22a8   :  { %8817 = vperm.xlu0 %11277, %v8740_v61   ;;  %8832 = vperm.xlu1 %11278, %v8745_v55  }
0x22ab   :  { %v10342_v18 = vpop.xlane.xlu0 %10341 }
0x22ac   :  { %8838 = vperm.xlu0 %11277, %v8747_v5   ;;  %8853 = vperm.xlu1 %11278, %v8752_v6  }
0x22af   :  { %v10357_v61 = vpop.xlane.xlu1 %10356 }
0x22b0   :  { %8820 = vperm.xlu0 %11277, %v8741_v51   ;;  %8835 = vperm.xlu1 %11278, %v8746_v49   ;;  %v10359_v51 = vcvt.f32.s32 %v15207_v24  ;;  %v10374_v49 = vcvt.f32.s32 %v15212_v10  ;;  %v10358_v26 = vcvt.f32.s32 %v10357_v61  ;;  %v10419_v24 = vcvt.f32.s32 %v15237_v45 }
0x22b1   :  { %v10404_v10 = vcvt.f32.s32 %v15217_v63 }
0x22b2   :  { %v10375_v48 = vshll.u32 %v10374_v49, 16 }
0x22b3   :  { %v10372_v12 = vpop.xlane.xlu0 %10371  ;;  %v10405_v9 = vshll.u32 %v10404_v10, 16 }
0x22b4   :  { %8844 = vperm.xlu0 %11277, %v8749_v50   ;;  %8859 = vperm.xlu1 %11278, %v8754_v44   ;;  %v10373_v0 = vcvt.f32.s32 %v10372_v12  ;;  %v10360_v50 = vshll.u32 %v10359_v51, 16  ;;  %v10343_v44 = vcvt.f32.s32 %v10342_v18 }
0x22b6   :  { %v10376_v38 = vadd.s32 %v10375_v48, %v10373_v0  ;;  %v10346_v22 = vadd.s32 %v10345_v59, %v10343_v44 }
0x22b8   :  { %8856 = vperm.xlu0 %11277, %v8753_v43   ;;  %8871 = vperm.xlu1 %11278, %v8758_v62   ;;  %v10390_v43 = vshll.u32 %v10389_v20, 16  ;;  %v10361_v62 = vadd.s32 %v10360_v50, %v10358_v26  ;;  %v10463_v45 = vrot.slane %v10376_v38, %v11977_v2  ;;  %v10455_v63 = vrot.slane %v10346_v22, %v11977_v2 }
0x22ba   :  { %v10402_v5 = vpop.xlane.xlu0 %10401  ;;  %v10459_v36 = vrot.slane %v10361_v62, %v11977_v2 }
0x22bb   :  { %v10403_v7 = vcvt.f32.s32 %v10402_v5 }
0x22bc   :  { %8847 = vperm.xlu0 %11277, %v8750_v41   ;;  %8862 = vperm.xlu1 %11278, %v8755_v31   ;;  %v10420_v41 = vshll.u32 %v10419_v24, 16  ;;  %v10449_v31 = vcvt.f32.s32 %v15247_v1  ;;  %v10484_v1 = vsel %vm1627_vm0, %v10459_v36, %v10455_v63 }
0x22bd   :  { %v10406_v40 = vadd.s32 %v10405_v9, %v10403_v7  ;;  %v10485_v19 = vsel %vm1629_vm8, %v10463_v45, %v10484_v1 }
0x22c0   :  { %8868 = vperm.xlu0 %11277, %v8757_v57   ;;  %8865 = vperm.xlu1 %11278, %v8756_v54  }
0x22c2   :  { %v15434_v15 = vpop.permute.xlu0 %10719 }
0x22c3   :  { %v10387_v55 = vpop.xlane.xlu1 %10386 }
0x22c4   :  { %8850 = vperm.xlu0 %11277, %v8751_v58   ;;  %8880 = vperm.xlu1 %11278, %v8761_v16   ;;  %v10388_v13 = vcvt.f32.s32 %v10387_v55  ;;  %v10450_v58 = vshll.u32 %v10449_v31, 16  ;;  %v10471_v55 = vrot.slane %v10406_v40, %v11977_v2 }
0x22c6   :  { %v15438_v30 = vpop.permute.xlu0 %10725  ;;  %v10391_v60 = vadd.s32 %v10390_v43, %v10388_v13 }
0x22c8   :  { %8874 = vperm.xlu0 %11277, %v8759_v46   ;;  %v10467_v54 = vrot.slane %v10391_v60, %v11977_v2 }
0x22ca   :  { %v15448_v11 = vpop.permute.xlu0 %10731  ;;  %v10486_v56 = vsel %vm1631_vm9, %v10467_v54, %v10485_v19 }
0x22cc   :  { %8877 = vperm.xlu0 %11277, %v8760_v3  }
0x22ce   :  { %v15454_v35 = vpop.permute.xlu0 %10737 }
0x22d7   :  { %v10417_v37 = vpop.xlane.xlu1 %10416 }
0x22d8   :  { %v10418_v21 = vcvt.f32.s32 %v10417_v37  ;;  %v10487_v37 = vsel %vm1633_vm10, %v10471_v55, %v10486_v56 }
0x22da   :  { %v10421_v39 = vadd.s32 %v10420_v41, %v10418_v21 }
0x22dc   :  { %v10475_v3 = vrot.slane %v10421_v39, %v11977_v2 }
0x22de   :  { %v10488_v5 = vsel %vm1635_vm11, %v10475_v3, %v10487_v37 }
0x22e0   :  { %v10447_v14 = vpop.xlane.xlu1 %10446 }
0x22e1   :  { %v10448_v29 = vcvt.f32.s32 %v10447_v14 }
0x22e3   :  { %v10451_v61 = vadd.s32 %v10450_v58, %v10448_v29 }
0x22e4   :  { %v15432_v6 = vpop.permute.xlu1 %10716 }
0x22e5   :  { %v10483_v51 = vrot.slane %v10451_v61, %v11977_v2 }
0x22e8   :  { %v15436_v33 = vpop.permute.xlu1 %10722 }
0x22ec   :  { %v15440_v47 = vpop.permute.xlu1 %10728 }
0x22f0   :  { %v15446_v25 = vpop.permute.xlu1 %10734 }
0x22f4   :  { %v8767_v32 = vpop.permute.xlu1 %8766 }
0x22f5   :  { %v8889_v43 = vrot.slane %v8767_v32, %v11977_v2 }
0x22f8   :  { %v8779_v57 = vpop.permute.xlu1 %8778 }
0x22f9   :  { %v8905_v58 = vrot.slane %v8779_v57, %v11977_v2 }
0x22fb   :  { %v10432_v16 = vpop.xlane.xlu0 %10431 }
0x22fc   :  { %v10433_v46 = vcvt.f32.s32 %v10432_v16  ;;  %v8782_v42 = vpop.permute.xlu1 %8781 }
0x22fd   :  { %v8909_v53 = vrot.slane %v8782_v42, %v11977_v2 }
0x22fe   :  { %v10436_v18 = vadd.s32 %v10435_v52, %v10433_v46 }
0x22ff   :  { %v9046_v19 = vsel %vm1627_vm0, %v8909_v53, %v8905_v58  ;;  %v10742_v53 = vrot.slane %v15432_v6, %v11977_v2 }
0x2300   :  { %v10479_v12 = vrot.slane %v10436_v18, %v11977_v2  ;;  %v8785_v14 = vpop.permute.xlu1 %8784 }
0x2301   :  { %v8913_v39 = vrot.slane %v8785_v14, %v11977_v2 }
0x2302   :  { %v10489_v49 = vsel %vm1637_vm12, %v10479_v12, %v10488_v5 }
0x2303   :  { %v10490_v27 = vsel %vm1639_vm13, %v10483_v51, %v10489_v49  ;;  %v8764_v20 = vpop.permute.xlu0 %8763  ;;  %v9047_v56 = vsel %vm1629_vm8, %v8913_v39, %v9046_v19 }
0x2304   :  { %10491 = vst.msk [vmem:[#allocation5 + $0x38] sm:$0xff] %vm1315_vm14, %v10490_v27  ;;  %v8797_v26 = vpop.permute.xlu1 %8796  ;;  %v8885_v13 = vrot.slane %v8764_v20, %v11977_v2 }
0x2305   :  { %v8929_v29 = vrot.slane %v8797_v26, %v11977_v2 }
0x2306   :  { %v9042_v62 = vsel %vm1627_vm0, %v8889_v43, %v8885_v13 }
0x2307   :  { %v8770_v0 = vpop.permute.xlu0 %8769 }
0x2308   :  { %v8788_v50 = vpop.permute.xlu1 %8787  ;;  %v8893_v59 = vrot.slane %v8770_v0, %v11977_v2 }
0x2309   :  { %v8917_v1 = vrot.slane %v8788_v50, %v11977_v2 }
0x230a   :  { %v9043_v22 = vsel %vm1629_vm8, %v8893_v59, %v9042_v62 }
0x230b   :  { %v8794_v44 = vpop.permute.xlu0 %8793  ;;  %v9048_v57 = vsel %vm1631_vm9, %v8917_v1, %v9047_v56  ;;  %v10746_v1 = vrot.slane %v15434_v15, %v11977_v2 }
0x230c   :  { %v15473_v48 = vpop.permute.xlu1 %8808  ;;  %v8925_v9 = vrot.slane %v8794_v44, %v11977_v2 }
0x230e   :  { %v9050_v16 = vsel %vm1627_vm0, %v8929_v29, %v8925_v9 }
0x230f   :  { %v8773_v24 = vpop.permute.xlu0 %8772 }
0x2310   :  { %v8897_v10 = vrot.slane %v8773_v24, %v11977_v2  ;;  %v8776_v38 = vpop.permute.xlu1 %8775 }
0x2311   :  { %v8901_v60 = vrot.slane %v8776_v38, %v11977_v2 }
0x2312   :  { %v9044_v21 = vsel %vm1631_vm9, %v8897_v10, %v9043_v22 }
0x2313   :  { %v9045_v7 = vsel %vm1633_vm10, %v8901_v60, %v9044_v21  ;;  %v8800_v41 = vpop.permute.xlu0 %8799  ;;  %v8945_v60 = vrot.slane %v15473_v48, %v11977_v2  ;;  %v10750_v48 = vrot.slane %v15436_v33, %v11977_v2  ;;  %v10771_v33 = vsel %vm1627_vm0, %v10746_v1, %v10742_v53 }
0x2314   :  { %v8803_v31 = vpop.permute.xlu1 %8802  ;;  %v15484_v36 = vsel %vm1434_vm4, %v9045_v7, 2147483647  ;;  %v8933_v45 = vrot.slane %v8800_v41, %v11977_v2 }
0x2315   :  { %v9076_v32 = vshra.s32 %v15484_v36, 16  ;;  %v8937_v52 = vrot.slane %v8803_v31, %v11977_v2  ;;  %v10772_v15 = vsel %vm1629_vm8, %v10750_v48, %v10771_v33 }
0x2316   :  { %v9051_v46 = vsel %vm1629_vm8, %v8933_v45, %v9050_v16 }
0x2317   :  { %v8812_v63 = vpop.permute.xlu0 %8811  ;;  %v15490_v54 = vcvt.s32.f32 %v9076_v32  ;;  %v9052_v18 = vsel %vm1631_vm9, %v8937_v52, %v9051_v46 }
0x2318   :  { %v8824_v40 = vpop.permute.xlu1 %8823  ;;  %v8949_v24 = vrot.slane %v8812_v63, %v11977_v2 }
0x2319   :  { %9079 = vmin.xlane.f32.xlu1 %v15490_v54  ;;  %v8965_v10 = vrot.slane %v8824_v40, %v11977_v2 }
0x231a   :  { %v9054_v31 = vsel %vm1627_vm0, %v8949_v24, %v8945_v60 }
0x231b   :  { %v8791_v42 = vpop.permute.xlu0 %8790 }
0x231c   :  { %v8921_v3 = vrot.slane %v8791_v42, %v11977_v2  ;;  %v8806_v61 = vpop.permute.xlu1 %8805 }
0x231d   :  { %v8941_v55 = vrot.slane %v8806_v61, %v11977_v2  ;;  %v10758_v61 = vrot.slane %v15440_v47, %v11977_v2  ;;  %v10766_v47 = vrot.slane %v15446_v25, %v11977_v2 }
0x231e   :  { %v9049_v37 = vsel %vm1633_vm10, %v8921_v3, %v9048_v57 }
0x231f   :  { %v9053_v12 = vsel %vm1633_vm10, %v8941_v55, %v9052_v18  ;;  %v8815_v14 = vpop.permute.xlu0 %8814  ;;  %v15509_v5 = vsel %vm1434_vm4, %v9049_v37, 2147483647  ;;  %v10754_v55 = vrot.slane %v15438_v30, %v11977_v2  ;;  %v10762_v30 = vrot.slane %v15448_v11, %v11977_v2 }
0x2320   :  { %v8830_v51 = vpop.permute.xlu1 %8829  ;;  %v9091_v49 = vshra.s32 %v15509_v5, 16  ;;  %v15513_v27 = vsel %vm1434_vm4, %v9053_v12, 2147483647  ;;  %v8953_v38 = vrot.slane %v8815_v14, %v11977_v2 }
0x2321   :  { %v9106_v26 = vshra.s32 %v15513_v27, 16  ;;  %v8973_v32 = vrot.slane %v8830_v51, %v11977_v2  ;;  %v10773_v14 = vsel %vm1631_vm9, %v10754_v55, %v10772_v15 }
0x2322   :  { %v15515_v20 = vcvt.s32.f32 %v9091_v49  ;;  %v9055_v45 = vsel %vm1629_vm8, %v8953_v38, %v9054_v31  ;;  %v10774_v49 = vsel %vm1633_vm10, %v10758_v61, %v10773_v14 }
0x2323   :  { %v8827_v0 = vpop.permute.xlu0 %8826  ;;  %v15521_v44 = vcvt.s32.f32 %v9106_v26 }
0x2324   :  { %v15518_v50 = vpop.permute.xlu1 %8841  ;;  %9094 = vmin.xlane.f32.xlu0 %v15515_v20  ;;  %v8969_v43 = vrot.slane %v8827_v0, %v11977_v2 }
0x2325   :  { %v8989_v31 = vrot.slane %v15518_v50, %v11977_v2 }
0x2326   :  { %v9058_v7 = vsel %vm1627_vm0, %v8969_v43, %v8965_v10  ;;  %v10770_v10 = vrot.slane %v15454_v35, %v11977_v2 }
0x2327   :  { %v8818_v13 = vpop.permute.xlu0 %8817  ;;  %v9059_v40 = vsel %vm1629_vm8, %v8973_v32, %v9058_v7 }
0x2328   :  { %v8833_v59 = vpop.permute.xlu1 %8832  ;;  %9109 = vmin.xlane.f32.xlu0 %v15521_v44  ;;  %v8957_v21 = vrot.slane %v8818_v13, %v11977_v2  ;;  %v10775_v13 = vsel %vm1635_vm11, %v10762_v30, %v10774_v49 }
0x2329   :  { %v8977_v41 = vrot.slane %v8833_v59, %v11977_v2  ;;  %v10776_v24 = vsel %vm1637_vm12, %v10766_v47, %v10775_v13 }
0x232a   :  { %v9056_v29 = vsel %vm1631_vm9, %v8957_v21, %v9055_v45 }
0x232b   :  { %v15526_v62 = vpop.permute.xlu0 %8838  ;;  %v9060_v16 = vsel %vm1631_vm9, %v8977_v41, %v9059_v40 }
0x232c   :  { %v8854_v22 = vpop.permute.xlu1 %8853  ;;  %v8985_v11 = vrot.slane %v15526_v62, %v11977_v2 }
0x232d   :  { %v9005_v59 = vrot.slane %v8854_v22, %v11977_v2  ;;  %v10777_v22 = vsel %vm1639_vm13, %v10770_v10, %v10776_v24 }
0x232e   :  { %v9062_v62 = vsel %vm1627_vm0, %v8989_v31, %v8985_v11  ;;  %v15604_v50 = vsel %vm1315_vm14, %v10777_v22, 2147483647 }
0x232f   :  { %v8821_v9 = vpop.permute.xlu0 %8820 }
0x2330   :  { %v8961_v63 = vrot.slane %v8821_v9, %v11977_v2  ;;  %v8836_v39 = vpop.permute.xlu1 %8835 }
0x2331   :  { %v8981_v58 = vrot.slane %v8836_v39, %v11977_v2 }
0x2332   :  { %v9057_v6 = vsel %vm1633_vm10, %v8961_v63, %v9056_v29 }
0x2333   :  { %v9061_v52 = vsel %vm1633_vm10, %v8981_v58, %v9060_v16  ;;  %v8845_v19 = vpop.permute.xlu0 %8844  ;;  %v15552_v46 = vsel %vm1434_vm4, %v9057_v6, 2147483647 }
0x2334   :  { %v8860_v42 = vpop.permute.xlu1 %8859  ;;  %v9121_v56 = vshra.s32 %v15552_v46, 16  ;;  %v15557_v3 = vsel %vm1434_vm4, %v9061_v52, 2147483647  ;;  %v8993_v7 = vrot.slane %v8845_v19, %v11977_v2  ;;  %v10780_v19 = vshra.s32 %v15604_v50, 16 }
0x2335   :  { %v9136_v57 = vshra.s32 %v15557_v3, 16  ;;  %v9013_v60 = vrot.slane %v8860_v42, %v11977_v2  ;;  %v9135_v22 = vand.u32 65535, %v15557_v3  ;;  %v10779_v3 = vand.u32 65535, %v15604_v50 }
0x2336   :  { %v15565_v18 = vcvt.s32.f32 %v9121_v56  ;;  %v9063_v39 = vsel %vm1629_vm8, %v8993_v7, %v9062_v62 }
0x2337   :  { %v8857_v37 = vpop.permute.xlu0 %8856  ;;  %v15567_v12 = vcvt.s32.f32 %v9136_v57 }
0x2338   :  { %v8872_v51 = vpop.permute.xlu1 %8871  ;;  %9124 = vmin.xlane.f32.xlu0 %v15565_v18  ;;  %v9009_v26 = vrot.slane %v8857_v37, %v11977_v2  ;;  %v10782_v37 = vcvt.s32.f32 %v10780_v19 }
0x2339   :  { %9139 = vmin.xlane.f32.xlu1 %v15567_v12  ;;  %v9029_v15 = vrot.slane %v8872_v51, %v11977_v2 }
0x233a   :  { %v9066_v25 = vsel %vm1627_vm0, %v9009_v26, %v9005_v59 }
0x233b   :  { %v8848_v0 = vpop.permute.xlu0 %8847  ;;  %v9067_v32 = vsel %vm1629_vm8, %v9013_v60, %v9066_v25 }
0x233c   :  { %v8863_v43 = vpop.permute.xlu1 %8862  ;;  %v8997_v35 = vrot.slane %v8848_v0, %v11977_v2 }
0x233d   :  { %v9017_v38 = vrot.slane %v8863_v43, %v11977_v2  ;;  %v9075_v43 = vand.u32 65535, %v15484_v36 }
0x233e   :  { %v9064_v40 = vsel %vm1631_vm9, %v8997_v35, %v9063_v39 }
0x233f   :  { %v8869_v21 = vpop.permute.xlu0 %8868  ;;  %v9068_v53 = vsel %vm1631_vm9, %v9017_v38, %v9067_v32  ;;  %v9077_v10 = vcvt.s32.f32 %v9075_v43  ;;  %v9090_v38 = vand.u32 65535, %v15509_v5  ;;  %v9120_v5 = vand.u32 65535, %v15552_v46 }
0x2340   :  { %v8866_v41 = vpop.permute.xlu1 %8865  ;;  %v9025_v33 = vrot.slane %v8869_v21, %v11977_v2  ;;  %v9105_v21 = vand.u32 65535, %v15513_v27 }
0x2341   :  { %v9021_v9 = vrot.slane %v8866_v41, %v11977_v2  ;;  %v9092_v60 = vcvt.s32.f32 %v9090_v38  ;;  %v9122_v27 = vcvt.s32.f32 %v9120_v5 }
0x2342   :  { %v9070_v14 = vsel %vm1627_vm0, %v9029_v15, %v9025_v33  ;;  %v9107_v41 = vcvt.s32.f32 %v9105_v21  ;;  %v17781_v33 = vld [vmem:[#allocation34_spill] sm:$0xff] }
0x2343   :  { %v9069_v45 = vsel %vm1633_vm10, %v9021_v9, %v9068_v53  ;;  %v8851_v63 = vpop.permute.xlu0 %8850 }
0x2344   :  { %v9001_v48 = vrot.slane %v8851_v63, %v11977_v2  ;;  %v15601_v29 = vsel %vm1434_vm4, %v9069_v45, 2147483647  ;;  %v8881_v61 = vpop.permute.xlu1 %8880 }
0x2345   :  { %v9166_v58 = vshra.s32 %v15601_v29, 16  ;;  %v9041_v47 = vrot.slane %v8881_v61, %v11977_v2  ;;  %v9165_v63 = vand.u32 65535, %v15601_v29  ;;  %v17780_v29 = vld [vmem:[#allocation186_spill] sm:$0xff] }
0x2346   :  { %v9065_v1 = vsel %vm1633_vm10, %v9001_v48, %v9064_v40  ;;  %v7227_v19 = vrot.slane %v17780_v29, %v11644_v8  ;;  %v7235_v15 = vrot.slane %v17780_v29, %v11920_v34 }
0x2347   :  { %v8875_v16 = vpop.permute.xlu0 %8874  ;;  %v15609_v6 = vcvt.s32.f32 %v9166_v58  ;;  %v9149_v52 = vsel %vm1434_vm4, %v9065_v1, 2147483647  ;;  %v9167_v48 = vcvt.s32.f32 %v9165_v63 }
0x2348   :  { %v9151_v42 = vshra.s32 %v9149_v52, 16  ;;  %v9033_v56 = vrot.slane %v8875_v16, %v11977_v2  ;;  %v9150_v9 = vand.u32 65535, %v9149_v52  ;;  %v7231_v52 = vrot.slane %v17780_v29, %v11809_v28 }
0x2349   :  { %9169 = vmin.xlane.f32.xlu1 %v15609_v6 }
0x234a   :  { %v9153_v57 = vcvt.s32.f32 %v9151_v42  ;;  %v9071_v30 = vsel %vm1629_vm8, %v9033_v56, %v9070_v14  ;;  %v9152_v62 = vcvt.s32.f32 %v9150_v9  ;;  %v17783_v56 = vld [vmem:[#allocation33_spill] sm:$0xff]  ;;  %v17785_v14 = vld [vmem:[#allocation151_spill] sm:$0xff]  ;;  %v17794_v9 = vld [vmem:[#allocation154_spill] sm:$0xff] }
0x234b   :  { %v8878_v55 = vpop.permute.xlu0 %8877 }
0x234c   :  { %v9037_v49 = vrot.slane %v8878_v55, %v11977_v2  ;;  %9154 = vmin.xlane.f32.xlu0 %v9153_v57  ;;  %v17784_v55 = vld [vmem:[#allocation149_spill] sm:$0xff] }
0x234d   :  { %10783 = vmin.xlane.f32.xlu1 %v10782_v37 }
0x234e   :  { %v9072_v26 = vsel %vm1631_vm9, %v9037_v49, %v9071_v30  ;;  %v17786_v49 = vld [vmem:[#allocation192_spill] sm:$0xff] }
0x234f   :  { %v9073_v0 = vsel %vm1633_vm10, %v9041_v47, %v9072_v26  ;;  %v7267_v47 = vrot.slane %v17786_v49, %v11644_v8  ;;  %v7271_v38 = vrot.slane %v17786_v49, %v11809_v28  ;;  %v7275_v21 = vrot.slane %v17786_v49, %v11920_v34 }
0x2350   :  { %v9179_v51 = vsel %vm1434_vm4, %v9073_v0, 2147483647  ;;  %v17787_v0 = vld [vmem:[#allocation148_spill] sm:$0xff] }
0x2351   :  { %v9181_v13 = vshra.s32 %v9179_v51, 16  ;;  %v9180_v50 = vand.u32 65535, %v9179_v51 }
0x2353   :  { %v9183_v59 = vcvt.s32.f32 %v9181_v13  ;;  %v9182_v1 = vcvt.s32.f32 %v9180_v50  ;;  %v17788_v13 = vld [vmem:[#allocation153_spill] sm:$0xff] }
0x2354   :  { %v17797_v50 = vld [vmem:[#allocation161_spill] sm:$0xff] }
0x2355   :  { %9184 = vmin.xlane.f32.xlu0 %v9183_v59 }
0x23a6   :  { %v15625_v24 = vpop.xlane.xlu1 %9079 }
0x23a7   :  { %vm9081_vm15 = vcmp.eq.f32.partialorder %v15490_v54, %v15625_v24 }
0x23a8   :  { %v9082_v25 = vsel %vm9081_vm15, %v9077_v10, inf }
0x23a9   :  { %9083 = vmin.xlane.f32.xlu0 %v9082_v25  ;;  %v17789_v25 = vld [vmem:[#allocation150_spill] sm:$0xff] }
0x23b1   :  { %v15630_v11 = vpop.xlane.xlu0 %9094 }
0x23b2   :  { %vm9096_vm1 = vcmp.eq.f32.partialorder %v15515_v20, %v15630_v11  ;;  %v9137_v20 = vcvt.s32.f32 %v9135_v22  ;;  %v17792_v22 = vld [vmem:[#allocation157_spill] sm:$0xff] }
0x23b3   :  { %v9097_v7 = vsel %vm9096_vm1, %v9092_v60, inf  ;;  %v17790_v60 = vld [vmem:[#allocation155_spill] sm:$0xff] }
0x23b4   :  { %9098 = vmin.xlane.f32.xlu1 %v9097_v7 }
0x23b5   :  { %v15635_v36 = vpop.xlane.xlu0 %9109 }
0x23b6   :  { %vm9111_vm3 = vcmp.eq.f32.partialorder %v15521_v44, %v15635_v36 }
0x23b7   :  { %v9112_v54 = vsel %vm9111_vm3, %v9107_v41, inf }
0x23b8   :  { %9113 = vmin.xlane.f32.xlu0 %v9112_v54  ;;  %v17791_v54 = vld [vmem:[#allocation35_spill] sm:$0xff] }
0x23c5   :  { %v15641_v31 = vpop.xlane.xlu0 %9124 }
0x23c6   :  { %v15643_v35 = vpop.xlane.xlu1 %9139  ;;  %vm9126_vm5 = vcmp.eq.f32.partialorder %v15565_v18, %v15641_v31  ;;  %v10781_v18 = vcvt.s32.f32 %v10779_v3 }
0x23c7   :  { %v9127_v32 = vsel %vm9126_vm5, %v9122_v27, inf  ;;  %vm9141_vm2 = vcmp.eq.f32.partialorder %v15567_v12, %v15643_v35  ;;  %vm7425_vm5 = vcmp.eq.f32.partialorder %v17781_v33, %v7231_v52  ;;  %v17793_v27 = vld [vmem:[#allocation197_spill] sm:$0xff]  ;;  %v17798_v52 = vld [vmem:[#allocation158_spill] sm:$0xff] }
0x23c8   :  { %9128 = vmin.xlane.f32.xlu1 %v9127_v32  ;;  %v9142_v44 = vsel %vm9141_vm2, %v9137_v20, inf  ;;  %vm7424_vm2 = vcmp.eq.f32.partialorder %v17783_v56, %v7227_v19  ;;  %v7465_v61 = vsel %vm7425_vm5, %v12026_v17, 5  ;;  %v7291_v20 = vrot.slane %v17793_v27, %v11809_v28  ;;  %v17799_v33 = vld [vmem:[#allocation37_spill] sm:$0xff] }
0x23c9   :  { %9143 = vmin.xlane.f32.xlu0 %v9142_v44  ;;  %v7287_v3 = vrot.slane %v17793_v27, %v11644_v8  ;;  %v7279_v19 = vrot.slane %v17786_v49, %v17414_v4 }
0x23d6   :  { %v15649_v46 = vpop.xlane.xlu1 %9169 }
0x23d7   :  { %vm9171_vm1 = vcmp.eq.f32.partialorder %v15609_v6, %v15649_v46  ;;  %v17782_v6 = vld [vmem:[#allocation188_spill] sm:$0xff] }
0x23d8   :  { %v9172_v40 = vsel %vm9171_vm1, %v9167_v48, inf  ;;  %v7247_v42 = vrot.slane %v17782_v6, %v11644_v8  ;;  %v7255_v51 = vrot.slane %v17782_v6, %v11920_v34  ;;  %v7259_v5 = vrot.slane %v17782_v6, %v17414_v4 }
0x23d9   :  { %v15652_v53 = vpop.xlane.xlu0 %9154  ;;  %v7243_v48 = vrot.slane %v17780_v29, %v11925_v23 }
0x23da   :  { %v15654_v45 = vpop.xlane.xlu1 %10783  ;;  %vm9156_vm7 = vcmp.eq.f32.partialorder %v9153_v57, %v15652_v53  ;;  %v7464_v57 = vsel %vm7424_vm2, %v12026_v17, 5  ;;  %vm7431_vm5 = vcmp.eq.f32.partialorder %v17789_v25, %v7255_v51  ;;  %v17807_v25 = vld [vmem:[#allocation168_spill] sm:$0xff] }
0x23db   :  { %v9157_v39 = vsel %vm9156_vm7, %v9152_v62, inf  ;;  %vm10785_vm15 = vcmp.eq.f32.partialorder %v10782_v37, %v15654_v45  ;;  %vm7429_vm7 = vcmp.eq.f32.partialorder %v17784_v55, %v7247_v42  ;;  %v7251_v37 = vrot.slane %v17782_v6, %v11809_v28  ;;  %v17795_v62 = vld [vmem:[#allocation159_spill] sm:$0xff] }
0x23dc   :  { %9158 = vmin.xlane.f32.xlu1 %v9157_v39  ;;  %v10786_v12 = vsel %vm10785_vm15, %v10781_v18, inf  ;;  %vm7426_vm15 = vcmp.eq.f32.partialorder %v17785_v14, %v7235_v15  ;;  %v7469_v30 = vsel %vm7429_vm7, %v12026_v17, 5  ;;  %v7471_v7 = vsel %vm7431_vm5, %v12026_v17, 5  ;;  %v17801_v15 = vld [vmem:[#allocation160_spill] sm:$0xff] }
0x23dd   :  { %10787 = vmin.xlane.f32.xlu0 %v10786_v12  ;;  %v7466_v26 = vsel %vm7426_vm15, %v12026_v17, 5  ;;  %vm7430_vm1 = vcmp.eq.f32.partialorder %v17787_v0, %v7251_v37  ;;  %vm7435_vm7 = vcmp.eq.f32.partialorder %v17791_v54, %v7271_v38  ;;  %vm7436_vm15 = vcmp.eq.f32.partialorder %v17792_v22, %v7275_v21  ;;  %v17796_v12 = vld [vmem:[#allocation36_spill] sm:$0xff]  ;;  %v17805_v0 = vld [vmem:[#allocation207_spill] sm:$0xff] }
0x23de   :  { %v7470_v43 = vsel %vm7430_vm1, %v12026_v17, 5  ;;  %v7475_v32 = vsel %vm7435_vm7, %v12026_v17, 5  ;;  %v7476_v44 = vsel %vm7436_vm15, %v12026_v17, 5  ;;  %vm7432_vm1 = vcmp.eq.f32.partialorder %v17794_v9, %v7259_v5  ;;  %v17808_v21 = vld [vmem:[#allocation167_spill] sm:$0xff] }
0x23df   :  { %v7263_v18 = vrot.slane %v17782_v6, %v11925_v23  ;;  %v7472_v63 = vsel %vm7432_vm1, %v12026_v17, 5  ;;  %vm7439_vm5 = vcmp.eq.f32.partialorder %v17796_v12, %v7287_v3  ;;  %vm7428_vm7 = vcmp.eq.f32.partialorder %v17798_v52, %v7243_v48  ;;  %v17817_v52 = vld [vmem:[#allocation215_spill] sm:$0xff] }
0x23e0   :  { %v7468_v42 = vsel %vm7428_vm7, %v12026_v17, 5  ;;  %vm7437_vm1 = vcmp.eq.f32.partialorder %v17801_v15, %v7279_v19  ;;  %v7299_v55 = vrot.slane %v17793_v27, %v17414_v4  ;;  %v7327_v51 = vrot.slane %v17805_v0, %v11644_v8  ;;  %v17819_v15 = vld [vmem:[#allocation178_spill] sm:$0xff] }
0x23e1   :  { %9173 = vmin.xlane.f32.xlu0 %v9172_v40  ;;  %v7295_v40 = vrot.slane %v17793_v27, %v11920_v34  ;;  %v7477_v37 = vsel %vm7437_vm1, %v12026_v17, 5  ;;  %v7335_v54 = vrot.slane %v17805_v0, %v11920_v34  ;;  %v7339_v12 = vrot.slane %v17805_v0, %v17414_v4 }
0x23e2   :  { %v15661_v58 = vpop.xlane.xlu0 %9184  ;;  %v7367_v19 = vrot.slane %v17817_v52, %v11644_v8 }
0x23e3   :  { %vm9186_vm3 = vcmp.eq.f32.partialorder %v9183_v59, %v15661_v58  ;;  %v7239_v59 = vrot.slane %v17780_v29, %v17414_v4  ;;  %vm7441_vm15 = vcmp.eq.f32.partialorder %v17799_v33, %v7295_v40  ;;  %v17800_v29 = vld [vmem:[#allocation201_spill] sm:$0xff] }
0x23e4   :  { %v9187_v16 = vsel %vm9186_vm3, %v9182_v1, inf  ;;  %vm7434_vm3 = vcmp.eq.f32.partialorder %v17788_v13, %v7267_v47  ;;  %v7479_v1 = vsel %vm7439_vm5, %v12026_v17, 5  ;;  %v7311_v6 = vrot.slane %v17800_v29, %v11809_v28  ;;  %v17803_v47 = vld [vmem:[#allocation163_spill] sm:$0xff]  ;;  %v17815_v40 = vld [vmem:[#allocation173_spill] sm:$0xff] }
0x23e5   :  { %9188 = vmin.xlane.f32.xlu1 %v9187_v16  ;;  %v7474_v10 = vsel %vm7434_vm3, %v12026_v17, 5  ;;  %vm7427_vm2 = vcmp.eq.f32.partialorder %v17790_v60, %v7239_v59  ;;  %vm7440_vm3 = vcmp.eq.f32.partialorder %v17795_v62, %v7291_v20  ;;  %v7481_v56 = vsel %vm7441_vm15, %v12026_v17, 5 }
0x23e6   :  { %v7467_v41 = vsel %vm7427_vm2, %v12026_v17, 5  ;;  %v7480_v39 = vsel %vm7440_vm3, %v12026_v17, 5  ;;  %vm7433_vm2 = vcmp.eq.f32.partialorder %v17797_v50, %v7263_v18  ;;  %vm7449_vm15 = vcmp.eq.f32.partialorder %v17807_v25, %v7327_v51  ;;  %v17813_v18 = vld [vmem:[#allocation171_spill] sm:$0xff]  ;;  %v17824_v25 = vld [vmem:[#allocation181_spill] sm:$0xff] }
0x23e7   :  { %v7473_v16 = vsel %vm7433_vm2, %v12026_v17, 5  ;;  %v7489_v60 = vsel %vm7449_vm15, %v12026_v17, 5  ;;  %v7319_v20 = vrot.slane %v17800_v29, %v17414_v4 }
0x23f6   :  { %7508 = vperm.xlu1 %11278, %v7465_v61   ;;  %v7307_v61 = vrot.slane %v17800_v29, %v11644_v8 }
0x23f7   :  { %7505 = vperm.xlu0 %11277, %v7464_v57   ;;  %v17802_v57 = vld [vmem:[#allocation164_spill] sm:$0xff] }
0x23f8   :  { %vm7445_vm3 = vcmp.eq.f32.partialorder %v17802_v57, %v7311_v6  ;;  %vm7444_vm5 = vcmp.eq.f32.partialorder %v17803_v47, %v7307_v61  ;;  %v7375_v47 = vrot.slane %v17817_v52, %v11920_v34 }
0x23f9   :  { %v7485_v14 = vsel %vm7445_vm3, %v12026_v17, 5  ;;  %v7484_v13 = vsel %vm7444_vm5, %v12026_v17, 5 }
0x23fa   :  { %7520 = vperm.xlu1 %11278, %v7469_v30   ;;  %v7283_v30 = vrot.slane %v17786_v49, %v11925_v23  ;;  %v7303_v49 = vrot.slane %v17793_v27, %v11925_v23  ;;  %v17810_v27 = vld [vmem:[#allocation169_spill] sm:$0xff] }
0x23fb   :  { %7511 = vperm.xlu0 %11277, %v7466_v26   ;;  %v17804_v26 = vld [vmem:[#allocation38_spill] sm:$0xff] }
0x23fc   :  { %vm7442_vm2 = vcmp.eq.f32.partialorder %v17804_v26, %v7299_v55  ;;  %v17820_v55 = vld [vmem:[#allocation177_spill] sm:$0xff] }
0x23fd   :  { %v7482_v59 = vsel %vm7442_vm2, %v12026_v17, 5 }
0x23fe   :  { %7523 = vperm.xlu1 %11278, %v7470_v43   ;;  %v17806_v43 = vld [vmem:[#allocation165_spill] sm:$0xff] }
0x23ff   :  { %7535 = vperm.xlu0 %11277, %v7474_v10   ;;  %vm7438_vm7 = vcmp.eq.f32.partialorder %v17806_v43, %v7283_v30  ;;  %v7315_v10 = vrot.slane %v17800_v29, %v11920_v34 }
0x2400   :  { %v7478_v38 = vsel %vm7438_vm7, %v12026_v17, 5  ;;  %vm7447_vm7 = vcmp.eq.f32.partialorder %v17813_v18, %v7319_v20  ;;  %v9131_v18 = vcvt.f32.s32 %v15641_v31 }
0x2401   :  { %vm7446_vm1 = vcmp.eq.f32.partialorder %v17808_v21, %v7315_v10  ;;  %v7487_v48 = vsel %vm7447_vm7, %v12026_v17, 5 }
0x2402   :  { %7526 = vperm.xlu1 %11278, %v7471_v7   ;;  %v7331_v7 = vrot.slane %v17805_v0, %v11809_v28  ;;  %v7486_v5 = vsel %vm7446_vm1, %v12026_v17, 5 }
0x2403   :  { %7514 = vperm.xlu0 %11277, %v7467_v41   ;;  %v17809_v41 = vld [vmem:[#allocation39_spill] sm:$0xff] }
0x2404   :  { %vm7443_vm3 = vcmp.eq.f32.partialorder %v17809_v41, %v7303_v49  ;;  %vm7450_vm5 = vcmp.eq.f32.partialorder %v17810_v27, %v7331_v7  ;;  %v17826_v7 = vld [vmem:[#allocation183_spill] sm:$0xff]  ;;  %v7383_v41 = vrot.slane %v17817_v52, %v11925_v23 }
0x2405   :  { %v7483_v22 = vsel %vm7443_vm3, %v12026_v17, 5  ;;  %v7490_v3 = vsel %vm7450_vm5, %v12026_v17, 5 }
0x2406   :  { %7538 = vperm.xlu1 %11278, %v7475_v32   ;;  %v17811_v32 = vld [vmem:[#allocation172_spill] sm:$0xff] }
0x2407   :  { %7541 = vperm.xlu0 %11277, %v7476_v44   ;;  %vm7451_vm2 = vcmp.eq.f32.partialorder %v17811_v32, %v7335_v54  ;;  %v17812_v44 = vld [vmem:[#allocation211_spill] sm:$0xff] }
0x2408   :  { %v7351_v9 = vrot.slane %v17812_v44, %v11809_v28  ;;  %v7491_v62 = vsel %vm7451_vm2, %v12026_v17, 5  ;;  %vm7459_vm2 = vcmp.eq.f32.partialorder %v17819_v15, %v7367_v19  ;;  %v7359_v51 = vrot.slane %v17812_v44, %v17414_v4 }
0x2409   :  { %v7499_v57 = vsel %vm7459_vm2, %v12026_v17, 5  ;;  %v7363_v49 = vrot.slane %v17812_v44, %v11925_v23 }
0x240a   :  { %7529 = vperm.xlu1 %11278, %v7472_v63   ;;  %v7347_v63 = vrot.slane %v17812_v44, %v11644_v8 }
0x240b   :  { %7553 = vperm.xlu0 %11277, %v7480_v39   ;;  %v17814_v39 = vld [vmem:[#allocation174_spill] sm:$0xff] }
0x240c   :  { %vm7455_vm15 = vcmp.eq.f32.partialorder %v17814_v39, %v7351_v9  ;;  %vm7454_vm1 = vcmp.eq.f32.partialorder %v17815_v40, %v7347_v63  ;;  %v9116_v9 = vcvt.f32.s32 %v15635_v36  ;;  %v10790_v39 = vcvt.f32.s32 %v15654_v45 }
0x240d   :  { %v7495_v50 = vsel %vm7455_vm15, %v12026_v17, 5  ;;  %v7494_v33 = vsel %vm7454_vm1, %v12026_v17, 5  ;;  %v9161_v36 = vcvt.f32.s32 %v15652_v53  ;;  %v9191_v53 = vcvt.f32.s32 %v15661_v58 }
0x240e   :  { %7550 = vperm.xlu1 %11278, %v7479_v1   ;;  %v7323_v1 = vrot.slane %v17800_v29, %v11925_v23  ;;  %v7343_v29 = vrot.slane %v17805_v0, %v11925_v23  ;;  %v17822_v0 = vld [vmem:[#allocation179_spill] sm:$0xff]  ;;  %v10791_v31 = vshll.u32 %v10790_v39, 16 }
0x240f   :  { %7532 = vperm.xlu0 %11277, %v7473_v16   ;;  %v17816_v16 = vld [vmem:[#allocation40_spill] sm:$0xff] }
0x2410   :  { %vm7452_vm3 = vcmp.eq.f32.partialorder %v17816_v16, %v7339_v12  ;;  %v9117_v16 = vshll.u32 %v9116_v9, 16 }
0x2411   :  { %v7492_v6 = vsel %vm7452_vm3, %v12026_v17, 5 }
0x2412   :  { %7517 = vperm.xlu1 %11278, %v7468_v42   ;;  %v17818_v42 = vld [vmem:[#allocation175_spill] sm:$0xff] }
0x2413   :  { %7556 = vperm.xlu0 %11277, %v7481_v56   ;;  %vm7448_vm5 = vcmp.eq.f32.partialorder %v17818_v42, %v7323_v1  ;;  %v7355_v56 = vrot.slane %v17812_v44, %v11920_v34  ;;  %v9101_v44 = vcvt.f32.s32 %v15630_v11  ;;  %v9132_v11 = vshll.u32 %v9131_v18, 16 }
0x2414   :  { %v7488_v61 = vsel %vm7448_vm5, %v12026_v17, 5  ;;  %vm7457_vm5 = vcmp.eq.f32.partialorder %v17824_v25, %v7359_v51 }
0x2415   :  { %vm7456_vm7 = vcmp.eq.f32.partialorder %v17820_v55, %v7355_v56 }
0x2416   :  { %7544 = vperm.xlu1 %11278, %v7477_v37   ;;  %v7371_v37 = vrot.slane %v17817_v52, %v11809_v28  ;;  %v7496_v30 = vsel %vm7456_vm7, %v12026_v17, 5  ;;  %vm7458_vm7 = vcmp.eq.f32.partialorder %v17826_v7, %v7363_v49 }
0x2417   :  { %7568 = vperm.xlu0 %11277, %v7485_v14   ;;  %v17821_v14 = vld [vmem:[#allocation180_spill] sm:$0xff]  ;;  %v7498_v54 = vsel %vm7458_vm7, %v12026_v17, 5 }
0x2418   :  { %vm7453_vm15 = vcmp.eq.f32.partialorder %v17821_v14, %v7343_v29  ;;  %vm7460_vm1 = vcmp.eq.f32.partialorder %v17822_v0, %v7371_v37  ;;  %v9162_v37 = vshll.u32 %v9161_v36, 16 }
0x2419   :  { %v7493_v26 = vsel %vm7453_vm15, %v12026_v17, 5  ;;  %v7500_v43 = vsel %vm7460_vm1, %v12026_v17, 5 }
0x241a   :  { %7565 = vperm.xlu1 %11278, %v7484_v13   ;;  %v17823_v13 = vld [vmem:[#allocation182_spill] sm:$0xff] }
0x241b   :  { %7559 = vperm.xlu0 %11277, %v7482_v59   ;;  %vm7461_vm3 = vcmp.eq.f32.partialorder %v17823_v13, %v7375_v47  ;;  %v7379_v59 = vrot.slane %v17817_v52, %v17414_v4  ;;  %v9146_v52 = vcvt.f32.s32 %v15643_v35 }
0x241c   :  { %v7501_v10 = vsel %vm7461_vm3, %v12026_v17, 5 }
0x241d   :  { %v9147_v55 = vshll.u32 %v9146_v52, 16 }
0x241e   :  { %7547 = vperm.xlu1 %11278, %v7478_v38   ;;  %v17825_v38 = vld [vmem:[#allocation184_spill] sm:$0xff] }
0x241f   :  { %7580 = vperm.xlu0 %11277, %v7489_v60   ;;  %vm7462_vm2 = vcmp.eq.f32.partialorder %v17825_v38, %v7379_v59  ;;  %v7497_v60 = vsel %vm7457_vm5, %v12026_v17, 5  ;;  %v9192_v38 = vshll.u32 %v9191_v53, 16 }
0x2420   :  { %v7502_v21 = vsel %vm7462_vm2, %v12026_v17, 5 }
0x2422   :  { %7571 = vperm.xlu1 %11278, %v7486_v5   ;;  %v17827_v5 = vld [vmem:[#allocation185_spill] sm:$0xff] }
0x2423   :  { %7562 = vperm.xlu0 %11277, %v7483_v22   ;;  %vm7463_vm15 = vcmp.eq.f32.partialorder %v17827_v5, %v7383_v41 }
0x2424   :  { %v7503_v22 = vsel %vm7463_vm15, %v12026_v17, 5 }
0x2426   :  { %7583 = vperm.xlu1 %11278, %v7490_v3  }
0x2427   :  { %7586 = vperm.xlu0 %11277, %v7491_v62   ;;  %v9086_v62 = vcvt.f32.s32 %v15625_v24  ;;  %v9176_v24 = vcvt.f32.s32 %v15649_v46 }
0x2429   :  { %v9087_v19 = vshll.u32 %v9086_v62, 16  ;;  %v9177_v47 = vshll.u32 %v9176_v24, 16 }
0x242a   :  { %7574 = vperm.xlu1 %11278, %v7487_v48  }
0x242b   :  { %7598 = vperm.xlu0 %11277, %v7495_v50   ;;  %v9102_v50 = vshll.u32 %v9101_v44, 16 }
0x242e   :  { %7595 = vperm.xlu1 %11278, %v7494_v33  }
0x242f   :  { %7589 = vperm.xlu0 %11277, %v7492_v6  }
0x2432   :  { %7577 = vperm.xlu1 %11278, %v7488_v61  }
0x2433   :  { %7610 = vperm.xlu0 %11277, %v7499_v57  }
0x2436   :  { %7601 = vperm.xlu1 %11278, %v7496_v30   ;;  %v9084_v27 = vpop.xlane.xlu0 %9083 }
0x2437   :  { %7592 = vperm.xlu0 %11277, %v7493_v26   ;;  %v9085_v40 = vcvt.f32.s32 %v9084_v27 }
0x2439   :  { %v9088_v15 = vadd.s32 %v9087_v19, %v9085_v40 }
0x243a   :  { %7613 = vperm.xlu1 %11278, %v7500_v43  }
0x243b   :  { %7616 = vperm.xlu0 %11277, %v7501_v10   ;;  %v9197_v0 = vrot.slane %v9088_v15, %v11977_v2 }
0x243e   :  { %7604 = vperm.xlu1 %11278, %v7497_v60  }
0x243f   :  { %7619 = vperm.xlu0 %11277, %v7502_v21  }
0x2441   :  { %v9099_v20 = vpop.xlane.xlu1 %9098 }
0x2442   :  { %7607 = vperm.xlu1 %11278, %v7498_v54   ;;  %v9100_v63 = vcvt.f32.s32 %v9099_v20 }
0x2444   :  { %v9103_v33 = vadd.s32 %v9102_v50, %v9100_v63 }
0x2445   :  { %v9114_v32 = vpop.xlane.xlu0 %9113 }
0x2446   :  { %7622 = vperm.xlu1 %11278, %v7503_v22   ;;  %v9115_v12 = vcvt.f32.s32 %v9114_v32  ;;  %v9201_v35 = vrot.slane %v9103_v33, %v11977_v2 }
0x2448   :  { %v9118_v42 = vadd.s32 %v9117_v16, %v9115_v12  ;;  %v9226_v43 = vsel %vm1627_vm0, %v9201_v35, %v9197_v0 }
0x244a   :  { %v9205_v30 = vrot.slane %v9118_v42, %v11977_v2 }
0x244c   :  { %v9227_v58 = vsel %vm1629_vm8, %v9205_v30, %v9226_v43 }
0x2455   :  { %v9129_v3 = vpop.xlane.xlu1 %9128 }
0x2456   :  { %v9144_v48 = vpop.xlane.xlu0 %9143  ;;  %v9130_v1 = vcvt.f32.s32 %v9129_v3 }
0x2457   :  { %v9145_v56 = vcvt.f32.s32 %v9144_v48 }
0x2458   :  { %v9133_v29 = vadd.s32 %v9132_v11, %v9130_v1 }
0x2459   :  { %v9148_v46 = vadd.s32 %v9147_v55, %v9145_v56 }
0x245a   :  { %v9209_v51 = vrot.slane %v9133_v29, %v11977_v2 }
0x245b   :  { %v9213_v25 = vrot.slane %v9148_v46, %v11977_v2 }
0x245c   :  { %v9228_v60 = vsel %vm1631_vm9, %v9209_v51, %v9227_v58 }
0x245d   :  { %v9229_v5 = vsel %vm1633_vm10, %v9213_v25, %v9228_v60 }
0x2469   :  { %v9159_v6 = vpop.xlane.xlu1 %9158 }
0x246a   :  { %v10788_v45 = vpop.xlane.xlu0 %10787  ;;  %v9160_v61 = vcvt.f32.s32 %v9159_v6 }
0x246b   :  { %v10789_v57 = vcvt.f32.s32 %v10788_v45 }
0x246c   :  { %v9163_v13 = vadd.s32 %v9162_v37, %v9160_v61 }
0x246d   :  { %v15833_v14 = vadd.s32 %v10791_v31, %v10789_v57 }
0x246e   :  { %v9174_v26 = vpop.xlane.xlu0 %9173  ;;  %v9217_v21 = vrot.slane %v9163_v13, %v11977_v2 }
0x246f   :  { %10795 = vst.msk [vmem:[%s17008_s11 + $0x38] sm:$0xff] %vm10793_vm6, %v15833_v14  ;;  %v9175_v59 = vcvt.f32.s32 %v9174_v26 }
0x2470   :  { %v9230_v20 = vsel %vm1635_vm11, %v9217_v21, %v9229_v5 }
0x2471   :  { %v9178_v10 = vadd.s32 %v9177_v47, %v9175_v59 }
0x2472   :  { %v9189_v49 = vpop.xlane.xlu1 %9188 }
0x2473   :  { %v9190_v7 = vcvt.f32.s32 %v9189_v49  ;;  %v9221_v41 = vrot.slane %v9178_v10, %v11977_v2 }
0x2475   :  { %v9193_v54 = vadd.s32 %v9192_v38, %v9190_v7  ;;  %v9231_v44 = vsel %vm1637_vm12, %v9221_v41, %v9230_v20 }
0x2476   :  { %v7509_v22 = vpop.permute.xlu1 %7508  ;;  %v7506_v27 = vpop.permute.xlu0 %7505 }
0x2477   :  { %v9225_v32 = vrot.slane %v9193_v54, %v11977_v2  ;;  %v7631_v36 = vrot.slane %v7509_v22, %v11977_v2  ;;  %v7627_v33 = vrot.slane %v7506_v27, %v11977_v2 }
0x2479   :  { %v9232_v9 = vsel %vm1639_vm13, %v9225_v32, %v9231_v44  ;;  %v7784_v57 = vsel %vm1627_vm0, %v7631_v36, %v7627_v33 }
0x247a   :  { %9233 = vst.msk [vmem:[#allocation5 + $0x30] sm:$0xff] %vm1315_vm14, %v9232_v9  ;;  %v7521_v3 = vpop.permute.xlu1 %7520  ;;  %v7512_v62 = vpop.permute.xlu0 %7511 }
0x247b   :  { %v7647_v19 = vrot.slane %v7521_v3, %v11977_v2  ;;  %v7635_v42 = vrot.slane %v7512_v62, %v11977_v2 }
0x247d   :  { %v7785_v47 = vsel %vm1629_vm8, %v7635_v42, %v7784_v57 }
0x247e   :  { %v7524_v18 = vpop.permute.xlu1 %7523  ;;  %v7536_v63 = vpop.permute.xlu0 %7535 }
0x247f   :  { %v7651_v40 = vrot.slane %v7524_v18, %v11977_v2  ;;  %v7667_v25 = vrot.slane %v7536_v63, %v11977_v2 }
0x2481   :  { %v7788_v6 = vsel %vm1627_vm0, %v7651_v40, %v7647_v19 }
0x2482   :  { %v7527_v39 = vpop.permute.xlu1 %7526  ;;  %v7515_v12 = vpop.permute.xlu0 %7514 }
0x2483   :  { %v7655_v52 = vrot.slane %v7527_v39, %v11977_v2  ;;  %v7639_v15 = vrot.slane %v7515_v12, %v11977_v2 }
0x2485   :  { %v7789_v56 = vsel %vm1629_vm8, %v7655_v52, %v7788_v6  ;;  %v7786_v46 = vsel %vm1631_vm9, %v7639_v15, %v7785_v47  ;;  %v17828_v15 = vld [vmem:[#allocation6_spill] sm:$0xff] }
0x2486   :  { %v7539_v48 = vpop.permute.xlu1 %7538  ;;  %v7542_v50 = vpop.permute.xlu0 %7541  ;;  %vm10797_vm1 = vcmp.eq.s32.totalorder %v17828_v15, %v15833_v14 }
0x2487   :  { %v7671_v10 = vrot.slane %v7539_v48, %v11977_v2  ;;  %v7675_v60 = vrot.slane %v7542_v50, %v11977_v2 }
0x2489   :  { %v7792_v21 = vsel %vm1627_vm0, %v7671_v10, %v7667_v25 }
0x248a   :  { %v7530_v1 = vpop.permute.xlu1 %7529  ;;  %v7554_v16 = vpop.permute.xlu0 %7553  ;;  %v7793_v22 = vsel %vm1629_vm8, %v7675_v60, %v7792_v21 }
0x248b   :  { %v7659_v11 = vrot.slane %v7530_v1, %v11977_v2  ;;  %v7691_v32 = vrot.slane %v7554_v16, %v11977_v2 }
0x248d   :  { %v7790_v29 = vsel %vm1631_vm9, %v7659_v11, %v7789_v56 }
0x248e   :  { %v7551_v24 = vpop.permute.xlu1 %7550  ;;  %v7533_v31 = vpop.permute.xlu0 %7532 }
0x248f   :  { %v7663_v45 = vrot.slane %v7533_v31, %v11977_v2  ;;  %v7687_v41 = vrot.slane %v7551_v24, %v11977_v2 }
0x2491   :  { %v7791_v61 = vsel %vm1633_vm10, %v7663_v45, %v7790_v29  ;;  %v7796_v62 = vsel %vm1627_vm0, %v7691_v32, %v7687_v41 }
0x2492   :  { %v7518_v55 = vpop.permute.xlu1 %7517  ;;  %v7557_v37 = vpop.permute.xlu0 %7556  ;;  %v15871_v35 = vsel %vm1434_vm4, %v7791_v61, 2147483647 }
0x2493   :  { %v7643_v53 = vrot.slane %v7518_v55, %v11977_v2  ;;  %v7833_v30 = vshra.s32 %v15871_v35, 16  ;;  %v7695_v27 = vrot.slane %v7557_v37, %v11977_v2 }
0x2495   :  { %v7787_v26 = vsel %vm1633_vm10, %v7643_v53, %v7786_v46  ;;  %v15878_v0 = vcvt.s32.f32 %v7833_v30  ;;  %v7797_v12 = vsel %vm1629_vm8, %v7695_v27, %v7796_v62  ;;  %v10796_v30 = vld [vmem:[#allocation5 + $0x38] sm:$0xff] }
0x2496   :  { %v7545_v51 = vpop.permute.xlu1 %7544  ;;  %v7569_v13 = vpop.permute.xlu0 %7568  ;;  %v15881_v59 = vsel %vm1434_vm4, %v7787_v26, 2147483647  ;;  %v10798_v14 = vsel %vm10797_vm1, %v10796_v30, 5 }
0x2497   :  { %7836 = vmin.xlane.f32.xlu0 %v15878_v0  ;;  %v7818_v43 = vshra.s32 %v15881_v59, 16  ;;  %v7679_v7 = vrot.slane %v7545_v51, %v11977_v2  ;;  %v7711_v29 = vrot.slane %v7569_v13, %v11977_v2  ;;  %v15940_v21 = vsel %vm1315_vm14, %v10798_v14, 2147483647 }
0x2499   :  { %v15886_v58 = vcvt.s32.f32 %v7818_v43  ;;  %v7794_v44 = vsel %vm1631_vm9, %v7679_v7, %v7793_v22 }
0x249a   :  { %v7566_v49 = vpop.permute.xlu1 %7565  ;;  %v7560_v38 = vpop.permute.xlu0 %7559 }
0x249b   :  { %7821 = vmin.xlane.f32.xlu1 %v15886_v58  ;;  %v7699_v9 = vrot.slane %v7560_v38, %v11977_v2  ;;  %v7707_v31 = vrot.slane %v7566_v49, %v11977_v2 }
0x249d   :  { %v7798_v40 = vsel %vm1631_vm9, %v7699_v9, %v7797_v12  ;;  %v7800_v55 = vsel %vm1627_vm0, %v7711_v29, %v7707_v31 }
0x249e   :  { %v7548_v54 = vpop.permute.xlu1 %7547  ;;  %v7581_v5 = vpop.permute.xlu0 %7580 }
0x249f   :  { %v7683_v20 = vrot.slane %v7548_v54, %v11977_v2  ;;  %v7727_v37 = vrot.slane %v7581_v5, %v11977_v2 }
0x24a1   :  { %v7795_v3 = vsel %vm1633_vm10, %v7683_v20, %v7794_v44  ;;  %v10801_v20 = vshra.s32 %v15940_v21, 16 }
0x24a2   :  { %v7572_v18 = vpop.permute.xlu1 %7571  ;;  %v7563_v63 = vpop.permute.xlu0 %7562  ;;  %v15903_v39 = vsel %vm1434_vm4, %v7795_v3, 2147483647 }
0x24a3   :  { %v7703_v48 = vrot.slane %v7563_v63, %v11977_v2  ;;  %v7848_v50 = vshra.s32 %v15903_v39, 16  ;;  %v7715_v45 = vrot.slane %v7572_v18, %v11977_v2  ;;  %v15955_v62 = vcvt.s32.f32 %v10801_v20 }
0x24a5   :  { %v7799_v1 = vsel %vm1633_vm10, %v7703_v48, %v7798_v40  ;;  %v15910_v16 = vcvt.s32.f32 %v7848_v50  ;;  %v7801_v46 = vsel %vm1629_vm8, %v7715_v45, %v7800_v55 }
0x24a6   :  { %v7584_v52 = vpop.permute.xlu1 %7583  ;;  %v7587_v19 = vpop.permute.xlu0 %7586  ;;  %v15913_v11 = vsel %vm1434_vm4, %v7799_v1, 2147483647 }
0x24a7   :  { %7851 = vmin.xlane.f32.xlu0 %v15910_v16  ;;  %v7863_v36 = vshra.s32 %v15913_v11, 16  ;;  %v7731_v61 = vrot.slane %v7584_v52, %v11977_v2  ;;  %v7735_v26 = vrot.slane %v7587_v19, %v11977_v2 }
0x24a9   :  { %v15917_v33 = vcvt.s32.f32 %v7863_v36  ;;  %v7804_v13 = vsel %vm1627_vm0, %v7731_v61, %v7727_v37 }
0x24aa   :  { %v7575_v6 = vpop.permute.xlu1 %7574  ;;  %v7599_v24 = vpop.permute.xlu0 %7598  ;;  %v7805_v7 = vsel %vm1629_vm8, %v7735_v26, %v7804_v13 }
0x24ab   :  { %7866 = vmin.xlane.f32.xlu0 %v15917_v33  ;;  %v7719_v57 = vrot.slane %v7575_v6, %v11977_v2  ;;  %v7751_v50 = vrot.slane %v7599_v24, %v11977_v2 }
0x24ad   :  { %v7802_v43 = vsel %vm1631_vm9, %v7719_v57, %v7801_v46 }
0x24ae   :  { %v7596_v42 = vpop.permute.xlu1 %7595  ;;  %v7590_v56 = vpop.permute.xlu0 %7589 }
0x24af   :  { %v7739_v10 = vrot.slane %v7590_v56, %v11977_v2  ;;  %v7747_v63 = vrot.slane %v7596_v42, %v11977_v2 }
0x24b1   :  { %v7806_v5 = vsel %vm1631_vm9, %v7739_v10, %v7805_v7  ;;  %v7808_v19 = vsel %vm1627_vm0, %v7751_v50, %v7747_v63 }
0x24b2   :  { %v7578_v47 = vpop.permute.xlu1 %7577  ;;  %v7611_v53 = vpop.permute.xlu0 %7610 }
0x24b3   :  { %v7723_v51 = vrot.slane %v7578_v47, %v11977_v2  ;;  %v7767_v36 = vrot.slane %v7611_v53, %v11977_v2 }
0x24b5   :  { %v7803_v25 = vsel %vm1633_vm10, %v7723_v51, %v7802_v43  ;;  %v7832_v43 = vand.u32 65535, %v15871_v35  ;;  %v7847_v35 = vand.u32 65535, %v15903_v39  ;;  %v10800_v39 = vand.u32 65535, %v15940_v21 }
0x24b6   :  { %v7602_v49 = vpop.permute.xlu1 %7601  ;;  %v7593_v38 = vpop.permute.xlu0 %7592  ;;  %v15937_v60 = vsel %vm1434_vm4, %v7803_v25, 2147483647 }
0x24b7   :  { %v7743_v41 = vrot.slane %v7593_v38, %v11977_v2  ;;  %v7878_v54 = vshra.s32 %v15937_v60, 16  ;;  %v7755_v48 = vrot.slane %v7602_v49, %v11977_v2  ;;  %v7834_v25 = vcvt.s32.f32 %v7832_v43 }
0x24b8   :  { %v7817_v49 = vand.u32 65535, %v15881_v59  ;;  %v7862_v59 = vand.u32 65535, %v15913_v11 }
0x24b9   :  { %v7807_v22 = vsel %vm1633_vm10, %v7743_v41, %v7806_v5  ;;  %v15947_v27 = vcvt.s32.f32 %v7878_v54  ;;  %v7809_v31 = vsel %vm1629_vm8, %v7755_v48, %v7808_v19  ;;  %v7877_v48 = vand.u32 65535, %v15937_v60 }
0x24ba   :  { %v7614_v32 = vpop.permute.xlu1 %7613  ;;  %v15951_v44 = vsel %vm1434_vm4, %v7807_v22, 2147483647  ;;  %v7617_v9 = vpop.permute.xlu0 %7616  ;;  %v7819_v41 = vcvt.s32.f32 %v7817_v49  ;;  %v7849_v22 = vcvt.s32.f32 %v7847_v35 }
0x24bb   :  { %7881 = vmin.xlane.f32.xlu1 %v15947_v27  ;;  %v7893_v3 = vshra.s32 %v15951_v44, 16  ;;  %v7771_v40 = vrot.slane %v7614_v32, %v11977_v2  ;;  %v7775_v42 = vrot.slane %v7617_v9, %v11977_v2  ;;  %v7864_v32 = vcvt.s32.f32 %v7862_v59 }
0x24bc   :  { %v7879_v21 = vcvt.s32.f32 %v7877_v48  ;;  %v17843_v48 = vld [vmem:[#allocation109_spill] sm:$0xff] }
0x24bd   :  { %v15957_v18 = vcvt.s32.f32 %v7893_v3  ;;  %v7812_v45 = vsel %vm1627_vm0, %v7771_v40, %v7767_v36  ;;  %v7892_v3 = vand.u32 65535, %v15951_v44 }
0x24be   :  { %v7605_v12 = vpop.permute.xlu1 %7604  ;;  %v7620_v52 = vpop.permute.xlu0 %7619  ;;  %v7813_v37 = vsel %vm1629_vm8, %v7775_v42, %v7812_v45  ;;  %v17830_v42 = vld [vmem:[#allocation26_spill] sm:$0xff] }
0x24bf   :  { %10804 = vmin.xlane.f32.xlu1 %v15955_v62  ;;  %7896 = vmin.xlane.f32.xlu0 %v15957_v18  ;;  %v7759_v1 = vrot.slane %v7605_v12, %v11977_v2  ;;  %v7779_v29 = vrot.slane %v7620_v52, %v11977_v2  ;;  %v7894_v12 = vcvt.s32.f32 %v7892_v3 }
0x24c1   :  { %v7810_v24 = vsel %vm1631_vm9, %v7759_v1, %v7809_v31  ;;  %v7814_v30 = vsel %vm1631_vm9, %v7779_v29, %v7813_v37 }
0x24c2   :  { %v7608_v6 = vpop.permute.xlu1 %7607 }
0x24c3   :  { %v7763_v56 = vrot.slane %v7608_v6, %v11977_v2 }
0x24c5   :  { %v7811_v61 = vsel %vm1633_vm10, %v7763_v56, %v7810_v24  ;;  %v17831_v56 = vld [vmem:[#allocation147_spill] sm:$0xff]  ;;  %v17832_v24 = vld [vmem:[#allocation102_spill] sm:$0xff] }
0x24c6   :  { %v7623_v57 = vpop.permute.xlu1 %7622  ;;  %v7906_v55 = vsel %vm1434_vm4, %v7811_v61, 2147483647  ;;  %v5989_v45 = vrot.slane %v17831_v56, %v11644_v8  ;;  %v5993_v37 = vrot.slane %v17831_v56, %v11809_v28 }
0x24c7   :  { %v7783_v47 = vrot.slane %v7623_v57, %v11977_v2  ;;  %v7908_v53 = vshra.s32 %v7906_v55, 16  ;;  %v7907_v40 = vand.u32 65535, %v7906_v55  ;;  %v17833_v55 = vld [vmem:[#allocation104_spill] sm:$0xff] }
0x24c9   :  { %v7815_v46 = vsel %vm1633_vm10, %v7783_v47, %v7814_v30  ;;  %v7910_v26 = vcvt.s32.f32 %v7908_v53  ;;  %v7909_v60 = vcvt.s32.f32 %v7907_v40  ;;  %v17834_v47 = vld [vmem:[#allocation106_spill] sm:$0xff]  ;;  %v17835_v53 = vld [vmem:[#allocation152_spill] sm:$0xff] }
0x24ca   :  { %v7921_v51 = vsel %vm1434_vm4, %v7815_v46, 2147483647  ;;  %v6009_v30 = vrot.slane %v17835_v53, %v11644_v8  ;;  %v6017_v35 = vrot.slane %v17835_v53, %v11920_v34 }
0x24cb   :  { %7911 = vmin.xlane.f32.xlu1 %v7910_v26  ;;  %v7923_v14 = vshra.s32 %v7921_v51, 16  ;;  %v7922_v52 = vand.u32 65535, %v7921_v51  ;;  %v17836_v51 = vld [vmem:[#allocation25_spill] sm:$0xff] }
0x24cd   :  { %v7925_v13 = vcvt.s32.f32 %v7923_v14  ;;  %v7924_v19 = vcvt.s32.f32 %v7922_v52  ;;  %v5997_v14 = vrot.slane %v17831_v56, %v11920_v34 }
0x24cf   :  { %7926 = vmin.xlane.f32.xlu0 %v7925_v13 }
0x2524   :  { %v15982_v10 = vpop.xlane.xlu0 %7836 }
0x2525   :  { %vm7838_vm3 = vcmp.eq.f32.partialorder %v15878_v0, %v15982_v10 }
0x2526   :  { %v7839_v38 = vsel %vm7838_vm3, %v7834_v25, inf }
0x2527   :  { %7840 = vmin.xlane.f32.xlu1 %v7839_v38  ;;  %v17838_v38 = vld [vmem:[#allocation27_spill] sm:$0xff] }
0x2528   :  { %v15987_v7 = vpop.xlane.xlu1 %7821 }
0x2529   :  { %vm7823_vm5 = vcmp.eq.f32.partialorder %v15886_v58, %v15987_v7 }
0x252a   :  { %v7824_v54 = vsel %vm7823_vm5, %v7819_v41, inf  ;;  %v6013_v41 = vrot.slane %v17835_v53, %v11809_v28 }
0x252b   :  { %7825 = vmin.xlane.f32.xlu0 %v7824_v54  ;;  %v17839_v54 = vld [vmem:[#allocation110_spill] sm:$0xff] }
0x2534   :  { %v15992_v5 = vpop.xlane.xlu0 %7851 }
0x2535   :  { %vm7853_vm2 = vcmp.eq.f32.partialorder %v15910_v16, %v15992_v5  ;;  %v10802_v16 = vcvt.s32.f32 %v10800_v39  ;;  %v17842_v39 = vld [vmem:[#allocation156_spill] sm:$0xff] }
0x2536   :  { %v7854_v0 = vsel %vm7853_vm2, %v7849_v22, inf  ;;  %v6033_v3 = vrot.slane %v17842_v39, %v11809_v28 }
0x2537   :  { %7855 = vmin.xlane.f32.xlu0 %v7854_v0  ;;  %v17840_v0 = vld [vmem:[#allocation107_spill] sm:$0xff] }
0x2538   :  { %v15997_v20 = vpop.xlane.xlu0 %7866 }
0x2539   :  { %vm7868_vm7 = vcmp.eq.f32.partialorder %v15917_v33, %v15997_v20 }
0x253a   :  { %v7869_v58 = vsel %vm7868_vm7, %v7864_v32, inf  ;;  %v6001_v32 = vrot.slane %v17831_v56, %v17414_v4 }
0x253b   :  { %7870 = vmin.xlane.f32.xlu1 %v7869_v58  ;;  %v17841_v58 = vld [vmem:[#allocation111_spill] sm:$0xff] }
0x2548   :  { %v16001_v9 = vpop.xlane.xlu1 %7881 }
0x2549   :  { %vm7883_vm3 = vcmp.eq.f32.partialorder %v15947_v27, %v16001_v9  ;;  %v17829_v27 = vld [vmem:[#allocation146_spill] sm:$0xff] }
0x254a   :  { %v7884_v44 = vsel %vm7883_vm3, %v7879_v21, inf  ;;  %v5973_v6 = vrot.slane %v17829_v27, %v11809_v28  ;;  %v5969_v31 = vrot.slane %v17829_v27, %v11644_v8  ;;  %v5977_v29 = vrot.slane %v17829_v27, %v11920_v34 }
0x254b   :  { %v5981_v43 = vrot.slane %v17829_v27, %v17414_v4  ;;  %v6005_v21 = vrot.slane %v17831_v56, %v11925_v23  ;;  %v5985_v52 = vrot.slane %v17829_v27, %v11925_v23  ;;  %v17848_v56 = vld [vmem:[#allocation117_spill] sm:$0xff]  ;;  %v17849_v27 = vld [vmem:[#allocation162_spill] sm:$0xff] }
0x254c   :  { %v16005_v11 = vpop.xlane.xlu1 %10804  ;;  %v16007_v63 = vpop.xlane.xlu0 %7896  ;;  %vm6167_vm7 = vcmp.eq.f32.partialorder %v17830_v42, %v5973_v6  ;;  %vm6168_vm3 = vcmp.eq.f32.partialorder %v17834_v47, %v5977_v29  ;;  %v6021_v42 = vrot.slane %v17835_v53, %v17414_v4 }
0x254d   :  { %vm10806_vm15 = vcmp.eq.f32.partialorder %v15955_v62, %v16005_v11  ;;  %vm7898_vm1 = vcmp.eq.f32.partialorder %v15957_v18, %v16007_v63  ;;  %v6207_v61 = vsel %vm6167_vm7, %v12026_v17, 5  ;;  %vm6173_vm7 = vcmp.eq.f32.partialorder %v17838_v38, %v5997_v14  ;;  %v17854_v14 = vld [vmem:[#allocation166_spill] sm:$0xff] }
0x254e   :  { %v10807_v33 = vsel %vm10806_vm15, %v10802_v16, inf  ;;  %v7899_v50 = vsel %vm7898_vm1, %v7894_v12, inf  ;;  %vm6166_vm15 = vcmp.eq.f32.partialorder %v17832_v24, %v5969_v31  ;;  %vm6171_vm1 = vcmp.eq.f32.partialorder %v17833_v55, %v5989_v45  ;;  %v17847_v31 = vld [vmem:[#allocation114_spill] sm:$0xff] }
0x254f   :  { %10808 = vmin.xlane.f32.xlu0 %v10807_v33  ;;  %7900 = vmin.xlane.f32.xlu1 %v7899_v50  ;;  %v6206_v57 = vsel %vm6166_vm15, %v12026_v17, 5  ;;  %v6211_v46 = vsel %vm6171_vm1, %v12026_v17, 5  ;;  %vm6169_vm15 = vcmp.eq.f32.partialorder %v17839_v54, %v5981_v43  ;;  %v6213_v22 = vsel %vm6173_vm7, %v12026_v17, 5  ;;  %v17844_v50 = vld [vmem:[#allocation113_spill] sm:$0xff]  ;;  %v17851_v55 = vld [vmem:[#allocation118_spill] sm:$0xff] }
0x2550   :  { %v6209_v59 = vsel %vm6169_vm15, %v12026_v17, 5  ;;  %vm6177_vm1 = vcmp.eq.f32.partialorder %v17840_v0, %v6013_v41  ;;  %v6029_v33 = vrot.slane %v17842_v39, %v11644_v8  ;;  %v6053_v45 = vrot.slane %v17849_v27, %v11809_v28  ;;  %v17856_v41 = vld [vmem:[#allocation30_spill] sm:$0xff]  ;;  %v17858_v0 = vld [vmem:[#allocation124_spill] sm:$0xff] }
0x2551   :  { %v6217_v16 = vsel %vm6177_vm1, %v12026_v17, 5  ;;  %vm6170_vm1 = vcmp.eq.f32.partialorder %v17847_v31, %v5985_v52  ;;  %v6057_v38 = vrot.slane %v17849_v27, %v11920_v34  ;;  %v6081_v52 = vrot.slane %v17854_v14, %v17414_v4  ;;  %v17865_v31 = vld [vmem:[#allocation32_spill] sm:$0xff] }
0x2552   :  { %v6210_v24 = vsel %vm6170_vm1, %v12026_v17, 5 }
0x2553   :  { %7885 = vmin.xlane.f32.xlu0 %v7884_v44 }
0x2558   :  { %v16016_v1 = vpop.xlane.xlu1 %7911 }
0x2559   :  { %vm7913_vm5 = vcmp.eq.f32.partialorder %v7910_v26, %v16016_v1  ;;  %v6208_v26 = vsel %vm6168_vm3, %v12026_v17, 5  ;;  %vm6178_vm3 = vcmp.eq.f32.partialorder %v17841_v58, %v6017_v35 }
0x255a   :  { %v7914_v62 = vsel %vm7913_vm5, %v7909_v60, inf  ;;  %vm6172_vm5 = vcmp.eq.f32.partialorder %v17836_v51, %v5993_v37  ;;  %v6218_v12 = vsel %vm6178_vm3, %v12026_v17, 5  ;;  %v17845_v60 = vld [vmem:[#allocation28_spill] sm:$0xff]  ;;  %v6041_v37 = vrot.slane %v17842_v39, %v17414_v4 }
0x255b   :  { %7915 = vmin.xlane.f32.xlu0 %v7914_v62  ;;  %v6212_v25 = vsel %vm6172_vm5, %v12026_v17, 5  ;;  %vm6174_vm5 = vcmp.eq.f32.partialorder %v17843_v48, %v6001_v32  ;;  %vm6181_vm7 = vcmp.eq.f32.partialorder %v17845_v60, %v6029_v33  ;;  %v17846_v62 = vld [vmem:[#allocation115_spill] sm:$0xff]  ;;  %v17853_v51 = vld [vmem:[#allocation120_spill] sm:$0xff]  ;;  %v6077_v32 = vrot.slane %v17854_v14, %v11920_v34  ;;  %v17861_v48 = vld [vmem:[#allocation170_spill] sm:$0xff] }
0x255c   :  { %v16019_v18 = vpop.xlane.xlu0 %7926  ;;  %v6214_v44 = vsel %vm6174_vm5, %v12026_v17, 5  ;;  %vm6175_vm15 = vcmp.eq.f32.partialorder %v17846_v62, %v6005_v21  ;;  %v6093_v33 = vrot.slane %v17861_v48, %v11809_v28  ;;  %v17863_v60 = vld [vmem:[#allocation128_spill] sm:$0xff] }
0x255d   :  { %vm7928_vm2 = vcmp.eq.f32.partialorder %v7925_v13, %v16019_v18  ;;  %v17837_v13 = vld [vmem:[#allocation108_spill] sm:$0xff]  ;;  %v6215_v6 = vsel %vm6175_vm15, %v12026_v17, 5  ;;  %vm6184_vm15 = vcmp.eq.f32.partialorder %v17853_v51, %v6041_v37 }
0x255e   :  { %v7929_v36 = vsel %vm7928_vm2, %v7924_v19, inf  ;;  %vm6176_vm2 = vcmp.eq.f32.partialorder %v17837_v13, %v6009_v30  ;;  %v6037_v19 = vrot.slane %v17842_v39, %v11920_v34  ;;  %v6069_v13 = vrot.slane %v17854_v14, %v11644_v8 }
0x255f   :  { %7930 = vmin.xlane.f32.xlu1 %v7929_v36  ;;  %v6216_v49 = vsel %vm6176_vm2, %v12026_v17, 5  ;;  %vm6182_vm2 = vcmp.eq.f32.partialorder %v17844_v50, %v6033_v3  ;;  %v6221_v36 = vsel %vm6181_vm7, %v12026_v17, 5  ;;  %v17859_v3 = vld [vmem:[#allocation125_spill] sm:$0xff] }
0x2560   :  { %v6222_v40 = vsel %vm6182_vm2, %v12026_v17, 5  ;;  %vm6183_vm3 = vcmp.eq.f32.partialorder %v17848_v56, %v6037_v19  ;;  %vm6187_vm2 = vcmp.eq.f32.partialorder %v17851_v55, %v6053_v45 }
0x2561   :  { %v6223_v29 = vsel %vm6183_vm3, %v12026_v17, 5  ;;  %v6227_v30 = vsel %vm6187_vm2, %v12026_v17, 5  ;;  %vm6191_vm3 = vcmp.eq.f32.partialorder %v17856_v41, %v6069_v13  ;;  %v17871_v13 = vld [vmem:[#allocation135_spill] sm:$0xff] }
0x2562   :  { %v6231_v35 = vsel %vm6191_vm3, %v12026_v17, 5  ;;  %vm6197_vm3 = vcmp.eq.f32.partialorder %v17863_v60, %v6093_v33  ;;  %v7873_v60 = vcvt.f32.s32 %v15997_v20 }
0x2563   :  { %v6237_v19 = vsel %vm6197_vm3, %v12026_v17, 5 }
0x2570   :  { %6250 = vperm.xlu1 %11278, %v6207_v61   ;;  %v17850_v61 = vld [vmem:[#allocation29_spill] sm:$0xff] }
0x2571   :  { %6247 = vperm.xlu0 %11277, %v6206_v57   ;;  %vm6179_vm5 = vcmp.eq.f32.partialorder %v17850_v61, %v6021_v42  ;;  %v6049_v57 = vrot.slane %v17849_v27, %v11644_v8  ;;  %v17866_v42 = vld [vmem:[#allocation176_spill] sm:$0xff]  ;;  %v6097_v61 = vrot.slane %v17861_v48, %v11920_v34 }
0x2572   :  { %v6219_v47 = vsel %vm6179_vm5, %v12026_v17, 5  ;;  %v6109_v56 = vrot.slane %v17866_v42, %v11644_v8 }
0x2574   :  { %6262 = vperm.xlu1 %11278, %v6211_v46   ;;  %v17852_v46 = vld [vmem:[#allocation119_spill] sm:$0xff] }
0x2575   :  { %6253 = vperm.xlu0 %11277, %v6208_v26   ;;  %vm6186_vm7 = vcmp.eq.f32.partialorder %v17852_v46, %v6049_v57  ;;  %v6025_v26 = vrot.slane %v17835_v53, %v11925_v23  ;;  %v6045_v53 = vrot.slane %v17842_v39, %v11925_v23  ;;  %v17868_v57 = vld [vmem:[#allocation132_spill] sm:$0xff]  ;;  %v17870_v46 = vld [vmem:[#allocation134_spill] sm:$0xff] }
0x2576   :  { %v6226_v43 = vsel %vm6186_vm7, %v12026_v17, 5 }
0x2577   :  { %vm6185_vm2 = vcmp.eq.f32.partialorder %v17858_v0, %v6045_v53  ;;  %v17873_v53 = vld [vmem:[#allocation137_spill] sm:$0xff]  ;;  %v17875_v0 = vld [vmem:[#allocation139_spill] sm:$0xff] }
0x2578   :  { %6265 = vperm.xlu1 %11278, %v6212_v25   ;;  %v6224_v25 = vsel %vm6184_vm15, %v12026_v17, 5  ;;  %v6225_v39 = vsel %vm6185_vm2, %v12026_v17, 5  ;;  %vm6194_vm2 = vcmp.eq.f32.partialorder %v17865_v31, %v6081_v52  ;;  %v7888_v52 = vcvt.f32.s32 %v16001_v9 }
0x2579   :  { %6277 = vperm.xlu0 %11277, %v6216_v49   ;;  %v17855_v49 = vld [vmem:[#allocation121_spill] sm:$0xff]  ;;  %v7874_v9 = vshll.u32 %v7873_v60, 16 }
0x257a   :  { %vm6180_vm1 = vcmp.eq.f32.partialorder %v17855_v49, %v6025_v26  ;;  %v6117_v26 = vrot.slane %v17866_v42, %v11920_v34  ;;  %v6121_v49 = vrot.slane %v17866_v42, %v17414_v4 }
0x257b   :  { %v6220_v54 = vsel %vm6180_vm1, %v12026_v17, 5 }
0x257c   :  { %6268 = vperm.xlu1 %11278, %v6213_v22   ;;  %v17857_v22 = vld [vmem:[#allocation123_spill] sm:$0xff] }
0x257d   :  { %6256 = vperm.xlu0 %11277, %v6209_v59   ;;  %vm6188_vm5 = vcmp.eq.f32.partialorder %v17857_v22, %v6057_v38  ;;  %v6073_v59 = vrot.slane %v17854_v14, %v11809_v28 }
0x257e   :  { %v6228_v58 = vsel %vm6188_vm5, %v12026_v17, 5 }
0x257f   :  { %vm6192_vm7 = vcmp.eq.f32.partialorder %v17859_v3, %v6073_v59  ;;  %v10811_v3 = vcvt.f32.s32 %v16005_v11 }
0x2580   :  { %6280 = vperm.xlu1 %11278, %v6217_v16   ;;  %v6061_v16 = vrot.slane %v17849_v27, %v17414_v4  ;;  %v6232_v50 = vsel %vm6192_vm7, %v12026_v17, 5 }
0x2581   :  { %6283 = vperm.xlu0 %11277, %v6218_v12   ;;  %v17860_v12 = vld [vmem:[#allocation31_spill] sm:$0xff]  ;;  %v10812_v33 = vshll.u32 %v10811_v3, 16 }
0x2582   :  { %vm6193_vm15 = vcmp.eq.f32.partialorder %v17860_v12, %v6077_v32 }
0x2583   :  { %v6233_v21 = vsel %vm6193_vm15, %v12026_v17, 5  ;;  %vm6201_vm15 = vcmp.eq.f32.partialorder %v17868_v57, %v6109_v56  ;;  %v7903_v57 = vcvt.f32.s32 %v16007_v63 }
0x2584   :  { %6271 = vperm.xlu1 %11278, %v6214_v44   ;;  %v17862_v44 = vld [vmem:[#allocation127_spill] sm:$0xff]  ;;  %v6241_v37 = vsel %vm6201_vm15, %v12026_v17, 5 }
0x2585   :  { %6295 = vperm.xlu0 %11277, %v6222_v40   ;;  %vm6189_vm1 = vcmp.eq.f32.partialorder %v17862_v44, %v6061_v16  ;;  %v6089_v40 = vrot.slane %v17861_v48, %v11644_v8  ;;  %v7858_v44 = vcvt.f32.s32 %v15992_v5 }
0x2586   :  { %v6229_v62 = vsel %vm6189_vm1, %v12026_v17, 5 }
0x2587   :  { %v7859_v5 = vshll.u32 %v7858_v44, 16 }
0x2588   :  { %6292 = vperm.xlu1 %11278, %v6221_v36   ;;  %v17864_v36 = vld [vmem:[#allocation129_spill] sm:$0xff] }
0x2589   :  { %6274 = vperm.xlu0 %11277, %v6215_v6   ;;  %vm6196_vm5 = vcmp.eq.f32.partialorder %v17864_v36, %v6089_v40  ;;  %v6065_v6 = vrot.slane %v17849_v27, %v11925_v23  ;;  %v6085_v27 = vrot.slane %v17854_v14, %v11925_v23 }
0x258a   :  { %v6236_v45 = vsel %vm6196_vm5, %v12026_v17, 5 }
0x258b   :  { %vm6195_vm3 = vcmp.eq.f32.partialorder %v17870_v46, %v6085_v27  ;;  %v7918_v27 = vcvt.f32.s32 %v16016_v1  ;;  %v7933_v1 = vcvt.f32.s32 %v16019_v18 }
0x258c   :  { %6259 = vperm.xlu1 %11278, %v6210_v24   ;;  %v6234_v24 = vsel %vm6194_vm2, %v12026_v17, 5  ;;  %v6235_v14 = vsel %vm6195_vm3, %v12026_v17, 5 }
0x258d   :  { %6298 = vperm.xlu0 %11277, %v6223_v29   ;;  %v17867_v29 = vld [vmem:[#allocation131_spill] sm:$0xff] }
0x258e   :  { %vm6190_vm7 = vcmp.eq.f32.partialorder %v17867_v29, %v6065_v6 }
0x258f   :  { %v6230_v55 = vsel %vm6190_vm7, %v12026_v17, 5 }
0x2590   :  { %6286 = vperm.xlu1 %11278, %v6219_v47   ;;  %v17869_v47 = vld [vmem:[#allocation133_spill] sm:$0xff] }
0x2591   :  { %6310 = vperm.xlu0 %11277, %v6227_v30   ;;  %vm6198_vm1 = vcmp.eq.f32.partialorder %v17869_v47, %v6097_v61  ;;  %v6113_v30 = vrot.slane %v17866_v42, %v11809_v28 }
0x2592   :  { %v6238_v51 = vsel %vm6198_vm1, %v12026_v17, 5 }
0x2593   :  { %vm6202_vm5 = vcmp.eq.f32.partialorder %v17871_v13, %v6113_v30 }
0x2594   :  { %6307 = vperm.xlu1 %11278, %v6226_v43   ;;  %v6101_v43 = vrot.slane %v17861_v48, %v17414_v4  ;;  %v6242_v38 = vsel %vm6202_vm5, %v12026_v17, 5 }
0x2595   :  { %6301 = vperm.xlu0 %11277, %v6224_v25   ;;  %v17872_v25 = vld [vmem:[#allocation136_spill] sm:$0xff] }
0x2596   :  { %vm6203_vm2 = vcmp.eq.f32.partialorder %v17872_v25, %v6117_v26  ;;  %vm6199_vm7 = vcmp.eq.f32.partialorder %v17873_v53, %v6101_v43  ;;  %v7904_v43 = vshll.u32 %v7903_v57, 16  ;;  %v7919_v25 = vshll.u32 %v7918_v27, 16 }
0x2597   :  { %v6243_v41 = vsel %vm6203_vm2, %v12026_v17, 5  ;;  %v6239_v22 = vsel %vm6199_vm7, %v12026_v17, 5 }
0x2598   :  { %6289 = vperm.xlu1 %11278, %v6220_v54   ;;  %v6105_v54 = vrot.slane %v17861_v48, %v11925_v23  ;;  %v7828_v48 = vcvt.f32.s32 %v15987_v7 }
0x2599   :  { %6322 = vperm.xlu0 %11277, %v6231_v35   ;;  %v17874_v35 = vld [vmem:[#allocation138_spill] sm:$0xff] }
0x259a   :  { %vm6204_vm15 = vcmp.eq.f32.partialorder %v17874_v35, %v6121_v49  ;;  %vm6200_vm1 = vcmp.eq.f32.partialorder %v17875_v0, %v6105_v54  ;;  %v7829_v11 = vshll.u32 %v7828_v48, 16 }
0x259b   :  { %v6244_v59 = vsel %vm6204_vm15, %v12026_v17, 5  ;;  %v6240_v32 = vsel %vm6200_vm1, %v12026_v17, 5 }
0x259c   :  { %6313 = vperm.xlu1 %11278, %v6228_v58  }
0x259d   :  { %6304 = vperm.xlu0 %11277, %v6225_v39  }
0x25a0   :  { %6325 = vperm.xlu1 %11278, %v6232_v50  }
0x25a1   :  { %6328 = vperm.xlu0 %11277, %v6233_v21   ;;  %v7843_v21 = vcvt.f32.s32 %v15982_v10  ;;  %v10815_v10 = vld [vmem:[#allocation5 + $0x30] sm:$0xff] }
0x25a3   :  { %v7844_v7 = vshll.u32 %v7843_v21, 16 }
0x25a4   :  { %6316 = vperm.xlu1 %11278, %v6229_v62  }
0x25a5   :  { %6340 = vperm.xlu0 %11277, %v6237_v19  }
0x25a8   :  { %6337 = vperm.xlu1 %11278, %v6236_v45  }
0x25a9   :  { %6331 = vperm.xlu0 %11277, %v6234_v24   ;;  %v7889_v24 = vshll.u32 %v7888_v52, 16 }
0x25ac   :  { %6319 = vperm.xlu1 %11278, %v6230_v55  }
0x25ad   :  { %6352 = vperm.xlu0 %11277, %v6241_v37  }
0x25b0   :  { %6343 = vperm.xlu1 %11278, %v6238_v51  }
0x25b1   :  { %6334 = vperm.xlu0 %11277, %v6235_v14  }
0x25b4   :  { %6355 = vperm.xlu1 %11278, %v6242_v38   ;;  %v7841_v16 = vpop.xlane.xlu1 %7840 }
0x25b5   :  { %6358 = vperm.xlu0 %11277, %v6243_v41   ;;  %v7842_v31 = vcvt.f32.s32 %v7841_v16 }
0x25b7   :  { %v7845_v30 = vadd.s32 %v7844_v7, %v7842_v31 }
0x25b8   :  { %6346 = vperm.xlu1 %11278, %v6239_v22   ;;  %v7826_v58 = vpop.xlane.xlu0 %7825 }
0x25b9   :  { %6361 = vperm.xlu0 %11277, %v6244_v59   ;;  %v7827_v62 = vcvt.f32.s32 %v7826_v58  ;;  %v7943_v38 = vrot.slane %v7845_v30, %v11977_v2  ;;  %v7934_v58 = vshll.u32 %v7933_v1, 16 }
0x25bb   :  { %v7830_v29 = vadd.s32 %v7829_v11, %v7827_v62 }
0x25bc   :  { %6349 = vperm.xlu1 %11278, %v6240_v32  }
0x25bd   :  { %v7939_v14 = vrot.slane %v7830_v29, %v11977_v2 }
0x25bf   :  { %v7968_v35 = vsel %vm1627_vm0, %v7943_v38, %v7939_v14 }
0x25c4   :  { %v7856_v39 = vpop.xlane.xlu0 %7855 }
0x25c5   :  { %v7857_v36 = vcvt.f32.s32 %v7856_v39 }
0x25c7   :  { %v7860_v55 = vadd.s32 %v7859_v5, %v7857_v36  ;;  %v17876_v36 = vld [vmem:[#allocation140_spill] sm:$0xff] }
0x25c8   :  { %v7871_v40 = vpop.xlane.xlu1 %7870 }
0x25c9   :  { %v7872_v56 = vcvt.f32.s32 %v7871_v40  ;;  %v7947_v49 = vrot.slane %v7860_v55, %v11977_v2  ;;  %v6125_v40 = vrot.slane %v17866_v42, %v11925_v23 }
0x25cb   :  { %v7875_v46 = vadd.s32 %v7874_v9, %v7872_v56  ;;  %v7969_v0 = vsel %vm1629_vm8, %v7947_v49, %v7968_v35  ;;  %vm6205_vm5 = vcmp.eq.f32.partialorder %v17876_v36, %v6125_v40 }
0x25cc   :  { %v6245_v31 = vsel %vm6205_vm5, %v12026_v17, 5 }
0x25cd   :  { %v7951_v41 = vrot.slane %v7875_v46, %v11977_v2 }
0x25cf   :  { %v7970_v39 = vsel %vm1631_vm9, %v7951_v41, %v7969_v0 }
0x25dc   :  { %v10809_v12 = vpop.xlane.xlu0 %10808  ;;  %v7901_v37 = vpop.xlane.xlu1 %7900 }
0x25dd   :  { %v10810_v50 = vcvt.f32.s32 %v10809_v12  ;;  %v7902_v13 = vcvt.f32.s32 %v7901_v37 }
0x25df   :  { %v10813_v19 = vadd.s32 %v10812_v33, %v10810_v50  ;;  %v7905_v22 = vadd.s32 %v7904_v43, %v7902_v13 }
0x25e0   :  { %v7886_v6 = vpop.xlane.xlu0 %7885 }
0x25e1   :  { %10814 = vst.msk [vmem:[%s17008_s11 + $0x30] sm:$0xff] %vm10793_vm6, %v10813_v19  ;;  %vm10816_vm3 = vcmp.eq.s32.totalorder %v17828_v15, %v10813_v19  ;;  %v7887_v20 = vcvt.f32.s32 %v7886_v6  ;;  %v7959_v12 = vrot.slane %v7905_v22, %v11977_v2 }
0x25e2   :  { %v10817_v45 = vsel %vm10816_vm3, %v10815_v10, 5 }
0x25e3   :  { %v16190_v61 = vsel %vm1315_vm14, %v10817_v45, 2147483647  ;;  %v7890_v26 = vadd.s32 %v7889_v24, %v7887_v20 }
0x25e4   :  { %v10820_v47 = vshra.s32 %v16190_v61, 16 }
0x25e5   :  { %v7955_v54 = vrot.slane %v7890_v26, %v11977_v2 }
0x25e6   :  { %v16195_v51 = vcvt.s32.f32 %v10820_v47 }
0x25e7   :  { %v7971_v18 = vsel %vm1633_vm10, %v7955_v54, %v7970_v39 }
0x25e8   :  { %10823 = vmin.xlane.f32.xlu1 %v16195_v51  ;;  %v7916_v63 = vpop.xlane.xlu0 %7915  ;;  %v7972_v21 = vsel %vm1635_vm11, %v7959_v12, %v7971_v18 }
0x25e9   :  { %v7917_v53 = vcvt.f32.s32 %v7916_v63 }
0x25eb   :  { %v7920_v59 = vadd.s32 %v7919_v25, %v7917_v53 }
0x25ec   :  { %v7931_v32 = vpop.xlane.xlu1 %7930 }
0x25ed   :  { %v7932_v3 = vcvt.f32.s32 %v7931_v32  ;;  %v7963_v16 = vrot.slane %v7920_v59, %v11977_v2 }
0x25ef   :  { %v7935_v48 = vadd.s32 %v7934_v58, %v7932_v3  ;;  %v7973_v60 = vsel %vm1637_vm12, %v7963_v16, %v7972_v21 }
0x25f0   :  { %v6251_v33 = vpop.permute.xlu1 %6250  ;;  %v6248_v50 = vpop.permute.xlu0 %6247 }
0x25f1   :  { %v7967_v44 = vrot.slane %v7935_v48, %v11977_v2  ;;  %v6373_v30 = vrot.slane %v6251_v33, %v11977_v2  ;;  %v6369_v46 = vrot.slane %v6248_v50, %v11977_v2 }
0x25f3   :  { %v7974_v52 = vsel %vm1639_vm13, %v7967_v44, %v7973_v60  ;;  %v6526_v41 = vsel %vm1627_vm0, %v6373_v30, %v6369_v46 }
0x25f4   :  { %7975 = vst.msk [vmem:[#allocation5 + $0x28] sm:$0xff] %vm1315_vm14, %v7974_v52  ;;  %v6263_v62 = vpop.permute.xlu1 %6262  ;;  %v6254_v19 = vpop.permute.xlu0 %6253 }
0x25f5   :  { %v6389_v24 = vrot.slane %v6263_v62, %v11977_v2  ;;  %v6377_v14 = vrot.slane %v6254_v19, %v11977_v2 }
0x25f7   :  { %v6527_v53 = vsel %vm1629_vm8, %v6377_v14, %v6526_v41 }
0x25f8   :  { %v6266_v6 = vpop.permute.xlu1 %6265  ;;  %v6278_v11 = vpop.permute.xlu0 %6277 }
0x25f9   :  { %6364 = vperm.xlu1 %11278, %v6245_v31   ;;  %v6393_v42 = vrot.slane %v6266_v6, %v11977_v2  ;;  %v6409_v58 = vrot.slane %v6278_v11, %v11977_v2 }
0x25fb   :  { %v6530_v57 = vsel %vm1627_vm0, %v6393_v42, %v6389_v24 }
0x25fc   :  { %v6269_v56 = vpop.permute.xlu1 %6268  ;;  %v6257_v10 = vpop.permute.xlu0 %6256 }
0x25fd   :  { %v6397_v9 = vrot.slane %v6269_v56, %v11977_v2  ;;  %v6381_v43 = vrot.slane %v6257_v10, %v11977_v2 }
0x25ff   :  { %v6531_v37 = vsel %vm1629_vm8, %v6397_v9, %v6530_v57  ;;  %v6528_v35 = vsel %vm1631_vm9, %v6381_v43, %v6527_v53 }
0x2600   :  { %v6281_v7 = vpop.permute.xlu1 %6280  ;;  %v6284_v5 = vpop.permute.xlu0 %6283 }
0x2601   :  { %v6413_v32 = vrot.slane %v6281_v7, %v11977_v2  ;;  %v6417_v16 = vrot.slane %v6284_v5, %v11977_v2 }
0x2603   :  { %v6534_v12 = vsel %vm1627_vm0, %v6413_v32, %v6409_v58 }
0x2604   :  { %v6272_v20 = vpop.permute.xlu1 %6271  ;;  %v6296_v45 = vpop.permute.xlu0 %6295  ;;  %v6535_v40 = vsel %vm1629_vm8, %v6417_v16, %v6534_v12 }
0x2605   :  { %v6401_v29 = vrot.slane %v6272_v20, %v11977_v2  ;;  %v6433_v62 = vrot.slane %v6296_v45, %v11977_v2 }
0x2607   :  { %v6532_v26 = vsel %vm1631_vm9, %v6401_v29, %v6531_v37 }
0x2608   :  { %v6293_v27 = vpop.permute.xlu1 %6292  ;;  %v6275_v55 = vpop.permute.xlu0 %6274 }
0x2609   :  { %v6405_v47 = vrot.slane %v6275_v55, %v11977_v2  ;;  %v6429_v50 = vrot.slane %v6293_v27, %v11977_v2 }
0x260b   :  { %v6533_v13 = vsel %vm1633_vm10, %v6405_v47, %v6532_v26  ;;  %v6538_v31 = vsel %vm1627_vm0, %v6433_v62, %v6429_v50 }
0x260c   :  { %v6260_v25 = vpop.permute.xlu1 %6259  ;;  %v6299_v49 = vpop.permute.xlu0 %6298  ;;  %v16233_v63 = vsel %vm1434_vm4, %v6533_v13, 2147483647 }
0x260d   :  { %v6385_v1 = vrot.slane %v6260_v25, %v11977_v2  ;;  %v6575_v38 = vshra.s32 %v16233_v63, 16  ;;  %v6437_v60 = vrot.slane %v6299_v49, %v11977_v2 }
0x260f   :  { %v16239_v54 = vcvt.s32.f32 %v6575_v38  ;;  %v6529_v0 = vsel %vm1633_vm10, %v6385_v1, %v6528_v35  ;;  %v6539_v5 = vsel %vm1629_vm8, %v6437_v60, %v6538_v31 }
0x2610   :  { %v6287_v22 = vpop.permute.xlu1 %6286  ;;  %v6311_v59 = vpop.permute.xlu0 %6310  ;;  %v16247_v18 = vsel %vm1434_vm4, %v6529_v0, 2147483647 }
0x2611   :  { %6578 = vmin.xlane.f32.xlu0 %v16239_v54  ;;  %v6421_v48 = vrot.slane %v6287_v22, %v11977_v2  ;;  %v6560_v33 = vshra.s32 %v16247_v18, 16  ;;  %v6453_v43 = vrot.slane %v6311_v59, %v11977_v2 }
0x2613   :  { %v6536_v19 = vsel %vm1631_vm9, %v6421_v48, %v6535_v40  ;;  %v16261_v11 = vcvt.s32.f32 %v6560_v33 }
0x2614   :  { %v6308_v39 = vpop.permute.xlu1 %6307  ;;  %v6302_v3 = vpop.permute.xlu0 %6301 }
0x2615   :  { %v6441_v36 = vrot.slane %v6302_v3, %v11977_v2  ;;  %v6449_v46 = vrot.slane %v6308_v39, %v11977_v2 }
0x2617   :  { %v6540_v45 = vsel %vm1631_vm9, %v6441_v36, %v6539_v5  ;;  %v6542_v1 = vsel %vm1627_vm0, %v6453_v43, %v6449_v46 }
0x2618   :  { %v6290_v21 = vpop.permute.xlu1 %6289  ;;  %v6323_v44 = vpop.permute.xlu0 %6322 }
0x2619   :  { %v6425_v52 = vrot.slane %v6290_v21, %v11977_v2  ;;  %v6469_v38 = vrot.slane %v6323_v44, %v11977_v2 }
0x261b   :  { %v6537_v6 = vsel %vm1633_vm10, %v6425_v52, %v6536_v19 }
0x261c   :  { %v6314_v56 = vpop.permute.xlu1 %6313  ;;  %v6305_v10 = vpop.permute.xlu0 %6304  ;;  %v16265_v7 = vsel %vm1434_vm4, %v6537_v6, 2147483647 }
0x261d   :  { %v6445_v42 = vrot.slane %v6305_v10, %v11977_v2  ;;  %6563 = vmin.xlane.f32.xlu1 %v16261_v11  ;;  %v6590_v20 = vshra.s32 %v16265_v7, 16  ;;  %v6457_v13 = vrot.slane %v6314_v56, %v11977_v2 }
0x261f   :  { %v6541_v9 = vsel %vm1633_vm10, %v6445_v42, %v6540_v45  ;;  %v16273_v24 = vcvt.s32.f32 %v6590_v20  ;;  %v6543_v35 = vsel %vm1629_vm8, %v6457_v13, %v6542_v1 }
0x2620   :  { %v6326_v29 = vpop.permute.xlu1 %6325  ;;  %v6329_v57 = vpop.permute.xlu0 %6328  ;;  %v16276_v27 = vsel %vm1434_vm4, %v6541_v9, 2147483647 }
0x2621   :  { %6593 = vmin.xlane.f32.xlu0 %v16273_v24  ;;  %v6605_v55 = vshra.s32 %v16276_v27, 16  ;;  %v6473_v25 = vrot.slane %v6326_v29, %v11977_v2  ;;  %v6477_v22 = vrot.slane %v6329_v57, %v11977_v2 }
0x2623   :  { %v16280_v37 = vcvt.s32.f32 %v6605_v55  ;;  %v6546_v32 = vsel %vm1627_vm0, %v6473_v25, %v6469_v38 }
0x2624   :  { %v6317_v47 = vpop.permute.xlu1 %6316  ;;  %v6341_v30 = vpop.permute.xlu0 %6340  ;;  %v6547_v48 = vsel %vm1629_vm8, %v6477_v22, %v6546_v32 }
0x2625   :  { %6608 = vmin.xlane.f32.xlu0 %v16280_v37  ;;  %v6461_v49 = vrot.slane %v6317_v47, %v11977_v2  ;;  %v6493_v56 = vrot.slane %v6341_v30, %v11977_v2 }
0x2627   :  { %v6544_v59 = vsel %vm1631_vm9, %v6461_v49, %v6543_v35 }
0x2628   :  { %v6338_v26 = vpop.permute.xlu1 %6337  ;;  %v6332_v14 = vpop.permute.xlu0 %6331 }
0x2629   :  { %v6481_v58 = vrot.slane %v6332_v14, %v11977_v2  ;;  %v6489_v36 = vrot.slane %v6338_v26, %v11977_v2 }
0x262b   :  { %v6548_v21 = vsel %vm1631_vm9, %v6481_v58, %v6547_v48  ;;  %v6550_v5 = vsel %vm1627_vm0, %v6493_v56, %v6489_v36 }
0x262c   :  { %v6320_v41 = vpop.permute.xlu1 %6319  ;;  %v6353_v53 = vpop.permute.xlu0 %6352 }
0x262d   :  { %v6465_v0 = vrot.slane %v6320_v41, %v11977_v2  ;;  %v6509_v14 = vrot.slane %v6353_v53, %v11977_v2 }
0x262f   :  { %v6545_v39 = vsel %vm1633_vm10, %v6465_v0, %v6544_v59  ;;  %v6574_v59 = vand.u32 65535, %v16233_v63 }
0x2630   :  { %v6344_v3 = vpop.permute.xlu1 %6343  ;;  %v6335_v16 = vpop.permute.xlu0 %6334  ;;  %v16298_v12 = vsel %vm1434_vm4, %v6545_v39, 2147483647 }
0x2631   :  { %v6485_v33 = vrot.slane %v6335_v16, %v11977_v2  ;;  %v6620_v50 = vshra.s32 %v16298_v12, 16  ;;  %v6497_v31 = vrot.slane %v6344_v3, %v11977_v2  ;;  %v6576_v39 = vcvt.s32.f32 %v6574_v59 }
0x2632   :  { %v6559_v16 = vand.u32 65535, %v16247_v18  ;;  %v6604_v18 = vand.u32 65535, %v16276_v27 }
0x2633   :  { %v6549_v44 = vsel %vm1633_vm10, %v6485_v33, %v6548_v21  ;;  %v16305_v40 = vcvt.s32.f32 %v6620_v50  ;;  %v6551_v20 = vsel %vm1629_vm8, %v6497_v31, %v6550_v5  ;;  %v10819_v50 = vand.u32 65535, %v16190_v61 }
0x2634   :  { %v6356_v60 = vpop.permute.xlu1 %6355  ;;  %v16308_v52 = vsel %vm1434_vm4, %v6549_v44, 2147483647  ;;  %v6359_v30 = vpop.permute.xlu0 %6358  ;;  %v6561_v33 = vcvt.s32.f32 %v6559_v16  ;;  %v6589_v44 = vand.u32 65535, %v16265_v7  ;;  %v6619_v7 = vand.u32 65535, %v16298_v12 }
0x2635   :  { %6623 = vmin.xlane.f32.xlu1 %v16305_v40  ;;  %v6635_v62 = vshra.s32 %v16308_v52, 16  ;;  %v6513_v46 = vrot.slane %v6356_v60, %v11977_v2  ;;  %v6517_v43 = vrot.slane %v6359_v30, %v11977_v2  ;;  %v6634_v31 = vand.u32 65535, %v16308_v52  ;;  %v17881_v30 = vld [vmem:[#allocation60_spill] sm:$0xff] }
0x2636   :  { %v6621_v27 = vcvt.s32.f32 %v6619_v7 }
0x2637   :  { %v16312_v19 = vcvt.s32.f32 %v6635_v62  ;;  %v6554_v25 = vsel %vm1627_vm0, %v6513_v46, %v6509_v14  ;;  %v6606_v62 = vcvt.s32.f32 %v6604_v18  ;;  %v17882_v14 = vld [vmem:[#allocation62_spill] sm:$0xff] }
0x2638   :  { %v6347_v6 = vpop.permute.xlu1 %6346  ;;  %v6362_v26 = vpop.permute.xlu0 %6361  ;;  %v6555_v38 = vsel %vm1629_vm8, %v6517_v43, %v6554_v25 }
0x2639   :  { %6638 = vmin.xlane.f32.xlu0 %v16312_v19  ;;  %v6501_v10 = vrot.slane %v6347_v6, %v11977_v2  ;;  %v6521_v49 = vrot.slane %v6362_v26, %v11977_v2 }
0x263b   :  { %v6552_v9 = vsel %vm1631_vm9, %v6501_v10, %v6551_v20  ;;  %v6556_v35 = vsel %vm1631_vm9, %v6521_v49, %v6555_v38  ;;  %v6636_v10 = vcvt.s32.f32 %v6634_v31  ;;  %v17883_v49 = vld [vmem:[#allocation50_spill] sm:$0xff] }
0x263c   :  { %v6350_v42 = vpop.permute.xlu1 %6349 }
0x263d   :  { %v6505_v45 = vrot.slane %v6350_v42, %v11977_v2 }
0x263f   :  { %v6553_v29 = vsel %vm1633_vm10, %v6505_v45, %v6552_v9  ;;  %v17878_v45 = vld [vmem:[#allocation56_spill] sm:$0xff] }
0x2640   :  { %v16325_v57 = vsel %vm1434_vm4, %v6553_v29, 2147483647  ;;  %v17879_v29 = vld [vmem:[#allocation59_spill] sm:$0xff] }
0x2641   :  { %v6650_v55 = vshra.s32 %v16325_v57, 16  ;;  %v6649_v12 = vand.u32 65535, %v16325_v57  ;;  %v17880_v57 = vld [vmem:[#allocation105_spill] sm:$0xff] }
0x2642   :  { %v4759_v43 = vrot.slane %v17880_v57, %v11920_v34 }
0x2643   :  { %v16328_v47 = vcvt.s32.f32 %v6650_v55  ;;  %v6651_v42 = vcvt.s32.f32 %v6649_v12  ;;  %v4751_v55 = vrot.slane %v17880_v57, %v11644_v8  ;;  %v17894_v12 = vld [vmem:[#allocation75_spill] sm:$0xff] }
0x2645   :  { %6653 = vmin.xlane.f32.xlu1 %v16328_v47 }
0x2675   :  { %v16333_v13 = vpop.xlane.xlu1 %10823 }
0x2676   :  { %vm10825_vm15 = vcmp.eq.f32.partialorder %v16195_v51, %v16333_v13 }
0x2679   :  { %v6365_v1 = vpop.permute.xlu1 %6364 }
0x267a   :  { %v6525_v41 = vrot.slane %v6365_v1, %v11977_v2  ;;  %v17884_v1 = vld [vmem:[#allocation112_spill] sm:$0xff] }
0x267b   :  { %v4775_v38 = vrot.slane %v17884_v1, %v11809_v28  ;;  %v4783_v18 = vrot.slane %v17884_v1, %v17414_v4 }
0x267c   :  { %v6557_v22 = vsel %vm1633_vm10, %v6525_v41, %v6556_v35  ;;  %v17885_v35 = vld [vmem:[#allocation66_spill] sm:$0xff] }
0x267d   :  { %v16343_v0 = vsel %vm1434_vm4, %v6557_v22, 2147483647  ;;  %v17886_v22 = vld [vmem:[#allocation103_spill] sm:$0xff] }
0x267e   :  { %v6665_v53 = vshra.s32 %v16343_v0, 16 }
0x2680   :  { %v16346_v32 = vcvt.s32.f32 %v6665_v53  ;;  %v4747_v53 = vrot.slane %v17886_v22, %v11925_v23 }
0x2682   :  { %6668 = vmin.xlane.f32.xlu0 %v16346_v32 }
0x269e   :  { %v16350_v58 = vpop.xlane.xlu0 %6578 }
0x269f   :  { %vm6580_vm2 = vcmp.eq.f32.partialorder %v16239_v54, %v16350_v58  ;;  %v10821_v54 = vcvt.s32.f32 %v10819_v50  ;;  %v17889_v50 = vld [vmem:[#allocation116_spill] sm:$0xff] }
0x26a0   :  { %v6581_v3 = vsel %vm6580_vm2, %v6576_v39, inf  ;;  %v17887_v39 = vld [vmem:[#allocation67_spill] sm:$0xff] }
0x26a1   :  { %6582 = vmin.xlane.f32.xlu1 %v6581_v3  ;;  %v10826_v60 = vsel %vm10825_vm15, %v10821_v54, inf  ;;  %v4779_v3 = vrot.slane %v17884_v1, %v11920_v34 }
0x26aa   :  { %v16355_v48 = vpop.xlane.xlu1 %6563 }
0x26ab   :  { %vm6565_vm7 = vcmp.eq.f32.partialorder %v16261_v11, %v16355_v48  ;;  %v6591_v11 = vcvt.s32.f32 %v6589_v44  ;;  %v17890_v44 = vld [vmem:[#allocation71_spill] sm:$0xff] }
0x26ac   :  { %v6566_v21 = vsel %vm6565_vm7, %v6561_v33, inf  ;;  %v17888_v33 = vld [vmem:[#allocation68_spill] sm:$0xff] }
0x26ad   :  { %6567 = vmin.xlane.f32.xlu0 %v6566_v21  ;;  %v4795_v21 = vrot.slane %v17889_v50, %v11809_v28 }
0x26ae   :  { %v16362_v63 = vpop.xlane.xlu0 %6593 }
0x26af   :  { %vm6595_vm1 = vcmp.eq.f32.partialorder %v16273_v24, %v16362_v63 }
0x26b0   :  { %v6596_v51 = vsel %vm6595_vm1, %v6591_v11, inf  ;;  %v17891_v11 = vld [vmem:[#allocation72_spill] sm:$0xff] }
0x26b1   :  { %10827 = vmin.xlane.f32.xlu0 %v10826_v60 }
0x26b2   :  { %v16368_v61 = vpop.xlane.xlu0 %6608 }
0x26b3   :  { %vm6610_vm3 = vcmp.eq.f32.partialorder %v16280_v37, %v16368_v61 }
0x26b4   :  { %v6611_v36 = vsel %vm6610_vm3, %v6606_v62, inf  ;;  %vm4918_vm3 = vcmp.eq.f32.partialorder %v17881_v30, %v4751_v55  ;;  %v6664_v62 = vand.u32 65535, %v16343_v0  ;;  %v17898_v30 = vld [vmem:[#allocation80_spill] sm:$0xff] }
0x26b5   :  { %6597 = vmin.xlane.f32.xlu0 %v6596_v51  ;;  %6612 = vmin.xlane.f32.xlu1 %v6611_v36  ;;  %v4958_v26 = vsel %vm4918_vm3, %v12026_v17, 5  ;;  %vm4929_vm3 = vcmp.eq.f32.partialorder %v17890_v44, %v4795_v21  ;;  %v17892_v51 = vld [vmem:[#allocation122_spill] sm:$0xff] }
0x26b6   :  { %v4969_v60 = vsel %vm4929_vm3, %v12026_v17, 5  ;;  %v4811_v36 = vrot.slane %v17892_v51, %v11644_v8  ;;  %v6666_v31 = vcvt.s32.f32 %v6664_v62  ;;  %v4755_v62 = vrot.slane %v17880_v57, %v11809_v28 }
0x26c2   :  { %v16373_v6 = vpop.xlane.xlu1 %6623 }
0x26c3   :  { %vm6625_vm5 = vcmp.eq.f32.partialorder %v16305_v40, %v16373_v6  ;;  %v17877_v40 = vld [vmem:[#allocation101_spill] sm:$0xff] }
0x26c4   :  { %v6626_v24 = vsel %vm6625_vm5, %v6621_v27, inf  ;;  %v4711_v20 = vrot.slane %v17877_v40, %v11644_v8  ;;  %v4723_v46 = vrot.slane %v17877_v40, %v17414_v4  ;;  %v4715_v55 = vrot.slane %v17877_v40, %v11809_v28 }
0x26c5   :  { %6627 = vmin.xlane.f32.xlu0 %v6626_v24  ;;  %v17893_v24 = vld [vmem:[#allocation74_spill] sm:$0xff] }
0x26c6   :  { %v16378_v56 = vpop.xlane.xlu0 %6638  ;;  %vm4908_vm15 = vcmp.eq.f32.partialorder %v17878_v45, %v4711_v20  ;;  %vm4911_vm5 = vcmp.eq.f32.partialorder %v17882_v14, %v4723_v46  ;;  %v17895_v20 = vld [vmem:[#allocation76_spill] sm:$0xff]  ;;  %v17896_v45 = vld [vmem:[#allocation126_spill] sm:$0xff]  ;;  %v17899_v46 = vld [vmem:[#allocation7_spill] sm:$0xff] }
0x26c7   :  { %vm6640_vm2 = vcmp.eq.f32.partialorder %v16312_v19, %v16378_v56  ;;  %v4719_v19 = vrot.slane %v17877_v40, %v11920_v34  ;;  %v4948_v9 = vsel %vm4908_vm15, %v12026_v17, 5  ;;  %v4951_v25 = vsel %vm4911_vm5, %v12026_v17, 5 }
0x26c8   :  { %v6641_v37 = vsel %vm6640_vm2, %v6636_v10, inf  ;;  %vm4920_vm2 = vcmp.eq.f32.partialorder %v17883_v49, %v4759_v43  ;;  %vm4917_vm15 = vcmp.eq.f32.partialorder %v17887_v39, %v4747_v53  ;;  %vm4926_vm5 = vcmp.eq.f32.partialorder %v17891_v11, %v4783_v18  ;;  %v17905_v18 = vld [vmem:[#allocation49_spill] sm:$0xff] }
0x26c9   :  { %6642 = vmin.xlane.f32.xlu1 %v6641_v37  ;;  %vm4910_vm1 = vcmp.eq.f32.partialorder %v17879_v29, %v4719_v19  ;;  %v4960_v41 = vsel %vm4920_vm2, %v12026_v17, 5  ;;  %v4957_v16 = vsel %vm4917_vm15, %v12026_v17, 5  ;;  %v4966_v7 = vsel %vm4926_vm5, %v12026_v17, 5 }
0x26ca   :  { %vm4933_vm2 = vcmp.eq.f32.partialorder %v17893_v24, %v4811_v36  ;;  %v4787_v10 = vrot.slane %v17884_v1, %v11925_v23  ;;  %v4835_v19 = vrot.slane %v17896_v45, %v11809_v28  ;;  %v4823_v29 = vrot.slane %v17892_v51, %v17414_v4  ;;  %v17908_v24 = vld [vmem:[#allocation57_spill] sm:$0xff] }
0x26cb   :  { %v4973_v0 = vsel %vm4933_vm2, %v12026_v17, 5  ;;  %vm4909_vm2 = vcmp.eq.f32.partialorder %v17899_v46, %v4715_v55  ;;  %v4731_v43 = vrot.slane %v17886_v22, %v11644_v8  ;;  %v4827_v53 = vrot.slane %v17892_v51, %v11925_v23  ;;  %v17911_v46 = vld [vmem:[#allocation63_spill] sm:$0xff] }
0x26cc   :  { %vm4927_vm15 = vcmp.eq.f32.partialorder %v17894_v12, %v4787_v10  ;;  %vm4936_vm5 = vcmp.eq.f32.partialorder %v17898_v30, %v4823_v29  ;;  %v4949_v49 = vsel %vm4909_vm2, %v12026_v17, 5  ;;  %v4743_v10 = vrot.slane %v17886_v22, %v17414_v4  ;;  %v17909_v12 = vld [vmem:[#allocation48_spill] sm:$0xff]  ;;  %v17910_v29 = vld [vmem:[#allocation61_spill] sm:$0xff] }
0x26d2   :  { %v16383_v5 = vpop.xlane.xlu1 %6653 }
0x26d3   :  { %vm6655_vm7 = vcmp.eq.f32.partialorder %v16328_v47, %v16383_v5  ;;  %v4950_v47 = vsel %vm4910_vm1, %v12026_v17, 5  ;;  %vm4925_vm1 = vcmp.eq.f32.partialorder %v17888_v33, %v4779_v3  ;;  %v4739_v3 = vrot.slane %v17886_v22, %v11920_v34  ;;  %v17904_v33 = vld [vmem:[#allocation55_spill] sm:$0xff] }
0x26d4   :  { %v6656_v52 = vsel %vm6655_vm7, %v6651_v42, inf  ;;  %vm4924_vm7 = vcmp.eq.f32.partialorder %v17885_v35, %v4775_v38  ;;  %v4965_v54 = vsel %vm4925_vm1, %v12026_v17, 5  ;;  %v4819_v42 = vrot.slane %v17892_v51, %v11920_v34  ;;  %v17902_v35 = vld [vmem:[#allocation58_spill] sm:$0xff] }
0x26d5   :  { %6657 = vmin.xlane.f32.xlu0 %v6656_v52  ;;  %v4964_v59 = vsel %vm4924_vm7, %v12026_v17, 5  ;;  %v4967_v52 = vsel %vm4927_vm15, %v12026_v17, 5  ;;  %v4735_v38 = vrot.slane %v17886_v22, %v11809_v28  ;;  %vm4913_vm15 = vcmp.eq.f32.partialorder %v17902_v35, %v4731_v43  ;;  %v17914_v35 = vld [vmem:[#allocation64_spill] sm:$0xff] }
0x26d6   :  { %vm4935_vm1 = vcmp.eq.f32.partialorder %v17895_v20, %v4819_v42  ;;  %v4953_v39 = vsel %vm4913_vm15, %v12026_v17, 5  ;;  %vm4919_vm15 = vcmp.eq.f32.partialorder %v17908_v24, %v4755_v62  ;;  %v4771_v42 = vrot.slane %v17884_v1, %v11644_v8 }
0x26d7   :  { %v6585_v20 = vcvt.f32.s32 %v16350_v58  ;;  %v6570_v22 = vcvt.f32.s32 %v16355_v48  ;;  %v4799_v58 = vrot.slane %v17889_v50, %v11920_v34 }
0x26d9   :  { %v6586_v55 = vshll.u32 %v6585_v20, 16 }
0x26eb   :  { %4989 = vperm.xlu0 %11277, %v4948_v9   ;;  %v17897_v9 = vld [vmem:[#allocation79_spill] sm:$0xff] }
0x26ec   :  { %vm4939_vm3 = vcmp.eq.f32.partialorder %v17897_v9, %v4835_v19 }
0x26ef   :  { %4995 = vperm.xlu0 %11277, %v4950_v47   ;;  %v4979_v47 = vsel %vm4939_vm3, %v12026_v17, 5  ;;  %vm4914_vm3 = vcmp.eq.f32.partialorder %v17904_v33, %v4735_v38  ;;  %v6600_v38 = vcvt.f32.s32 %v16362_v63 }
0x26f0   :  { %v4954_v44 = vsel %vm4914_vm3, %v12026_v17, 5  ;;  %vm4923_vm3 = vcmp.eq.f32.partialorder %v17910_v29, %v4771_v42  ;;  %v6630_v42 = vcvt.f32.s32 %v16373_v6  ;;  %v10834_v29 = vld [vmem:[#allocation5 + $0x28] sm:$0xff]  ;;  %v4767_v6 = vrot.slane %v17880_v57, %v11925_v23 }
0x26f1   :  { %v4963_v1 = vsel %vm4923_vm3, %v12026_v17, 5 }
0x26f2   :  { %v6631_v20 = vshll.u32 %v6630_v42, 16  ;;  %v17928_v42 = vld [vmem:[#allocation83_spill] sm:$0xff] }
0x26f3   :  { %5019 = vperm.xlu0 %11277, %v4958_v26   ;;  %v17900_v26 = vld [vmem:[#allocation130_spill] sm:$0xff] }
0x26f4   :  { %v4851_v14 = vrot.slane %v17900_v26, %v11644_v8  ;;  %v4859_v21 = vrot.slane %v17900_v26, %v11920_v34  ;;  %v4863_v11 = vrot.slane %v17900_v26, %v17414_v4 }
0x26f7   :  { %4998 = vperm.xlu0 %11277, %v4951_v25   ;;  %v4976_v25 = vsel %vm4936_vm5, %v12026_v17, 5  ;;  %vm4915_vm5 = vcmp.eq.f32.partialorder %v17905_v18, %v4739_v3 }
0x26fb   :  { %5025 = vperm.xlu0 %11277, %v4960_v41   ;;  %v17901_v41 = vld [vmem:[#allocation82_spill] sm:$0xff] }
0x26ff   :  { %5037 = vperm.xlu0 %11277, %v4964_v59  }
0x2703   :  { %5016 = vperm.xlu0 %11277, %v4957_v16   ;;  %v17903_v16 = vld [vmem:[#allocation84_spill] sm:$0xff] }
0x2707   :  { %5040 = vperm.xlu0 %11277, %v4965_v54  }
0x270b   :  { %5052 = vperm.xlu0 %11277, %v4969_v60   ;;  %v17906_v60 = vld [vmem:[#allocation17_spill] sm:$0xff] }
0x270c   :  { %vm4945_vm2 = vcmp.eq.f32.partialorder %v17906_v60, %v4859_v21  ;;  %v17917_v60 = vld [vmem:[#allocation65_spill] sm:$0xff] }
0x270d   :  { %v4985_v36 = vsel %vm4945_vm2, %v12026_v17, 5 }
0x270f   :  { %5043 = vperm.xlu0 %11277, %v4966_v7   ;;  %v16430_v27 = vpop.xlane.xlu0 %6668  ;;  %v4955_v7 = vsel %vm4915_vm5, %v12026_v17, 5 }
0x2710   :  { %vm6670_vm7 = vcmp.eq.f32.partialorder %v16346_v32, %v16430_v27  ;;  %v4975_v32 = vsel %vm4935_vm1, %v12026_v17, 5  ;;  %vm4937_vm1 = vcmp.eq.f32.partialorder %v17903_v16, %v4827_v53 }
0x2711   :  { %v6671_v37 = vsel %vm6670_vm7, %v6666_v31, inf  ;;  %vm4943_vm7 = vcmp.eq.f32.partialorder %v17901_v41, %v4851_v14  ;;  %v4977_v54 = vsel %vm4937_vm1, %v12026_v17, 5  ;;  %v17907_v31 = vld [vmem:[#allocation85_spill] sm:$0xff]  ;;  %vm4916_vm1 = vcmp.eq.f32.partialorder %v17909_v12, %v4743_v10 }
0x2712   :  { %6672 = vmin.xlane.f32.xlu1 %v6671_v37  ;;  %v4983_v59 = vsel %vm4943_vm7, %v12026_v17, 5  ;;  %vm4946_vm7 = vcmp.eq.f32.partialorder %v17907_v31, %v4863_v11  ;;  %v4956_v19 = vsel %vm4916_vm1, %v12026_v17, 5  ;;  %v6571_v14 = vshll.u32 %v6570_v22, 16 }
0x2713   :  { %5064 = vperm.xlu0 %11277, %v4973_v0   ;;  %v4986_v37 = vsel %vm4946_vm7, %v12026_v17, 5  ;;  %v4959_v0 = vsel %vm4919_vm15, %v12026_v17, 5  ;;  %v6601_v11 = vshll.u32 %v6600_v38, 16  ;;  %v4831_v38 = vrot.slane %v17896_v45, %v11644_v8 }
0x2717   :  { %5046 = vperm.xlu0 %11277, %v4967_v52  }
0x271b   :  { %5070 = vperm.xlu0 %11277, %v4975_v32   ;;  %v4727_v32 = vrot.slane %v17877_v40, %v11925_v23  ;;  %v4763_v40 = vrot.slane %v17880_v57, %v17414_v4  ;;  %v4803_v57 = vrot.slane %v17889_v50, %v17414_v4 }
0x271d   :  { %vm16502_vm5 = vcmp.eq.f32.partialorder %v17911_v46, %v4727_v32  ;;  %vm16513_vm2 = vcmp.eq.f32.partialorder %v17914_v35, %v4763_v40  ;;  %v17918_v46 = vld [vmem:[#allocation51_spill] sm:$0xff]  ;;  %v4807_v35 = vrot.slane %v17889_v50, %v11925_v23 }
0x271e   :  { %v4961_v18 = vsel %vm16513_vm2, %v12026_v17, 5  ;;  %vm4922_vm1 = vcmp.eq.f32.partialorder %v17918_v46, %v4767_v6 }
0x271f   :  { %5082 = vperm.xlu0 %11277, %v4979_v47   ;;  %v10830_v47 = vcvt.f32.s32 %v16333_v13  ;;  %v4952_v13 = vsel %vm16502_vm5, %v12026_v17, 5  ;;  %v4962_v40 = vsel %vm4922_vm1, %v12026_v17, 5 }
0x2723   :  { %5073 = vperm.xlu0 %11277, %v4976_v25   ;;  %4992 = vperm.xlu1 %11278, %v4949_v49   ;;  %v10831_v49 = vshll.u32 %v10830_v47, 16 }
0x2727   :  { %5094 = vperm.xlu0 %11277, %v4983_v59   ;;  %5004 = vperm.xlu1 %11278, %v4953_v39   ;;  %v4791_v59 = vrot.slane %v17889_v50, %v11644_v8  ;;  %v6615_v39 = vcvt.f32.s32 %v16368_v61  ;;  %v17924_v8 = vld [vmem:[#allocation77_spill] sm:$0xff]  ;;  %v17925_v50 = vld [vmem:[#allocation78_spill] sm:$0xff] }
0x2729   :  { %vm4928_vm7 = vcmp.eq.f32.partialorder %v17917_v60, %v4791_v59  ;;  %v6616_v62 = vshll.u32 %v6615_v39, 16  ;;  %v17923_v59 = vld [vmem:[#allocation53_spill] sm:$0xff]  ;;  %v4839_v39 = vrot.slane %v17896_v45, %v11920_v34 }
0x272a   :  { %v4968_v24 = vsel %vm4928_vm7, %v12026_v17, 5 }
0x272b   :  { %5076 = vperm.xlu0 %11277, %v4977_v54   ;;  %5007 = vperm.xlu1 %11278, %v4954_v44   ;;  %vm4940_vm1 = vcmp.eq.f32.partialorder %v17924_v8, %v4839_v39 }
0x272e   :  { %v6583_v52 = vpop.xlane.xlu1 %6582 }
0x272f   :  { %5100 = vperm.xlu0 %11277, %v4985_v36   ;;  %5010 = vperm.xlu1 %11278, %v4955_v7   ;;  %v6584_v9 = vcvt.f32.s32 %v6583_v52 }
0x2731   :  { %v6587_v48 = vadd.s32 %v6586_v55, %v6584_v9 }
0x2733   :  { %5103 = vperm.xlu0 %11277, %v4986_v37   ;;  %5022 = vperm.xlu1 %11278, %v4959_v0   ;;  %v6685_v3 = vrot.slane %v6587_v48, %v11977_v2  ;;  %v4815_v48 = vrot.slane %v17892_v51, %v11809_v28  ;;  %v17922_v51 = vld [vmem:[#allocation73_spill] sm:$0xff] }
0x2734   :  { %vm4938_vm7 = vcmp.eq.f32.partialorder %v17922_v51, %v4831_v38 }
0x2735   :  { %v4978_v53 = vsel %vm4938_vm7, %v12026_v17, 5 }
0x2737   :  { %5013 = vperm.xlu1 %11278, %v4956_v19  }
0x273a   :  { %v6568_v30 = vpop.xlane.xlu0 %6567 }
0x273b   :  { %v6569_v43 = vcvt.f32.s32 %v6568_v30  ;;  %5034 = vperm.xlu1 %11278, %v4963_v1  }
0x273d   :  { %v6572_v25 = vadd.s32 %v6571_v14, %v6569_v43  ;;  %v17919_v14 = vld [vmem:[#allocation69_spill] sm:$0xff] }
0x273e   :  { %v10828_v41 = vpop.xlane.xlu0 %10827  ;;  %vm4930_vm3 = vcmp.eq.f32.partialorder %v17919_v14, %v4799_v58 }
0x273f   :  { %v6681_v16 = vrot.slane %v6572_v25, %v11977_v2  ;;  %v10829_v33 = vcvt.f32.s32 %v10828_v41  ;;  %5001 = vperm.xlu1 %11278, %v4952_v13   ;;  %v4970_v43 = vsel %vm4930_vm3, %v12026_v17, 5  ;;  %v17920_v25 = vld [vmem:[#allocation70_spill] sm:$0xff] }
0x2740   :  { %vm4934_vm5 = vcmp.eq.f32.partialorder %v17920_v25, %v4815_v48 }
0x2741   :  { %v6710_v21 = vsel %vm1627_vm0, %v6685_v3, %v6681_v16  ;;  %v10832_v63 = vadd.s32 %v10831_v49, %v10829_v33  ;;  %v4974_v13 = vsel %vm4934_vm5, %v12026_v17, 5  ;;  %v17921_v49 = vld [vmem:[#allocation52_spill] sm:$0xff]  ;;  %v4855_v16 = vrot.slane %v17900_v26, %v11809_v28 }
0x2742   :  { %v6613_v54 = vpop.xlane.xlu1 %6612  ;;  %v6598_v44 = vpop.xlane.xlu0 %6597  ;;  %vm4931_vm2 = vcmp.eq.f32.partialorder %v17921_v49, %v4803_v57  ;;  %v4980_v33 = vsel %vm4940_vm1, %v12026_v17, 5  ;;  %v4847_v28 = vrot.slane %v17896_v45, %v11925_v23 }
0x2743   :  { %10833 = vst.msk [vmem:[%s17008_s11 + $0x28] sm:$0xff] %vm10793_vm6, %v10832_v63  ;;  %v6614_v61 = vcvt.f32.s32 %v6613_v54  ;;  %v6599_v36 = vcvt.f32.s32 %v6598_v44  ;;  %5028 = vperm.xlu1 %11278, %v4961_v18   ;;  %vm10835_vm15 = vcmp.eq.s32.totalorder %v17828_v15, %v10832_v63  ;;  %v4971_v41 = vsel %vm4931_vm2, %v12026_v17, 5 }
0x2744   :  { %v10836_v55 = vsel %vm10835_vm15, %v10834_v29, 5  ;;  %vm4932_vm15 = vcmp.eq.f32.partialorder %v17923_v59, %v4807_v35  ;;  %vm4944_vm3 = vcmp.eq.f32.partialorder %v17925_v50, %v4855_v16  ;;  %v6645_v54 = vcvt.f32.s32 %v16378_v56 }
0x2745   :  { %v6617_v7 = vadd.s32 %v6616_v62, %v6614_v61  ;;  %v6602_v31 = vadd.s32 %v6601_v11, %v6599_v36  ;;  %v16543_v47 = vsel %vm1315_vm14, %v10836_v55, 2147483647  ;;  %v4972_v3 = vsel %vm4932_vm15, %v12026_v17, 5  ;;  %v17926_v11 = vld [vmem:[#allocation54_spill] sm:$0xff] }
0x2746   :  { %v10839_v30 = vshra.s32 %v16543_v47, 16  ;;  %v6660_v44 = vcvt.f32.s32 %v16383_v5  ;;  %v4984_v18 = vsel %vm4944_vm3, %v12026_v17, 5  ;;  %v6646_v61 = vshll.u32 %v6645_v54, 16 }
0x2747   :  { %v6693_v10 = vrot.slane %v6617_v7, %v11977_v2  ;;  %v6689_v37 = vrot.slane %v6602_v31, %v11977_v2  ;;  %5049 = vperm.xlu1 %11278, %v4968_v24   ;;  %v6675_v7 = vcvt.f32.s32 %v16430_v27  ;;  %v17927_v31 = vld [vmem:[#allocation81_spill] sm:$0xff]  ;;  %v4867_v5 = vrot.slane %v17900_v26, %v11925_v23 }
0x2748   :  { %v16546_v1 = vcvt.s32.f32 %v10839_v30  ;;  %v6661_v36 = vshll.u32 %v6660_v44, 16  ;;  %vm4942_vm2 = vcmp.eq.f32.partialorder %v17927_v31, %v4847_v28 }
0x2749   :  { %v6711_v0 = vsel %vm1629_vm8, %v6689_v37, %v6710_v21  ;;  %v4843_v21 = vrot.slane %v17896_v45, %v17414_v4  ;;  %v4982_v37 = vsel %vm4942_vm2, %v12026_v17, 5  ;;  %vm4947_vm7 = vcmp.eq.f32.partialorder %v17928_v42, %v4867_v5 }
0x274a   :  { %v6712_v12 = vsel %vm1631_vm9, %v6693_v10, %v6711_v0  ;;  %v6676_v0 = vshll.u32 %v6675_v7, 16 }
0x274b   :  { %vm4941_vm5 = vcmp.eq.f32.partialorder %v17926_v11, %v4843_v21 }
0x274c   :  { %v4981_v4 = vsel %vm4941_vm5, %v12026_v17, 5 }
0x2752   :  { %v6628_v52 = vpop.xlane.xlu0 %6627 }
0x2753   :  { %v6629_v19 = vcvt.f32.s32 %v6628_v52 }
0x2755   :  { %v6632_v32 = vadd.s32 %v6631_v20, %v6629_v19  ;;  %v4987_v19 = vsel %vm4947_vm7, %v12026_v17, 5 }
0x2756   :  { %v6643_v63 = vpop.xlane.xlu1 %6642 }
0x2757   :  { %v6697_v22 = vrot.slane %v6632_v32, %v11977_v2  ;;  %v6644_v60 = vcvt.f32.s32 %v6643_v63 }
0x2759   :  { %v16539_v9 = vsel %vm1633_vm10, %v6697_v22, %v6712_v12  ;;  %v6647_v56 = vadd.s32 %v6646_v61, %v6644_v60 }
0x275b   :  { %v6701_v45 = vrot.slane %v6647_v56, %v11977_v2 }
0x275d   :  { %v6714_v23 = vsel %vm1635_vm11, %v6701_v45, %v16539_v9 }
0x2762   :  { %v6658_v34 = vpop.xlane.xlu0 %6657 }
0x2763   :  { %v6659_v62 = vcvt.f32.s32 %v6658_v34 }
0x2765   :  { %v6662_v24 = vadd.s32 %v6661_v36, %v6659_v62 }
0x2767   :  { %v6705_v27 = vrot.slane %v6662_v24, %v11977_v2 }
0x2769   :  { %v6715_v32 = vsel %vm1637_vm12, %v6705_v27, %v6714_v23 }
0x276a   :  { %v4990_v22 = vpop.permute.xlu0 %4989 }
0x276b   :  { %10842 = vmin.xlane.f32.xlu1 %v16546_v1  ;;  %v5111_v49 = vrot.slane %v4990_v22, %v11977_v2 }
0x276e   :  { %v4996_v30 = vpop.permute.xlu0 %4995 }
0x276f   :  { %v5119_v51 = vrot.slane %v4996_v30, %v11977_v2 }
0x2772   :  { %v5020_v14 = vpop.permute.xlu0 %5019 }
0x2773   :  { %v5151_v27 = vrot.slane %v5020_v14, %v11977_v2 }
0x2776   :  { %v4999_v25 = vpop.permute.xlu0 %4998 }
0x2777   :  { %v5123_v59 = vrot.slane %v4999_v25, %v11977_v2 }
0x277a   :  { %v5026_v35 = vpop.permute.xlu0 %5025 }
0x277c   :  { %5031 = vperm.xlu1 %11278, %v4962_v40  }
0x2780   :  { %5055 = vperm.xlu1 %11278, %v4970_v43  }
0x2784   :  { %5067 = vperm.xlu1 %11278, %v4974_v13  }
0x2788   :  { %5058 = vperm.xlu1 %11278, %v4971_v41  }
0x278c   :  { %5079 = vperm.xlu1 %11278, %v4978_v53  }
0x2790   :  { %5061 = vperm.xlu1 %11278, %v4972_v3  }
0x2794   :  { %5085 = vperm.xlu1 %11278, %v4980_v33   ;;  %v5038_v33 = vpop.permute.xlu0 %5037 }
0x2795   :  { %v5175_v56 = vrot.slane %v5038_v33, %v11977_v2 }
0x2798   :  { %5097 = vperm.xlu1 %11278, %v4984_v18   ;;  %v5017_v54 = vpop.permute.xlu0 %5016 }
0x2799   :  { %v5147_v7 = vrot.slane %v5017_v54, %v11977_v2 }
0x279c   :  { %5088 = vperm.xlu1 %11278, %v4981_v4   ;;  %v5041_v34 = vpop.permute.xlu0 %5040 }
0x279f   :  { %v6673_v10 = vpop.xlane.xlu1 %6672 }
0x27a0   :  { %v6674_v12 = vcvt.f32.s32 %v6673_v10  ;;  %5091 = vperm.xlu1 %11278, %v4982_v37   ;;  %v16625_v44 = vpop.permute.xlu0 %5052  ;;  %v10838_v37 = vand.u32 65535, %v16543_v47 }
0x27a2   :  { %v6677_v52 = vadd.s32 %v6676_v0, %v6674_v12  ;;  %v5179_v0 = vrot.slane %v5041_v34, %v11977_v2 }
0x27a3   :  { %v4993_v20 = vpop.permute.xlu1 %4992 }
0x27a4   :  { %v6709_v26 = vrot.slane %v6677_v52, %v11977_v2  ;;  %5106 = vperm.xlu1 %11278, %v4987_v19   ;;  %v5115_v57 = vrot.slane %v4993_v20, %v11977_v2  ;;  %v5044_v18 = vpop.permute.xlu0 %5043  ;;  %v10840_v19 = vcvt.s32.f32 %v10838_v37 }
0x27a5   :  { %v5183_v52 = vrot.slane %v5044_v18, %v11977_v2 }
0x27a6   :  { %v6716_v29 = vsel %vm1639_vm13, %v6709_v26, %v6715_v32  ;;  %v5268_v38 = vsel %vm1627_vm0, %v5115_v57, %v5111_v49 }
0x27a7   :  { %6717 = vst.msk [vmem:[#allocation5 + $0x20] sm:$0xff] %vm1315_vm14, %v6716_v29  ;;  %v5005_v55 = vpop.permute.xlu1 %5004  ;;  %v5269_v53 = vsel %vm1629_vm8, %v5119_v51, %v5268_v38 }
0x27a8   :  { %v5131_v46 = vrot.slane %v5005_v55, %v11977_v2  ;;  %v5270_v8 = vsel %vm1631_vm9, %v5123_v59, %v5269_v53  ;;  %v5065_v60 = vpop.permute.xlu0 %5064  ;;  %v5159_v55 = vrot.slane %v5026_v35, %v11977_v2 }
0x27ab   :  { %v5008_v6 = vpop.permute.xlu1 %5007 }
0x27ac   :  { %v5135_v17 = vrot.slane %v5008_v6, %v11977_v2  ;;  %v5047_v11 = vpop.permute.xlu0 %5046 }
0x27ad   :  { %v5187_v30 = vrot.slane %v5047_v11, %v11977_v2 }
0x27ae   :  { %v5272_v58 = vsel %vm1627_vm0, %v5135_v17, %v5131_v46 }
0x27af   :  { %v5011_v9 = vpop.permute.xlu1 %5010 }
0x27b0   :  { %v5139_v40 = vrot.slane %v5011_v9, %v11977_v2  ;;  %v5071_v62 = vpop.permute.xlu0 %5070 }
0x27b1   :  { %v5219_v53 = vrot.slane %v5071_v62, %v11977_v2  ;;  %v5195_v62 = vrot.slane %v16625_v44, %v11977_v2 }
0x27b2   :  { %v5273_v48 = vsel %vm1629_vm8, %v5139_v40, %v5272_v58 }
0x27b3   :  { %v5023_v43 = vpop.permute.xlu1 %5022 }
0x27b4   :  { %v16632_v31 = vpop.permute.xlu0 %5082  ;;  %v5155_v45 = vrot.slane %v5023_v43, %v11977_v2 }
0x27b6   :  { %v5276_v26 = vsel %vm1627_vm0, %v5155_v45, %v5151_v27 }
0x27b7   :  { %v5014_v13 = vpop.permute.xlu1 %5013  ;;  %v5277_v46 = vsel %vm1629_vm8, %v5159_v55, %v5276_v26  ;;  %v5235_v26 = vrot.slane %v16632_v31, %v11977_v2 }
0x27b8   :  { %v5143_v28 = vrot.slane %v5014_v13, %v11977_v2  ;;  %v5074_v23 = vpop.permute.xlu0 %5073 }
0x27b9   :  { %v5223_v59 = vrot.slane %v5074_v23, %v11977_v2 }
0x27ba   :  { %v5274_v36 = vsel %vm1631_vm9, %v5143_v28, %v5273_v48 }
0x27bb   :  { %v5035_v41 = vpop.permute.xlu1 %5034  ;;  %v5275_v5 = vsel %vm1633_vm10, %v5147_v7, %v5274_v36 }
0x27bc   :  { %v5171_v4 = vrot.slane %v5035_v41, %v11977_v2  ;;  %v16640_v12 = vsel %vm1434_vm4, %v5275_v5, 2147483647  ;;  %v5095_v40 = vpop.permute.xlu0 %5094  ;;  %v5211_v41 = vrot.slane %v5065_v60, %v11977_v2 }
0x27bd   :  { %v5317_v47 = vshra.s32 %v16640_v12, 16 }
0x27be   :  { %v5280_v24 = vsel %vm1627_vm0, %v5175_v56, %v5171_v4 }
0x27bf   :  { %v5002_v39 = vpop.permute.xlu1 %5001  ;;  %v5281_v42 = vsel %vm1629_vm8, %v5179_v0, %v5280_v24 }
0x27c0   :  { %v5127_v3 = vrot.slane %v5002_v39, %v11977_v2  ;;  %v5282_v29 = vsel %vm1631_vm9, %v5183_v52, %v5281_v42  ;;  %v5077_v51 = vpop.permute.xlu0 %5076 }
0x27c1   :  { %v5283_v58 = vsel %vm1633_vm10, %v5187_v30, %v5282_v29 }
0x27c2   :  { %v5271_v16 = vsel %vm1633_vm10, %v5127_v3, %v5270_v8  ;;  %v16667_v25 = vsel %vm1434_vm4, %v5283_v58, 2147483647  ;;  %v5227_v8 = vrot.slane %v5077_v51, %v11977_v2 }
0x27c3   :  { %v16619_v50 = vsel %vm1434_vm4, %v5271_v16, 2147483647  ;;  %v5029_v61 = vpop.permute.xlu1 %5028  ;;  %v5347_v49 = vshra.s32 %v16667_v25, 16 }
0x27c4   :  { %v5302_v21 = vshra.s32 %v16619_v50, 16  ;;  %v5163_v32 = vrot.slane %v5029_v61, %v11977_v2  ;;  %v5101_v27 = vpop.permute.xlu0 %5100 }
0x27c5   :  { %v16679_v3 = vcvt.s32.f32 %v5347_v49 }
0x27c6   :  { %v16622_v63 = vcvt.s32.f32 %v5302_v21  ;;  %v5278_v9 = vsel %vm1631_vm9, %v5163_v32, %v5277_v46  ;;  %v5251_v32 = vrot.slane %v5095_v40, %v11977_v2 }
0x27c7   :  { %v5050_v10 = vpop.permute.xlu1 %5049 }
0x27c8   :  { %5305 = vmin.xlane.f32.xlu1 %v16622_v63  ;;  %v5191_v18 = vrot.slane %v5050_v10, %v11977_v2  ;;  %v5104_v46 = vpop.permute.xlu0 %5103 }
0x27ca   :  { %v5284_v4 = vsel %vm1627_vm0, %v5195_v62, %v5191_v18  ;;  %v10853_v62 = vld [vmem:[#allocation5 + $0x20] sm:$0xff] }
0x27f8   :  { %v16645_v20 = vpop.xlane.xlu1 %10842 }
0x27f9   :  { %vm10844_vm15 = vcmp.eq.f32.partialorder %v16546_v1, %v16645_v20  ;;  %v16657_v1 = vcvt.s32.f32 %v5317_v47 }
0x27fa   :  { %v10845_v22 = vsel %vm10844_vm15, %v10840_v19, inf }
0x27fb   :  { %10846 = vmin.xlane.f32.xlu0 %v10845_v22 }
0x27fc   :  { %v5032_v6 = vpop.permute.xlu1 %5031 }
0x27fd   :  { %v5167_v17 = vrot.slane %v5032_v6, %v11977_v2  ;;  %v5259_v6 = vrot.slane %v5101_v27, %v11977_v2 }
0x27ff   :  { %v5279_v14 = vsel %vm1633_vm10, %v5167_v17, %v5278_v9  ;;  %5320 = vmin.xlane.f32.xlu0 %v16657_v1 }
0x2800   :  { %v5056_v48 = vpop.permute.xlu1 %5055  ;;  %v16664_v43 = vsel %vm1434_vm4, %v5279_v14, 2147483647  ;;  %v5263_v14 = vrot.slane %v5104_v46, %v11977_v2 }
0x2801   :  { %v5332_v57 = vshra.s32 %v16664_v43, 16  ;;  %v5199_v28 = vrot.slane %v5056_v48, %v11977_v2 }
0x2803   :  { %v16670_v13 = vcvt.s32.f32 %v5332_v57  ;;  %v5285_v56 = vsel %vm1629_vm8, %v5199_v28, %v5284_v4 }
0x2804   :  { %v5068_v38 = vpop.permute.xlu1 %5067 }
0x2805   :  { %v5215_v35 = vrot.slane %v5068_v38, %v11977_v2  ;;  %5335 = vmin.xlane.f32.xlu0 %v16670_v13 }
0x2807   :  { %v5288_v39 = vsel %vm1627_vm0, %v5215_v35, %v5211_v41 }
0x2808   :  { %v5289_v16 = vsel %vm1629_vm8, %v5219_v53, %v5288_v39  ;;  %v5059_v33 = vpop.permute.xlu1 %5058 }
0x2809   :  { %5350 = vmin.xlane.f32.xlu0 %v16679_v3  ;;  %v5290_v21 = vsel %vm1631_vm9, %v5223_v59, %v5289_v16  ;;  %v5203_v61 = vrot.slane %v5059_v33, %v11977_v2 }
0x280a   :  { %v5291_v54 = vsel %vm1633_vm10, %v5227_v8, %v5290_v21  ;;  %v5301_v8 = vand.u32 65535, %v16619_v50 }
0x280b   :  { %v16687_v34 = vsel %vm1434_vm4, %v5291_v54, 2147483647  ;;  %v5286_v24 = vsel %vm1631_vm9, %v5203_v61, %v5285_v56  ;;  %v10849_v54 = vcvt.f32.s32 %v16645_v20 }
0x280c   :  { %v5080_v60 = vpop.permute.xlu1 %5079  ;;  %v5377_v11 = vshra.s32 %v16687_v34, 16  ;;  %v5303_v33 = vcvt.s32.f32 %v5301_v8  ;;  %v17938_v8 = vld [vmem:[#allocation94_spill] sm:$0xff] }
0x280d   :  { %v5231_v52 = vrot.slane %v5080_v60, %v11977_v2  ;;  %v10850_v60 = vshll.u32 %v10849_v54, 16 }
0x280e   :  { %v16695_v36 = vcvt.s32.f32 %v5377_v11 }
0x280f   :  { %v5292_v29 = vsel %vm1627_vm0, %v5235_v26, %v5231_v52 }
0x2810   :  { %v5062_v7 = vpop.permute.xlu1 %5061  ;;  %5380 = vmin.xlane.f32.xlu0 %v16695_v36 }
0x2811   :  { %v5207_v5 = vrot.slane %v5062_v7, %v11977_v2  ;;  %v5316_v7 = vand.u32 65535, %v16640_v12 }
0x2813   :  { %v5287_v10 = vsel %vm1633_vm10, %v5207_v5, %v5286_v24 }
0x2814   :  { %v5086_v37 = vpop.permute.xlu1 %5085  ;;  %v16704_v44 = vsel %vm1434_vm4, %v5287_v10, 2147483647  ;;  %v5318_v10 = vcvt.s32.f32 %v5316_v7 }
0x2815   :  { %v5362_v0 = vshra.s32 %v16704_v44, 16  ;;  %v5239_v47 = vrot.slane %v5086_v37, %v11977_v2  ;;  %v5346_v37 = vand.u32 65535, %v16667_v25  ;;  %v5361_v25 = vand.u32 65535, %v16704_v44  ;;  %v17932_v44 = vld [vmem:[#allocation19_spill] sm:$0xff] }
0x2817   :  { %v16707_v45 = vcvt.s32.f32 %v5362_v0  ;;  %v5293_v17 = vsel %vm1629_vm8, %v5239_v47, %v5292_v29  ;;  %v5363_v47 = vcvt.s32.f32 %v5361_v25 }
0x2818   :  { %v5098_v42 = vpop.permute.xlu1 %5097 }
0x2819   :  { %5365 = vmin.xlane.f32.xlu1 %v16707_v45  ;;  %v5255_v19 = vrot.slane %v5098_v42, %v11977_v2  ;;  %v5348_v42 = vcvt.s32.f32 %v5346_v37 }
0x281b   :  { %v5296_v55 = vsel %vm1627_vm0, %v5255_v19, %v5251_v32  ;;  %v17930_v32 = vld [vmem:[#allocation14_spill] sm:$0xff] }
0x281c   :  { %v5089_v23 = vpop.permute.xlu1 %5088  ;;  %v5297_v31 = vsel %vm1629_vm8, %v5259_v6, %v5296_v55 }
0x281d   :  { %v5243_v22 = vrot.slane %v5089_v23, %v11977_v2  ;;  %v5298_v41 = vsel %vm1631_vm9, %v5263_v14, %v5297_v31 }
0x281f   :  { %v5294_v9 = vsel %vm1631_vm9, %v5243_v22, %v5293_v17  ;;  %v3917_v22 = vrot.slane %v17930_v32, %v11977_v2  ;;  %v17934_v17 = vld [vmem:[#allocation23_spill] sm:$0xff] }
0x2820   :  { %v5092_v30 = vpop.permute.xlu1 %5091 }
0x2821   :  { %v5247_v58 = vrot.slane %v5092_v30, %v11977_v2  ;;  %v3925_v30 = vrot.slane %v17932_v44, %v11977_v2  ;;  %v17945_v44 = vld [vmem:[#allocation143_spill] sm:$0xff] }
0x2823   :  { %v5295_v40 = vsel %vm1633_vm10, %v5247_v58, %v5294_v9  ;;  %v3953_v58 = vrot.slane %v17934_v17, %v11977_v2  ;;  %v17935_v9 = vld [vmem:[#allocation24_spill] sm:$0xff] }
0x2824   :  { %v5107_v48 = vpop.permute.xlu1 %5106  ;;  %v16727_v57 = vsel %vm1434_vm4, %v5295_v40, 2147483647  ;;  %v3957_v31 = vrot.slane %v17935_v9, %v11977_v2  ;;  %v17936_v40 = vld [vmem:[#allocation86_spill] sm:$0xff] }
0x2825   :  { %v5267_v49 = vrot.slane %v5107_v48, %v11977_v2  ;;  %v5392_v38 = vshra.s32 %v16727_v57, 16  ;;  %v3961_v14 = vrot.slane %v17936_v40, %v11977_v2 }
0x2827   :  { %v5299_v51 = vsel %vm1633_vm10, %v5267_v49, %v5298_v41  ;;  %v16733_v35 = vcvt.s32.f32 %v5392_v38  ;;  %v5391_v49 = vand.u32 65535, %v16727_v57  ;;  %v4030_v41 = vsel %vm1627_vm0, %v3957_v31, %v3953_v58  ;;  %v17941_v57 = vld [vmem:[#allocation96_spill] sm:$0xff] }
0x2828   :  { %v16736_v53 = vsel %vm1434_vm4, %v5299_v51, 2147483647  ;;  %v17937_v51 = vld [vmem:[#allocation87_spill] sm:$0xff]  ;;  %v17948_v58 = vld [vmem:[#allocation20_spill] sm:$0xff] }
0x2829   :  { %5395 = vmin.xlane.f32.xlu1 %v16733_v35  ;;  %v5407_v59 = vshra.s32 %v16736_v53, 16  ;;  %v3933_v9 = vrot.slane %v17948_v58, %v11977_v2  ;;  %v17949_v31 = vld [vmem:[#allocation16_spill] sm:$0xff] }
0x282a   :  { %v3941_v40 = vrot.slane %v17949_v31, %v11977_v2 }
0x282b   :  { %v16740_v39 = vcvt.s32.f32 %v5407_v59  ;;  %v3965_v59 = vrot.slane %v17937_v51, %v11977_v2  ;;  %v17952_v51 = vld [vmem:[#allocation89_spill] sm:$0xff] }
0x282d   :  { %5410 = vmin.xlane.f32.xlu0 %v16740_v39 }
0x2855   :  { %v16744_v16 = vpop.xlane.xlu1 %5305 }
0x2856   :  { %vm5307_vm1 = vcmp.eq.f32.partialorder %v16622_v63, %v16744_v16  ;;  %v5331_v63 = vand.u32 65535, %v16664_v43 }
0x2857   :  { %v5308_v21 = vsel %vm5307_vm1, %v5303_v33, inf  ;;  %v3993_v33 = vrot.slane %v17938_v8, %v11977_v2 }
0x2858   :  { %5309 = vmin.xlane.f32.xlu0 %v5308_v21  ;;  %v5333_v24 = vcvt.s32.f32 %v5331_v63  ;;  %v17939_v21 = vld [vmem:[#allocation95_spill] sm:$0xff]  ;;  %v5406_v63 = vand.u32 65535, %v16736_v53  ;;  %v17943_v53 = vld [vmem:[#allocation98_spill] sm:$0xff] }
0x2859   :  { %v3997_v54 = vrot.slane %v17939_v21, %v11977_v2 }
0x2888   :  { %v10847_v18 = vpop.xlane.xlu0 %10846 }
0x2889   :  { %v10848_v11 = vcvt.f32.s32 %v10847_v18  ;;  %v4031_v18 = vsel %vm1629_vm8, %v3961_v14, %v4030_v41 }
0x288a   :  { %v4032_v7 = vsel %vm1631_vm9, %v3965_v59, %v4031_v18  ;;  %v3973_v59 = vrot.slane %v17952_v51, %v11977_v2 }
0x288b   :  { %v10851_v28 = vadd.s32 %v10850_v60, %v10848_v11  ;;  %v17940_v60 = vld [vmem:[#allocation88_spill] sm:$0xff] }
0x288c   :  { %v16754_v61 = vpop.xlane.xlu0 %5320  ;;  %v3969_v11 = vrot.slane %v17940_v60, %v11977_v2 }
0x288d   :  { %10852 = vst.msk [vmem:[%s17008_s11 + $0x20] sm:$0xff] %vm10793_vm6, %v10851_v28  ;;  %vm10854_vm3 = vcmp.eq.s32.totalorder %v17828_v15, %v10851_v28  ;;  %vm5322_vm2 = vcmp.eq.f32.partialorder %v16657_v1, %v16754_v61  ;;  %v4001_v28 = vrot.slane %v17941_v57, %v11977_v2  ;;  %v17955_v57 = vld [vmem:[#allocation92_spill] sm:$0xff] }
0x288e   :  { %v10855_v50 = vsel %vm10854_vm3, %v10853_v62, 5  ;;  %v5323_v12 = vsel %vm5322_vm2, %v5318_v10, inf }
0x288f   :  { %v16758_v4 = vsel %vm1315_vm14, %v10855_v50, 2147483647  ;;  %v5393_v50 = vcvt.s32.f32 %v5391_v49 }
0x2890   :  { %v10858_v20 = vshra.s32 %v16758_v4, 16 }
0x2892   :  { %v16762_v56 = vpop.xlane.xlu0 %5335  ;;  %v16764_v5 = vcvt.s32.f32 %v10858_v20 }
0x2893   :  { %vm5337_vm5 = vcmp.eq.f32.partialorder %v16670_v13, %v16762_v56  ;;  %v5376_v13 = vand.u32 65535, %v16687_v34  ;;  %v17929_v34 = vld [vmem:[#allocation18_spill] sm:$0xff] }
0x2894   :  { %10861 = vmin.xlane.f32.xlu1 %v16764_v5  ;;  %v5338_v43 = vsel %vm5337_vm5, %v5333_v24, inf  ;;  %v3913_v26 = vrot.slane %v17929_v34, %v11977_v2  ;;  %v4038_v24 = vsel %vm1627_vm0, %v3997_v54, %v3993_v33  ;;  %v17953_v33 = vld [vmem:[#allocation22_spill] sm:$0xff]  ;;  %v17954_v54 = vld [vmem:[#allocation91_spill] sm:$0xff] }
0x2895   :  { %5339 = vmin.xlane.f32.xlu0 %v5338_v43  ;;  %v5378_v52 = vcvt.s32.f32 %v5376_v13  ;;  %v17942_v43 = vld [vmem:[#allocation97_spill] sm:$0xff]  ;;  %v4009_v13 = vrot.slane %v17943_v53, %v11977_v2  ;;  %v3949_v21 = vrot.slane %v17953_v33, %v11977_v2  ;;  %v3981_v18 = vrot.slane %v17954_v54, %v11977_v2 }
0x2896   :  { %v16772_v0 = vpop.xlane.xlu0 %5350  ;;  %v4022_v55 = vsel %vm1627_vm0, %v3917_v22, %v3913_v26  ;;  %v4005_v10 = vrot.slane %v17942_v43, %v11977_v2  ;;  %v5312_v53 = vcvt.f32.s32 %v16744_v16 }
0x2897   :  { %vm5352_vm7 = vcmp.eq.f32.partialorder %v16679_v3, %v16772_v0 }
0x2898   :  { %5324 = vmin.xlane.f32.xlu1 %v5323_v12  ;;  %v5353_v27 = vsel %vm5352_vm7, %v5348_v42, inf  ;;  %v4033_v12 = vsel %vm1633_vm10, %v3969_v11, %v4032_v7  ;;  %v4039_v42 = vsel %vm1629_vm8, %v4001_v28, %v4038_v24  ;;  %v3985_v28 = vrot.slane %v17955_v57, %v11977_v2  ;;  %v17956_v7 = vld [vmem:[#allocation93_spill] sm:$0xff] }
0x2899   :  { %v3989_v24 = vrot.slane %v17956_v7, %v11977_v2  ;;  %v5313_v16 = vshll.u32 %v5312_v53, 16 }
0x289c   :  { %5354 = vmin.xlane.f32.xlu1 %v5353_v27  ;;  %v5408_v27 = vcvt.s32.f32 %v5406_v63 }
0x289d   :  { %v16777_v1 = vpop.xlane.xlu0 %5380 }
0x289e   :  { %vm5382_vm15 = vcmp.eq.f32.partialorder %v16695_v36, %v16777_v1  ;;  %v17931_v36 = vld [vmem:[#allocation12_spill] sm:$0xff] }
0x289f   :  { %v5383_v19 = vsel %vm5382_vm15, %v5378_v52, inf  ;;  %v3921_v29 = vrot.slane %v17931_v36, %v11977_v2  ;;  %v17944_v36 = vld [vmem:[#allocation99_spill] sm:$0xff] }
0x28a0   :  { %5384 = vmin.xlane.f32.xlu1 %v5383_v19  ;;  %v4040_v19 = vsel %vm1631_vm9, %v4005_v10, %v4039_v42  ;;  %v10857_v10 = vand.u32 65535, %v16758_v4 }
0x28a1   :  { %v4023_v6 = vsel %vm1629_vm8, %v3921_v29, %v4022_v55  ;;  %v4073_v29 = vand.u32 65535, %v17944_v36 }
0x28a2   :  { %v4024_v48 = vsel %vm1631_vm9, %v3925_v30, %v4023_v6  ;;  %v17946_v30 = vld [vmem:[#allocation100_spill] sm:$0xff] }
0x28a3   :  { %vm4079_vm2 = vcmp.eq.f32.partialorder %v17946_v30, %v17945_v44  ;;  %v4075_v6 = vcvt.s32.f32 %v4073_v29 }
0x28a6   :  { %v16782_v23 = vpop.xlane.xlu1 %5365 }
0x28a7   :  { %vm5367_vm1 = vcmp.eq.f32.partialorder %v16707_v45, %v16782_v23  ;;  %v17933_v45 = vld [vmem:[#allocation15_spill] sm:$0xff]  ;;  %v5372_v54 = vcvt.f32.s32 %v16782_v23 }
0x28a8   :  { %v5368_v3 = vsel %vm5367_vm1, %v5363_v47, inf  ;;  %v3929_v46 = vrot.slane %v17933_v45, %v11977_v2  ;;  %v16842_v47 = vsel %vm1434_vm4, %v4033_v12, 2147483647  ;;  %v4080_v45 = vsel %vm4079_vm2, %v4075_v6, inf }
0x28a9   :  { %5369 = vmin.xlane.f32.xlu0 %v5368_v3  ;;  %v4041_v3 = vsel %vm1633_vm10, %v4009_v13, %v4040_v19  ;;  %v4119_v26 = vshra.s32 %v16842_v47, 16  ;;  %v5342_v13 = vcvt.f32.s32 %v16762_v56  ;;  %v5373_v57 = vshll.u32 %v5372_v54, 16 }
0x28aa   :  { %v4025_v38 = vsel %vm1633_vm10, %v3929_v46, %v4024_v48  ;;  %v16849_v32 = vsel %vm1434_vm4, %v4041_v3, 2147483647  ;;  %v17947_v46 = vld [vmem:[#allocation13_spill] sm:$0xff] }
0x28ab   :  { %v16825_v20 = vsel %vm1434_vm4, %v4025_v38, 2147483647  ;;  %v4149_v22 = vshra.s32 %v16849_v32, 16  ;;  %v3937_v17 = vrot.slane %v17947_v46, %v11977_v2  ;;  %v17950_v48 = vld [vmem:[#allocation21_spill] sm:$0xff]  ;;  %v17951_v38 = vld [vmem:[#allocation90_spill] sm:$0xff]  ;;  %v5343_v56 = vshll.u32 %v5342_v13, 16 }
0x28ac   :  { %v4089_v52 = vshra.s32 %v16825_v20, 16  ;;  %v3945_v49 = vrot.slane %v17950_v48, %v11977_v2  ;;  %v3977_v41 = vrot.slane %v17951_v38, %v11977_v2 }
0x28ad   :  { %v16857_v55 = vcvt.s32.f32 %v4149_v22  ;;  %v4026_v14 = vsel %vm1627_vm0, %v3937_v17, %v3933_v9 }
0x28ae   :  { %v16845_v34 = vcvt.s32.f32 %v4089_v52  ;;  %v4027_v8 = vsel %vm1629_vm8, %v3941_v40, %v4026_v14  ;;  %v4034_v11 = vsel %vm1627_vm0, %v3977_v41, %v3973_v59  ;;  %v10859_v52 = vcvt.s32.f32 %v10857_v10 }
0x28af   :  { %v4028_v60 = vsel %vm1631_vm9, %v3945_v49, %v4027_v8  ;;  %v4035_v63 = vsel %vm1629_vm8, %v3981_v18, %v4034_v11 }
0x28b0   :  { %v4036_v43 = vsel %vm1631_vm9, %v3985_v28, %v4035_v63 }
0x28b1   :  { %v4037_v42 = vsel %vm1633_vm10, %v3989_v24, %v4036_v43 }
0x28b6   :  { %v16819_v62 = vpop.xlane.xlu1 %5395 }
0x28b7   :  { %vm5397_vm3 = vcmp.eq.f32.partialorder %v16733_v35, %v16819_v62 }
0x28b8   :  { %v5398_v37 = vsel %vm5397_vm3, %v5393_v50, inf  ;;  %v4029_v50 = vsel %vm1633_vm10, %v3949_v21, %v4028_v60  ;;  %v5387_v21 = vcvt.f32.s32 %v16777_v1 }
0x28b9   :  { %5399 = vmin.xlane.f32.xlu0 %v5398_v37  ;;  %v16891_v12 = vsel %vm1434_vm4, %v4029_v50, 2147483647 }
0x28ba   :  { %v16835_v35 = vpop.xlane.xlu0 %5410  ;;  %v4104_v19 = vshra.s32 %v16891_v12, 16  ;;  %v5388_v60 = vshll.u32 %v5387_v21, 16 }
0x28bb   :  { %vm5412_vm5 = vcmp.eq.f32.partialorder %v16740_v39, %v16835_v35  ;;  %v16852_v39 = vcvt.s32.f32 %v4119_v26  ;;  %v16903_v26 = vsel %vm1434_vm4, %v4037_v42, 2147483647  ;;  %v5417_v23 = vcvt.f32.s32 %v16835_v35 }
0x28bc   :  { %v5413_v25 = vsel %vm5412_vm5, %v5408_v27, inf  ;;  %v16905_v30 = vcvt.s32.f32 %v4104_v19  ;;  %v4134_v6 = vshra.s32 %v16903_v26, 16  ;;  %v4103_v35 = vand.u32 65535, %v16891_v12 }
0x28bd   :  { %5414 = vmin.xlane.f32.xlu1 %v5413_v25  ;;  %v5327_v25 = vcvt.f32.s32 %v16754_v61  ;;  %v5357_v61 = vcvt.f32.s32 %v16772_v0  ;;  %v5418_v19 = vshll.u32 %v5417_v23, 16 }
0x28be   :  { %v16910_v31 = vcvt.s32.f32 %v4134_v6 }
0x28bf   :  { %v5358_v40 = vshll.u32 %v5357_v61, 16 }
0x28c1   :  { %4092 = vmin.xlane.f32.xlu1 %v16845_v34 }
0x28c5   :  { %4122 = vmin.xlane.f32.xlu1 %v16852_v39 }
0x28c9   :  { %4152 = vmin.xlane.f32.xlu1 %v16857_v55 }
0x28cd   :  { %4081 = vmin.xlane.f32.xlu1 %v4080_v45  ;;  %v5328_v45 = vshll.u32 %v5327_v25, 16 }
0x28e5   :  { %v5310_v37 = vpop.xlane.xlu0 %5309 }
0x28e6   :  { %v5311_v3 = vcvt.f32.s32 %v5310_v37  ;;  %v5402_v37 = vcvt.f32.s32 %v16819_v62 }
0x28e8   :  { %v5314_v46 = vadd.s32 %v5313_v16, %v5311_v3  ;;  %v5403_v42 = vshll.u32 %v5402_v37, 16 }
0x28ea   :  { %v5423_v14 = vrot.slane %v5314_v46, %v11977_v2  ;;  %v4105_v46 = vcvt.s32.f32 %v4103_v35 }
0x2921   :  { %v16896_v27 = vpop.xlane.xlu1 %10861 }
0x2922   :  { %vm10863_vm7 = vcmp.eq.f32.partialorder %v16764_v5, %v16896_v27  ;;  %v5340_v4 = vpop.xlane.xlu0 %5339  ;;  %v10868_v62 = vcvt.f32.s32 %v16896_v27 }
0x2923   :  { %v5341_v22 = vcvt.f32.s32 %v5340_v4  ;;  %v10864_v36 = vsel %vm10863_vm7, %v10859_v52, inf }
0x2924   :  { %10865 = vmin.xlane.f32.xlu0 %v10864_v36 }
0x2925   :  { %v5325_v29 = vpop.xlane.xlu1 %5324  ;;  %v5344_v5 = vadd.s32 %v5343_v56, %v5341_v22 }
0x2926   :  { %v5326_v17 = vcvt.f32.s32 %v5325_v29  ;;  %v10869_v29 = vshll.u32 %v10868_v62, 16 }
0x2927   :  { %v5431_v38 = vrot.slane %v5344_v5, %v11977_v2 }
0x2928   :  { %v5329_v58 = vadd.s32 %v5328_v45, %v5326_v17  ;;  %4107 = vmin.xlane.f32.xlu0 %v16905_v30  ;;  %v4133_v17 = vand.u32 65535, %v16903_v26 }
0x2929   :  { %v5355_v9 = vpop.xlane.xlu1 %5354 }
0x292a   :  { %v5427_v48 = vrot.slane %v5329_v58, %v11977_v2  ;;  %v5356_v49 = vcvt.f32.s32 %v5355_v9 }
0x292c   :  { %v5452_v41 = vsel %vm1627_vm0, %v5427_v48, %v5423_v14  ;;  %v5359_v0 = vadd.s32 %v5358_v40, %v5356_v49  ;;  %4137 = vmin.xlane.f32.xlu0 %v16910_v31  ;;  %v4135_v14 = vcvt.s32.f32 %v4133_v17  ;;  %v4088_v48 = vand.u32 65535, %v16825_v20 }
0x292d   :  { %v5453_v51 = vsel %vm1629_vm8, %v5431_v38, %v5452_v41  ;;  %v5385_v33 = vpop.xlane.xlu1 %5384 }
0x292e   :  { %v5435_v59 = vrot.slane %v5359_v0, %v11977_v2  ;;  %v5386_v18 = vcvt.f32.s32 %v5385_v33  ;;  %v4118_v0 = vand.u32 65535, %v16842_v47 }
0x2930   :  { %v5454_v8 = vsel %vm1631_vm9, %v5435_v59, %v5453_v51  ;;  %v5389_v50 = vadd.s32 %v5388_v60, %v5386_v18  ;;  %v17958_v18 = vld [vmem:[#allocation141_spill] sm:$0xff] }
0x2931   :  { %v4054_v60 = vcvt.f32.s32 %v17958_v18 }
0x2932   :  { %v5443_v24 = vrot.slane %v5389_v50, %v11977_v2 }
0x2936   :  { %v5370_v11 = vpop.xlane.xlu0 %5369 }
0x2937   :  { %v5371_v28 = vcvt.f32.s32 %v5370_v11  ;;  %v4084_v11 = vcvt.f32.s32 %v17945_v44 }
0x2939   :  { %v5374_v63 = vadd.s32 %v5373_v57, %v5371_v28 }
0x293b   :  { %v5439_v7 = vrot.slane %v5374_v63, %v11977_v2  ;;  %v17960_v63 = vld [vmem:[#allocation144_spill] sm:$0xff] }
0x293d   :  { %v5455_v43 = vsel %vm1633_vm10, %v5439_v7, %v5454_v8  ;;  %v4120_v8 = vcvt.s32.f32 %v4118_v0 }
0x293e   :  { %v5456_v10 = vsel %vm1635_vm11, %v5443_v24, %v5455_v43  ;;  %v4055_v24 = vshll.u32 %v4054_v60, 16  ;;  %v4085_v43 = vshll.u32 %v4084_v11, 16 }
0x2946   :  { %v5400_v1 = vpop.xlane.xlu0 %5399 }
0x2947   :  { %v5401_v53 = vcvt.f32.s32 %v5400_v1 }
0x2949   :  { %v5404_v13 = vadd.s32 %v5403_v42, %v5401_v53 }
0x294a   :  { %v5415_v52 = vpop.xlane.xlu1 %5414 }
0x294b   :  { %v5416_v25 = vcvt.f32.s32 %v5415_v52  ;;  %v5447_v3 = vrot.slane %v5404_v13, %v11977_v2 }
0x294d   :  { %v5419_v4 = vadd.s32 %v5418_v19, %v5416_v25  ;;  %v5457_v36 = vsel %vm1637_vm12, %v5447_v3, %v5456_v10 }
0x294e   :  { %v4093_v5 = vpop.xlane.xlu1 %4092 }
0x294f   :  { %v5451_v22 = vrot.slane %v5419_v4, %v11977_v2  ;;  %vm4094_vm3 = vcmp.eq.f32.partialorder %v16845_v34, %v4093_v5  ;;  %v17957_v34 = vld [vmem:[#allocation142_spill] sm:$0xff]  ;;  %v4099_v23 = vcvt.f32.s32 %v4093_v5 }
0x2950   :  { %v4069_v54 = vcvt.f32.s32 %v17957_v34 }
0x2951   :  { %v5458_v16 = vsel %vm1639_vm13, %v5451_v22, %v5457_v36  ;;  %v4100_v4 = vshll.u32 %v4099_v23, 16 }
0x2952   :  { %5459 = vst.msk [vmem:[#allocation5 + $0x18] sm:$0xff] %vm1315_vm14, %v5458_v16  ;;  %v4123_v41 = vpop.xlane.xlu1 %4122  ;;  %v4070_v50 = vshll.u32 %v4069_v54, 16 }
0x2953   :  { %vm4124_vm5 = vcmp.eq.f32.partialorder %v16852_v39, %v4123_v41  ;;  %v17959_v39 = vld [vmem:[#allocation145_spill] sm:$0xff]  ;;  %v4129_v22 = vcvt.f32.s32 %v4123_v41 }
0x2954   :  { %v4125_v33 = vsel %vm4124_vm5, %v4120_v8, inf  ;;  %v4068_v57 = vcvt.f32.s32 %v17959_v39 }
0x2955   :  { %v4130_v17 = vshll.u32 %v4129_v22, 16 }
0x2956   :  { %v4153_v59 = vpop.xlane.xlu1 %4152  ;;  %v4071_v10 = vadd.s32 %v4070_v50, %v4068_v57 }
0x2957   :  { %vm4154_vm2 = vcmp.eq.f32.partialorder %v16857_v55, %v4153_v59  ;;  %v4159_v5 = vcvt.f32.s32 %v4153_v59 }
0x2958   :  { %v4169_v19 = vrot.slane %v4071_v10, %v11977_v2 }
0x2959   :  { %v10872_v58 = vld [vmem:[#allocation5 + $0x18] sm:$0xff]  ;;  %v4160_v41 = vshll.u32 %v4159_v5, 16 }
0x295a   :  { %v4082_v47 = vpop.xlane.xlu1 %4081 }
0x295b   :  { %v4083_v7 = vcvt.f32.s32 %v4082_v47 }
0x295d   :  { %v4086_v13 = vadd.s32 %v4085_v43, %v4083_v7 }
0x29b1   :  { %v10866_v56 = vpop.xlane.xlu0 %10865 }
0x29b2   :  { %v10867_v6 = vcvt.f32.s32 %v10866_v56  ;;  %v4173_v56 = vrot.slane %v4086_v13, %v11977_v2 }
0x29b4   :  { %v10870_v45 = vadd.s32 %v10869_v29, %v10867_v6 }
0x29b5   :  { %v4108_v61 = vpop.xlane.xlu0 %4107 }
0x29b6   :  { %10871 = vst.msk [vmem:[%s17008_s11 + $0x18] sm:$0xff] %vm10793_vm6, %v10870_v45  ;;  %vm10873_vm4 = vcmp.eq.s32.totalorder %v17828_v15, %v10870_v45  ;;  %vm4109_vm15 = vcmp.eq.f32.partialorder %v16905_v30, %v4108_v61  ;;  %v4090_v30 = vcvt.s32.f32 %v4088_v48  ;;  %v4114_v37 = vcvt.f32.s32 %v4108_v61 }
0x29b7   :  { %v10874_v27 = vsel %vm10873_vm4, %v10872_v58, 5  ;;  %v4110_v12 = vsel %vm4109_vm15, %v4105_v46, inf }
0x29b8   :  { %4111 = vmin.xlane.f32.xlu1 %v4110_v12  ;;  %v10875_v9 = vsel %vm1315_vm14, %v10874_v27, 2147483647  ;;  %v4095_v51 = vsel %vm4094_vm3, %v4090_v30, inf  ;;  %v4115_v25 = vshll.u32 %v4114_v37, 16  ;;  %v10910_v37 = vld [vmem:[#allocation5 + $0x8] sm:$0xff] }
0x29b9   :  { %v16943_v40 = vpop.xlane.xlu0 %4137  ;;  %v10877_v26 = vshra.s32 %v10875_v9, 16  ;;  %v10876_v28 = vand.u32 65535, %v10875_v9 }
0x29ba   :  { %vm4139_vm1 = vcmp.eq.f32.partialorder %v16910_v31, %v16943_v40  ;;  %v4148_v31 = vand.u32 65535, %v16849_v32  ;;  %v4053_v32 = vcvt.f32.s32 %v17960_v63  ;;  %v4144_v35 = vcvt.f32.s32 %v16943_v40 }
0x29bb   :  { %v4140_v49 = vsel %vm4139_vm1, %v4135_v14, inf  ;;  %v10879_v38 = vcvt.s32.f32 %v10877_v26  ;;  %v10878_v42 = vcvt.s32.f32 %v10876_v28 }
0x29bc   :  { %4141 = vmin.xlane.f32.xlu1 %v4140_v49  ;;  %v4150_v20 = vcvt.s32.f32 %v4148_v31  ;;  %v4056_v53 = vadd.s32 %v4055_v24, %v4053_v32  ;;  %v4145_v9 = vshll.u32 %v4144_v35, 16 }
0x29bd   :  { %10880 = vmin.xlane.f32.xlu0 %v10879_v38 }
0x29be   :  { %v4155_v21 = vsel %vm4154_vm2, %v4150_v20, inf  ;;  %v4165_v62 = vrot.slane %v4056_v53, %v11977_v2 }
0x29c0   :  { %v4194_v45 = vsel %vm1627_vm0, %v4169_v19, %v4165_v62 }
0x29c1   :  { %4096 = vmin.xlane.f32.xlu0 %v4095_v51  ;;  %v4195_v12 = vsel %vm1629_vm8, %v4173_v56, %v4194_v45 }
0x29c5   :  { %4126 = vmin.xlane.f32.xlu0 %v4125_v33 }
0x29c9   :  { %4156 = vmin.xlane.f32.xlu0 %v4155_v21 }
0x2a45   :  { %v4112_v55 = vpop.xlane.xlu1 %4111 }
0x2a46   :  { %v4113_v52 = vcvt.f32.s32 %v4112_v55 }
0x2a48   :  { %v4116_v29 = vadd.s32 %v4115_v25, %v4113_v52 }
0x2a49   :  { %v4142_v36 = vpop.xlane.xlu1 %4141 }
0x2a4a   :  { %v10881_v1 = vpop.xlane.xlu0 %10880  ;;  %v4143_v61 = vcvt.f32.s32 %v4142_v36  ;;  %v4181_v14 = vrot.slane %v4116_v29, %v11977_v2 }
0x2a4b   :  { %vm10882_vm7 = vcmp.eq.f32.partialorder %v10879_v38, %v10881_v1  ;;  %v10887_v21 = vcvt.f32.s32 %v10881_v1 }
0x2a4c   :  { %v10883_v44 = vsel %vm10882_vm7, %v10878_v42, inf  ;;  %v4146_v40 = vadd.s32 %v4145_v9, %v4143_v61 }
0x2a4d   :  { %10884 = vmin.xlane.f32.xlu1 %v10883_v44  ;;  %v10888_v54 = vshll.u32 %v10887_v21, 16 }
0x2a4e   :  { %v4097_v3 = vpop.xlane.xlu0 %4096  ;;  %v4189_v8 = vrot.slane %v4146_v40, %v11977_v2 }
0x2a4f   :  { %v4098_v16 = vcvt.f32.s32 %v4097_v3 }
0x2a51   :  { %v4101_v6 = vadd.s32 %v4100_v4, %v4098_v16  ;;  %v10929_v16 = vld [vmem:[#allocation5] sm:$0xff] }
0x2a52   :  { %v4127_v46 = vpop.xlane.xlu0 %4126 }
0x2a53   :  { %v4177_v58 = vrot.slane %v4101_v6, %v11977_v2  ;;  %v4128_v27 = vcvt.f32.s32 %v4127_v46 }
0x2a55   :  { %v4196_v26 = vsel %vm1631_vm9, %v4177_v58, %v4195_v12  ;;  %v4131_v48 = vadd.s32 %v4130_v17, %v4128_v27 }
0x2a56   :  { %v4197_v49 = vsel %vm1633_vm10, %v4181_v14, %v4196_v26  ;;  %v4157_v38 = vpop.xlane.xlu0 %4156 }
0x2a57   :  { %v4185_v30 = vrot.slane %v4131_v48, %v11977_v2  ;;  %v4158_v0 = vcvt.f32.s32 %v4157_v38 }
0x2a59   :  { %v4198_v51 = vsel %vm1635_vm11, %v4185_v30, %v4197_v49  ;;  %v4161_v59 = vadd.s32 %v4160_v41, %v4158_v0 }
0x2a5a   :  { %v4199_v33 = vsel %vm1637_vm12, %v4189_v8, %v4198_v51 }
0x2a5b   :  { %v4193_v31 = vrot.slane %v4161_v59, %v11977_v2 }
0x2a5d   :  { %v4200_v20 = vsel %vm1639_vm13, %v4193_v31, %v4199_v33 }
0x2a5e   :  { %4201 = vst.msk [vmem:[#allocation5 + $0x10] sm:$0xff] %vm1315_vm14, %v4200_v20 }
0x2a65   :  { %v10891_v47 = vld [vmem:[#allocation5 + $0x10] sm:$0xff] }
0x2ada   :  { %v10885_v34 = vpop.xlane.xlu1 %10884 }
0x2adb   :  { %v10886_v18 = vcvt.f32.s32 %v10885_v34 }
0x2add   :  { %v10889_v60 = vadd.s32 %v10888_v54, %v10886_v18 }
0x2adf   :  { %10890 = vst.msk [vmem:[%s17008_s11 + $0x10] sm:$0xff] %vm10793_vm6, %v10889_v60  ;;  %vm10892_vm0 = vcmp.eq.s32.totalorder %v17828_v15, %v10889_v60 }
0x2ae0   :  { %v10893_v2 = vsel %vm10892_vm0, %v10891_v47, 5 }
0x2ae1   :  { %v10894_v11 = vsel %vm1315_vm14, %v10893_v2, 2147483647 }
0x2ae2   :  { %v10896_v39 = vshra.s32 %v10894_v11, 16  ;;  %v10895_v28 = vand.u32 65535, %v10894_v11 }
0x2ae4   :  { %v10898_v57 = vcvt.s32.f32 %v10896_v39  ;;  %v10897_v63 = vcvt.s32.f32 %v10895_v28 }
0x2ae6   :  { %10899 = vmin.xlane.f32.xlu0 %v10898_v57 }
0x2b73   :  { %v10900_v50 = vpop.xlane.xlu0 %10899 }
0x2b74   :  { %vm10901_vm8 = vcmp.eq.f32.partialorder %v10898_v57, %v10900_v50  ;;  %v10906_v7 = vcvt.f32.s32 %v10900_v50 }
0x2b75   :  { %v10902_v32 = vsel %vm10901_vm8, %v10897_v63, inf }
0x2b76   :  { %10903 = vmin.xlane.f32.xlu1 %v10902_v32  ;;  %v10907_v55 = vshll.u32 %v10906_v7, 16 }
0x2c03   :  { %v10904_v24 = vpop.xlane.xlu1 %10903 }
0x2c04   :  { %v10905_v43 = vcvt.f32.s32 %v10904_v24 }
0x2c06   :  { %v10908_v10 = vadd.s32 %v10907_v55, %v10905_v43 }
0x2c08   :  { %10909 = vst.msk [vmem:[%s17008_s11 + $0x8] sm:$0xff] %vm10793_vm6, %v10908_v10  ;;  %vm10911_vm9 = vcmp.eq.s32.totalorder %v17828_v15, %v10908_v10 }
0x2c09   :  { %v10912_v1 = vsel %vm10911_vm9, %v10910_v37, 5 }
0x2c0a   :  { %v10913_v42 = vsel %vm1315_vm14, %v10912_v1, 2147483647 }
0x2c0b   :  { %v10915_v23 = vshra.s32 %v10913_v42, 16  ;;  %v10914_v13 = vand.u32 65535, %v10913_v42 }
0x2c0d   :  { %v10917_v53 = vcvt.s32.f32 %v10915_v23  ;;  %v10916_v44 = vcvt.s32.f32 %v10914_v13 }
0x2c0f   :  { %10918 = vmin.xlane.f32.xlu0 %v10917_v53 }
0x2c9c   :  { %v10919_v52 = vpop.xlane.xlu0 %10918 }
0x2c9d   :  { %vm10920_vm10 = vcmp.eq.f32.partialorder %v10917_v53, %v10919_v52  ;;  %v10925_v25 = vcvt.f32.s32 %v10919_v52 }
0x2c9e   :  { %v10921_v19 = vsel %vm10920_vm10, %v10916_v44, inf }
0x2c9f   :  { %10922 = vmin.xlane.f32.xlu1 %v10921_v19  ;;  %v10926_v4 = vshll.u32 %v10925_v25, 16 }
0x2d2c   :  { %v10923_v3 = vpop.xlane.xlu1 %10922 }
0x2d2d   :  { %v10924_v22 = vcvt.f32.s32 %v10923_v3 }
0x2d2f   :  { %v10927_v36 = vadd.s32 %v10926_v4, %v10924_v22 }
0x2d31   :  { %10928 = vst.msk [vmem:[%s17008_s11] sm:$0xff] %vm10793_vm6, %v10927_v36  ;;  %vm10930_vm11 = vcmp.eq.s32.totalorder %v17828_v15, %v10927_v36 }
0x2d32   :  { %v10931_v62 = vsel %vm10930_vm11, %v10929_v16, 5 }
0x2d33   :  { %v10932_v56 = vsel %vm1315_vm14, %v10931_v62, 2147483647 }
0x2d34   :  { %v10934_v35 = vshra.s32 %v10932_v56, 16  ;;  %v10933_v6 = vand.u32 65535, %v10932_v56 }
0x2d36   :  { %v10936_v29 = vcvt.s32.f32 %v10934_v35  ;;  %v10935_v61 = vcvt.s32.f32 %v10933_v6 }
0x2d38   :  { %10937 = vmin.xlane.f32.xlu0 %v10936_v29 }
0x2dc5   :  { %v10938_v45 = vpop.xlane.xlu0 %10937 }
0x2dc6   :  { %vm10939_vm12 = vcmp.eq.f32.partialorder %v10936_v29, %v10938_v45  ;;  %v10944_v17 = vcvt.f32.s32 %v10938_v45 }
0x2dc7   :  { %v10940_v46 = vsel %vm10939_vm12, %v10935_v61, inf }
0x2dc8   :  { %10941 = vmin.xlane.f32.xlu1 %v10940_v46  ;;  %v10945_v58 = vshll.u32 %v10944_v17, 16 }
0x2e55   :  { %v10942_v5 = vpop.xlane.xlu1 %10941 }
0x2e56   :  { %v10943_v27 = vcvt.f32.s32 %v10942_v5 }
0x2e58   :  { %v10946_v12 = vadd.s32 %v10945_v58, %v10943_v27 }
0x2e5a   :  { %10947 = vst.msk [vmem:[%s17009_s12] sm:$0xff] %vm10793_vm6, %v10946_v12 }

</bundles_post_ra>
